<compile_context>
chip_gen: v7x
topology: tpu7x:2x2x1
jax: 0.10.0
libtpu: 0.0.40
codegen_flags: <defaults>
</compile_context>

<pallas_src>
import functools

import jax
import jax.numpy as jnp
from jax.experimental import pallas as pl
from jax.experimental.pallas import tpu as pltpu


# ----------------------------------------------------------------------------
# Fused per-stage kernel (nb BasicBlocks, stride on block 0 only)
# ----------------------------------------------------------------------------
def _make_stage_kernel(nb, H, W, Cin, C, stride):
    Ho = (H - 1) // stride + 1           # 3x3, pad 1, stride s
    Wo = (W - 1) // stride + 1
    HP, WP = Ho + 2, Wo + 2              # padded intra-stage activation dims
    L1 = Ho * WP                         # rows of a stride-1 tap slice / accumulator

    if stride == 2:
        Hq, Wq = (H + 2) // 2, (W + 2) // 2      # phase-plane dims
        R0 = Hq * Wq + 2                         # plane rows incl. slack
        rs0, L0 = Wq, Ho * Wq                    # block-0 acc row stride / length
    else:
        rs0, L0 = W + 2, Ho * (W + 2)

    bf16, f32 = jnp.bfloat16, jnp.float32

    def b0_tap(xin_ref, t):
        """Tap t of the 3x3 conv on the (prepared) stage input."""
        dy, dx = divmod(t, 3)
        if stride == 2:
            p = (dy % 2) * 2 + (dx % 2)
            start = p * R0 + (dy // 2) * Wq + (dx // 2)
        else:
            start = dy * (W + 2) + dx
        return xin_ref[0, start:start + L0, :]

    def s1_tap(pad_ref, t):
        """Tap t of a stride-1 3x3 conv on a padded row-flattened VMEM buffer."""
        dy, dx = divmod(t, 3)
        start = dy * WP + dx
        return pad_ref[start:start + L1, :]

    def conv9(tap_fn, src, w_ref):
        """3x3 conv = 9 tap matmuls; bf16 operands, f32 accumulation (MXU)."""
        acc = None
        for t in range(9):
            part = jnp.dot(tap_fn(src, t).astype(bf16), w_ref[t, :, :],
                           preferred_element_type=f32)
            acc = part if acc is None else acc + part
        return acc

    def kernel(*refs):
        xin_ref = refs[0]
        out_ref = refs[-3]
        hpad = refs[-2]       # conv1 activation, padded row-flattened (f32)
        curpad = refs[-1]     # current block input, padded row-flattened (f32)
        w_refs = refs[1:-3]

        # Zero the pad rings / slack; interiors are fully rewritten every step.
        hpad[...] = jnp.zeros_like(hpad)
        curpad[...] = jnp.zeros_like(curpad)

        idx = 0
        for k in range(nb):
            if k == 0:
                w1, s1, b1, wd, bd, w2, s2, b2 = w_refs[idx:idx + 8]
                idx += 8
            else:
                w1, s1, b1, w2, s2, b2 = w_refs[idx:idx + 6]
                idx += 6
            last = (k == nb - 1)

            # ---- conv1 + BN + ReLU (block 0 also runs the downsample conv) ----
            if k == 0:
                acc1 = conv9(b0_tap, xin_ref, w1)
                ident = conv9(b0_tap, xin_ref, wd) + bd[...]   # conv + bias shortcut
                rs = rs0
            else:
                acc1 = conv9(s1_tap, curpad, w1)
                rs = WP
            h = jnp.maximum(acc1 * s1[...] + b1[...], 0.0)

            # Stage the conv1 activation into its padded buffer (VMEM resident).
            for i in range(Ho):
                hpad[(i + 1) * WP + 1:(i + 1) * WP + 1 + Wo, :] = \
                    h[i * rs:i * rs + Wo, :]

            # ---- conv2 + BN + residual add + ReLU ----
            sb = conv9(s1_tap, hpad, w2) * s2[...] + b2[...]
            for i in range(Ho):
                if k == 0:
                    ident_row = ident[i * rs0:i * rs0 + Wo, :]
                else:
                    # identity = block input (read before overwrite below)
                    ident_row = curpad[(i + 1) * WP + 1:(i + 1) * WP + 1 + Wo, :]
                row = jnp.maximum(sb[i * WP:i * WP + Wo, :] + ident_row, 0.0)
                if last:
                    out_ref[0, i, :, :] = row
                else:
                    curpad[(i + 1) * WP + 1:(i + 1) * WP + 1 + Wo, :] = row

    return kernel


# ----------------------------------------------------------------------------
# JAX glue: prepare the stage input (pad + phase decomposition for stride 2)
# ----------------------------------------------------------------------------
def _prep_stage_input(x_nhwc, stride):
    n, h, w, c = x_nhwc.shape
    xp = jnp.pad(x_nhwc, ((0, 0), (1, 1), (1, 1), (0, 0)))
    if stride == 2:
        hq, wq = (h + 2) // 2, (w + 2) // 2
        ph = xp.reshape(n, hq, 2, wq, 2, c).transpose(0, 2, 4, 1, 3, 5)
        ph = ph.reshape(n, 4, hq * wq, c)
        ph = jnp.pad(ph, ((0, 0), (0, 0), (0, 2), (0, 0)))   # slack rows (zeros)
        return ph.reshape(n, 4 * (hq * wq + 2), c)
    flat = xp.reshape(n, (h + 2) * (w + 2), c)
    return jnp.pad(flat, ((0, 0), (0, 2), (0, 0)))            # slack rows (zeros)


def _stage_forward(x_nhwc, stage_blocks, stride):
    n, h, w, cin = x_nhwc.shape
    c = stage_blocks[0]["s1"].shape[-1]
    nb = len(stage_blocks)
    assert stride in (1, 2), "only stride 1/2 supported"
    if stride == 2:
        assert h % 2 == 0 and w % 2 == 0  # TODO(synk): odd spatial dims w/ stride 2
    ho = (h - 1) // stride + 1
    wo = (w - 1) // stride + 1
    hp, wp = ho + 2, wo + 2

    xprep = _prep_stage_input(x_nhwc, stride)

    inputs = [xprep]
    for k, bp in enumerate(stage_blocks):
        if k == 0:
            inputs += [bp["w1"], bp["s1"], bp["b1"], bp["wd"], bp["bd"],
                       bp["w2"], bp["s2"], bp["b2"]]
        else:
            inputs += [bp["w1"], bp["s1"], bp["b1"], bp["w2"], bp["s2"], bp["b2"]]

    def _resident_spec(a):  # whole array, same block every step -> stays in VMEM
        return pl.BlockSpec(a.shape, lambda b, _nd=a.ndim: (0,) * _nd)

    in_specs = [pl.BlockSpec((1,) + xprep.shape[1:],
                             lambda b, _nd=xprep.ndim: (b,) + (0,) * (_nd - 1))]
    in_specs += [_resident_spec(a) for a in inputs[1:]]

    kernel = _make_stage_kernel(nb, h, w, cin, c, stride)
    pad_rows = hp * wp + 2

    return pl.pallas_call(
        kernel,
        grid=(n,),
        in_specs=in_specs,
        out_specs=pl.BlockSpec((1, ho, wo, c), lambda b: (b, 0, 0, 0)),
        out_shape=jax.ShapeDtypeStruct((n, ho, wo, c), jnp.float32),
        scratch_shapes=[pltpu.VMEM((pad_rows, c), jnp.float32),   # hpad
                        pltpu.VMEM((pad_rows, c), jnp.float32)],  # curpad
        compiler_params=pltpu.CompilerParams(
            dimension_semantics=("parallel",)),
    )(*inputs)


def resnet_bev_forward(x_nchw, prep_params, strides):
    """Matches ResNetBEV.forward: returns the list of per-stage features (NCHW)."""
    x = jnp.transpose(x_nchw, (0, 2, 3, 1))           # NCHW -> NHWC
    feats = []
    for stage_blocks, s in zip(prep_params, strides):
        x = _stage_forward(x, stage_blocks, s)
        feats.append(jnp.transpose(x, (0, 3, 1, 2)))  # NHWC -> NCHW
    return feats


# ----------------------------------------------------------------------------
# Parameters: PyTorch-layout init + one-time kernel-layout preparation
# ----------------------------------------------------------------------------
def _bn_init(key, c):
    k1, k2, k3, k4 = jax.random.split(key, 4)
    return {
        "gamma": 1.0 + 0.1 * jax.random.normal(k1, (c,), jnp.float32),
        "beta": 0.1 * jax.random.normal(k2, (c,), jnp.float32),
        "mean": 0.1 * jax.random.normal(k3, (c,), jnp.float32),
        "var": 1.0 + 0.1 * jnp.abs(jax.random.normal(k4, (c,), jnp.float32)),
    }


def init_params(key, numC_input, num_layer, stride):
    num_channels = [numC_input * 2 ** (i + 1) for i in range(len(num_layer))]
    params, curr = [], numC_input
    for i, nl in enumerate(num_layer):
        stage = []
        for b in range(nl):
            cin = curr if b == 0 else num_channels[i]
            cout = num_channels[i]
            key, k1, k2, k3, k4, k5, k6 = jax.random.split(key, 7)
            bp = {
                "conv1_w": 0.1 * jax.random.normal(k1, (cout, cin, 3, 3), jnp.float32),
                "bn1": _bn_init(k2, cout),
                "conv2_w": 0.1 * jax.random.normal(k3, (cout, cout, 3, 3), jnp.float32),
                "bn2": _bn_init(k4, cout),
            }
            if b == 0:  # downsample = nn.Conv2d(cin, cout, 3, stride, 1) with bias
                bp["ds_w"] = 0.1 * jax.random.normal(k5, (cout, cin, 3, 3), jnp.float32)
                bp["ds_b"] = 0.1 * jax.random.normal(k6, (cout,), jnp.float32)
            stage.append(bp)
        curr = num_channels[i]
        params.append(stage)
    return params


def _fold_bn(bn, eps=1e-5):
    scale = bn["gamma"] / jnp.sqrt(bn["var"] + eps)
    bias = bn["beta"] - bn["mean"] * scale
    return scale, bias


def _to_tap_layout(w_oihw):
    """(Cout, Cin, 3, 3) -> (9, Cin, Cout) bf16, tap index t = dy*3 + dx."""
    cout, cin = w_oihw.shape[:2]
    return jnp.transpose(w_oihw, (2, 3, 1, 0)).reshape(9, cin, cout).astype(jnp.bfloat16)


def prepare_params(params, eps=1e-5):
    """One-time: fold BN stats, pre-transpose/cast conv weights for the kernel."""
    prep = []
    for stage in params:
        pstage = []
        for b, bp in enumerate(stage):
            s1, b1 = _fold_bn(bp["bn1"], eps)
            s2, b2 = _fold_bn(bp["bn2"], eps)
            cout = s1.shape[0]
            pb = {
                "w1": _to_tap_layout(bp["conv1_w"]),
                "s1": s1.reshape(1, cout), "b1": b1.reshape(1, cout),
                "w2": _to_tap_layout(bp["conv2_w"]),
                "s2": s2.reshape(1, cout), "b2": b2.reshape(1, cout),
            }
            if b == 0:
                pb["wd"] = _to_tap_layout(bp["ds_w"])
                pb["bd"] = bp["ds_b"].reshape(1, cout)
            pstage.append(pb)
        prep.append(pstage)
    return prep


# ----------------------------------------------------------------------------
if __name__ == "__main__":
    numC_input = 4
    num_layer = [2, 2, 2]
    strides = [2, 2, 2]

    x = jax.random.normal(jax.random.PRNGKey(0), (2, numC_input, 16, 16),
                          jnp.float32)  # NCHW, as in PyTorch
    raw_params = init_params(jax.random.PRNGKey(42), numC_input, num_layer, strides)
    params = prepare_params(raw_params)  # weight relayout / BN folding done once

    fwd = jax.jit(functools.partial(resnet_bev_forward, strides=strides))
    feats = jax.block_until_ready(fwd(x, params))

    expected = [(2, 8, 8, 8), (2, 16, 4, 4), (2, 32, 2, 2)]
    assert [tuple(f.shape) for f in feats] == expected, \
        f"unexpected shapes: {[f.shape for f in feats]}"
    assert all(bool(jnp.all(jnp.isfinite(f))) for f in feats)
    print("KERNEL_OK")
</pallas_src>

<mosaic_0001>
module attributes {stable_mosaic.version = 11 : i64} {
  func.func @kernel(%arg0: i32, %arg1: memref<1x332x4xf32, #tpu.memory_space<vmem>>, %arg2: memref<9x4x8xbf16, #tpu.memory_space<vmem>>, %arg3: memref<1x8xf32, #tpu.memory_space<vmem>>, %arg4: memref<1x8xf32, #tpu.memory_space<vmem>>, %arg5: memref<9x4x8xbf16, #tpu.memory_space<vmem>>, %arg6: memref<1x8xf32, #tpu.memory_space<vmem>>, %arg7: memref<9x8x8xbf16, #tpu.memory_space<vmem>>, %arg8: memref<1x8xf32, #tpu.memory_space<vmem>>, %arg9: memref<1x8xf32, #tpu.memory_space<vmem>>, %arg10: memref<9x8x8xbf16, #tpu.memory_space<vmem>>, %arg11: memref<1x8xf32, #tpu.memory_space<vmem>>, %arg12: memref<1x8xf32, #tpu.memory_space<vmem>>, %arg13: memref<9x8x8xbf16, #tpu.memory_space<vmem>>, %arg14: memref<1x8xf32, #tpu.memory_space<vmem>>, %arg15: memref<1x8xf32, #tpu.memory_space<vmem>>, %arg16: memref<1x8x8x8xf32, #tpu.memory_space<vmem>>, %arg17: memref<102x8xf32, #tpu.memory_space<vmem>>, %arg18: memref<102x8xf32, #tpu.memory_space<vmem>>) attributes {dimension_semantics = [#tpu.dimension_semantics<parallel>], iteration_bounds = array<i64: 2>, scalar_prefetch = 0 : i64, scratch_operands = 2 : i64, tpu.core_type = #tpu.core_type<tc>, window_params = [{transform_indices = @transform_0, window_bounds = array<i64: 1, 332, 4>}, {pipeline_mode = #tpu.pipeline_mode<synchronous>, transform_indices = @transform_1, window_bounds = array<i64: 9, 4, 8>}, {pipeline_mode = #tpu.pipeline_mode<synchronous>, transform_indices = @transform_2, window_bounds = array<i64: 1, 8>}, {pipeline_mode = #tpu.pipeline_mode<synchronous>, transform_indices = @transform_3, window_bounds = array<i64: 1, 8>}, {pipeline_mode = #tpu.pipeline_mode<synchronous>, transform_indices = @transform_4, window_bounds = array<i64: 9, 4, 8>}, {pipeline_mode = #tpu.pipeline_mode<synchronous>, transform_indices = @transform_5, window_bounds = array<i64: 1, 8>}, {pipeline_mode = #tpu.pipeline_mode<synchronous>, transform_indices = @transform_6, window_bounds = array<i64: 9, 8, 8>}, {pipeline_mode = #tpu.pipeline_mode<synchronous>, transform_indices = @transform_7, window_bounds = array<i64: 1, 8>}, {pipeline_mode = #tpu.pipeline_mode<synchronous>, transform_indices = @transform_8, window_bounds = array<i64: 1, 8>}, {pipeline_mode = #tpu.pipeline_mode<synchronous>, transform_indices = @transform_9, window_bounds = array<i64: 9, 8, 8>}, {pipeline_mode = #tpu.pipeline_mode<synchronous>, transform_indices = @transform_10, window_bounds = array<i64: 1, 8>}, {pipeline_mode = #tpu.pipeline_mode<synchronous>, transform_indices = @transform_11, window_bounds = array<i64: 1, 8>}, {pipeline_mode = #tpu.pipeline_mode<synchronous>, transform_indices = @transform_12, window_bounds = array<i64: 9, 8, 8>}, {pipeline_mode = #tpu.pipeline_mode<synchronous>, transform_indices = @transform_13, window_bounds = array<i64: 1, 8>}, {pipeline_mode = #tpu.pipeline_mode<synchronous>, transform_indices = @transform_14, window_bounds = array<i64: 1, 8>}, {transform_indices = @transform_15, window_bounds = array<i64: 1, 8, 8, 8>}]} {
    %cst = arith.constant 0.000000e+00 : f32
    %0 = vector.broadcast %cst : f32 to vector<102x8xf32>
    %c0 = arith.constant 0 : index
    %c0_0 = arith.constant 0 : index
    %1 = vector.load %arg17[%c0, %c0_0] : memref<102x8xf32, #tpu.memory_space<vmem>>, vector<102x8xf32>
    tpu.vector_store %arg17[%c0, %c0_0], %0 {strides = array<i32>} : memref<102x8xf32, #tpu.memory_space<vmem>>, vector<102x8xf32>,
    %cst_1 = arith.constant 0.000000e+00 : f32
    %2 = vector.broadcast %cst_1 : f32 to vector<102x8xf32>
    %c0_2 = arith.constant 0 : index
    %c0_3 = arith.constant 0 : index
    %3 = vector.load %arg18[%c0_2, %c0_3] : memref<102x8xf32, #tpu.memory_space<vmem>>, vector<102x8xf32>
    tpu.vector_store %arg18[%c0_2, %c0_3], %2 {strides = array<i32>} : memref<102x8xf32, #tpu.memory_space<vmem>>, vector<102x8xf32>,
    %c0_4 = arith.constant 0 : index
    %c0_5 = arith.constant 0 : index
    %c0_6 = arith.constant 0 : index
    %4 = vector.load %arg1[%c0_4, %c0_5, %c0_6] : memref<1x332x4xf32, #tpu.memory_space<vmem>>, vector<1x72x4xf32>
    %5 = vector.shape_cast %4 : vector<1x72x4xf32> to vector<72x4xf32>
    %6 = arith.truncf %5 : vector<72x4xf32> to vector<72x4xbf16>
    %c0_7 = arith.constant 0 : index
    %c0_8 = arith.constant 0 : index
    %c0_9 = arith.constant 0 : index
    %7 = vector.load %arg2[%c0_7, %c0_8, %c0_9] : memref<9x4x8xbf16, #tpu.memory_space<vmem>>, vector<1x4x8xbf16>
    %8 = vector.shape_cast %7 : vector<1x4x8xbf16> to vector<4x8xbf16>
    %cst_10 = arith.constant dense<0.000000e+00> : vector<72x8xf32>
    %9 = tpu.matmul %6, %8, %cst_10 {dimension_numbers = #tpu.dot_dimension_numbers<[1], [0], [0], [1], [0, 0, 1, 1], [], []>} : vector<72x4xbf16>, vector<4x8xbf16>, vector<72x8xf32> -> vector<72x8xf32>
    %c0_11 = arith.constant 0 : index
    %c83 = arith.constant 83 : index
    %c0_12 = arith.constant 0 : index
    %10 = vector.load %arg1[%c0_11, %c83, %c0_12] : memref<1x332x4xf32, #tpu.memory_space<vmem>>, vector<1x72x4xf32>
    %11 = vector.shape_cast %10 : vector<1x72x4xf32> to vector<72x4xf32>
    %12 = arith.truncf %11 : vector<72x4xf32> to vector<72x4xbf16>
    %c1 = arith.constant 1 : index
    %c0_13 = arith.constant 0 : index
    %c0_14 = arith.constant 0 : index
    %13 = vector.load %arg2[%c1, %c0_13, %c0_14] : memref<9x4x8xbf16, #tpu.memory_space<vmem>>, vector<1x4x8xbf16>
    %14 = vector.shape_cast %13 : vector<1x4x8xbf16> to vector<4x8xbf16>
    %cst_15 = arith.constant dense<0.000000e+00> : vector<72x8xf32>
    %15 = tpu.matmul %12, %14, %cst_15 {dimension_numbers = #tpu.dot_dimension_numbers<[1], [0], [0], [1], [0, 0, 1, 1], [], []>} : vector<72x4xbf16>, vector<4x8xbf16>, vector<72x8xf32> -> vector<72x8xf32>
    %16 = arith.addf %9, %15 : vector<72x8xf32>
    %c0_16 = arith.constant 0 : index
    %c1_17 = arith.constant 1 : index
    %c0_18 = arith.constant 0 : index
    %17 = vector.load %arg1[%c0_16, %c1_17, %c0_18] : memref<1x332x4xf32, #tpu.memory_space<vmem>>, vector<1x72x4xf32>
    %18 = vector.shape_cast %17 : vector<1x72x4xf32> to vector<72x4xf32>
    %19 = arith.truncf %18 : vector<72x4xf32> to vector<72x4xbf16>
    %c2 = arith.constant 2 : index
    %c0_19 = arith.constant 0 : index
    %c0_20 = arith.constant 0 : index
    %20 = vector.load %arg2[%c2, %c0_19, %c0_20] : memref<9x4x8xbf16, #tpu.memory_space<vmem>>, vector<1x4x8xbf16>
    %21 = vector.shape_cast %20 : vector<1x4x8xbf16> to vector<4x8xbf16>
    %cst_21 = arith.constant dense<0.000000e+00> : vector<72x8xf32>
    %22 = tpu.matmul %19, %21, %cst_21 {dimension_numbers = #tpu.dot_dimension_numbers<[1], [0], [0], [1], [0, 0, 1, 1], [], []>} : vector<72x4xbf16>, vector<4x8xbf16>, vector<72x8xf32> -> vector<72x8xf32>
    %23 = arith.addf %16, %22 : vector<72x8xf32>
    %c0_22 = arith.constant 0 : index
    %c166 = arith.constant 166 : index
    %c0_23 = arith.constant 0 : index
    %24 = vector.load %arg1[%c0_22, %c166, %c0_23] : memref<1x332x4xf32, #tpu.memory_space<vmem>>, vector<1x72x4xf32>
    %25 = vector.shape_cast %24 : vector<1x72x4xf32> to vector<72x4xf32>
    %26 = arith.truncf %25 : vector<72x4xf32> to vector<72x4xbf16>
    %c3 = arith.constant 3 : index
    %c0_24 = arith.constant 0 : index
    %c0_25 = arith.constant 0 : index
    %27 = vector.load %arg2[%c3, %c0_24, %c0_25] : memref<9x4x8xbf16, #tpu.memory_space<vmem>>, vector<1x4x8xbf16>
    %28 = vector.shape_cast %27 : vector<1x4x8xbf16> to vector<4x8xbf16>
    %cst_26 = arith.constant dense<0.000000e+00> : vector<72x8xf32>
    %29 = tpu.matmul %26, %28, %cst_26 {dimension_numbers = #tpu.dot_dimension_numbers<[1], [0], [0], [1], [0, 0, 1, 1], [], []>} : vector<72x4xbf16>, vector<4x8xbf16>, vector<72x8xf32> -> vector<72x8xf32>
    %30 = arith.addf %23, %29 : vector<72x8xf32>
    %c0_27 = arith.constant 0 : index
    %c249 = arith.constant 249 : index
    %c0_28 = arith.constant 0 : index
    %31 = vector.load %arg1[%c0_27, %c249, %c0_28] : memref<1x332x4xf32, #tpu.memory_space<vmem>>, vector<1x72x4xf32>
    %32 = vector.shape_cast %31 : vector<1x72x4xf32> to vector<72x4xf32>
    %33 = arith.truncf %32 : vector<72x4xf32> to vector<72x4xbf16>
    %c4 = arith.constant 4 : index
    %c0_29 = arith.constant 0 : index
    %c0_30 = arith.constant 0 : index
    %34 = vector.load %arg2[%c4, %c0_29, %c0_30] : memref<9x4x8xbf16, #tpu.memory_space<vmem>>, vector<1x4x8xbf16>
    %35 = vector.shape_cast %34 : vector<1x4x8xbf16> to vector<4x8xbf16>
    %cst_31 = arith.constant dense<0.000000e+00> : vector<72x8xf32>
    %36 = tpu.matmul %33, %35, %cst_31 {dimension_numbers = #tpu.dot_dimension_numbers<[1], [0], [0], [1], [0, 0, 1, 1], [], []>} : vector<72x4xbf16>, vector<4x8xbf16>, vector<72x8xf32> -> vector<72x8xf32>
    %37 = arith.addf %30, %36 : vector<72x8xf32>
    %c0_32 = arith.constant 0 : index
    %c167 = arith.constant 167 : index
    %c0_33 = arith.constant 0 : index
    %38 = vector.load %arg1[%c0_32, %c167, %c0_33] : memref<1x332x4xf32, #tpu.memory_space<vmem>>, vector<1x72x4xf32>
    %39 = vector.shape_cast %38 : vector<1x72x4xf32> to vector<72x4xf32>
    %40 = arith.truncf %39 : vector<72x4xf32> to vector<72x4xbf16>
    %c5 = arith.constant 5 : index
    %c0_34 = arith.constant 0 : index
    %c0_35 = arith.constant 0 : index
    %41 = vector.load %arg2[%c5, %c0_34, %c0_35] : memref<9x4x8xbf16, #tpu.memory_space<vmem>>, vector<1x4x8xbf16>
    %42 = vector.shape_cast %41 : vector<1x4x8xbf16> to vector<4x8xbf16>
    %cst_36 = arith.constant dense<0.000000e+00> : vector<72x8xf32>
    %43 = tpu.matmul %40, %42, %cst_36 {dimension_numbers = #tpu.dot_dimension_numbers<[1], [0], [0], [1], [0, 0, 1, 1], [], []>} : vector<72x4xbf16>, vector<4x8xbf16>, vector<72x8xf32> -> vector<72x8xf32>
    %44 = arith.addf %37, %43 : vector<72x8xf32>
    %c0_37 = arith.constant 0 : index
    %c9 = arith.constant 9 : index
    %c0_38 = arith.constant 0 : index
    %45 = vector.load %arg1[%c0_37, %c9, %c0_38] : memref<1x332x4xf32, #tpu.memory_space<vmem>>, vector<1x72x4xf32>
    %46 = vector.shape_cast %45 : vector<1x72x4xf32> to vector<72x4xf32>
    %47 = arith.truncf %46 : vector<72x4xf32> to vector<72x4xbf16>
    %c6 = arith.constant 6 : index
    %c0_39 = arith.constant 0 : index
    %c0_40 = arith.constant 0 : index
    %48 = vector.load %arg2[%c6, %c0_39, %c0_40] : memref<9x4x8xbf16, #tpu.memory_space<vmem>>, vector<1x4x8xbf16>
    %49 = vector.shape_cast %48 : vector<1x4x8xbf16> to vector<4x8xbf16>
    %cst_41 = arith.constant dense<0.000000e+00> : vector<72x8xf32>
    %50 = tpu.matmul %47, %49, %cst_41 {dimension_numbers = #tpu.dot_dimension_numbers<[1], [0], [0], [1], [0, 0, 1, 1], [], []>} : vector<72x4xbf16>, vector<4x8xbf16>, vector<72x8xf32> -> vector<72x8xf32>
    %51 = arith.addf %44, %50 : vector<72x8xf32>
    %c0_42 = arith.constant 0 : index
    %c92 = arith.constant 92 : index
    %c0_43 = arith.constant 0 : index
    %52 = vector.load %arg1[%c0_42, %c92, %c0_43] : memref<1x332x4xf32, #tpu.memory_space<vmem>>, vector<1x72x4xf32>
    %53 = vector.shape_cast %52 : vector<1x72x4xf32> to vector<72x4xf32>
    %54 = arith.truncf %53 : vector<72x4xf32> to vector<72x4xbf16>
    %c7 = arith.constant 7 : index
    %c0_44 = arith.constant 0 : index
    %c0_45 = arith.constant 0 : index
    %55 = vector.load %arg2[%c7, %c0_44, %c0_45] : memref<9x4x8xbf16, #tpu.memory_space<vmem>>, vector<1x4x8xbf16>
    %56 = vector.shape_cast %55 : vector<1x4x8xbf16> to vector<4x8xbf16>
    %cst_46 = arith.constant dense<0.000000e+00> : vector<72x8xf32>
    %57 = tpu.matmul %54, %56, %cst_46 {dimension_numbers = #tpu.dot_dimension_numbers<[1], [0], [0], [1], [0, 0, 1, 1], [], []>} : vector<72x4xbf16>, vector<4x8xbf16>, vector<72x8xf32> -> vector<72x8xf32>
    %58 = arith.addf %51, %57 : vector<72x8xf32>
    %c0_47 = arith.constant 0 : index
    %c10 = arith.constant 10 : index
    %c0_48 = arith.constant 0 : index
    %59 = vector.load %arg1[%c0_47, %c10, %c0_48] : memref<1x332x4xf32, #tpu.memory_space<vmem>>, vector<1x72x4xf32>
    %60 = vector.shape_cast %59 : vector<1x72x4xf32> to vector<72x4xf32>
    %61 = arith.truncf %60 : vector<72x4xf32> to vector<72x4xbf16>
    %c8 = arith.constant 8 : index
    %c0_49 = arith.constant 0 : index
    %c0_50 = arith.constant 0 : index
    %62 = vector.load %arg2[%c8, %c0_49, %c0_50] : memref<9x4x8xbf16, #tpu.memory_space<vmem>>, vector<1x4x8xbf16>
    %63 = vector.shape_cast %62 : vector<1x4x8xbf16> to vector<4x8xbf16>
    %cst_51 = arith.constant dense<0.000000e+00> : vector<72x8xf32>
    %64 = tpu.matmul %61, %63, %cst_51 {dimension_numbers = #tpu.dot_dimension_numbers<[1], [0], [0], [1], [0, 0, 1, 1], [], []>} : vector<72x4xbf16>, vector<4x8xbf16>, vector<72x8xf32> -> vector<72x8xf32>
    %65 = arith.addf %58, %64 : vector<72x8xf32>
    %c0_52 = arith.constant 0 : index
    %c0_53 = arith.constant 0 : index
    %c0_54 = arith.constant 0 : index
    %66 = vector.load %arg1[%c0_52, %c0_53, %c0_54] : memref<1x332x4xf32, #tpu.memory_space<vmem>>, vector<1x72x4xf32>
    %67 = vector.shape_cast %66 : vector<1x72x4xf32> to vector<72x4xf32>
    %68 = arith.truncf %67 : vector<72x4xf32> to vector<72x4xbf16>
    %c0_55 = arith.constant 0 : index
    %c0_56 = arith.constant 0 : index
    %c0_57 = arith.constant 0 : index
    %69 = vector.load %arg5[%c0_55, %c0_56, %c0_57] : memref<9x4x8xbf16, #tpu.memory_space<vmem>>, vector<1x4x8xbf16>
    %70 = vector.shape_cast %69 : vector<1x4x8xbf16> to vector<4x8xbf16>
    %cst_58 = arith.constant dense<0.000000e+00> : vector<72x8xf32>
    %71 = tpu.matmul %68, %70, %cst_58 {dimension_numbers = #tpu.dot_dimension_numbers<[1], [0], [0], [1], [0, 0, 1, 1], [], []>} : vector<72x4xbf16>, vector<4x8xbf16>, vector<72x8xf32> -> vector<72x8xf32>
    %c0_59 = arith.constant 0 : index
    %c83_60 = arith.constant 83 : index
    %c0_61 = arith.constant 0 : index
    %72 = vector.load %arg1[%c0_59, %c83_60, %c0_61] : memref<1x332x4xf32, #tpu.memory_space<vmem>>, vector<1x72x4xf32>
    %73 = vector.shape_cast %72 : vector<1x72x4xf32> to vector<72x4xf32>
    %74 = arith.truncf %73 : vector<72x4xf32> to vector<72x4xbf16>
    %c1_62 = arith.constant 1 : index
    %c0_63 = arith.constant 0 : index
    %c0_64 = arith.constant 0 : index
    %75 = vector.load %arg5[%c1_62, %c0_63, %c0_64] : memref<9x4x8xbf16, #tpu.memory_space<vmem>>, vector<1x4x8xbf16>
    %76 = vector.shape_cast %75 : vector<1x4x8xbf16> to vector<4x8xbf16>
    %cst_65 = arith.constant dense<0.000000e+00> : vector<72x8xf32>
    %77 = tpu.matmul %74, %76, %cst_65 {dimension_numbers = #tpu.dot_dimension_numbers<[1], [0], [0], [1], [0, 0, 1, 1], [], []>} : vector<72x4xbf16>, vector<4x8xbf16>, vector<72x8xf32> -> vector<72x8xf32>
    %78 = arith.addf %71, %77 : vector<72x8xf32>
    %c0_66 = arith.constant 0 : index
    %c1_67 = arith.constant 1 : index
    %c0_68 = arith.constant 0 : index
    %79 = vector.load %arg1[%c0_66, %c1_67, %c0_68] : memref<1x332x4xf32, #tpu.memory_space<vmem>>, vector<1x72x4xf32>
    %80 = vector.shape_cast %79 : vector<1x72x4xf32> to vector<72x4xf32>
    %81 = arith.truncf %80 : vector<72x4xf32> to vector<72x4xbf16>
    %c2_69 = arith.constant 2 : index
    %c0_70 = arith.constant 0 : index
    %c0_71 = arith.constant 0 : index
    %82 = vector.load %arg5[%c2_69, %c0_70, %c0_71] : memref<9x4x8xbf16, #tpu.memory_space<vmem>>, vector<1x4x8xbf16>
    %83 = vector.shape_cast %82 : vector<1x4x8xbf16> to vector<4x8xbf16>
    %cst_72 = arith.constant dense<0.000000e+00> : vector<72x8xf32>
    %84 = tpu.matmul %81, %83, %cst_72 {dimension_numbers = #tpu.dot_dimension_numbers<[1], [0], [0], [1], [0, 0, 1, 1], [], []>} : vector<72x4xbf16>, vector<4x8xbf16>, vector<72x8xf32> -> vector<72x8xf32>
    %85 = arith.addf %78, %84 : vector<72x8xf32>
    %c0_73 = arith.constant 0 : index
    %c166_74 = arith.constant 166 : index
    %c0_75 = arith.constant 0 : index
    %86 = vector.load %arg1[%c0_73, %c166_74, %c0_75] : memref<1x332x4xf32, #tpu.memory_space<vmem>>, vector<1x72x4xf32>
    %87 = vector.shape_cast %86 : vector<1x72x4xf32> to vector<72x4xf32>
    %88 = arith.truncf %87 : vector<72x4xf32> to vector<72x4xbf16>
    %c3_76 = arith.constant 3 : index
    %c0_77 = arith.constant 0 : index
    %c0_78 = arith.constant 0 : index
    %89 = vector.load %arg5[%c3_76, %c0_77, %c0_78] : memref<9x4x8xbf16, #tpu.memory_space<vmem>>, vector<1x4x8xbf16>
    %90 = vector.shape_cast %89 : vector<1x4x8xbf16> to vector<4x8xbf16>
    %cst_79 = arith.constant dense<0.000000e+00> : vector<72x8xf32>
    %91 = tpu.matmul %88, %90, %cst_79 {dimension_numbers = #tpu.dot_dimension_numbers<[1], [0], [0], [1], [0, 0, 1, 1], [], []>} : vector<72x4xbf16>, vector<4x8xbf16>, vector<72x8xf32> -> vector<72x8xf32>
    %92 = arith.addf %85, %91 : vector<72x8xf32>
    %c0_80 = arith.constant 0 : index
    %c249_81 = arith.constant 249 : index
    %c0_82 = arith.constant 0 : index
    %93 = vector.load %arg1[%c0_80, %c249_81, %c0_82] : memref<1x332x4xf32, #tpu.memory_space<vmem>>, vector<1x72x4xf32>
    %94 = vector.shape_cast %93 : vector<1x72x4xf32> to vector<72x4xf32>
    %95 = arith.truncf %94 : vector<72x4xf32> to vector<72x4xbf16>
    %c4_83 = arith.constant 4 : index
    %c0_84 = arith.constant 0 : index
    %c0_85 = arith.constant 0 : index
    %96 = vector.load %arg5[%c4_83, %c0_84, %c0_85] : memref<9x4x8xbf16, #tpu.memory_space<vmem>>, vector<1x4x8xbf16>
    %97 = vector.shape_cast %96 : vector<1x4x8xbf16> to vector<4x8xbf16>
    %cst_86 = arith.constant dense<0.000000e+00> : vector<72x8xf32>
    %98 = tpu.matmul %95, %97, %cst_86 {dimension_numbers = #tpu.dot_dimension_numbers<[1], [0], [0], [1], [0, 0, 1, 1], [], []>} : vector<72x4xbf16>, vector<4x8xbf16>, vector<72x8xf32> -> vector<72x8xf32>
    %99 = arith.addf %92, %98 : vector<72x8xf32>
    %c0_87 = arith.constant 0 : index
    %c167_88 = arith.constant 167 : index
    %c0_89 = arith.constant 0 : index
    %100 = vector.load %arg1[%c0_87, %c167_88, %c0_89] : memref<1x332x4xf32, #tpu.memory_space<vmem>>, vector<1x72x4xf32>
    %101 = vector.shape_cast %100 : vector<1x72x4xf32> to vector<72x4xf32>
    %102 = arith.truncf %101 : vector<72x4xf32> to vector<72x4xbf16>
    %c5_90 = arith.constant 5 : index
    %c0_91 = arith.constant 0 : index
    %c0_92 = arith.constant 0 : index
    %103 = vector.load %arg5[%c5_90, %c0_91, %c0_92] : memref<9x4x8xbf16, #tpu.memory_space<vmem>>, vector<1x4x8xbf16>
    %104 = vector.shape_cast %103 : vector<1x4x8xbf16> to vector<4x8xbf16>
    %cst_93 = arith.constant dense<0.000000e+00> : vector<72x8xf32>
    %105 = tpu.matmul %102, %104, %cst_93 {dimension_numbers = #tpu.dot_dimension_numbers<[1], [0], [0], [1], [0, 0, 1, 1], [], []>} : vector<72x4xbf16>, vector<4x8xbf16>, vector<72x8xf32> -> vector<72x8xf32>
    %106 = arith.addf %99, %105 : vector<72x8xf32>
    %c0_94 = arith.constant 0 : index
    %c9_95 = arith.constant 9 : index
    %c0_96 = arith.constant 0 : index
    %107 = vector.load %arg1[%c0_94, %c9_95, %c0_96] : memref<1x332x4xf32, #tpu.memory_space<vmem>>, vector<1x72x4xf32>
    %108 = vector.shape_cast %107 : vector<1x72x4xf32> to vector<72x4xf32>
    %109 = arith.truncf %108 : vector<72x4xf32> to vector<72x4xbf16>
    %c6_97 = arith.constant 6 : index
    %c0_98 = arith.constant 0 : index
    %c0_99 = arith.constant 0 : index
    %110 = vector.load %arg5[%c6_97, %c0_98, %c0_99] : memref<9x4x8xbf16, #tpu.memory_space<vmem>>, vector<1x4x8xbf16>
    %111 = vector.shape_cast %110 : vector<1x4x8xbf16> to vector<4x8xbf16>
    %cst_100 = arith.constant dense<0.000000e+00> : vector<72x8xf32>
    %112 = tpu.matmul %109, %111, %cst_100 {dimension_numbers = #tpu.dot_dimension_numbers<[1], [0], [0], [1], [0, 0, 1, 1], [], []>} : vector<72x4xbf16>, vector<4x8xbf16>, vector<72x8xf32> -> vector<72x8xf32>
    %113 = arith.addf %106, %112 : vector<72x8xf32>
    %c0_101 = arith.constant 0 : index
    %c92_102 = arith.constant 92 : index
    %c0_103 = arith.constant 0 : index
    %114 = vector.load %arg1[%c0_101, %c92_102, %c0_103] : memref<1x332x4xf32, #tpu.memory_space<vmem>>, vector<1x72x4xf32>
    %115 = vector.shape_cast %114 : vector<1x72x4xf32> to vector<72x4xf32>
    %116 = arith.truncf %115 : vector<72x4xf32> to vector<72x4xbf16>
    %c7_104 = arith.constant 7 : index
    %c0_105 = arith.constant 0 : index
    %c0_106 = arith.constant 0 : index
    %117 = vector.load %arg5[%c7_104, %c0_105, %c0_106] : memref<9x4x8xbf16, #tpu.memory_space<vmem>>, vector<1x4x8xbf16>
    %118 = vector.shape_cast %117 : vector<1x4x8xbf16> to vector<4x8xbf16>
    %cst_107 = arith.constant dense<0.000000e+00> : vector<72x8xf32>
    %119 = tpu.matmul %116, %118, %cst_107 {dimension_numbers = #tpu.dot_dimension_numbers<[1], [0], [0], [1], [0, 0, 1, 1], [], []>} : vector<72x4xbf16>, vector<4x8xbf16>, vector<72x8xf32> -> vector<72x8xf32>
    %120 = arith.addf %113, %119 : vector<72x8xf32>
    %c0_108 = arith.constant 0 : index
    %c10_109 = arith.constant 10 : index
    %c0_110 = arith.constant 0 : index
    %121 = vector.load %arg1[%c0_108, %c10_109, %c0_110] : memref<1x332x4xf32, #tpu.memory_space<vmem>>, vector<1x72x4xf32>
    %122 = vector.shape_cast %121 : vector<1x72x4xf32> to vector<72x4xf32>
    %123 = arith.truncf %122 : vector<72x4xf32> to vector<72x4xbf16>
    %c8_111 = arith.constant 8 : index
    %c0_112 = arith.constant 0 : index
    %c0_113 = arith.constant 0 : index
    %124 = vector.load %arg5[%c8_111, %c0_112, %c0_113] : memref<9x4x8xbf16, #tpu.memory_space<vmem>>, vector<1x4x8xbf16>
    %125 = vector.shape_cast %124 : vector<1x4x8xbf16> to vector<4x8xbf16>
    %cst_114 = arith.constant dense<0.000000e+00> : vector<72x8xf32>
    %126 = tpu.matmul %123, %125, %cst_114 {dimension_numbers = #tpu.dot_dimension_numbers<[1], [0], [0], [1], [0, 0, 1, 1], [], []>} : vector<72x4xbf16>, vector<4x8xbf16>, vector<72x8xf32> -> vector<72x8xf32>
    %127 = arith.addf %120, %126 : vector<72x8xf32>
    %c0_115 = arith.constant 0 : index
    %c0_116 = arith.constant 0 : index
    %128 = vector.load %arg6[%c0_115, %c0_116] : memref<1x8xf32, #tpu.memory_space<vmem>>, vector<1x8xf32>
    %129 = vector.broadcast %128 : vector<1x8xf32> to vector<72x8xf32>
    %130 = arith.addf %127, %129 : vector<72x8xf32>
    %c0_117 = arith.constant 0 : index
    %c0_118 = arith.constant 0 : index
    %131 = vector.load %arg3[%c0_117, %c0_118] : memref<1x8xf32, #tpu.memory_space<vmem>>, vector<1x8xf32>
    %132 = vector.broadcast %131 : vector<1x8xf32> to vector<72x8xf32>
    %133 = arith.mulf %65, %132 : vector<72x8xf32>
    %c0_119 = arith.constant 0 : index
    %c0_120 = arith.constant 0 : index
    %134 = vector.load %arg4[%c0_119, %c0_120] : memref<1x8xf32, #tpu.memory_space<vmem>>, vector<1x8xf32>
    %135 = vector.broadcast %134 : vector<1x8xf32> to vector<72x8xf32>
    %136 = arith.addf %133, %135 : vector<72x8xf32>
    %cst_121 = arith.constant 0.000000e+00 : f32
    %137 = vector.broadcast %cst_121 : f32 to vector<72x8xf32>
    %138 = arith.maximumf %136, %137 : vector<72x8xf32>
    %139 = vector.extract_strided_slice %138 {offsets = [0, 0], sizes = [8, 8], strides = [1, 1]} : vector<72x8xf32> to vector<8x8xf32>
    %c11 = arith.constant 11 : index
    %c0_122 = arith.constant 0 : index
    %140 = vector.load %arg17[%c11, %c0_122] : memref<102x8xf32, #tpu.memory_space<vmem>>, vector<8x8xf32>
    tpu.vector_store %arg17[%c11, %c0_122], %139 {strides = array<i32>} : memref<102x8xf32, #tpu.memory_space<vmem>>, vector<8x8xf32>,
    %141 = vector.extract_strided_slice %138 {offsets = [9, 0], sizes = [8, 8], strides = [1, 1]} : vector<72x8xf32> to vector<8x8xf32>
    %c21 = arith.constant 21 : index
    %c0_123 = arith.constant 0 : index
    %142 = vector.load %arg17[%c21, %c0_123] : memref<102x8xf32, #tpu.memory_space<vmem>>, vector<8x8xf32>
    tpu.vector_store %arg17[%c21, %c0_123], %141 {strides = array<i32>} : memref<102x8xf32, #tpu.memory_space<vmem>>, vector<8x8xf32>,
    %143 = vector.extract_strided_slice %138 {offsets = [18, 0], sizes = [8, 8], strides = [1, 1]} : vector<72x8xf32> to vector<8x8xf32>
    %c31 = arith.constant 31 : index
    %c0_124 = arith.constant 0 : index
    %144 = vector.load %arg17[%c31, %c0_124] : memref<102x8xf32, #tpu.memory_space<vmem>>, vector<8x8xf32>
    tpu.vector_store %arg17[%c31, %c0_124], %143 {strides = array<i32>} : memref<102x8xf32, #tpu.memory_space<vmem>>, vector<8x8xf32>,
    %145 = vector.extract_strided_slice %138 {offsets = [27, 0], sizes = [8, 8], strides = [1, 1]} : vector<72x8xf32> to vector<8x8xf32>
    %c41 = arith.constant 41 : index
    %c0_125 = arith.constant 0 : index
    %146 = vector.load %arg17[%c41, %c0_125] : memref<102x8xf32, #tpu.memory_space<vmem>>, vector<8x8xf32>
    tpu.vector_store %arg17[%c41, %c0_125], %145 {strides = array<i32>} : memref<102x8xf32, #tpu.memory_space<vmem>>, vector<8x8xf32>,
    %147 = vector.extract_strided_slice %138 {offsets = [36, 0], sizes = [8, 8], strides = [1, 1]} : vector<72x8xf32> to vector<8x8xf32>
    %c51 = arith.constant 51 : index
    %c0_126 = arith.constant 0 : index
    %148 = vector.load %arg17[%c51, %c0_126] : memref<102x8xf32, #tpu.memory_space<vmem>>, vector<8x8xf32>
    tpu.vector_store %arg17[%c51, %c0_126], %147 {strides = array<i32>} : memref<102x8xf32, #tpu.memory_space<vmem>>, vector<8x8xf32>,
    %149 = vector.extract_strided_slice %138 {offsets = [45, 0], sizes = [8, 8], strides = [1, 1]} : vector<72x8xf32> to vector<8x8xf32>
    %c61 = arith.constant 61 : index
    %c0_127 = arith.constant 0 : index
    %150 = vector.load %arg17[%c61, %c0_127] : memref<102x8xf32, #tpu.memory_space<vmem>>, vector<8x8xf32>
    tpu.vector_store %arg17[%c61, %c0_127], %149 {strides = array<i32>} : memref<102x8xf32, #tpu.memory_space<vmem>>, vector<8x8xf32>,
    %151 = vector.extract_strided_slice %138 {offsets = [54, 0], sizes = [8, 8], strides = [1, 1]} : vector<72x8xf32> to vector<8x8xf32>
    %c71 = arith.constant 71 : index
    %c0_128 = arith.constant 0 : index
    %152 = vector.load %arg17[%c71, %c0_128] : memref<102x8xf32, #tpu.memory_space<vmem>>, vector<8x8xf32>
    tpu.vector_store %arg17[%c71, %c0_128], %151 {strides = array<i32>} : memref<102x8xf32, #tpu.memory_space<vmem>>, vector<8x8xf32>,
    %153 = vector.extract_strided_slice %138 {offsets = [63, 0], sizes = [8, 8], strides = [1, 1]} : vector<72x8xf32> to vector<8x8xf32>
    %c81 = arith.constant 81 : index
    %c0_129 = arith.constant 0 : index
    %154 = vector.load %arg17[%c81, %c0_129] : memref<102x8xf32, #tpu.memory_space<vmem>>, vector<8x8xf32>
    tpu.vector_store %arg17[%c81, %c0_129], %153 {strides = array<i32>} : memref<102x8xf32, #tpu.memory_space<vmem>>, vector<8x8xf32>,
    %c0_130 = arith.constant 0 : index
    %c0_131 = arith.constant 0 : index
    %155 = vector.load %arg17[%c0_130, %c0_131] : memref<102x8xf32, #tpu.memory_space<vmem>>, vector<80x8xf32>
    %156 = arith.truncf %155 : vector<80x8xf32> to vector<80x8xbf16>
    %c0_132 = arith.constant 0 : index
    %c0_133 = arith.constant 0 : index
    %c0_134 = arith.constant 0 : index
    %157 = vector.load %arg7[%c0_132, %c0_133, %c0_134] : memref<9x8x8xbf16, #tpu.memory_space<vmem>>, vector<1x8x8xbf16>
    %158 = vector.shape_cast %157 : vector<1x8x8xbf16> to vector<8x8xbf16>
    %cst_135 = arith.constant dense<0.000000e+00> : vector<80x8xf32>
    %159 = tpu.matmul %156, %158, %cst_135 {dimension_numbers = #tpu.dot_dimension_numbers<[1], [0], [0], [1], [0, 0, 1, 1], [], []>} : vector<80x8xbf16>, vector<8x8xbf16>, vector<80x8xf32> -> vector<80x8xf32>
    %c1_136 = arith.constant 1 : index
    %c0_137 = arith.constant 0 : index
    %160 = vector.load %arg17[%c1_136, %c0_137] : memref<102x8xf32, #tpu.memory_space<vmem>>, vector<80x8xf32>
    %161 = arith.truncf %160 : vector<80x8xf32> to vector<80x8xbf16>
    %c1_138 = arith.constant 1 : index
    %c0_139 = arith.constant 0 : index
    %c0_140 = arith.constant 0 : index
    %162 = vector.load %arg7[%c1_138, %c0_139, %c0_140] : memref<9x8x8xbf16, #tpu.memory_space<vmem>>, vector<1x8x8xbf16>
    %163 = vector.shape_cast %162 : vector<1x8x8xbf16> to vector<8x8xbf16>
    %cst_141 = arith.constant dense<0.000000e+00> : vector<80x8xf32>
    %164 = tpu.matmul %161, %163, %cst_141 {dimension_numbers = #tpu.dot_dimension_numbers<[1], [0], [0], [1], [0, 0, 1, 1], [], []>} : vector<80x8xbf16>, vector<8x8xbf16>, vector<80x8xf32> -> vector<80x8xf32>
    %165 = arith.addf %159, %164 : vector<80x8xf32>
    %c2_142 = arith.constant 2 : index
    %c0_143 = arith.constant 0 : index
    %166 = vector.load %arg17[%c2_142, %c0_143] : memref<102x8xf32, #tpu.memory_space<vmem>>, vector<80x8xf32>
    %167 = arith.truncf %166 : vector<80x8xf32> to vector<80x8xbf16>
    %c2_144 = arith.constant 2 : index
    %c0_145 = arith.constant 0 : index
    %c0_146 = arith.constant 0 : index
    %168 = vector.load %arg7[%c2_144, %c0_145, %c0_146] : memref<9x8x8xbf16, #tpu.memory_space<vmem>>, vector<1x8x8xbf16>
    %169 = vector.shape_cast %168 : vector<1x8x8xbf16> to vector<8x8xbf16>
    %cst_147 = arith.constant dense<0.000000e+00> : vector<80x8xf32>
    %170 = tpu.matmul %167, %169, %cst_147 {dimension_numbers = #tpu.dot_dimension_numbers<[1], [0], [0], [1], [0, 0, 1, 1], [], []>} : vector<80x8xbf16>, vector<8x8xbf16>, vector<80x8xf32> -> vector<80x8xf32>
    %171 = arith.addf %165, %170 : vector<80x8xf32>
    %c10_148 = arith.constant 10 : index
    %c0_149 = arith.constant 0 : index
    %172 = vector.load %arg17[%c10_148, %c0_149] : memref<102x8xf32, #tpu.memory_space<vmem>>, vector<80x8xf32>
    %173 = arith.truncf %172 : vector<80x8xf32> to vector<80x8xbf16>
    %c3_150 = arith.constant 3 : index
    %c0_151 = arith.constant 0 : index
    %c0_152 = arith.constant 0 : index
    %174 = vector.load %arg7[%c3_150, %c0_151, %c0_152] : memref<9x8x8xbf16, #tpu.memory_space<vmem>>, vector<1x8x8xbf16>
    %175 = vector.shape_cast %174 : vector<1x8x8xbf16> to vector<8x8xbf16>
    %cst_153 = arith.constant dense<0.000000e+00> : vector<80x8xf32>
    %176 = tpu.matmul %173, %175, %cst_153 {dimension_numbers = #tpu.dot_dimension_numbers<[1], [0], [0], [1], [0, 0, 1, 1], [], []>} : vector<80x8xbf16>, vector<8x8xbf16>, vector<80x8xf32> -> vector<80x8xf32>
    %177 = arith.addf %171, %176 : vector<80x8xf32>
    %c11_154 = arith.constant 11 : index
    %c0_155 = arith.constant 0 : index
    %178 = vector.load %arg17[%c11_154, %c0_155] : memref<102x8xf32, #tpu.memory_space<vmem>>, vector<80x8xf32>
    %179 = arith.truncf %178 : vector<80x8xf32> to vector<80x8xbf16>
    %c4_156 = arith.constant 4 : index
    %c0_157 = arith.constant 0 : index
    %c0_158 = arith.constant 0 : index
    %180 = vector.load %arg7[%c4_156, %c0_157, %c0_158] : memref<9x8x8xbf16, #tpu.memory_space<vmem>>, vector<1x8x8xbf16>
    %181 = vector.shape_cast %180 : vector<1x8x8xbf16> to vector<8x8xbf16>
    %cst_159 = arith.constant dense<0.000000e+00> : vector<80x8xf32>
    %182 = tpu.matmul %179, %181, %cst_159 {dimension_numbers = #tpu.dot_dimension_numbers<[1], [0], [0], [1], [0, 0, 1, 1], [], []>} : vector<80x8xbf16>, vector<8x8xbf16>, vector<80x8xf32> -> vector<80x8xf32>
    %183 = arith.addf %177, %182 : vector<80x8xf32>
    %c12 = arith.constant 12 : index
    %c0_160 = arith.constant 0 : index
    %184 = vector.load %arg17[%c12, %c0_160] : memref<102x8xf32, #tpu.memory_space<vmem>>, vector<80x8xf32>
    %185 = arith.truncf %184 : vector<80x8xf32> to vector<80x8xbf16>
    %c5_161 = arith.constant 5 : index
    %c0_162 = arith.constant 0 : index
    %c0_163 = arith.constant 0 : index
    %186 = vector.load %arg7[%c5_161, %c0_162, %c0_163] : memref<9x8x8xbf16, #tpu.memory_space<vmem>>, vector<1x8x8xbf16>
    %187 = vector.shape_cast %186 : vector<1x8x8xbf16> to vector<8x8xbf16>
    %cst_164 = arith.constant dense<0.000000e+00> : vector<80x8xf32>
    %188 = tpu.matmul %185, %187, %cst_164 {dimension_numbers = #tpu.dot_dimension_numbers<[1], [0], [0], [1], [0, 0, 1, 1], [], []>} : vector<80x8xbf16>, vector<8x8xbf16>, vector<80x8xf32> -> vector<80x8xf32>
    %189 = arith.addf %183, %188 : vector<80x8xf32>
    %c20 = arith.constant 20 : index
    %c0_165 = arith.constant 0 : index
    %190 = vector.load %arg17[%c20, %c0_165] : memref<102x8xf32, #tpu.memory_space<vmem>>, vector<80x8xf32>
    %191 = arith.truncf %190 : vector<80x8xf32> to vector<80x8xbf16>
    %c6_166 = arith.constant 6 : index
    %c0_167 = arith.constant 0 : index
    %c0_168 = arith.constant 0 : index
    %192 = vector.load %arg7[%c6_166, %c0_167, %c0_168] : memref<9x8x8xbf16, #tpu.memory_space<vmem>>, vector<1x8x8xbf16>
    %193 = vector.shape_cast %192 : vector<1x8x8xbf16> to vector<8x8xbf16>
    %cst_169 = arith.constant dense<0.000000e+00> : vector<80x8xf32>
    %194 = tpu.matmul %191, %193, %cst_169 {dimension_numbers = #tpu.dot_dimension_numbers<[1], [0], [0], [1], [0, 0, 1, 1], [], []>} : vector<80x8xbf16>, vector<8x8xbf16>, vector<80x8xf32> -> vector<80x8xf32>
    %195 = arith.addf %189, %194 : vector<80x8xf32>
    %c21_170 = arith.constant 21 : index
    %c0_171 = arith.constant 0 : index
    %196 = vector.load %arg17[%c21_170, %c0_171] : memref<102x8xf32, #tpu.memory_space<vmem>>, vector<80x8xf32>
    %197 = arith.truncf %196 : vector<80x8xf32> to vector<80x8xbf16>
    %c7_172 = arith.constant 7 : index
    %c0_173 = arith.constant 0 : index
    %c0_174 = arith.constant 0 : index
    %198 = vector.load %arg7[%c7_172, %c0_173, %c0_174] : memref<9x8x8xbf16, #tpu.memory_space<vmem>>, vector<1x8x8xbf16>
    %199 = vector.shape_cast %198 : vector<1x8x8xbf16> to vector<8x8xbf16>
    %cst_175 = arith.constant dense<0.000000e+00> : vector<80x8xf32>
    %200 = tpu.matmul %197, %199, %cst_175 {dimension_numbers = #tpu.dot_dimension_numbers<[1], [0], [0], [1], [0, 0, 1, 1], [], []>} : vector<80x8xbf16>, vector<8x8xbf16>, vector<80x8xf32> -> vector<80x8xf32>
    %201 = arith.addf %195, %200 : vector<80x8xf32>
    %c22 = arith.constant 22 : index
    %c0_176 = arith.constant 0 : index
    %202 = vector.load %arg17[%c22, %c0_176] : memref<102x8xf32, #tpu.memory_space<vmem>>, vector<80x8xf32>
    %203 = arith.truncf %202 : vector<80x8xf32> to vector<80x8xbf16>
    %c8_177 = arith.constant 8 : index
    %c0_178 = arith.constant 0 : index
    %c0_179 = arith.constant 0 : index
    %204 = vector.load %arg7[%c8_177, %c0_178, %c0_179] : memref<9x8x8xbf16, #tpu.memory_space<vmem>>, vector<1x8x8xbf16>
    %205 = vector.shape_cast %204 : vector<1x8x8xbf16> to vector<8x8xbf16>
    %cst_180 = arith.constant dense<0.000000e+00> : vector<80x8xf32>
    %206 = tpu.matmul %203, %205, %cst_180 {dimension_numbers = #tpu.dot_dimension_numbers<[1], [0], [0], [1], [0, 0, 1, 1], [], []>} : vector<80x8xbf16>, vector<8x8xbf16>, vector<80x8xf32> -> vector<80x8xf32>
    %207 = arith.addf %201, %206 : vector<80x8xf32>
    %c0_181 = arith.constant 0 : index
    %c0_182 = arith.constant 0 : index
    %208 = vector.load %arg8[%c0_181, %c0_182] : memref<1x8xf32, #tpu.memory_space<vmem>>, vector<1x8xf32>
    %209 = vector.broadcast %208 : vector<1x8xf32> to vector<80x8xf32>
    %210 = arith.mulf %207, %209 : vector<80x8xf32>
    %c0_183 = arith.constant 0 : index
    %c0_184 = arith.constant 0 : index
    %211 = vector.load %arg9[%c0_183, %c0_184] : memref<1x8xf32, #tpu.memory_space<vmem>>, vector<1x8xf32>
    %212 = vector.broadcast %211 : vector<1x8xf32> to vector<80x8xf32>
    %213 = arith.addf %210, %212 : vector<80x8xf32>
    %214 = vector.extract_strided_slice %130 {offsets = [0, 0], sizes = [8, 8], strides = [1, 1]} : vector<72x8xf32> to vector<8x8xf32>
    %215 = vector.extract_strided_slice %213 {offsets = [0, 0], sizes = [8, 8], strides = [1, 1]} : vector<80x8xf32> to vector<8x8xf32>
    %216 = arith.addf %215, %214 : vector<8x8xf32>
    %cst_185 = arith.constant 0.000000e+00 : f32
    %217 = vector.broadcast %cst_185 : f32 to vector<8x8xf32>
    %218 = arith.maximumf %216, %217 : vector<8x8xf32>
    %c11_186 = arith.constant 11 : index
    %c0_187 = arith.constant 0 : index
    %219 = vector.load %arg18[%c11_186, %c0_187] : memref<102x8xf32, #tpu.memory_space<vmem>>, vector<8x8xf32>
    tpu.vector_store %arg18[%c11_186, %c0_187], %218 {strides = array<i32>} : memref<102x8xf32, #tpu.memory_space<vmem>>, vector<8x8xf32>,
    %220 = vector.extract_strided_slice %130 {offsets = [9, 0], sizes = [8, 8], strides = [1, 1]} : vector<72x8xf32> to vector<8x8xf32>
    %221 = vector.extract_strided_slice %213 {offsets = [10, 0], sizes = [8, 8], strides = [1, 1]} : vector<80x8xf32> to vector<8x8xf32>
    %222 = arith.addf %221, %220 : vector<8x8xf32>
    %cst_188 = arith.constant 0.000000e+00 : f32
    %223 = vector.broadcast %cst_188 : f32 to vector<8x8xf32>
    %224 = arith.maximumf %222, %223 : vector<8x8xf32>
    %c21_189 = arith.constant 21 : index
    %c0_190 = arith.constant 0 : index
    %225 = vector.load %arg18[%c21_189, %c0_190] : memref<102x8xf32, #tpu.memory_space<vmem>>, vector<8x8xf32>
    tpu.vector_store %arg18[%c21_189, %c0_190], %224 {strides = array<i32>} : memref<102x8xf32, #tpu.memory_space<vmem>>, vector<8x8xf32>,
    %226 = vector.extract_strided_slice %130 {offsets = [18, 0], sizes = [8, 8], strides = [1, 1]} : vector<72x8xf32> to vector<8x8xf32>
    %227 = vector.extract_strided_slice %213 {offsets = [20, 0], sizes = [8, 8], strides = [1, 1]} : vector<80x8xf32> to vector<8x8xf32>
    %228 = arith.addf %227, %226 : vector<8x8xf32>
    %cst_191 = arith.constant 0.000000e+00 : f32
    %229 = vector.broadcast %cst_191 : f32 to vector<8x8xf32>
    %230 = arith.maximumf %228, %229 : vector<8x8xf32>
    %c31_192 = arith.constant 31 : index
    %c0_193 = arith.constant 0 : index
    %231 = vector.load %arg18[%c31_192, %c0_193] : memref<102x8xf32, #tpu.memory_space<vmem>>, vector<8x8xf32>
    tpu.vector_store %arg18[%c31_192, %c0_193], %230 {strides = array<i32>} : memref<102x8xf32, #tpu.memory_space<vmem>>, vector<8x8xf32>,
    %232 = vector.extract_strided_slice %130 {offsets = [27, 0], sizes = [8, 8], strides = [1, 1]} : vector<72x8xf32> to vector<8x8xf32>
    %233 = vector.extract_strided_slice %213 {offsets = [30, 0], sizes = [8, 8], strides = [1, 1]} : vector<80x8xf32> to vector<8x8xf32>
    %234 = arith.addf %233, %232 : vector<8x8xf32>
    %cst_194 = arith.constant 0.000000e+00 : f32
    %235 = vector.broadcast %cst_194 : f32 to vector<8x8xf32>
    %236 = arith.maximumf %234, %235 : vector<8x8xf32>
    %c41_195 = arith.constant 41 : index
    %c0_196 = arith.constant 0 : index
    %237 = vector.load %arg18[%c41_195, %c0_196] : memref<102x8xf32, #tpu.memory_space<vmem>>, vector<8x8xf32>
    tpu.vector_store %arg18[%c41_195, %c0_196], %236 {strides = array<i32>} : memref<102x8xf32, #tpu.memory_space<vmem>>, vector<8x8xf32>,
    %238 = vector.extract_strided_slice %130 {offsets = [36, 0], sizes = [8, 8], strides = [1, 1]} : vector<72x8xf32> to vector<8x8xf32>
    %239 = vector.extract_strided_slice %213 {offsets = [40, 0], sizes = [8, 8], strides = [1, 1]} : vector<80x8xf32> to vector<8x8xf32>
    %240 = arith.addf %239, %238 : vector<8x8xf32>
    %cst_197 = arith.constant 0.000000e+00 : f32
    %241 = vector.broadcast %cst_197 : f32 to vector<8x8xf32>
    %242 = arith.maximumf %240, %241 : vector<8x8xf32>
    %c51_198 = arith.constant 51 : index
    %c0_199 = arith.constant 0 : index
    %243 = vector.load %arg18[%c51_198, %c0_199] : memref<102x8xf32, #tpu.memory_space<vmem>>, vector<8x8xf32>
    tpu.vector_store %arg18[%c51_198, %c0_199], %242 {strides = array<i32>} : memref<102x8xf32, #tpu.memory_space<vmem>>, vector<8x8xf32>,
    %244 = vector.extract_strided_slice %130 {offsets = [45, 0], sizes = [8, 8], strides = [1, 1]} : vector<72x8xf32> to vector<8x8xf32>
    %245 = vector.extract_strided_slice %213 {offsets = [50, 0], sizes = [8, 8], strides = [1, 1]} : vector<80x8xf32> to vector<8x8xf32>
    %246 = arith.addf %245, %244 : vector<8x8xf32>
    %cst_200 = arith.constant 0.000000e+00 : f32
    %247 = vector.broadcast %cst_200 : f32 to vector<8x8xf32>
    %248 = arith.maximumf %246, %247 : vector<8x8xf32>
    %c61_201 = arith.constant 61 : index
    %c0_202 = arith.constant 0 : index
    %249 = vector.load %arg18[%c61_201, %c0_202] : memref<102x8xf32, #tpu.memory_space<vmem>>, vector<8x8xf32>
    tpu.vector_store %arg18[%c61_201, %c0_202], %248 {strides = array<i32>} : memref<102x8xf32, #tpu.memory_space<vmem>>, vector<8x8xf32>,
    %250 = vector.extract_strided_slice %130 {offsets = [54, 0], sizes = [8, 8], strides = [1, 1]} : vector<72x8xf32> to vector<8x8xf32>
    %251 = vector.extract_strided_slice %213 {offsets = [60, 0], sizes = [8, 8], strides = [1, 1]} : vector<80x8xf32> to vector<8x8xf32>
    %252 = arith.addf %251, %250 : vector<8x8xf32>
    %cst_203 = arith.constant 0.000000e+00 : f32
    %253 = vector.broadcast %cst_203 : f32 to vector<8x8xf32>
    %254 = arith.maximumf %252, %253 : vector<8x8xf32>
    %c71_204 = arith.constant 71 : index
    %c0_205 = arith.constant 0 : index
    %255 = vector.load %arg18[%c71_204, %c0_205] : memref<102x8xf32, #tpu.memory_space<vmem>>, vector<8x8xf32>
    tpu.vector_store %arg18[%c71_204, %c0_205], %254 {strides = array<i32>} : memref<102x8xf32, #tpu.memory_space<vmem>>, vector<8x8xf32>,
    %256 = vector.extract_strided_slice %130 {offsets = [63, 0], sizes = [8, 8], strides = [1, 1]} : vector<72x8xf32> to vector<8x8xf32>
    %257 = vector.extract_strided_slice %213 {offsets = [70, 0], sizes = [8, 8], strides = [1, 1]} : vector<80x8xf32> to vector<8x8xf32>
    %258 = arith.addf %257, %256 : vector<8x8xf32>
    %cst_206 = arith.constant 0.000000e+00 : f32
    %259 = vector.broadcast %cst_206 : f32 to vector<8x8xf32>
    %260 = arith.maximumf %258, %259 : vector<8x8xf32>
    %c81_207 = arith.constant 81 : index
    %c0_208 = arith.constant 0 : index
    %261 = vector.load %arg18[%c81_207, %c0_208] : memref<102x8xf32, #tpu.memory_space<vmem>>, vector<8x8xf32>
    tpu.vector_store %arg18[%c81_207, %c0_208], %260 {strides = array<i32>} : memref<102x8xf32, #tpu.memory_space<vmem>>, vector<8x8xf32>,
    %c0_209 = arith.constant 0 : index
    %c0_210 = arith.constant 0 : index
    %262 = vector.load %arg18[%c0_209, %c0_210] : memref<102x8xf32, #tpu.memory_space<vmem>>, vector<80x8xf32>
    %263 = arith.truncf %262 : vector<80x8xf32> to vector<80x8xbf16>
    %c0_211 = arith.constant 0 : index
    %c0_212 = arith.constant 0 : index
    %c0_213 = arith.constant 0 : index
    %264 = vector.load %arg10[%c0_211, %c0_212, %c0_213] : memref<9x8x8xbf16, #tpu.memory_space<vmem>>, vector<1x8x8xbf16>
    %265 = vector.shape_cast %264 : vector<1x8x8xbf16> to vector<8x8xbf16>
    %cst_214 = arith.constant dense<0.000000e+00> : vector<80x8xf32>
    %266 = tpu.matmul %263, %265, %cst_214 {dimension_numbers = #tpu.dot_dimension_numbers<[1], [0], [0], [1], [0, 0, 1, 1], [], []>} : vector<80x8xbf16>, vector<8x8xbf16>, vector<80x8xf32> -> vector<80x8xf32>
    %c1_215 = arith.constant 1 : index
    %c0_216 = arith.constant 0 : index
    %267 = vector.load %arg18[%c1_215, %c0_216] : memref<102x8xf32, #tpu.memory_space<vmem>>, vector<80x8xf32>
    %268 = arith.truncf %267 : vector<80x8xf32> to vector<80x8xbf16>
    %c1_217 = arith.constant 1 : index
    %c0_218 = arith.constant 0 : index
    %c0_219 = arith.constant 0 : index
    %269 = vector.load %arg10[%c1_217, %c0_218, %c0_219] : memref<9x8x8xbf16, #tpu.memory_space<vmem>>, vector<1x8x8xbf16>
    %270 = vector.shape_cast %269 : vector<1x8x8xbf16> to vector<8x8xbf16>
    %cst_220 = arith.constant dense<0.000000e+00> : vector<80x8xf32>
    %271 = tpu.matmul %268, %270, %cst_220 {dimension_numbers = #tpu.dot_dimension_numbers<[1], [0], [0], [1], [0, 0, 1, 1], [], []>} : vector<80x8xbf16>, vector<8x8xbf16>, vector<80x8xf32> -> vector<80x8xf32>
    %272 = arith.addf %266, %271 : vector<80x8xf32>
    %c2_221 = arith.constant 2 : index
    %c0_222 = arith.constant 0 : index
    %273 = vector.load %arg18[%c2_221, %c0_222] : memref<102x8xf32, #tpu.memory_space<vmem>>, vector<80x8xf32>
    %274 = arith.truncf %273 : vector<80x8xf32> to vector<80x8xbf16>
    %c2_223 = arith.constant 2 : index
    %c0_224 = arith.constant 0 : index
    %c0_225 = arith.constant 0 : index
    %275 = vector.load %arg10[%c2_223, %c0_224, %c0_225] : memref<9x8x8xbf16, #tpu.memory_space<vmem>>, vector<1x8x8xbf16>
    %276 = vector.shape_cast %275 : vector<1x8x8xbf16> to vector<8x8xbf16>
    %cst_226 = arith.constant dense<0.000000e+00> : vector<80x8xf32>
    %277 = tpu.matmul %274, %276, %cst_226 {dimension_numbers = #tpu.dot_dimension_numbers<[1], [0], [0], [1], [0, 0, 1, 1], [], []>} : vector<80x8xbf16>, vector<8x8xbf16>, vector<80x8xf32> -> vector<80x8xf32>
    %278 = arith.addf %272, %277 : vector<80x8xf32>
    %c10_227 = arith.constant 10 : index
    %c0_228 = arith.constant 0 : index
    %279 = vector.load %arg18[%c10_227, %c0_228] : memref<102x8xf32, #tpu.memory_space<vmem>>, vector<80x8xf32>
    %280 = arith.truncf %279 : vector<80x8xf32> to vector<80x8xbf16>
    %c3_229 = arith.constant 3 : index
    %c0_230 = arith.constant 0 : index
    %c0_231 = arith.constant 0 : index
    %281 = vector.load %arg10[%c3_229, %c0_230, %c0_231] : memref<9x8x8xbf16, #tpu.memory_space<vmem>>, vector<1x8x8xbf16>
    %282 = vector.shape_cast %281 : vector<1x8x8xbf16> to vector<8x8xbf16>
    %cst_232 = arith.constant dense<0.000000e+00> : vector<80x8xf32>
    %283 = tpu.matmul %280, %282, %cst_232 {dimension_numbers = #tpu.dot_dimension_numbers<[1], [0], [0], [1], [0, 0, 1, 1], [], []>} : vector<80x8xbf16>, vector<8x8xbf16>, vector<80x8xf32> -> vector<80x8xf32>
    %284 = arith.addf %278, %283 : vector<80x8xf32>
    %c11_233 = arith.constant 11 : index
    %c0_234 = arith.constant 0 : index
    %285 = vector.load %arg18[%c11_233, %c0_234] : memref<102x8xf32, #tpu.memory_space<vmem>>, vector<80x8xf32>
    %286 = arith.truncf %285 : vector<80x8xf32> to vector<80x8xbf16>
    %c4_235 = arith.constant 4 : index
    %c0_236 = arith.constant 0 : index
    %c0_237 = arith.constant 0 : index
    %287 = vector.load %arg10[%c4_235, %c0_236, %c0_237] : memref<9x8x8xbf16, #tpu.memory_space<vmem>>, vector<1x8x8xbf16>
    %288 = vector.shape_cast %287 : vector<1x8x8xbf16> to vector<8x8xbf16>
    %cst_238 = arith.constant dense<0.000000e+00> : vector<80x8xf32>
    %289 = tpu.matmul %286, %288, %cst_238 {dimension_numbers = #tpu.dot_dimension_numbers<[1], [0], [0], [1], [0, 0, 1, 1], [], []>} : vector<80x8xbf16>, vector<8x8xbf16>, vector<80x8xf32> -> vector<80x8xf32>
    %290 = arith.addf %284, %289 : vector<80x8xf32>
    %c12_239 = arith.constant 12 : index
    %c0_240 = arith.constant 0 : index
    %291 = vector.load %arg18[%c12_239, %c0_240] : memref<102x8xf32, #tpu.memory_space<vmem>>, vector<80x8xf32>
    %292 = arith.truncf %291 : vector<80x8xf32> to vector<80x8xbf16>
    %c5_241 = arith.constant 5 : index
    %c0_242 = arith.constant 0 : index
    %c0_243 = arith.constant 0 : index
    %293 = vector.load %arg10[%c5_241, %c0_242, %c0_243] : memref<9x8x8xbf16, #tpu.memory_space<vmem>>, vector<1x8x8xbf16>
    %294 = vector.shape_cast %293 : vector<1x8x8xbf16> to vector<8x8xbf16>
    %cst_244 = arith.constant dense<0.000000e+00> : vector<80x8xf32>
    %295 = tpu.matmul %292, %294, %cst_244 {dimension_numbers = #tpu.dot_dimension_numbers<[1], [0], [0], [1], [0, 0, 1, 1], [], []>} : vector<80x8xbf16>, vector<8x8xbf16>, vector<80x8xf32> -> vector<80x8xf32>
    %296 = arith.addf %290, %295 : vector<80x8xf32>
    %c20_245 = arith.constant 20 : index
    %c0_246 = arith.constant 0 : index
    %297 = vector.load %arg18[%c20_245, %c0_246] : memref<102x8xf32, #tpu.memory_space<vmem>>, vector<80x8xf32>
    %298 = arith.truncf %297 : vector<80x8xf32> to vector<80x8xbf16>
    %c6_247 = arith.constant 6 : index
    %c0_248 = arith.constant 0 : index
    %c0_249 = arith.constant 0 : index
    %299 = vector.load %arg10[%c6_247, %c0_248, %c0_249] : memref<9x8x8xbf16, #tpu.memory_space<vmem>>, vector<1x8x8xbf16>
    %300 = vector.shape_cast %299 : vector<1x8x8xbf16> to vector<8x8xbf16>
    %cst_250 = arith.constant dense<0.000000e+00> : vector<80x8xf32>
    %301 = tpu.matmul %298, %300, %cst_250 {dimension_numbers = #tpu.dot_dimension_numbers<[1], [0], [0], [1], [0, 0, 1, 1], [], []>} : vector<80x8xbf16>, vector<8x8xbf16>, vector<80x8xf32> -> vector<80x8xf32>
    %302 = arith.addf %296, %301 : vector<80x8xf32>
    %c21_251 = arith.constant 21 : index
    %c0_252 = arith.constant 0 : index
    %303 = vector.load %arg18[%c21_251, %c0_252] : memref<102x8xf32, #tpu.memory_space<vmem>>, vector<80x8xf32>
    %304 = arith.truncf %303 : vector<80x8xf32> to vector<80x8xbf16>
    %c7_253 = arith.constant 7 : index
    %c0_254 = arith.constant 0 : index
    %c0_255 = arith.constant 0 : index
    %305 = vector.load %arg10[%c7_253, %c0_254, %c0_255] : memref<9x8x8xbf16, #tpu.memory_space<vmem>>, vector<1x8x8xbf16>
    %306 = vector.shape_cast %305 : vector<1x8x8xbf16> to vector<8x8xbf16>
    %cst_256 = arith.constant dense<0.000000e+00> : vector<80x8xf32>
    %307 = tpu.matmul %304, %306, %cst_256 {dimension_numbers = #tpu.dot_dimension_numbers<[1], [0], [0], [1], [0, 0, 1, 1], [], []>} : vector<80x8xbf16>, vector<8x8xbf16>, vector<80x8xf32> -> vector<80x8xf32>
    %308 = arith.addf %302, %307 : vector<80x8xf32>
    %c22_257 = arith.constant 22 : index
    %c0_258 = arith.constant 0 : index
    %309 = vector.load %arg18[%c22_257, %c0_258] : memref<102x8xf32, #tpu.memory_space<vmem>>, vector<80x8xf32>
    %310 = arith.truncf %309 : vector<80x8xf32> to vector<80x8xbf16>
    %c8_259 = arith.constant 8 : index
    %c0_260 = arith.constant 0 : index
    %c0_261 = arith.constant 0 : index
    %311 = vector.load %arg10[%c8_259, %c0_260, %c0_261] : memref<9x8x8xbf16, #tpu.memory_space<vmem>>, vector<1x8x8xbf16>
    %312 = vector.shape_cast %311 : vector<1x8x8xbf16> to vector<8x8xbf16>
    %cst_262 = arith.constant dense<0.000000e+00> : vector<80x8xf32>
    %313 = tpu.matmul %310, %312, %cst_262 {dimension_numbers = #tpu.dot_dimension_numbers<[1], [0], [0], [1], [0, 0, 1, 1], [], []>} : vector<80x8xbf16>, vector<8x8xbf16>, vector<80x8xf32> -> vector<80x8xf32>
    %314 = arith.addf %308, %313 : vector<80x8xf32>
    %c0_263 = arith.constant 0 : index
    %c0_264 = arith.constant 0 : index
    %315 = vector.load %arg11[%c0_263, %c0_264] : memref<1x8xf32, #tpu.memory_space<vmem>>, vector<1x8xf32>
    %316 = vector.broadcast %315 : vector<1x8xf32> to vector<80x8xf32>
    %317 = arith.mulf %314, %316 : vector<80x8xf32>
    %c0_265 = arith.constant 0 : index
    %c0_266 = arith.constant 0 : index
    %318 = vector.load %arg12[%c0_265, %c0_266] : memref<1x8xf32, #tpu.memory_space<vmem>>, vector<1x8xf32>
    %319 = vector.broadcast %318 : vector<1x8xf32> to vector<80x8xf32>
    %320 = arith.addf %317, %319 : vector<80x8xf32>
    %cst_267 = arith.constant 0.000000e+00 : f32
    %321 = vector.broadcast %cst_267 : f32 to vector<80x8xf32>
    %322 = arith.maximumf %320, %321 : vector<80x8xf32>
    %323 = vector.extract_strided_slice %322 {offsets = [0, 0], sizes = [8, 8], strides = [1, 1]} : vector<80x8xf32> to vector<8x8xf32>
    %c11_268 = arith.constant 11 : index
    %c0_269 = arith.constant 0 : index
    %324 = vector.load %arg17[%c11_268, %c0_269] : memref<102x8xf32, #tpu.memory_space<vmem>>, vector<8x8xf32>
    tpu.vector_store %arg17[%c11_268, %c0_269], %323 {strides = array<i32>} : memref<102x8xf32, #tpu.memory_space<vmem>>, vector<8x8xf32>,
    %325 = vector.extract_strided_slice %322 {offsets = [10, 0], sizes = [8, 8], strides = [1, 1]} : vector<80x8xf32> to vector<8x8xf32>
    %c21_270 = arith.constant 21 : index
    %c0_271 = arith.constant 0 : index
    %326 = vector.load %arg17[%c21_270, %c0_271] : memref<102x8xf32, #tpu.memory_space<vmem>>, vector<8x8xf32>
    tpu.vector_store %arg17[%c21_270, %c0_271], %325 {strides = array<i32>} : memref<102x8xf32, #tpu.memory_space<vmem>>, vector<8x8xf32>,
    %327 = vector.extract_strided_slice %322 {offsets = [20, 0], sizes = [8, 8], strides = [1, 1]} : vector<80x8xf32> to vector<8x8xf32>
    %c31_272 = arith.constant 31 : index
    %c0_273 = arith.constant 0 : index
    %328 = vector.load %arg17[%c31_272, %c0_273] : memref<102x8xf32, #tpu.memory_space<vmem>>, vector<8x8xf32>
    tpu.vector_store %arg17[%c31_272, %c0_273], %327 {strides = array<i32>} : memref<102x8xf32, #tpu.memory_space<vmem>>, vector<8x8xf32>,
    %329 = vector.extract_strided_slice %322 {offsets = [30, 0], sizes = [8, 8], strides = [1, 1]} : vector<80x8xf32> to vector<8x8xf32>
    %c41_274 = arith.constant 41 : index
    %c0_275 = arith.constant 0 : index
    %330 = vector.load %arg17[%c41_274, %c0_275] : memref<102x8xf32, #tpu.memory_space<vmem>>, vector<8x8xf32>
    tpu.vector_store %arg17[%c41_274, %c0_275], %329 {strides = array<i32>} : memref<102x8xf32, #tpu.memory_space<vmem>>, vector<8x8xf32>,
    %331 = vector.extract_strided_slice %322 {offsets = [40, 0], sizes = [8, 8], strides = [1, 1]} : vector<80x8xf32> to vector<8x8xf32>
    %c51_276 = arith.constant 51 : index
    %c0_277 = arith.constant 0 : index
    %332 = vector.load %arg17[%c51_276, %c0_277] : memref<102x8xf32, #tpu.memory_space<vmem>>, vector<8x8xf32>
    tpu.vector_store %arg17[%c51_276, %c0_277], %331 {strides = array<i32>} : memref<102x8xf32, #tpu.memory_space<vmem>>, vector<8x8xf32>,
    %333 = vector.extract_strided_slice %322 {offsets = [50, 0], sizes = [8, 8], strides = [1, 1]} : vector<80x8xf32> to vector<8x8xf32>
    %c61_278 = arith.constant 61 : index
    %c0_279 = arith.constant 0 : index
    %334 = vector.load %arg17[%c61_278, %c0_279] : memref<102x8xf32, #tpu.memory_space<vmem>>, vector<8x8xf32>
    tpu.vector_store %arg17[%c61_278, %c0_279], %333 {strides = array<i32>} : memref<102x8xf32, #tpu.memory_space<vmem>>, vector<8x8xf32>,
    %335 = vector.extract_strided_slice %322 {offsets = [60, 0], sizes = [8, 8], strides = [1, 1]} : vector<80x8xf32> to vector<8x8xf32>
    %c71_280 = arith.constant 71 : index
    %c0_281 = arith.constant 0 : index
    %336 = vector.load %arg17[%c71_280, %c0_281] : memref<102x8xf32, #tpu.memory_space<vmem>>, vector<8x8xf32>
    tpu.vector_store %arg17[%c71_280, %c0_281], %335 {strides = array<i32>} : memref<102x8xf32, #tpu.memory_space<vmem>>, vector<8x8xf32>,
    %337 = vector.extract_strided_slice %322 {offsets = [70, 0], sizes = [8, 8], strides = [1, 1]} : vector<80x8xf32> to vector<8x8xf32>
    %c81_282 = arith.constant 81 : index
    %c0_283 = arith.constant 0 : index
    %338 = vector.load %arg17[%c81_282, %c0_283] : memref<102x8xf32, #tpu.memory_space<vmem>>, vector<8x8xf32>
    tpu.vector_store %arg17[%c81_282, %c0_283], %337 {strides = array<i32>} : memref<102x8xf32, #tpu.memory_space<vmem>>, vector<8x8xf32>,
    %c0_284 = arith.constant 0 : index
    %c0_285 = arith.constant 0 : index
    %339 = vector.load %arg17[%c0_284, %c0_285] : memref<102x8xf32, #tpu.memory_space<vmem>>, vector<80x8xf32>
    %340 = arith.truncf %339 : vector<80x8xf32> to vector<80x8xbf16>
    %c0_286 = arith.constant 0 : index
    %c0_287 = arith.constant 0 : index
    %c0_288 = arith.constant 0 : index
    %341 = vector.load %arg13[%c0_286, %c0_287, %c0_288] : memref<9x8x8xbf16, #tpu.memory_space<vmem>>, vector<1x8x8xbf16>
    %342 = vector.shape_cast %341 : vector<1x8x8xbf16> to vector<8x8xbf16>
    %cst_289 = arith.constant dense<0.000000e+00> : vector<80x8xf32>
    %343 = tpu.matmul %340, %342, %cst_289 {dimension_numbers = #tpu.dot_dimension_numbers<[1], [0], [0], [1], [0, 0, 1, 1], [], []>} : vector<80x8xbf16>, vector<8x8xbf16>, vector<80x8xf32> -> vector<80x8xf32>
    %c1_290 = arith.constant 1 : index
    %c0_291 = arith.constant 0 : index
    %344 = vector.load %arg17[%c1_290, %c0_291] : memref<102x8xf32, #tpu.memory_space<vmem>>, vector<80x8xf32>
    %345 = arith.truncf %344 : vector<80x8xf32> to vector<80x8xbf16>
    %c1_292 = arith.constant 1 : index
    %c0_293 = arith.constant 0 : index
    %c0_294 = arith.constant 0 : index
    %346 = vector.load %arg13[%c1_292, %c0_293, %c0_294] : memref<9x8x8xbf16, #tpu.memory_space<vmem>>, vector<1x8x8xbf16>
    %347 = vector.shape_cast %346 : vector<1x8x8xbf16> to vector<8x8xbf16>
    %cst_295 = arith.constant dense<0.000000e+00> : vector<80x8xf32>
    %348 = tpu.matmul %345, %347, %cst_295 {dimension_numbers = #tpu.dot_dimension_numbers<[1], [0], [0], [1], [0, 0, 1, 1], [], []>} : vector<80x8xbf16>, vector<8x8xbf16>, vector<80x8xf32> -> vector<80x8xf32>
    %349 = arith.addf %343, %348 : vector<80x8xf32>
    %c2_296 = arith.constant 2 : index
    %c0_297 = arith.constant 0 : index
    %350 = vector.load %arg17[%c2_296, %c0_297] : memref<102x8xf32, #tpu.memory_space<vmem>>, vector<80x8xf32>
    %351 = arith.truncf %350 : vector<80x8xf32> to vector<80x8xbf16>
    %c2_298 = arith.constant 2 : index
    %c0_299 = arith.constant 0 : index
    %c0_300 = arith.constant 0 : index
    %352 = vector.load %arg13[%c2_298, %c0_299, %c0_300] : memref<9x8x8xbf16, #tpu.memory_space<vmem>>, vector<1x8x8xbf16>
    %353 = vector.shape_cast %352 : vector<1x8x8xbf16> to vector<8x8xbf16>
    %cst_301 = arith.constant dense<0.000000e+00> : vector<80x8xf32>
    %354 = tpu.matmul %351, %353, %cst_301 {dimension_numbers = #tpu.dot_dimension_numbers<[1], [0], [0], [1], [0, 0, 1, 1], [], []>} : vector<80x8xbf16>, vector<8x8xbf16>, vector<80x8xf32> -> vector<80x8xf32>
    %355 = arith.addf %349, %354 : vector<80x8xf32>
    %c10_302 = arith.constant 10 : index
    %c0_303 = arith.constant 0 : index
    %356 = vector.load %arg17[%c10_302, %c0_303] : memref<102x8xf32, #tpu.memory_space<vmem>>, vector<80x8xf32>
    %357 = arith.truncf %356 : vector<80x8xf32> to vector<80x8xbf16>
    %c3_304 = arith.constant 3 : index
    %c0_305 = arith.constant 0 : index
    %c0_306 = arith.constant 0 : index
    %358 = vector.load %arg13[%c3_304, %c0_305, %c0_306] : memref<9x8x8xbf16, #tpu.memory_space<vmem>>, vector<1x8x8xbf16>
    %359 = vector.shape_cast %358 : vector<1x8x8xbf16> to vector<8x8xbf16>
    %cst_307 = arith.constant dense<0.000000e+00> : vector<80x8xf32>
    %360 = tpu.matmul %357, %359, %cst_307 {dimension_numbers = #tpu.dot_dimension_numbers<[1], [0], [0], [1], [0, 0, 1, 1], [], []>} : vector<80x8xbf16>, vector<8x8xbf16>, vector<80x8xf32> -> vector<80x8xf32>
    %361 = arith.addf %355, %360 : vector<80x8xf32>
    %c11_308 = arith.constant 11 : index
    %c0_309 = arith.constant 0 : index
    %362 = vector.load %arg17[%c11_308, %c0_309] : memref<102x8xf32, #tpu.memory_space<vmem>>, vector<80x8xf32>
    %363 = arith.truncf %362 : vector<80x8xf32> to vector<80x8xbf16>
    %c4_310 = arith.constant 4 : index
    %c0_311 = arith.constant 0 : index
    %c0_312 = arith.constant 0 : index
    %364 = vector.load %arg13[%c4_310, %c0_311, %c0_312] : memref<9x8x8xbf16, #tpu.memory_space<vmem>>, vector<1x8x8xbf16>
    %365 = vector.shape_cast %364 : vector<1x8x8xbf16> to vector<8x8xbf16>
    %cst_313 = arith.constant dense<0.000000e+00> : vector<80x8xf32>
    %366 = tpu.matmul %363, %365, %cst_313 {dimension_numbers = #tpu.dot_dimension_numbers<[1], [0], [0], [1], [0, 0, 1, 1], [], []>} : vector<80x8xbf16>, vector<8x8xbf16>, vector<80x8xf32> -> vector<80x8xf32>
    %367 = arith.addf %361, %366 : vector<80x8xf32>
    %c12_314 = arith.constant 12 : index
    %c0_315 = arith.constant 0 : index
    %368 = vector.load %arg17[%c12_314, %c0_315] : memref<102x8xf32, #tpu.memory_space<vmem>>, vector<80x8xf32>
    %369 = arith.truncf %368 : vector<80x8xf32> to vector<80x8xbf16>
    %c5_316 = arith.constant 5 : index
    %c0_317 = arith.constant 0 : index
    %c0_318 = arith.constant 0 : index
    %370 = vector.load %arg13[%c5_316, %c0_317, %c0_318] : memref<9x8x8xbf16, #tpu.memory_space<vmem>>, vector<1x8x8xbf16>
    %371 = vector.shape_cast %370 : vector<1x8x8xbf16> to vector<8x8xbf16>
    %cst_319 = arith.constant dense<0.000000e+00> : vector<80x8xf32>
    %372 = tpu.matmul %369, %371, %cst_319 {dimension_numbers = #tpu.dot_dimension_numbers<[1], [0], [0], [1], [0, 0, 1, 1], [], []>} : vector<80x8xbf16>, vector<8x8xbf16>, vector<80x8xf32> -> vector<80x8xf32>
    %373 = arith.addf %367, %372 : vector<80x8xf32>
    %c20_320 = arith.constant 20 : index
    %c0_321 = arith.constant 0 : index
    %374 = vector.load %arg17[%c20_320, %c0_321] : memref<102x8xf32, #tpu.memory_space<vmem>>, vector<80x8xf32>
    %375 = arith.truncf %374 : vector<80x8xf32> to vector<80x8xbf16>
    %c6_322 = arith.constant 6 : index
    %c0_323 = arith.constant 0 : index
    %c0_324 = arith.constant 0 : index
    %376 = vector.load %arg13[%c6_322, %c0_323, %c0_324] : memref<9x8x8xbf16, #tpu.memory_space<vmem>>, vector<1x8x8xbf16>
    %377 = vector.shape_cast %376 : vector<1x8x8xbf16> to vector<8x8xbf16>
    %cst_325 = arith.constant dense<0.000000e+00> : vector<80x8xf32>
    %378 = tpu.matmul %375, %377, %cst_325 {dimension_numbers = #tpu.dot_dimension_numbers<[1], [0], [0], [1], [0, 0, 1, 1], [], []>} : vector<80x8xbf16>, vector<8x8xbf16>, vector<80x8xf32> -> vector<80x8xf32>
    %379 = arith.addf %373, %378 : vector<80x8xf32>
    %c21_326 = arith.constant 21 : index
    %c0_327 = arith.constant 0 : index
    %380 = vector.load %arg17[%c21_326, %c0_327] : memref<102x8xf32, #tpu.memory_space<vmem>>, vector<80x8xf32>
    %381 = arith.truncf %380 : vector<80x8xf32> to vector<80x8xbf16>
    %c7_328 = arith.constant 7 : index
    %c0_329 = arith.constant 0 : index
    %c0_330 = arith.constant 0 : index
    %382 = vector.load %arg13[%c7_328, %c0_329, %c0_330] : memref<9x8x8xbf16, #tpu.memory_space<vmem>>, vector<1x8x8xbf16>
    %383 = vector.shape_cast %382 : vector<1x8x8xbf16> to vector<8x8xbf16>
    %cst_331 = arith.constant dense<0.000000e+00> : vector<80x8xf32>
    %384 = tpu.matmul %381, %383, %cst_331 {dimension_numbers = #tpu.dot_dimension_numbers<[1], [0], [0], [1], [0, 0, 1, 1], [], []>} : vector<80x8xbf16>, vector<8x8xbf16>, vector<80x8xf32> -> vector<80x8xf32>
    %385 = arith.addf %379, %384 : vector<80x8xf32>
    %c22_332 = arith.constant 22 : index
    %c0_333 = arith.constant 0 : index
    %386 = vector.load %arg17[%c22_332, %c0_333] : memref<102x8xf32, #tpu.memory_space<vmem>>, vector<80x8xf32>
    %387 = arith.truncf %386 : vector<80x8xf32> to vector<80x8xbf16>
    %c8_334 = arith.constant 8 : index
    %c0_335 = arith.constant 0 : index
    %c0_336 = arith.constant 0 : index
    %388 = vector.load %arg13[%c8_334, %c0_335, %c0_336] : memref<9x8x8xbf16, #tpu.memory_space<vmem>>, vector<1x8x8xbf16>
    %389 = vector.shape_cast %388 : vector<1x8x8xbf16> to vector<8x8xbf16>
    %cst_337 = arith.constant dense<0.000000e+00> : vector<80x8xf32>
    %390 = tpu.matmul %387, %389, %cst_337 {dimension_numbers = #tpu.dot_dimension_numbers<[1], [0], [0], [1], [0, 0, 1, 1], [], []>} : vector<80x8xbf16>, vector<8x8xbf16>, vector<80x8xf32> -> vector<80x8xf32>
    %391 = arith.addf %385, %390 : vector<80x8xf32>
    %c0_338 = arith.constant 0 : index
    %c0_339 = arith.constant 0 : index
    %392 = vector.load %arg14[%c0_338, %c0_339] : memref<1x8xf32, #tpu.memory_space<vmem>>, vector<1x8xf32>
    %393 = vector.broadcast %392 : vector<1x8xf32> to vector<80x8xf32>
    %394 = arith.mulf %391, %393 : vector<80x8xf32>
    %c0_340 = arith.constant 0 : index
    %c0_341 = arith.constant 0 : index
    %395 = vector.load %arg15[%c0_340, %c0_341] : memref<1x8xf32, #tpu.memory_space<vmem>>, vector<1x8xf32>
    %396 = vector.broadcast %395 : vector<1x8xf32> to vector<80x8xf32>
    %397 = arith.addf %394, %396 : vector<80x8xf32>
    %c11_342 = arith.constant 11 : index
    %c0_343 = arith.constant 0 : index
    %398 = vector.load %arg18[%c11_342, %c0_343] : memref<102x8xf32, #tpu.memory_space<vmem>>, vector<8x8xf32>
    %399 = vector.extract_strided_slice %397 {offsets = [0, 0], sizes = [8, 8], strides = [1, 1]} : vector<80x8xf32> to vector<8x8xf32>
    %400 = arith.addf %399, %398 : vector<8x8xf32>
    %cst_344 = arith.constant 0.000000e+00 : f32
    %401 = vector.broadcast %cst_344 : f32 to vector<8x8xf32>
    %402 = arith.maximumf %400, %401 : vector<8x8xf32>
    %c0_345 = arith.constant 0 : index
    %c0_346 = arith.constant 0 : index
    %c0_347 = arith.constant 0 : index
    %c0_348 = arith.constant 0 : index
    %403 = vector.load %arg16[%c0_345, %c0_346, %c0_347, %c0_348] : memref<1x8x8x8xf32, #tpu.memory_space<vmem>>, vector<1x1x8x8xf32>
    %404 = vector.shape_cast %403 : vector<1x1x8x8xf32> to vector<8x8xf32>
    %405 = vector.shape_cast %402 : vector<8x8xf32> to vector<1x1x8x8xf32>
    tpu.vector_store %arg16[%c0_345, %c0_346, %c0_347, %c0_348], %405 {strides = array<i32>} : memref<1x8x8x8xf32, #tpu.memory_space<vmem>>, vector<1x1x8x8xf32>,
    %c21_349 = arith.constant 21 : index
    %c0_350 = arith.constant 0 : index
    %406 = vector.load %arg18[%c21_349, %c0_350] : memref<102x8xf32, #tpu.memory_space<vmem>>, vector<8x8xf32>
    %407 = vector.extract_strided_slice %397 {offsets = [10, 0], sizes = [8, 8], strides = [1, 1]} : vector<80x8xf32> to vector<8x8xf32>
    %408 = arith.addf %407, %406 : vector<8x8xf32>
    %cst_351 = arith.constant 0.000000e+00 : f32
    %409 = vector.broadcast %cst_351 : f32 to vector<8x8xf32>
    %410 = arith.maximumf %408, %409 : vector<8x8xf32>
    %c0_352 = arith.constant 0 : index
    %c1_353 = arith.constant 1 : index
    %c0_354 = arith.constant 0 : index
    %c0_355 = arith.constant 0 : index
    %411 = vector.load %arg16[%c0_352, %c1_353, %c0_354, %c0_355] : memref<1x8x8x8xf32, #tpu.memory_space<vmem>>, vector<1x1x8x8xf32>
    %412 = vector.shape_cast %411 : vector<1x1x8x8xf32> to vector<8x8xf32>
    %413 = vector.shape_cast %410 : vector<8x8xf32> to vector<1x1x8x8xf32>
    tpu.vector_store %arg16[%c0_352, %c1_353, %c0_354, %c0_355], %413 {strides = array<i32>} : memref<1x8x8x8xf32, #tpu.memory_space<vmem>>, vector<1x1x8x8xf32>,
    %c31_356 = arith.constant 31 : index
    %c0_357 = arith.constant 0 : index
    %414 = vector.load %arg18[%c31_356, %c0_357] : memref<102x8xf32, #tpu.memory_space<vmem>>, vector<8x8xf32>
    %415 = vector.extract_strided_slice %397 {offsets = [20, 0], sizes = [8, 8], strides = [1, 1]} : vector<80x8xf32> to vector<8x8xf32>
    %416 = arith.addf %415, %414 : vector<8x8xf32>
    %cst_358 = arith.constant 0.000000e+00 : f32
    %417 = vector.broadcast %cst_358 : f32 to vector<8x8xf32>
    %418 = arith.maximumf %416, %417 : vector<8x8xf32>
    %c0_359 = arith.constant 0 : index
    %c2_360 = arith.constant 2 : index
    %c0_361 = arith.constant 0 : index
    %c0_362 = arith.constant 0 : index
    %419 = vector.load %arg16[%c0_359, %c2_360, %c0_361, %c0_362] : memref<1x8x8x8xf32, #tpu.memory_space<vmem>>, vector<1x1x8x8xf32>
    %420 = vector.shape_cast %419 : vector<1x1x8x8xf32> to vector<8x8xf32>
    %421 = vector.shape_cast %418 : vector<8x8xf32> to vector<1x1x8x8xf32>
    tpu.vector_store %arg16[%c0_359, %c2_360, %c0_361, %c0_362], %421 {strides = array<i32>} : memref<1x8x8x8xf32, #tpu.memory_space<vmem>>, vector<1x1x8x8xf32>,
    %c41_363 = arith.constant 41 : index
    %c0_364 = arith.constant 0 : index
    %422 = vector.load %arg18[%c41_363, %c0_364] : memref<102x8xf32, #tpu.memory_space<vmem>>, vector<8x8xf32>
    %423 = vector.extract_strided_slice %397 {offsets = [30, 0], sizes = [8, 8], strides = [1, 1]} : vector<80x8xf32> to vector<8x8xf32>
    %424 = arith.addf %423, %422 : vector<8x8xf32>
    %cst_365 = arith.constant 0.000000e+00 : f32
    %425 = vector.broadcast %cst_365 : f32 to vector<8x8xf32>
    %426 = arith.maximumf %424, %425 : vector<8x8xf32>
    %c0_366 = arith.constant 0 : index
    %c3_367 = arith.constant 3 : index
    %c0_368 = arith.constant 0 : index
    %c0_369 = arith.constant 0 : index
    %427 = vector.load %arg16[%c0_366, %c3_367, %c0_368, %c0_369] : memref<1x8x8x8xf32, #tpu.memory_space<vmem>>, vector<1x1x8x8xf32>
    %428 = vector.shape_cast %427 : vector<1x1x8x8xf32> to vector<8x8xf32>
    %429 = vector.shape_cast %426 : vector<8x8xf32> to vector<1x1x8x8xf32>
    tpu.vector_store %arg16[%c0_366, %c3_367, %c0_368, %c0_369], %429 {strides = array<i32>} : memref<1x8x8x8xf32, #tpu.memory_space<vmem>>, vector<1x1x8x8xf32>,
    %c51_370 = arith.constant 51 : index
    %c0_371 = arith.constant 0 : index
    %430 = vector.load %arg18[%c51_370, %c0_371] : memref<102x8xf32, #tpu.memory_space<vmem>>, vector<8x8xf32>
    %431 = vector.extract_strided_slice %397 {offsets = [40, 0], sizes = [8, 8], strides = [1, 1]} : vector<80x8xf32> to vector<8x8xf32>
    %432 = arith.addf %431, %430 : vector<8x8xf32>
    %cst_372 = arith.constant 0.000000e+00 : f32
    %433 = vector.broadcast %cst_372 : f32 to vector<8x8xf32>
    %434 = arith.maximumf %432, %433 : vector<8x8xf32>
    %c0_373 = arith.constant 0 : index
    %c4_374 = arith.constant 4 : index
    %c0_375 = arith.constant 0 : index
    %c0_376 = arith.constant 0 : index
    %435 = vector.load %arg16[%c0_373, %c4_374, %c0_375, %c0_376] : memref<1x8x8x8xf32, #tpu.memory_space<vmem>>, vector<1x1x8x8xf32>
    %436 = vector.shape_cast %435 : vector<1x1x8x8xf32> to vector<8x8xf32>
    %437 = vector.shape_cast %434 : vector<8x8xf32> to vector<1x1x8x8xf32>
    tpu.vector_store %arg16[%c0_373, %c4_374, %c0_375, %c0_376], %437 {strides = array<i32>} : memref<1x8x8x8xf32, #tpu.memory_space<vmem>>, vector<1x1x8x8xf32>,
    %c61_377 = arith.constant 61 : index
    %c0_378 = arith.constant 0 : index
    %438 = vector.load %arg18[%c61_377, %c0_378] : memref<102x8xf32, #tpu.memory_space<vmem>>, vector<8x8xf32>
    %439 = vector.extract_strided_slice %397 {offsets = [50, 0], sizes = [8, 8], strides = [1, 1]} : vector<80x8xf32> to vector<8x8xf32>
    %440 = arith.addf %439, %438 : vector<8x8xf32>
    %cst_379 = arith.constant 0.000000e+00 : f32
    %441 = vector.broadcast %cst_379 : f32 to vector<8x8xf32>
    %442 = arith.maximumf %440, %441 : vector<8x8xf32>
    %c0_380 = arith.constant 0 : index
    %c5_381 = arith.constant 5 : index
    %c0_382 = arith.constant 0 : index
    %c0_383 = arith.constant 0 : index
    %443 = vector.load %arg16[%c0_380, %c5_381, %c0_382, %c0_383] : memref<1x8x8x8xf32, #tpu.memory_space<vmem>>, vector<1x1x8x8xf32>
    %444 = vector.shape_cast %443 : vector<1x1x8x8xf32> to vector<8x8xf32>
    %445 = vector.shape_cast %442 : vector<8x8xf32> to vector<1x1x8x8xf32>
    tpu.vector_store %arg16[%c0_380, %c5_381, %c0_382, %c0_383], %445 {strides = array<i32>} : memref<1x8x8x8xf32, #tpu.memory_space<vmem>>, vector<1x1x8x8xf32>,
    %c71_384 = arith.constant 71 : index
    %c0_385 = arith.constant 0 : index
    %446 = vector.load %arg18[%c71_384, %c0_385] : memref<102x8xf32, #tpu.memory_space<vmem>>, vector<8x8xf32>
    %447 = vector.extract_strided_slice %397 {offsets = [60, 0], sizes = [8, 8], strides = [1, 1]} : vector<80x8xf32> to vector<8x8xf32>
    %448 = arith.addf %447, %446 : vector<8x8xf32>
    %cst_386 = arith.constant 0.000000e+00 : f32
    %449 = vector.broadcast %cst_386 : f32 to vector<8x8xf32>
    %450 = arith.maximumf %448, %449 : vector<8x8xf32>
    %c0_387 = arith.constant 0 : index
    %c6_388 = arith.constant 6 : index
    %c0_389 = arith.constant 0 : index
    %c0_390 = arith.constant 0 : index
    %451 = vector.load %arg16[%c0_387, %c6_388, %c0_389, %c0_390] : memref<1x8x8x8xf32, #tpu.memory_space<vmem>>, vector<1x1x8x8xf32>
    %452 = vector.shape_cast %451 : vector<1x1x8x8xf32> to vector<8x8xf32>
    %453 = vector.shape_cast %450 : vector<8x8xf32> to vector<1x1x8x8xf32>
    tpu.vector_store %arg16[%c0_387, %c6_388, %c0_389, %c0_390], %453 {strides = array<i32>} : memref<1x8x8x8xf32, #tpu.memory_space<vmem>>, vector<1x1x8x8xf32>,
    %c81_391 = arith.constant 81 : index
    %c0_392 = arith.constant 0 : index
    %454 = vector.load %arg18[%c81_391, %c0_392] : memref<102x8xf32, #tpu.memory_space<vmem>>, vector<8x8xf32>
    %455 = vector.extract_strided_slice %397 {offsets = [70, 0], sizes = [8, 8], strides = [1, 1]} : vector<80x8xf32> to vector<8x8xf32>
    %456 = arith.addf %455, %454 : vector<8x8xf32>
    %cst_393 = arith.constant 0.000000e+00 : f32
    %457 = vector.broadcast %cst_393 : f32 to vector<8x8xf32>
    %458 = arith.maximumf %456, %457 : vector<8x8xf32>
    %c0_394 = arith.constant 0 : index
    %c7_395 = arith.constant 7 : index
    %c0_396 = arith.constant 0 : index
    %c0_397 = arith.constant 0 : index
    %459 = vector.load %arg16[%c0_394, %c7_395, %c0_396, %c0_397] : memref<1x8x8x8xf32, #tpu.memory_space<vmem>>, vector<1x1x8x8xf32>
    %460 = vector.shape_cast %459 : vector<1x1x8x8xf32> to vector<8x8xf32>
    %461 = vector.shape_cast %458 : vector<8x8xf32> to vector<1x1x8x8xf32>
    tpu.vector_store %arg16[%c0_394, %c7_395, %c0_396, %c0_397], %461 {strides = array<i32>} : memref<1x8x8x8xf32, #tpu.memory_space<vmem>>, vector<1x1x8x8xf32>,
    return
  }
  func.func @transform_0(%arg0: i32) -> (i32, i32, i32) {
    %c0_i32 = arith.constant 0 : i32
    %c0_i32_0 = arith.constant 0 : i32
    %c0_i32_1 = arith.constant 0 : i32
    return %arg0, %c0_i32, %c0_i32_0 : i32, i32, i32
  }
  func.func @transform_1(%arg0: i32) -> (i32, i32, i32) {
    %c0_i32 = arith.constant 0 : i32
    %c0_i32_0 = arith.constant 0 : i32
    %c0_i32_1 = arith.constant 0 : i32
    %c0_i32_2 = arith.constant 0 : i32
    return %c0_i32, %c0_i32_0, %c0_i32_1 : i32, i32, i32
  }
  func.func @transform_2(%arg0: i32) -> (i32, i32) {
    %c0_i32 = arith.constant 0 : i32
    %c0_i32_0 = arith.constant 0 : i32
    %c0_i32_1 = arith.constant 0 : i32
    return %c0_i32, %c0_i32_0 : i32, i32
  }
  func.func @transform_3(%arg0: i32) -> (i32, i32) {
    %c0_i32 = arith.constant 0 : i32
    %c0_i32_0 = arith.constant 0 : i32
    %c0_i32_1 = arith.constant 0 : i32
    return %c0_i32, %c0_i32_0 : i32, i32
  }
  func.func @transform_4(%arg0: i32) -> (i32, i32, i32) {
    %c0_i32 = arith.constant 0 : i32
    %c0_i32_0 = arith.constant 0 : i32
    %c0_i32_1 = arith.constant 0 : i32
    %c0_i32_2 = arith.constant 0 : i32
    return %c0_i32, %c0_i32_0, %c0_i32_1 : i32, i32, i32
  }
  func.func @transform_5(%arg0: i32) -> (i32, i32) {
    %c0_i32 = arith.constant 0 : i32
    %c0_i32_0 = arith.constant 0 : i32
    %c0_i32_1 = arith.constant 0 : i32
    return %c0_i32, %c0_i32_0 : i32, i32
  }
  func.func @transform_6(%arg0: i32) -> (i32, i32, i32) {
    %c0_i32 = arith.constant 0 : i32
    %c0_i32_0 = arith.constant 0 : i32
    %c0_i32_1 = arith.constant 0 : i32
    %c0_i32_2 = arith.constant 0 : i32
    return %c0_i32, %c0_i32_0, %c0_i32_1 : i32, i32, i32
  }
  func.func @transform_7(%arg0: i32) -> (i32, i32) {
    %c0_i32 = arith.constant 0 : i32
    %c0_i32_0 = arith.constant 0 : i32
    %c0_i32_1 = arith.constant 0 : i32
    return %c0_i32, %c0_i32_0 : i32, i32
  }
  func.func @transform_8(%arg0: i32) -> (i32, i32) {
    %c0_i32 = arith.constant 0 : i32
    %c0_i32_0 = arith.constant 0 : i32
    %c0_i32_1 = arith.constant 0 : i32
    return %c0_i32, %c0_i32_0 : i32, i32
  }
  func.func @transform_9(%arg0: i32) -> (i32, i32, i32) {
    %c0_i32 = arith.constant 0 : i32
    %c0_i32_0 = arith.constant 0 : i32
    %c0_i32_1 = arith.constant 0 : i32
    %c0_i32_2 = arith.constant 0 : i32
    return %c0_i32, %c0_i32_0, %c0_i32_1 : i32, i32, i32
  }
  func.func @transform_10(%arg0: i32) -> (i32, i32) {
    %c0_i32 = arith.constant 0 : i32
    %c0_i32_0 = arith.constant 0 : i32
    %c0_i32_1 = arith.constant 0 : i32
    return %c0_i32, %c0_i32_0 : i32, i32
  }
  func.func @transform_11(%arg0: i32) -> (i32, i32) {
    %c0_i32 = arith.constant 0 : i32
    %c0_i32_0 = arith.constant 0 : i32
    %c0_i32_1 = arith.constant 0 : i32
    return %c0_i32, %c0_i32_0 : i32, i32
  }
  func.func @transform_12(%arg0: i32) -> (i32, i32, i32) {
    %c0_i32 = arith.constant 0 : i32
    %c0_i32_0 = arith.constant 0 : i32
    %c0_i32_1 = arith.constant 0 : i32
    %c0_i32_2 = arith.constant 0 : i32
    return %c0_i32, %c0_i32_0, %c0_i32_1 : i32, i32, i32
  }
  func.func @transform_13(%arg0: i32) -> (i32, i32) {
    %c0_i32 = arith.constant 0 : i32
    %c0_i32_0 = arith.constant 0 : i32
    %c0_i32_1 = arith.constant 0 : i32
    return %c0_i32, %c0_i32_0 : i32, i32
  }
  func.func @transform_14(%arg0: i32) -> (i32, i32) {
    %c0_i32 = arith.constant 0 : i32
    %c0_i32_0 = arith.constant 0 : i32
    %c0_i32_1 = arith.constant 0 : i32
    return %c0_i32, %c0_i32_0 : i32, i32
  }
  func.func @transform_15(%arg0: i32) -> (i32, i32, i32, i32) {
    %c0_i32 = arith.constant 0 : i32
    %c0_i32_0 = arith.constant 0 : i32
    %c0_i32_1 = arith.constant 0 : i32
    %c0_i32_2 = arith.constant 0 : i32
    return %arg0, %c0_i32, %c0_i32_0, %c0_i32_1 : i32, i32, i32, i32
  }
}

module attributes {stable_mosaic.version = 11 : i64} {
  func.func @kernel(%arg0: i32, %arg1: memref<1x108x8xf32, #tpu.memory_space<vmem>>, %arg2: memref<9x8x16xbf16, #tpu.memory_space<vmem>>, %arg3: memref<1x16xf32, #tpu.memory_space<vmem>>, %arg4: memref<1x16xf32, #tpu.memory_space<vmem>>, %arg5: memref<9x8x16xbf16, #tpu.memory_space<vmem>>, %arg6: memref<1x16xf32, #tpu.memory_space<vmem>>, %arg7: memref<9x16x16xbf16, #tpu.memory_space<vmem>>, %arg8: memref<1x16xf32, #tpu.memory_space<vmem>>, %arg9: memref<1x16xf32, #tpu.memory_space<vmem>>, %arg10: memref<9x16x16xbf16, #tpu.memory_space<vmem>>, %arg11: memref<1x16xf32, #tpu.memory_space<vmem>>, %arg12: memref<1x16xf32, #tpu.memory_space<vmem>>, %arg13: memref<9x16x16xbf16, #tpu.memory_space<vmem>>, %arg14: memref<1x16xf32, #tpu.memory_space<vmem>>, %arg15: memref<1x16xf32, #tpu.memory_space<vmem>>, %arg16: memref<1x4x4x16xf32, #tpu.memory_space<vmem>>, %arg17: memref<38x16xf32, #tpu.memory_space<vmem>>, %arg18: memref<38x16xf32, #tpu.memory_space<vmem>>) attributes {dimension_semantics = [#tpu.dimension_semantics<parallel>], iteration_bounds = array<i64: 2>, scalar_prefetch = 0 : i64, scratch_operands = 2 : i64, tpu.core_type = #tpu.core_type<tc>, window_params = [{transform_indices = @transform_0, window_bounds = array<i64: 1, 108, 8>}, {pipeline_mode = #tpu.pipeline_mode<synchronous>, transform_indices = @transform_1, window_bounds = array<i64: 9, 8, 16>}, {pipeline_mode = #tpu.pipeline_mode<synchronous>, transform_indices = @transform_2, window_bounds = array<i64: 1, 16>}, {pipeline_mode = #tpu.pipeline_mode<synchronous>, transform_indices = @transform_3, window_bounds = array<i64: 1, 16>}, {pipeline_mode = #tpu.pipeline_mode<synchronous>, transform_indices = @transform_4, window_bounds = array<i64: 9, 8, 16>}, {pipeline_mode = #tpu.pipeline_mode<synchronous>, transform_indices = @transform_5, window_bounds = array<i64: 1, 16>}, {pipeline_mode = #tpu.pipeline_mode<synchronous>, transform_indices = @transform_6, window_bounds = array<i64: 9, 16, 16>}, {pipeline_mode = #tpu.pipeline_mode<synchronous>, transform_indices = @transform_7, window_bounds = array<i64: 1, 16>}, {pipeline_mode = #tpu.pipeline_mode<synchronous>, transform_indices = @transform_8, window_bounds = array<i64: 1, 16>}, {pipeline_mode = #tpu.pipeline_mode<synchronous>, transform_indices = @transform_9, window_bounds = array<i64: 9, 16, 16>}, {pipeline_mode = #tpu.pipeline_mode<synchronous>, transform_indices = @transform_10, window_bounds = array<i64: 1, 16>}, {pipeline_mode = #tpu.pipeline_mode<synchronous>, transform_indices = @transform_11, window_bounds = array<i64: 1, 16>}, {pipeline_mode = #tpu.pipeline_mode<synchronous>, transform_indices = @transform_12, window_bounds = array<i64: 9, 16, 16>}, {pipeline_mode = #tpu.pipeline_mode<synchronous>, transform_indices = @transform_13, window_bounds = array<i64: 1, 16>}, {pipeline_mode = #tpu.pipeline_mode<synchronous>, transform_indices = @transform_14, window_bounds = array<i64: 1, 16>}, {transform_indices = @transform_15, window_bounds = array<i64: 1, 4, 4, 16>}]} {
    %cst = arith.constant 0.000000e+00 : f32
    %0 = vector.broadcast %cst : f32 to vector<38x16xf32>
    %c0 = arith.constant 0 : index
    %c0_0 = arith.constant 0 : index
    %1 = vector.load %arg17[%c0, %c0_0] : memref<38x16xf32, #tpu.memory_space<vmem>>, vector<38x16xf32>
    tpu.vector_store %arg17[%c0, %c0_0], %0 {strides = array<i32>} : memref<38x16xf32, #tpu.memory_space<vmem>>, vector<38x16xf32>,
    %cst_1 = arith.constant 0.000000e+00 : f32
    %2 = vector.broadcast %cst_1 : f32 to vector<38x16xf32>
    %c0_2 = arith.constant 0 : index
    %c0_3 = arith.constant 0 : index
    %3 = vector.load %arg18[%c0_2, %c0_3] : memref<38x16xf32, #tpu.memory_space<vmem>>, vector<38x16xf32>
    tpu.vector_store %arg18[%c0_2, %c0_3], %2 {strides = array<i32>} : memref<38x16xf32, #tpu.memory_space<vmem>>, vector<38x16xf32>,
    %c0_4 = arith.constant 0 : index
    %c0_5 = arith.constant 0 : index
    %c0_6 = arith.constant 0 : index
    %4 = vector.load %arg1[%c0_4, %c0_5, %c0_6] : memref<1x108x8xf32, #tpu.memory_space<vmem>>, vector<1x20x8xf32>
    %5 = vector.shape_cast %4 : vector<1x20x8xf32> to vector<20x8xf32>
    %6 = arith.truncf %5 : vector<20x8xf32> to vector<20x8xbf16>
    %c0_7 = arith.constant 0 : index
    %c0_8 = arith.constant 0 : index
    %c0_9 = arith.constant 0 : index
    %7 = vector.load %arg2[%c0_7, %c0_8, %c0_9] : memref<9x8x16xbf16, #tpu.memory_space<vmem>>, vector<1x8x16xbf16>
    %8 = vector.shape_cast %7 : vector<1x8x16xbf16> to vector<8x16xbf16>
    %cst_10 = arith.constant dense<0.000000e+00> : vector<20x16xf32>
    %9 = tpu.matmul %6, %8, %cst_10 {dimension_numbers = #tpu.dot_dimension_numbers<[1], [0], [0], [1], [0, 0, 1, 1], [], []>} : vector<20x8xbf16>, vector<8x16xbf16>, vector<20x16xf32> -> vector<20x16xf32>
    %c0_11 = arith.constant 0 : index
    %c27 = arith.constant 27 : index
    %c0_12 = arith.constant 0 : index
    %10 = vector.load %arg1[%c0_11, %c27, %c0_12] : memref<1x108x8xf32, #tpu.memory_space<vmem>>, vector<1x20x8xf32>
    %11 = vector.shape_cast %10 : vector<1x20x8xf32> to vector<20x8xf32>
    %12 = arith.truncf %11 : vector<20x8xf32> to vector<20x8xbf16>
    %c1 = arith.constant 1 : index
    %c0_13 = arith.constant 0 : index
    %c0_14 = arith.constant 0 : index
    %13 = vector.load %arg2[%c1, %c0_13, %c0_14] : memref<9x8x16xbf16, #tpu.memory_space<vmem>>, vector<1x8x16xbf16>
    %14 = vector.shape_cast %13 : vector<1x8x16xbf16> to vector<8x16xbf16>
    %cst_15 = arith.constant dense<0.000000e+00> : vector<20x16xf32>
    %15 = tpu.matmul %12, %14, %cst_15 {dimension_numbers = #tpu.dot_dimension_numbers<[1], [0], [0], [1], [0, 0, 1, 1], [], []>} : vector<20x8xbf16>, vector<8x16xbf16>, vector<20x16xf32> -> vector<20x16xf32>
    %16 = arith.addf %9, %15 : vector<20x16xf32>
    %c0_16 = arith.constant 0 : index
    %c1_17 = arith.constant 1 : index
    %c0_18 = arith.constant 0 : index
    %17 = vector.load %arg1[%c0_16, %c1_17, %c0_18] : memref<1x108x8xf32, #tpu.memory_space<vmem>>, vector<1x20x8xf32>
    %18 = vector.shape_cast %17 : vector<1x20x8xf32> to vector<20x8xf32>
    %19 = arith.truncf %18 : vector<20x8xf32> to vector<20x8xbf16>
    %c2 = arith.constant 2 : index
    %c0_19 = arith.constant 0 : index
    %c0_20 = arith.constant 0 : index
    %20 = vector.load %arg2[%c2, %c0_19, %c0_20] : memref<9x8x16xbf16, #tpu.memory_space<vmem>>, vector<1x8x16xbf16>
    %21 = vector.shape_cast %20 : vector<1x8x16xbf16> to vector<8x16xbf16>
    %cst_21 = arith.constant dense<0.000000e+00> : vector<20x16xf32>
    %22 = tpu.matmul %19, %21, %cst_21 {dimension_numbers = #tpu.dot_dimension_numbers<[1], [0], [0], [1], [0, 0, 1, 1], [], []>} : vector<20x8xbf16>, vector<8x16xbf16>, vector<20x16xf32> -> vector<20x16xf32>
    %23 = arith.addf %16, %22 : vector<20x16xf32>
    %c0_22 = arith.constant 0 : index
    %c54 = arith.constant 54 : index
    %c0_23 = arith.constant 0 : index
    %24 = vector.load %arg1[%c0_22, %c54, %c0_23] : memref<1x108x8xf32, #tpu.memory_space<vmem>>, vector<1x20x8xf32>
    %25 = vector.shape_cast %24 : vector<1x20x8xf32> to vector<20x8xf32>
    %26 = arith.truncf %25 : vector<20x8xf32> to vector<20x8xbf16>
    %c3 = arith.constant 3 : index
    %c0_24 = arith.constant 0 : index
    %c0_25 = arith.constant 0 : index
    %27 = vector.load %arg2[%c3, %c0_24, %c0_25] : memref<9x8x16xbf16, #tpu.memory_space<vmem>>, vector<1x8x16xbf16>
    %28 = vector.shape_cast %27 : vector<1x8x16xbf16> to vector<8x16xbf16>
    %cst_26 = arith.constant dense<0.000000e+00> : vector<20x16xf32>
    %29 = tpu.matmul %26, %28, %cst_26 {dimension_numbers = #tpu.dot_dimension_numbers<[1], [0], [0], [1], [0, 0, 1, 1], [], []>} : vector<20x8xbf16>, vector<8x16xbf16>, vector<20x16xf32> -> vector<20x16xf32>
    %30 = arith.addf %23, %29 : vector<20x16xf32>
    %c0_27 = arith.constant 0 : index
    %c81 = arith.constant 81 : index
    %c0_28 = arith.constant 0 : index
    %31 = vector.load %arg1[%c0_27, %c81, %c0_28] : memref<1x108x8xf32, #tpu.memory_space<vmem>>, vector<1x20x8xf32>
    %32 = vector.shape_cast %31 : vector<1x20x8xf32> to vector<20x8xf32>
    %33 = arith.truncf %32 : vector<20x8xf32> to vector<20x8xbf16>
    %c4 = arith.constant 4 : index
    %c0_29 = arith.constant 0 : index
    %c0_30 = arith.constant 0 : index
    %34 = vector.load %arg2[%c4, %c0_29, %c0_30] : memref<9x8x16xbf16, #tpu.memory_space<vmem>>, vector<1x8x16xbf16>
    %35 = vector.shape_cast %34 : vector<1x8x16xbf16> to vector<8x16xbf16>
    %cst_31 = arith.constant dense<0.000000e+00> : vector<20x16xf32>
    %36 = tpu.matmul %33, %35, %cst_31 {dimension_numbers = #tpu.dot_dimension_numbers<[1], [0], [0], [1], [0, 0, 1, 1], [], []>} : vector<20x8xbf16>, vector<8x16xbf16>, vector<20x16xf32> -> vector<20x16xf32>
    %37 = arith.addf %30, %36 : vector<20x16xf32>
    %c0_32 = arith.constant 0 : index
    %c55 = arith.constant 55 : index
    %c0_33 = arith.constant 0 : index
    %38 = vector.load %arg1[%c0_32, %c55, %c0_33] : memref<1x108x8xf32, #tpu.memory_space<vmem>>, vector<1x20x8xf32>
    %39 = vector.shape_cast %38 : vector<1x20x8xf32> to vector<20x8xf32>
    %40 = arith.truncf %39 : vector<20x8xf32> to vector<20x8xbf16>
    %c5 = arith.constant 5 : index
    %c0_34 = arith.constant 0 : index
    %c0_35 = arith.constant 0 : index
    %41 = vector.load %arg2[%c5, %c0_34, %c0_35] : memref<9x8x16xbf16, #tpu.memory_space<vmem>>, vector<1x8x16xbf16>
    %42 = vector.shape_cast %41 : vector<1x8x16xbf16> to vector<8x16xbf16>
    %cst_36 = arith.constant dense<0.000000e+00> : vector<20x16xf32>
    %43 = tpu.matmul %40, %42, %cst_36 {dimension_numbers = #tpu.dot_dimension_numbers<[1], [0], [0], [1], [0, 0, 1, 1], [], []>} : vector<20x8xbf16>, vector<8x16xbf16>, vector<20x16xf32> -> vector<20x16xf32>
    %44 = arith.addf %37, %43 : vector<20x16xf32>
    %c0_37 = arith.constant 0 : index
    %c5_38 = arith.constant 5 : index
    %c0_39 = arith.constant 0 : index
    %45 = vector.load %arg1[%c0_37, %c5_38, %c0_39] : memref<1x108x8xf32, #tpu.memory_space<vmem>>, vector<1x20x8xf32>
    %46 = vector.shape_cast %45 : vector<1x20x8xf32> to vector<20x8xf32>
    %47 = arith.truncf %46 : vector<20x8xf32> to vector<20x8xbf16>
    %c6 = arith.constant 6 : index
    %c0_40 = arith.constant 0 : index
    %c0_41 = arith.constant 0 : index
    %48 = vector.load %arg2[%c6, %c0_40, %c0_41] : memref<9x8x16xbf16, #tpu.memory_space<vmem>>, vector<1x8x16xbf16>
    %49 = vector.shape_cast %48 : vector<1x8x16xbf16> to vector<8x16xbf16>
    %cst_42 = arith.constant dense<0.000000e+00> : vector<20x16xf32>
    %50 = tpu.matmul %47, %49, %cst_42 {dimension_numbers = #tpu.dot_dimension_numbers<[1], [0], [0], [1], [0, 0, 1, 1], [], []>} : vector<20x8xbf16>, vector<8x16xbf16>, vector<20x16xf32> -> vector<20x16xf32>
    %51 = arith.addf %44, %50 : vector<20x16xf32>
    %c0_43 = arith.constant 0 : index
    %c32 = arith.constant 32 : index
    %c0_44 = arith.constant 0 : index
    %52 = vector.load %arg1[%c0_43, %c32, %c0_44] : memref<1x108x8xf32, #tpu.memory_space<vmem>>, vector<1x20x8xf32>
    %53 = vector.shape_cast %52 : vector<1x20x8xf32> to vector<20x8xf32>
    %54 = arith.truncf %53 : vector<20x8xf32> to vector<20x8xbf16>
    %c7 = arith.constant 7 : index
    %c0_45 = arith.constant 0 : index
    %c0_46 = arith.constant 0 : index
    %55 = vector.load %arg2[%c7, %c0_45, %c0_46] : memref<9x8x16xbf16, #tpu.memory_space<vmem>>, vector<1x8x16xbf16>
    %56 = vector.shape_cast %55 : vector<1x8x16xbf16> to vector<8x16xbf16>
    %cst_47 = arith.constant dense<0.000000e+00> : vector<20x16xf32>
    %57 = tpu.matmul %54, %56, %cst_47 {dimension_numbers = #tpu.dot_dimension_numbers<[1], [0], [0], [1], [0, 0, 1, 1], [], []>} : vector<20x8xbf16>, vector<8x16xbf16>, vector<20x16xf32> -> vector<20x16xf32>
    %58 = arith.addf %51, %57 : vector<20x16xf32>
    %c0_48 = arith.constant 0 : index
    %c6_49 = arith.constant 6 : index
    %c0_50 = arith.constant 0 : index
    %59 = vector.load %arg1[%c0_48, %c6_49, %c0_50] : memref<1x108x8xf32, #tpu.memory_space<vmem>>, vector<1x20x8xf32>
    %60 = vector.shape_cast %59 : vector<1x20x8xf32> to vector<20x8xf32>
    %61 = arith.truncf %60 : vector<20x8xf32> to vector<20x8xbf16>
    %c8 = arith.constant 8 : index
    %c0_51 = arith.constant 0 : index
    %c0_52 = arith.constant 0 : index
    %62 = vector.load %arg2[%c8, %c0_51, %c0_52] : memref<9x8x16xbf16, #tpu.memory_space<vmem>>, vector<1x8x16xbf16>
    %63 = vector.shape_cast %62 : vector<1x8x16xbf16> to vector<8x16xbf16>
    %cst_53 = arith.constant dense<0.000000e+00> : vector<20x16xf32>
    %64 = tpu.matmul %61, %63, %cst_53 {dimension_numbers = #tpu.dot_dimension_numbers<[1], [0], [0], [1], [0, 0, 1, 1], [], []>} : vector<20x8xbf16>, vector<8x16xbf16>, vector<20x16xf32> -> vector<20x16xf32>
    %65 = arith.addf %58, %64 : vector<20x16xf32>
    %c0_54 = arith.constant 0 : index
    %c0_55 = arith.constant 0 : index
    %c0_56 = arith.constant 0 : index
    %66 = vector.load %arg1[%c0_54, %c0_55, %c0_56] : memref<1x108x8xf32, #tpu.memory_space<vmem>>, vector<1x20x8xf32>
    %67 = vector.shape_cast %66 : vector<1x20x8xf32> to vector<20x8xf32>
    %68 = arith.truncf %67 : vector<20x8xf32> to vector<20x8xbf16>
    %c0_57 = arith.constant 0 : index
    %c0_58 = arith.constant 0 : index
    %c0_59 = arith.constant 0 : index
    %69 = vector.load %arg5[%c0_57, %c0_58, %c0_59] : memref<9x8x16xbf16, #tpu.memory_space<vmem>>, vector<1x8x16xbf16>
    %70 = vector.shape_cast %69 : vector<1x8x16xbf16> to vector<8x16xbf16>
    %cst_60 = arith.constant dense<0.000000e+00> : vector<20x16xf32>
    %71 = tpu.matmul %68, %70, %cst_60 {dimension_numbers = #tpu.dot_dimension_numbers<[1], [0], [0], [1], [0, 0, 1, 1], [], []>} : vector<20x8xbf16>, vector<8x16xbf16>, vector<20x16xf32> -> vector<20x16xf32>
    %c0_61 = arith.constant 0 : index
    %c27_62 = arith.constant 27 : index
    %c0_63 = arith.constant 0 : index
    %72 = vector.load %arg1[%c0_61, %c27_62, %c0_63] : memref<1x108x8xf32, #tpu.memory_space<vmem>>, vector<1x20x8xf32>
    %73 = vector.shape_cast %72 : vector<1x20x8xf32> to vector<20x8xf32>
    %74 = arith.truncf %73 : vector<20x8xf32> to vector<20x8xbf16>
    %c1_64 = arith.constant 1 : index
    %c0_65 = arith.constant 0 : index
    %c0_66 = arith.constant 0 : index
    %75 = vector.load %arg5[%c1_64, %c0_65, %c0_66] : memref<9x8x16xbf16, #tpu.memory_space<vmem>>, vector<1x8x16xbf16>
    %76 = vector.shape_cast %75 : vector<1x8x16xbf16> to vector<8x16xbf16>
    %cst_67 = arith.constant dense<0.000000e+00> : vector<20x16xf32>
    %77 = tpu.matmul %74, %76, %cst_67 {dimension_numbers = #tpu.dot_dimension_numbers<[1], [0], [0], [1], [0, 0, 1, 1], [], []>} : vector<20x8xbf16>, vector<8x16xbf16>, vector<20x16xf32> -> vector<20x16xf32>
    %78 = arith.addf %71, %77 : vector<20x16xf32>
    %c0_68 = arith.constant 0 : index
    %c1_69 = arith.constant 1 : index
    %c0_70 = arith.constant 0 : index
    %79 = vector.load %arg1[%c0_68, %c1_69, %c0_70] : memref<1x108x8xf32, #tpu.memory_space<vmem>>, vector<1x20x8xf32>
    %80 = vector.shape_cast %79 : vector<1x20x8xf32> to vector<20x8xf32>
    %81 = arith.truncf %80 : vector<20x8xf32> to vector<20x8xbf16>
    %c2_71 = arith.constant 2 : index
    %c0_72 = arith.constant 0 : index
    %c0_73 = arith.constant 0 : index
    %82 = vector.load %arg5[%c2_71, %c0_72, %c0_73] : memref<9x8x16xbf16, #tpu.memory_space<vmem>>, vector<1x8x16xbf16>
    %83 = vector.shape_cast %82 : vector<1x8x16xbf16> to vector<8x16xbf16>
    %cst_74 = arith.constant dense<0.000000e+00> : vector<20x16xf32>
    %84 = tpu.matmul %81, %83, %cst_74 {dimension_numbers = #tpu.dot_dimension_numbers<[1], [0], [0], [1], [0, 0, 1, 1], [], []>} : vector<20x8xbf16>, vector<8x16xbf16>, vector<20x16xf32> -> vector<20x16xf32>
    %85 = arith.addf %78, %84 : vector<20x16xf32>
    %c0_75 = arith.constant 0 : index
    %c54_76 = arith.constant 54 : index
    %c0_77 = arith.constant 0 : index
    %86 = vector.load %arg1[%c0_75, %c54_76, %c0_77] : memref<1x108x8xf32, #tpu.memory_space<vmem>>, vector<1x20x8xf32>
    %87 = vector.shape_cast %86 : vector<1x20x8xf32> to vector<20x8xf32>
    %88 = arith.truncf %87 : vector<20x8xf32> to vector<20x8xbf16>
    %c3_78 = arith.constant 3 : index
    %c0_79 = arith.constant 0 : index
    %c0_80 = arith.constant 0 : index
    %89 = vector.load %arg5[%c3_78, %c0_79, %c0_80] : memref<9x8x16xbf16, #tpu.memory_space<vmem>>, vector<1x8x16xbf16>
    %90 = vector.shape_cast %89 : vector<1x8x16xbf16> to vector<8x16xbf16>
    %cst_81 = arith.constant dense<0.000000e+00> : vector<20x16xf32>
    %91 = tpu.matmul %88, %90, %cst_81 {dimension_numbers = #tpu.dot_dimension_numbers<[1], [0], [0], [1], [0, 0, 1, 1], [], []>} : vector<20x8xbf16>, vector<8x16xbf16>, vector<20x16xf32> -> vector<20x16xf32>
    %92 = arith.addf %85, %91 : vector<20x16xf32>
    %c0_82 = arith.constant 0 : index
    %c81_83 = arith.constant 81 : index
    %c0_84 = arith.constant 0 : index
    %93 = vector.load %arg1[%c0_82, %c81_83, %c0_84] : memref<1x108x8xf32, #tpu.memory_space<vmem>>, vector<1x20x8xf32>
    %94 = vector.shape_cast %93 : vector<1x20x8xf32> to vector<20x8xf32>
    %95 = arith.truncf %94 : vector<20x8xf32> to vector<20x8xbf16>
    %c4_85 = arith.constant 4 : index
    %c0_86 = arith.constant 0 : index
    %c0_87 = arith.constant 0 : index
    %96 = vector.load %arg5[%c4_85, %c0_86, %c0_87] : memref<9x8x16xbf16, #tpu.memory_space<vmem>>, vector<1x8x16xbf16>
    %97 = vector.shape_cast %96 : vector<1x8x16xbf16> to vector<8x16xbf16>
    %cst_88 = arith.constant dense<0.000000e+00> : vector<20x16xf32>
    %98 = tpu.matmul %95, %97, %cst_88 {dimension_numbers = #tpu.dot_dimension_numbers<[1], [0], [0], [1], [0, 0, 1, 1], [], []>} : vector<20x8xbf16>, vector<8x16xbf16>, vector<20x16xf32> -> vector<20x16xf32>
    %99 = arith.addf %92, %98 : vector<20x16xf32>
    %c0_89 = arith.constant 0 : index
    %c55_90 = arith.constant 55 : index
    %c0_91 = arith.constant 0 : index
    %100 = vector.load %arg1[%c0_89, %c55_90, %c0_91] : memref<1x108x8xf32, #tpu.memory_space<vmem>>, vector<1x20x8xf32>
    %101 = vector.shape_cast %100 : vector<1x20x8xf32> to vector<20x8xf32>
    %102 = arith.truncf %101 : vector<20x8xf32> to vector<20x8xbf16>
    %c5_92 = arith.constant 5 : index
    %c0_93 = arith.constant 0 : index
    %c0_94 = arith.constant 0 : index
    %103 = vector.load %arg5[%c5_92, %c0_93, %c0_94] : memref<9x8x16xbf16, #tpu.memory_space<vmem>>, vector<1x8x16xbf16>
    %104 = vector.shape_cast %103 : vector<1x8x16xbf16> to vector<8x16xbf16>
    %cst_95 = arith.constant dense<0.000000e+00> : vector<20x16xf32>
    %105 = tpu.matmul %102, %104, %cst_95 {dimension_numbers = #tpu.dot_dimension_numbers<[1], [0], [0], [1], [0, 0, 1, 1], [], []>} : vector<20x8xbf16>, vector<8x16xbf16>, vector<20x16xf32> -> vector<20x16xf32>
    %106 = arith.addf %99, %105 : vector<20x16xf32>
    %c0_96 = arith.constant 0 : index
    %c5_97 = arith.constant 5 : index
    %c0_98 = arith.constant 0 : index
    %107 = vector.load %arg1[%c0_96, %c5_97, %c0_98] : memref<1x108x8xf32, #tpu.memory_space<vmem>>, vector<1x20x8xf32>
    %108 = vector.shape_cast %107 : vector<1x20x8xf32> to vector<20x8xf32>
    %109 = arith.truncf %108 : vector<20x8xf32> to vector<20x8xbf16>
    %c6_99 = arith.constant 6 : index
    %c0_100 = arith.constant 0 : index
    %c0_101 = arith.constant 0 : index
    %110 = vector.load %arg5[%c6_99, %c0_100, %c0_101] : memref<9x8x16xbf16, #tpu.memory_space<vmem>>, vector<1x8x16xbf16>
    %111 = vector.shape_cast %110 : vector<1x8x16xbf16> to vector<8x16xbf16>
    %cst_102 = arith.constant dense<0.000000e+00> : vector<20x16xf32>
    %112 = tpu.matmul %109, %111, %cst_102 {dimension_numbers = #tpu.dot_dimension_numbers<[1], [0], [0], [1], [0, 0, 1, 1], [], []>} : vector<20x8xbf16>, vector<8x16xbf16>, vector<20x16xf32> -> vector<20x16xf32>
    %113 = arith.addf %106, %112 : vector<20x16xf32>
    %c0_103 = arith.constant 0 : index
    %c32_104 = arith.constant 32 : index
    %c0_105 = arith.constant 0 : index
    %114 = vector.load %arg1[%c0_103, %c32_104, %c0_105] : memref<1x108x8xf32, #tpu.memory_space<vmem>>, vector<1x20x8xf32>
    %115 = vector.shape_cast %114 : vector<1x20x8xf32> to vector<20x8xf32>
    %116 = arith.truncf %115 : vector<20x8xf32> to vector<20x8xbf16>
    %c7_106 = arith.constant 7 : index
    %c0_107 = arith.constant 0 : index
    %c0_108 = arith.constant 0 : index
    %117 = vector.load %arg5[%c7_106, %c0_107, %c0_108] : memref<9x8x16xbf16, #tpu.memory_space<vmem>>, vector<1x8x16xbf16>
    %118 = vector.shape_cast %117 : vector<1x8x16xbf16> to vector<8x16xbf16>
    %cst_109 = arith.constant dense<0.000000e+00> : vector<20x16xf32>
    %119 = tpu.matmul %116, %118, %cst_109 {dimension_numbers = #tpu.dot_dimension_numbers<[1], [0], [0], [1], [0, 0, 1, 1], [], []>} : vector<20x8xbf16>, vector<8x16xbf16>, vector<20x16xf32> -> vector<20x16xf32>
    %120 = arith.addf %113, %119 : vector<20x16xf32>
    %c0_110 = arith.constant 0 : index
    %c6_111 = arith.constant 6 : index
    %c0_112 = arith.constant 0 : index
    %121 = vector.load %arg1[%c0_110, %c6_111, %c0_112] : memref<1x108x8xf32, #tpu.memory_space<vmem>>, vector<1x20x8xf32>
    %122 = vector.shape_cast %121 : vector<1x20x8xf32> to vector<20x8xf32>
    %123 = arith.truncf %122 : vector<20x8xf32> to vector<20x8xbf16>
    %c8_113 = arith.constant 8 : index
    %c0_114 = arith.constant 0 : index
    %c0_115 = arith.constant 0 : index
    %124 = vector.load %arg5[%c8_113, %c0_114, %c0_115] : memref<9x8x16xbf16, #tpu.memory_space<vmem>>, vector<1x8x16xbf16>
    %125 = vector.shape_cast %124 : vector<1x8x16xbf16> to vector<8x16xbf16>
    %cst_116 = arith.constant dense<0.000000e+00> : vector<20x16xf32>
    %126 = tpu.matmul %123, %125, %cst_116 {dimension_numbers = #tpu.dot_dimension_numbers<[1], [0], [0], [1], [0, 0, 1, 1], [], []>} : vector<20x8xbf16>, vector<8x16xbf16>, vector<20x16xf32> -> vector<20x16xf32>
    %127 = arith.addf %120, %126 : vector<20x16xf32>
    %c0_117 = arith.constant 0 : index
    %c0_118 = arith.constant 0 : index
    %128 = vector.load %arg6[%c0_117, %c0_118] : memref<1x16xf32, #tpu.memory_space<vmem>>, vector<1x16xf32>
    %129 = vector.broadcast %128 : vector<1x16xf32> to vector<20x16xf32>
    %130 = arith.addf %127, %129 : vector<20x16xf32>
    %c0_119 = arith.constant 0 : index
    %c0_120 = arith.constant 0 : index
    %131 = vector.load %arg3[%c0_119, %c0_120] : memref<1x16xf32, #tpu.memory_space<vmem>>, vector<1x16xf32>
    %132 = vector.broadcast %131 : vector<1x16xf32> to vector<20x16xf32>
    %133 = arith.mulf %65, %132 : vector<20x16xf32>
    %c0_121 = arith.constant 0 : index
    %c0_122 = arith.constant 0 : index
    %134 = vector.load %arg4[%c0_121, %c0_122] : memref<1x16xf32, #tpu.memory_space<vmem>>, vector<1x16xf32>
    %135 = vector.broadcast %134 : vector<1x16xf32> to vector<20x16xf32>
    %136 = arith.addf %133, %135 : vector<20x16xf32>
    %cst_123 = arith.constant 0.000000e+00 : f32
    %137 = vector.broadcast %cst_123 : f32 to vector<20x16xf32>
    %138 = arith.maximumf %136, %137 : vector<20x16xf32>
    %139 = vector.extract_strided_slice %138 {offsets = [0, 0], sizes = [4, 16], strides = [1, 1]} : vector<20x16xf32> to vector<4x16xf32>
    %c7_124 = arith.constant 7 : index
    %c0_125 = arith.constant 0 : index
    %140 = vector.load %arg17[%c7_124, %c0_125] : memref<38x16xf32, #tpu.memory_space<vmem>>, vector<4x16xf32>
    tpu.vector_store %arg17[%c7_124, %c0_125], %139 {strides = array<i32>} : memref<38x16xf32, #tpu.memory_space<vmem>>, vector<4x16xf32>,
    %141 = vector.extract_strided_slice %138 {offsets = [5, 0], sizes = [4, 16], strides = [1, 1]} : vector<20x16xf32> to vector<4x16xf32>
    %c13 = arith.constant 13 : index
    %c0_126 = arith.constant 0 : index
    %142 = vector.load %arg17[%c13, %c0_126] : memref<38x16xf32, #tpu.memory_space<vmem>>, vector<4x16xf32>
    tpu.vector_store %arg17[%c13, %c0_126], %141 {strides = array<i32>} : memref<38x16xf32, #tpu.memory_space<vmem>>, vector<4x16xf32>,
    %143 = vector.extract_strided_slice %138 {offsets = [10, 0], sizes = [4, 16], strides = [1, 1]} : vector<20x16xf32> to vector<4x16xf32>
    %c19 = arith.constant 19 : index
    %c0_127 = arith.constant 0 : index
    %144 = vector.load %arg17[%c19, %c0_127] : memref<38x16xf32, #tpu.memory_space<vmem>>, vector<4x16xf32>
    tpu.vector_store %arg17[%c19, %c0_127], %143 {strides = array<i32>} : memref<38x16xf32, #tpu.memory_space<vmem>>, vector<4x16xf32>,
    %145 = vector.extract_strided_slice %138 {offsets = [15, 0], sizes = [4, 16], strides = [1, 1]} : vector<20x16xf32> to vector<4x16xf32>
    %c25 = arith.constant 25 : index
    %c0_128 = arith.constant 0 : index
    %146 = vector.load %arg17[%c25, %c0_128] : memref<38x16xf32, #tpu.memory_space<vmem>>, vector<4x16xf32>
    tpu.vector_store %arg17[%c25, %c0_128], %145 {strides = array<i32>} : memref<38x16xf32, #tpu.memory_space<vmem>>, vector<4x16xf32>,
    %c0_129 = arith.constant 0 : index
    %c0_130 = arith.constant 0 : index
    %147 = vector.load %arg17[%c0_129, %c0_130] : memref<38x16xf32, #tpu.memory_space<vmem>>, vector<24x16xf32>
    %148 = arith.truncf %147 : vector<24x16xf32> to vector<24x16xbf16>
    %c0_131 = arith.constant 0 : index
    %c0_132 = arith.constant 0 : index
    %c0_133 = arith.constant 0 : index
    %149 = vector.load %arg7[%c0_131, %c0_132, %c0_133] : memref<9x16x16xbf16, #tpu.memory_space<vmem>>, vector<1x16x16xbf16>
    %150 = vector.shape_cast %149 : vector<1x16x16xbf16> to vector<16x16xbf16>
    %cst_134 = arith.constant dense<0.000000e+00> : vector<24x16xf32>
    %151 = tpu.matmul %148, %150, %cst_134 {dimension_numbers = #tpu.dot_dimension_numbers<[1], [0], [0], [1], [0, 0, 1, 1], [], []>} : vector<24x16xbf16>, vector<16x16xbf16>, vector<24x16xf32> -> vector<24x16xf32>
    %c1_135 = arith.constant 1 : index
    %c0_136 = arith.constant 0 : index
    %152 = vector.load %arg17[%c1_135, %c0_136] : memref<38x16xf32, #tpu.memory_space<vmem>>, vector<24x16xf32>
    %153 = arith.truncf %152 : vector<24x16xf32> to vector<24x16xbf16>
    %c1_137 = arith.constant 1 : index
    %c0_138 = arith.constant 0 : index
    %c0_139 = arith.constant 0 : index
    %154 = vector.load %arg7[%c1_137, %c0_138, %c0_139] : memref<9x16x16xbf16, #tpu.memory_space<vmem>>, vector<1x16x16xbf16>
    %155 = vector.shape_cast %154 : vector<1x16x16xbf16> to vector<16x16xbf16>
    %cst_140 = arith.constant dense<0.000000e+00> : vector<24x16xf32>
    %156 = tpu.matmul %153, %155, %cst_140 {dimension_numbers = #tpu.dot_dimension_numbers<[1], [0], [0], [1], [0, 0, 1, 1], [], []>} : vector<24x16xbf16>, vector<16x16xbf16>, vector<24x16xf32> -> vector<24x16xf32>
    %157 = arith.addf %151, %156 : vector<24x16xf32>
    %c2_141 = arith.constant 2 : index
    %c0_142 = arith.constant 0 : index
    %158 = vector.load %arg17[%c2_141, %c0_142] : memref<38x16xf32, #tpu.memory_space<vmem>>, vector<24x16xf32>
    %159 = arith.truncf %158 : vector<24x16xf32> to vector<24x16xbf16>
    %c2_143 = arith.constant 2 : index
    %c0_144 = arith.constant 0 : index
    %c0_145 = arith.constant 0 : index
    %160 = vector.load %arg7[%c2_143, %c0_144, %c0_145] : memref<9x16x16xbf16, #tpu.memory_space<vmem>>, vector<1x16x16xbf16>
    %161 = vector.shape_cast %160 : vector<1x16x16xbf16> to vector<16x16xbf16>
    %cst_146 = arith.constant dense<0.000000e+00> : vector<24x16xf32>
    %162 = tpu.matmul %159, %161, %cst_146 {dimension_numbers = #tpu.dot_dimension_numbers<[1], [0], [0], [1], [0, 0, 1, 1], [], []>} : vector<24x16xbf16>, vector<16x16xbf16>, vector<24x16xf32> -> vector<24x16xf32>
    %163 = arith.addf %157, %162 : vector<24x16xf32>
    %c6_147 = arith.constant 6 : index
    %c0_148 = arith.constant 0 : index
    %164 = vector.load %arg17[%c6_147, %c0_148] : memref<38x16xf32, #tpu.memory_space<vmem>>, vector<24x16xf32>
    %165 = arith.truncf %164 : vector<24x16xf32> to vector<24x16xbf16>
    %c3_149 = arith.constant 3 : index
    %c0_150 = arith.constant 0 : index
    %c0_151 = arith.constant 0 : index
    %166 = vector.load %arg7[%c3_149, %c0_150, %c0_151] : memref<9x16x16xbf16, #tpu.memory_space<vmem>>, vector<1x16x16xbf16>
    %167 = vector.shape_cast %166 : vector<1x16x16xbf16> to vector<16x16xbf16>
    %cst_152 = arith.constant dense<0.000000e+00> : vector<24x16xf32>
    %168 = tpu.matmul %165, %167, %cst_152 {dimension_numbers = #tpu.dot_dimension_numbers<[1], [0], [0], [1], [0, 0, 1, 1], [], []>} : vector<24x16xbf16>, vector<16x16xbf16>, vector<24x16xf32> -> vector<24x16xf32>
    %169 = arith.addf %163, %168 : vector<24x16xf32>
    %c7_153 = arith.constant 7 : index
    %c0_154 = arith.constant 0 : index
    %170 = vector.load %arg17[%c7_153, %c0_154] : memref<38x16xf32, #tpu.memory_space<vmem>>, vector<24x16xf32>
    %171 = arith.truncf %170 : vector<24x16xf32> to vector<24x16xbf16>
    %c4_155 = arith.constant 4 : index
    %c0_156 = arith.constant 0 : index
    %c0_157 = arith.constant 0 : index
    %172 = vector.load %arg7[%c4_155, %c0_156, %c0_157] : memref<9x16x16xbf16, #tpu.memory_space<vmem>>, vector<1x16x16xbf16>
    %173 = vector.shape_cast %172 : vector<1x16x16xbf16> to vector<16x16xbf16>
    %cst_158 = arith.constant dense<0.000000e+00> : vector<24x16xf32>
    %174 = tpu.matmul %171, %173, %cst_158 {dimension_numbers = #tpu.dot_dimension_numbers<[1], [0], [0], [1], [0, 0, 1, 1], [], []>} : vector<24x16xbf16>, vector<16x16xbf16>, vector<24x16xf32> -> vector<24x16xf32>
    %175 = arith.addf %169, %174 : vector<24x16xf32>
    %c8_159 = arith.constant 8 : index
    %c0_160 = arith.constant 0 : index
    %176 = vector.load %arg17[%c8_159, %c0_160] : memref<38x16xf32, #tpu.memory_space<vmem>>, vector<24x16xf32>
    %177 = arith.truncf %176 : vector<24x16xf32> to vector<24x16xbf16>
    %c5_161 = arith.constant 5 : index
    %c0_162 = arith.constant 0 : index
    %c0_163 = arith.constant 0 : index
    %178 = vector.load %arg7[%c5_161, %c0_162, %c0_163] : memref<9x16x16xbf16, #tpu.memory_space<vmem>>, vector<1x16x16xbf16>
    %179 = vector.shape_cast %178 : vector<1x16x16xbf16> to vector<16x16xbf16>
    %cst_164 = arith.constant dense<0.000000e+00> : vector<24x16xf32>
    %180 = tpu.matmul %177, %179, %cst_164 {dimension_numbers = #tpu.dot_dimension_numbers<[1], [0], [0], [1], [0, 0, 1, 1], [], []>} : vector<24x16xbf16>, vector<16x16xbf16>, vector<24x16xf32> -> vector<24x16xf32>
    %181 = arith.addf %175, %180 : vector<24x16xf32>
    %c12 = arith.constant 12 : index
    %c0_165 = arith.constant 0 : index
    %182 = vector.load %arg17[%c12, %c0_165] : memref<38x16xf32, #tpu.memory_space<vmem>>, vector<24x16xf32>
    %183 = arith.truncf %182 : vector<24x16xf32> to vector<24x16xbf16>
    %c6_166 = arith.constant 6 : index
    %c0_167 = arith.constant 0 : index
    %c0_168 = arith.constant 0 : index
    %184 = vector.load %arg7[%c6_166, %c0_167, %c0_168] : memref<9x16x16xbf16, #tpu.memory_space<vmem>>, vector<1x16x16xbf16>
    %185 = vector.shape_cast %184 : vector<1x16x16xbf16> to vector<16x16xbf16>
    %cst_169 = arith.constant dense<0.000000e+00> : vector<24x16xf32>
    %186 = tpu.matmul %183, %185, %cst_169 {dimension_numbers = #tpu.dot_dimension_numbers<[1], [0], [0], [1], [0, 0, 1, 1], [], []>} : vector<24x16xbf16>, vector<16x16xbf16>, vector<24x16xf32> -> vector<24x16xf32>
    %187 = arith.addf %181, %186 : vector<24x16xf32>
    %c13_170 = arith.constant 13 : index
    %c0_171 = arith.constant 0 : index
    %188 = vector.load %arg17[%c13_170, %c0_171] : memref<38x16xf32, #tpu.memory_space<vmem>>, vector<24x16xf32>
    %189 = arith.truncf %188 : vector<24x16xf32> to vector<24x16xbf16>
    %c7_172 = arith.constant 7 : index
    %c0_173 = arith.constant 0 : index
    %c0_174 = arith.constant 0 : index
    %190 = vector.load %arg7[%c7_172, %c0_173, %c0_174] : memref<9x16x16xbf16, #tpu.memory_space<vmem>>, vector<1x16x16xbf16>
    %191 = vector.shape_cast %190 : vector<1x16x16xbf16> to vector<16x16xbf16>
    %cst_175 = arith.constant dense<0.000000e+00> : vector<24x16xf32>
    %192 = tpu.matmul %189, %191, %cst_175 {dimension_numbers = #tpu.dot_dimension_numbers<[1], [0], [0], [1], [0, 0, 1, 1], [], []>} : vector<24x16xbf16>, vector<16x16xbf16>, vector<24x16xf32> -> vector<24x16xf32>
    %193 = arith.addf %187, %192 : vector<24x16xf32>
    %c14 = arith.constant 14 : index
    %c0_176 = arith.constant 0 : index
    %194 = vector.load %arg17[%c14, %c0_176] : memref<38x16xf32, #tpu.memory_space<vmem>>, vector<24x16xf32>
    %195 = arith.truncf %194 : vector<24x16xf32> to vector<24x16xbf16>
    %c8_177 = arith.constant 8 : index
    %c0_178 = arith.constant 0 : index
    %c0_179 = arith.constant 0 : index
    %196 = vector.load %arg7[%c8_177, %c0_178, %c0_179] : memref<9x16x16xbf16, #tpu.memory_space<vmem>>, vector<1x16x16xbf16>
    %197 = vector.shape_cast %196 : vector<1x16x16xbf16> to vector<16x16xbf16>
    %cst_180 = arith.constant dense<0.000000e+00> : vector<24x16xf32>
    %198 = tpu.matmul %195, %197, %cst_180 {dimension_numbers = #tpu.dot_dimension_numbers<[1], [0], [0], [1], [0, 0, 1, 1], [], []>} : vector<24x16xbf16>, vector<16x16xbf16>, vector<24x16xf32> -> vector<24x16xf32>
    %199 = arith.addf %193, %198 : vector<24x16xf32>
    %c0_181 = arith.constant 0 : index
    %c0_182 = arith.constant 0 : index
    %200 = vector.load %arg8[%c0_181, %c0_182] : memref<1x16xf32, #tpu.memory_space<vmem>>, vector<1x16xf32>
    %201 = vector.broadcast %200 : vector<1x16xf32> to vector<24x16xf32>
    %202 = arith.mulf %199, %201 : vector<24x16xf32>
    %c0_183 = arith.constant 0 : index
    %c0_184 = arith.constant 0 : index
    %203 = vector.load %arg9[%c0_183, %c0_184] : memref<1x16xf32, #tpu.memory_space<vmem>>, vector<1x16xf32>
    %204 = vector.broadcast %203 : vector<1x16xf32> to vector<24x16xf32>
    %205 = arith.addf %202, %204 : vector<24x16xf32>
    %206 = vector.extract_strided_slice %130 {offsets = [0, 0], sizes = [4, 16], strides = [1, 1]} : vector<20x16xf32> to vector<4x16xf32>
    %207 = vector.extract_strided_slice %205 {offsets = [0, 0], sizes = [4, 16], strides = [1, 1]} : vector<24x16xf32> to vector<4x16xf32>
    %208 = arith.addf %207, %206 : vector<4x16xf32>
    %cst_185 = arith.constant 0.000000e+00 : f32
    %209 = vector.broadcast %cst_185 : f32 to vector<4x16xf32>
    %210 = arith.maximumf %208, %209 : vector<4x16xf32>
    %c7_186 = arith.constant 7 : index
    %c0_187 = arith.constant 0 : index
    %211 = vector.load %arg18[%c7_186, %c0_187] : memref<38x16xf32, #tpu.memory_space<vmem>>, vector<4x16xf32>
    tpu.vector_store %arg18[%c7_186, %c0_187], %210 {strides = array<i32>} : memref<38x16xf32, #tpu.memory_space<vmem>>, vector<4x16xf32>,
    %212 = vector.extract_strided_slice %130 {offsets = [5, 0], sizes = [4, 16], strides = [1, 1]} : vector<20x16xf32> to vector<4x16xf32>
    %213 = vector.extract_strided_slice %205 {offsets = [6, 0], sizes = [4, 16], strides = [1, 1]} : vector<24x16xf32> to vector<4x16xf32>
    %214 = arith.addf %213, %212 : vector<4x16xf32>
    %cst_188 = arith.constant 0.000000e+00 : f32
    %215 = vector.broadcast %cst_188 : f32 to vector<4x16xf32>
    %216 = arith.maximumf %214, %215 : vector<4x16xf32>
    %c13_189 = arith.constant 13 : index
    %c0_190 = arith.constant 0 : index
    %217 = vector.load %arg18[%c13_189, %c0_190] : memref<38x16xf32, #tpu.memory_space<vmem>>, vector<4x16xf32>
    tpu.vector_store %arg18[%c13_189, %c0_190], %216 {strides = array<i32>} : memref<38x16xf32, #tpu.memory_space<vmem>>, vector<4x16xf32>,
    %218 = vector.extract_strided_slice %130 {offsets = [10, 0], sizes = [4, 16], strides = [1, 1]} : vector<20x16xf32> to vector<4x16xf32>
    %219 = vector.extract_strided_slice %205 {offsets = [12, 0], sizes = [4, 16], strides = [1, 1]} : vector<24x16xf32> to vector<4x16xf32>
    %220 = arith.addf %219, %218 : vector<4x16xf32>
    %cst_191 = arith.constant 0.000000e+00 : f32
    %221 = vector.broadcast %cst_191 : f32 to vector<4x16xf32>
    %222 = arith.maximumf %220, %221 : vector<4x16xf32>
    %c19_192 = arith.constant 19 : index
    %c0_193 = arith.constant 0 : index
    %223 = vector.load %arg18[%c19_192, %c0_193] : memref<38x16xf32, #tpu.memory_space<vmem>>, vector<4x16xf32>
    tpu.vector_store %arg18[%c19_192, %c0_193], %222 {strides = array<i32>} : memref<38x16xf32, #tpu.memory_space<vmem>>, vector<4x16xf32>,
    %224 = vector.extract_strided_slice %130 {offsets = [15, 0], sizes = [4, 16], strides = [1, 1]} : vector<20x16xf32> to vector<4x16xf32>
    %225 = vector.extract_strided_slice %205 {offsets = [18, 0], sizes = [4, 16], strides = [1, 1]} : vector<24x16xf32> to vector<4x16xf32>
    %226 = arith.addf %225, %224 : vector<4x16xf32>
    %cst_194 = arith.constant 0.000000e+00 : f32
    %227 = vector.broadcast %cst_194 : f32 to vector<4x16xf32>
    %228 = arith.maximumf %226, %227 : vector<4x16xf32>
    %c25_195 = arith.constant 25 : index
    %c0_196 = arith.constant 0 : index
    %229 = vector.load %arg18[%c25_195, %c0_196] : memref<38x16xf32, #tpu.memory_space<vmem>>, vector<4x16xf32>
    tpu.vector_store %arg18[%c25_195, %c0_196], %228 {strides = array<i32>} : memref<38x16xf32, #tpu.memory_space<vmem>>, vector<4x16xf32>,
    %c0_197 = arith.constant 0 : index
    %c0_198 = arith.constant 0 : index
    %230 = vector.load %arg18[%c0_197, %c0_198] : memref<38x16xf32, #tpu.memory_space<vmem>>, vector<24x16xf32>
    %231 = arith.truncf %230 : vector<24x16xf32> to vector<24x16xbf16>
    %c0_199 = arith.constant 0 : index
    %c0_200 = arith.constant 0 : index
    %c0_201 = arith.constant 0 : index
    %232 = vector.load %arg10[%c0_199, %c0_200, %c0_201] : memref<9x16x16xbf16, #tpu.memory_space<vmem>>, vector<1x16x16xbf16>
    %233 = vector.shape_cast %232 : vector<1x16x16xbf16> to vector<16x16xbf16>
    %cst_202 = arith.constant dense<0.000000e+00> : vector<24x16xf32>
    %234 = tpu.matmul %231, %233, %cst_202 {dimension_numbers = #tpu.dot_dimension_numbers<[1], [0], [0], [1], [0, 0, 1, 1], [], []>} : vector<24x16xbf16>, vector<16x16xbf16>, vector<24x16xf32> -> vector<24x16xf32>
    %c1_203 = arith.constant 1 : index
    %c0_204 = arith.constant 0 : index
    %235 = vector.load %arg18[%c1_203, %c0_204] : memref<38x16xf32, #tpu.memory_space<vmem>>, vector<24x16xf32>
    %236 = arith.truncf %235 : vector<24x16xf32> to vector<24x16xbf16>
    %c1_205 = arith.constant 1 : index
    %c0_206 = arith.constant 0 : index
    %c0_207 = arith.constant 0 : index
    %237 = vector.load %arg10[%c1_205, %c0_206, %c0_207] : memref<9x16x16xbf16, #tpu.memory_space<vmem>>, vector<1x16x16xbf16>
    %238 = vector.shape_cast %237 : vector<1x16x16xbf16> to vector<16x16xbf16>
    %cst_208 = arith.constant dense<0.000000e+00> : vector<24x16xf32>
    %239 = tpu.matmul %236, %238, %cst_208 {dimension_numbers = #tpu.dot_dimension_numbers<[1], [0], [0], [1], [0, 0, 1, 1], [], []>} : vector<24x16xbf16>, vector<16x16xbf16>, vector<24x16xf32> -> vector<24x16xf32>
    %240 = arith.addf %234, %239 : vector<24x16xf32>
    %c2_209 = arith.constant 2 : index
    %c0_210 = arith.constant 0 : index
    %241 = vector.load %arg18[%c2_209, %c0_210] : memref<38x16xf32, #tpu.memory_space<vmem>>, vector<24x16xf32>
    %242 = arith.truncf %241 : vector<24x16xf32> to vector<24x16xbf16>
    %c2_211 = arith.constant 2 : index
    %c0_212 = arith.constant 0 : index
    %c0_213 = arith.constant 0 : index
    %243 = vector.load %arg10[%c2_211, %c0_212, %c0_213] : memref<9x16x16xbf16, #tpu.memory_space<vmem>>, vector<1x16x16xbf16>
    %244 = vector.shape_cast %243 : vector<1x16x16xbf16> to vector<16x16xbf16>
    %cst_214 = arith.constant dense<0.000000e+00> : vector<24x16xf32>
    %245 = tpu.matmul %242, %244, %cst_214 {dimension_numbers = #tpu.dot_dimension_numbers<[1], [0], [0], [1], [0, 0, 1, 1], [], []>} : vector<24x16xbf16>, vector<16x16xbf16>, vector<24x16xf32> -> vector<24x16xf32>
    %246 = arith.addf %240, %245 : vector<24x16xf32>
    %c6_215 = arith.constant 6 : index
    %c0_216 = arith.constant 0 : index
    %247 = vector.load %arg18[%c6_215, %c0_216] : memref<38x16xf32, #tpu.memory_space<vmem>>, vector<24x16xf32>
    %248 = arith.truncf %247 : vector<24x16xf32> to vector<24x16xbf16>
    %c3_217 = arith.constant 3 : index
    %c0_218 = arith.constant 0 : index
    %c0_219 = arith.constant 0 : index
    %249 = vector.load %arg10[%c3_217, %c0_218, %c0_219] : memref<9x16x16xbf16, #tpu.memory_space<vmem>>, vector<1x16x16xbf16>
    %250 = vector.shape_cast %249 : vector<1x16x16xbf16> to vector<16x16xbf16>
    %cst_220 = arith.constant dense<0.000000e+00> : vector<24x16xf32>
    %251 = tpu.matmul %248, %250, %cst_220 {dimension_numbers = #tpu.dot_dimension_numbers<[1], [0], [0], [1], [0, 0, 1, 1], [], []>} : vector<24x16xbf16>, vector<16x16xbf16>, vector<24x16xf32> -> vector<24x16xf32>
    %252 = arith.addf %246, %251 : vector<24x16xf32>
    %c7_221 = arith.constant 7 : index
    %c0_222 = arith.constant 0 : index
    %253 = vector.load %arg18[%c7_221, %c0_222] : memref<38x16xf32, #tpu.memory_space<vmem>>, vector<24x16xf32>
    %254 = arith.truncf %253 : vector<24x16xf32> to vector<24x16xbf16>
    %c4_223 = arith.constant 4 : index
    %c0_224 = arith.constant 0 : index
    %c0_225 = arith.constant 0 : index
    %255 = vector.load %arg10[%c4_223, %c0_224, %c0_225] : memref<9x16x16xbf16, #tpu.memory_space<vmem>>, vector<1x16x16xbf16>
    %256 = vector.shape_cast %255 : vector<1x16x16xbf16> to vector<16x16xbf16>
    %cst_226 = arith.constant dense<0.000000e+00> : vector<24x16xf32>
    %257 = tpu.matmul %254, %256, %cst_226 {dimension_numbers = #tpu.dot_dimension_numbers<[1], [0], [0], [1], [0, 0, 1, 1], [], []>} : vector<24x16xbf16>, vector<16x16xbf16>, vector<24x16xf32> -> vector<24x16xf32>
    %258 = arith.addf %252, %257 : vector<24x16xf32>
    %c8_227 = arith.constant 8 : index
    %c0_228 = arith.constant 0 : index
    %259 = vector.load %arg18[%c8_227, %c0_228] : memref<38x16xf32, #tpu.memory_space<vmem>>, vector<24x16xf32>
    %260 = arith.truncf %259 : vector<24x16xf32> to vector<24x16xbf16>
    %c5_229 = arith.constant 5 : index
    %c0_230 = arith.constant 0 : index
    %c0_231 = arith.constant 0 : index
    %261 = vector.load %arg10[%c5_229, %c0_230, %c0_231] : memref<9x16x16xbf16, #tpu.memory_space<vmem>>, vector<1x16x16xbf16>
    %262 = vector.shape_cast %261 : vector<1x16x16xbf16> to vector<16x16xbf16>
    %cst_232 = arith.constant dense<0.000000e+00> : vector<24x16xf32>
    %263 = tpu.matmul %260, %262, %cst_232 {dimension_numbers = #tpu.dot_dimension_numbers<[1], [0], [0], [1], [0, 0, 1, 1], [], []>} : vector<24x16xbf16>, vector<16x16xbf16>, vector<24x16xf32> -> vector<24x16xf32>
    %264 = arith.addf %258, %263 : vector<24x16xf32>
    %c12_233 = arith.constant 12 : index
    %c0_234 = arith.constant 0 : index
    %265 = vector.load %arg18[%c12_233, %c0_234] : memref<38x16xf32, #tpu.memory_space<vmem>>, vector<24x16xf32>
    %266 = arith.truncf %265 : vector<24x16xf32> to vector<24x16xbf16>
    %c6_235 = arith.constant 6 : index
    %c0_236 = arith.constant 0 : index
    %c0_237 = arith.constant 0 : index
    %267 = vector.load %arg10[%c6_235, %c0_236, %c0_237] : memref<9x16x16xbf16, #tpu.memory_space<vmem>>, vector<1x16x16xbf16>
    %268 = vector.shape_cast %267 : vector<1x16x16xbf16> to vector<16x16xbf16>
    %cst_238 = arith.constant dense<0.000000e+00> : vector<24x16xf32>
    %269 = tpu.matmul %266, %268, %cst_238 {dimension_numbers = #tpu.dot_dimension_numbers<[1], [0], [0], [1], [0, 0, 1, 1], [], []>} : vector<24x16xbf16>, vector<16x16xbf16>, vector<24x16xf32> -> vector<24x16xf32>
    %270 = arith.addf %264, %269 : vector<24x16xf32>
    %c13_239 = arith.constant 13 : index
    %c0_240 = arith.constant 0 : index
    %271 = vector.load %arg18[%c13_239, %c0_240] : memref<38x16xf32, #tpu.memory_space<vmem>>, vector<24x16xf32>
    %272 = arith.truncf %271 : vector<24x16xf32> to vector<24x16xbf16>
    %c7_241 = arith.constant 7 : index
    %c0_242 = arith.constant 0 : index
    %c0_243 = arith.constant 0 : index
    %273 = vector.load %arg10[%c7_241, %c0_242, %c0_243] : memref<9x16x16xbf16, #tpu.memory_space<vmem>>, vector<1x16x16xbf16>
    %274 = vector.shape_cast %273 : vector<1x16x16xbf16> to vector<16x16xbf16>
    %cst_244 = arith.constant dense<0.000000e+00> : vector<24x16xf32>
    %275 = tpu.matmul %272, %274, %cst_244 {dimension_numbers = #tpu.dot_dimension_numbers<[1], [0], [0], [1], [0, 0, 1, 1], [], []>} : vector<24x16xbf16>, vector<16x16xbf16>, vector<24x16xf32> -> vector<24x16xf32>
    %276 = arith.addf %270, %275 : vector<24x16xf32>
    %c14_245 = arith.constant 14 : index
    %c0_246 = arith.constant 0 : index
    %277 = vector.load %arg18[%c14_245, %c0_246] : memref<38x16xf32, #tpu.memory_space<vmem>>, vector<24x16xf32>
    %278 = arith.truncf %277 : vector<24x16xf32> to vector<24x16xbf16>
    %c8_247 = arith.constant 8 : index
    %c0_248 = arith.constant 0 : index
    %c0_249 = arith.constant 0 : index
    %279 = vector.load %arg10[%c8_247, %c0_248, %c0_249] : memref<9x16x16xbf16, #tpu.memory_space<vmem>>, vector<1x16x16xbf16>
    %280 = vector.shape_cast %279 : vector<1x16x16xbf16> to vector<16x16xbf16>
    %cst_250 = arith.constant dense<0.000000e+00> : vector<24x16xf32>
    %281 = tpu.matmul %278, %280, %cst_250 {dimension_numbers = #tpu.dot_dimension_numbers<[1], [0], [0], [1], [0, 0, 1, 1], [], []>} : vector<24x16xbf16>, vector<16x16xbf16>, vector<24x16xf32> -> vector<24x16xf32>
    %282 = arith.addf %276, %281 : vector<24x16xf32>
    %c0_251 = arith.constant 0 : index
    %c0_252 = arith.constant 0 : index
    %283 = vector.load %arg11[%c0_251, %c0_252] : memref<1x16xf32, #tpu.memory_space<vmem>>, vector<1x16xf32>
    %284 = vector.broadcast %283 : vector<1x16xf32> to vector<24x16xf32>
    %285 = arith.mulf %282, %284 : vector<24x16xf32>
    %c0_253 = arith.constant 0 : index
    %c0_254 = arith.constant 0 : index
    %286 = vector.load %arg12[%c0_253, %c0_254] : memref<1x16xf32, #tpu.memory_space<vmem>>, vector<1x16xf32>
    %287 = vector.broadcast %286 : vector<1x16xf32> to vector<24x16xf32>
    %288 = arith.addf %285, %287 : vector<24x16xf32>
    %cst_255 = arith.constant 0.000000e+00 : f32
    %289 = vector.broadcast %cst_255 : f32 to vector<24x16xf32>
    %290 = arith.maximumf %288, %289 : vector<24x16xf32>
    %291 = vector.extract_strided_slice %290 {offsets = [0, 0], sizes = [4, 16], strides = [1, 1]} : vector<24x16xf32> to vector<4x16xf32>
    %c7_256 = arith.constant 7 : index
    %c0_257 = arith.constant 0 : index
    %292 = vector.load %arg17[%c7_256, %c0_257] : memref<38x16xf32, #tpu.memory_space<vmem>>, vector<4x16xf32>
    tpu.vector_store %arg17[%c7_256, %c0_257], %291 {strides = array<i32>} : memref<38x16xf32, #tpu.memory_space<vmem>>, vector<4x16xf32>,
    %293 = vector.extract_strided_slice %290 {offsets = [6, 0], sizes = [4, 16], strides = [1, 1]} : vector<24x16xf32> to vector<4x16xf32>
    %c13_258 = arith.constant 13 : index
    %c0_259 = arith.constant 0 : index
    %294 = vector.load %arg17[%c13_258, %c0_259] : memref<38x16xf32, #tpu.memory_space<vmem>>, vector<4x16xf32>
    tpu.vector_store %arg17[%c13_258, %c0_259], %293 {strides = array<i32>} : memref<38x16xf32, #tpu.memory_space<vmem>>, vector<4x16xf32>,
    %295 = vector.extract_strided_slice %290 {offsets = [12, 0], sizes = [4, 16], strides = [1, 1]} : vector<24x16xf32> to vector<4x16xf32>
    %c19_260 = arith.constant 19 : index
    %c0_261 = arith.constant 0 : index
    %296 = vector.load %arg17[%c19_260, %c0_261] : memref<38x16xf32, #tpu.memory_space<vmem>>, vector<4x16xf32>
    tpu.vector_store %arg17[%c19_260, %c0_261], %295 {strides = array<i32>} : memref<38x16xf32, #tpu.memory_space<vmem>>, vector<4x16xf32>,
    %297 = vector.extract_strided_slice %290 {offsets = [18, 0], sizes = [4, 16], strides = [1, 1]} : vector<24x16xf32> to vector<4x16xf32>
    %c25_262 = arith.constant 25 : index
    %c0_263 = arith.constant 0 : index
    %298 = vector.load %arg17[%c25_262, %c0_263] : memref<38x16xf32, #tpu.memory_space<vmem>>, vector<4x16xf32>
    tpu.vector_store %arg17[%c25_262, %c0_263], %297 {strides = array<i32>} : memref<38x16xf32, #tpu.memory_space<vmem>>, vector<4x16xf32>,
    %c0_264 = arith.constant 0 : index
    %c0_265 = arith.constant 0 : index
    %299 = vector.load %arg17[%c0_264, %c0_265] : memref<38x16xf32, #tpu.memory_space<vmem>>, vector<24x16xf32>
    %300 = arith.truncf %299 : vector<24x16xf32> to vector<24x16xbf16>
    %c0_266 = arith.constant 0 : index
    %c0_267 = arith.constant 0 : index
    %c0_268 = arith.constant 0 : index
    %301 = vector.load %arg13[%c0_266, %c0_267, %c0_268] : memref<9x16x16xbf16, #tpu.memory_space<vmem>>, vector<1x16x16xbf16>
    %302 = vector.shape_cast %301 : vector<1x16x16xbf16> to vector<16x16xbf16>
    %cst_269 = arith.constant dense<0.000000e+00> : vector<24x16xf32>
    %303 = tpu.matmul %300, %302, %cst_269 {dimension_numbers = #tpu.dot_dimension_numbers<[1], [0], [0], [1], [0, 0, 1, 1], [], []>} : vector<24x16xbf16>, vector<16x16xbf16>, vector<24x16xf32> -> vector<24x16xf32>
    %c1_270 = arith.constant 1 : index
    %c0_271 = arith.constant 0 : index
    %304 = vector.load %arg17[%c1_270, %c0_271] : memref<38x16xf32, #tpu.memory_space<vmem>>, vector<24x16xf32>
    %305 = arith.truncf %304 : vector<24x16xf32> to vector<24x16xbf16>
    %c1_272 = arith.constant 1 : index
    %c0_273 = arith.constant 0 : index
    %c0_274 = arith.constant 0 : index
    %306 = vector.load %arg13[%c1_272, %c0_273, %c0_274] : memref<9x16x16xbf16, #tpu.memory_space<vmem>>, vector<1x16x16xbf16>
    %307 = vector.shape_cast %306 : vector<1x16x16xbf16> to vector<16x16xbf16>
    %cst_275 = arith.constant dense<0.000000e+00> : vector<24x16xf32>
    %308 = tpu.matmul %305, %307, %cst_275 {dimension_numbers = #tpu.dot_dimension_numbers<[1], [0], [0], [1], [0, 0, 1, 1], [], []>} : vector<24x16xbf16>, vector<16x16xbf16>, vector<24x16xf32> -> vector<24x16xf32>
    %309 = arith.addf %303, %308 : vector<24x16xf32>
    %c2_276 = arith.constant 2 : index
    %c0_277 = arith.constant 0 : index
    %310 = vector.load %arg17[%c2_276, %c0_277] : memref<38x16xf32, #tpu.memory_space<vmem>>, vector<24x16xf32>
    %311 = arith.truncf %310 : vector<24x16xf32> to vector<24x16xbf16>
    %c2_278 = arith.constant 2 : index
    %c0_279 = arith.constant 0 : index
    %c0_280 = arith.constant 0 : index
    %312 = vector.load %arg13[%c2_278, %c0_279, %c0_280] : memref<9x16x16xbf16, #tpu.memory_space<vmem>>, vector<1x16x16xbf16>
    %313 = vector.shape_cast %312 : vector<1x16x16xbf16> to vector<16x16xbf16>
    %cst_281 = arith.constant dense<0.000000e+00> : vector<24x16xf32>
    %314 = tpu.matmul %311, %313, %cst_281 {dimension_numbers = #tpu.dot_dimension_numbers<[1], [0], [0], [1], [0, 0, 1, 1], [], []>} : vector<24x16xbf16>, vector<16x16xbf16>, vector<24x16xf32> -> vector<24x16xf32>
    %315 = arith.addf %309, %314 : vector<24x16xf32>
    %c6_282 = arith.constant 6 : index
    %c0_283 = arith.constant 0 : index
    %316 = vector.load %arg17[%c6_282, %c0_283] : memref<38x16xf32, #tpu.memory_space<vmem>>, vector<24x16xf32>
    %317 = arith.truncf %316 : vector<24x16xf32> to vector<24x16xbf16>
    %c3_284 = arith.constant 3 : index
    %c0_285 = arith.constant 0 : index
    %c0_286 = arith.constant 0 : index
    %318 = vector.load %arg13[%c3_284, %c0_285, %c0_286] : memref<9x16x16xbf16, #tpu.memory_space<vmem>>, vector<1x16x16xbf16>
    %319 = vector.shape_cast %318 : vector<1x16x16xbf16> to vector<16x16xbf16>
    %cst_287 = arith.constant dense<0.000000e+00> : vector<24x16xf32>
    %320 = tpu.matmul %317, %319, %cst_287 {dimension_numbers = #tpu.dot_dimension_numbers<[1], [0], [0], [1], [0, 0, 1, 1], [], []>} : vector<24x16xbf16>, vector<16x16xbf16>, vector<24x16xf32> -> vector<24x16xf32>
    %321 = arith.addf %315, %320 : vector<24x16xf32>
    %c7_288 = arith.constant 7 : index
    %c0_289 = arith.constant 0 : index
    %322 = vector.load %arg17[%c7_288, %c0_289] : memref<38x16xf32, #tpu.memory_space<vmem>>, vector<24x16xf32>
    %323 = arith.truncf %322 : vector<24x16xf32> to vector<24x16xbf16>
    %c4_290 = arith.constant 4 : index
    %c0_291 = arith.constant 0 : index
    %c0_292 = arith.constant 0 : index
    %324 = vector.load %arg13[%c4_290, %c0_291, %c0_292] : memref<9x16x16xbf16, #tpu.memory_space<vmem>>, vector<1x16x16xbf16>
    %325 = vector.shape_cast %324 : vector<1x16x16xbf16> to vector<16x16xbf16>
    %cst_293 = arith.constant dense<0.000000e+00> : vector<24x16xf32>
    %326 = tpu.matmul %323, %325, %cst_293 {dimension_numbers = #tpu.dot_dimension_numbers<[1], [0], [0], [1], [0, 0, 1, 1], [], []>} : vector<24x16xbf16>, vector<16x16xbf16>, vector<24x16xf32> -> vector<24x16xf32>
    %327 = arith.addf %321, %326 : vector<24x16xf32>
    %c8_294 = arith.constant 8 : index
    %c0_295 = arith.constant 0 : index
    %328 = vector.load %arg17[%c8_294, %c0_295] : memref<38x16xf32, #tpu.memory_space<vmem>>, vector<24x16xf32>
    %329 = arith.truncf %328 : vector<24x16xf32> to vector<24x16xbf16>
    %c5_296 = arith.constant 5 : index
    %c0_297 = arith.constant 0 : index
    %c0_298 = arith.constant 0 : index
    %330 = vector.load %arg13[%c5_296, %c0_297, %c0_298] : memref<9x16x16xbf16, #tpu.memory_space<vmem>>, vector<1x16x16xbf16>
    %331 = vector.shape_cast %330 : vector<1x16x16xbf16> to vector<16x16xbf16>
    %cst_299 = arith.constant dense<0.000000e+00> : vector<24x16xf32>
    %332 = tpu.matmul %329, %331, %cst_299 {dimension_numbers = #tpu.dot_dimension_numbers<[1], [0], [0], [1], [0, 0, 1, 1], [], []>} : vector<24x16xbf16>, vector<16x16xbf16>, vector<24x16xf32> -> vector<24x16xf32>
    %333 = arith.addf %327, %332 : vector<24x16xf32>
    %c12_300 = arith.constant 12 : index
    %c0_301 = arith.constant 0 : index
    %334 = vector.load %arg17[%c12_300, %c0_301] : memref<38x16xf32, #tpu.memory_space<vmem>>, vector<24x16xf32>
    %335 = arith.truncf %334 : vector<24x16xf32> to vector<24x16xbf16>
    %c6_302 = arith.constant 6 : index
    %c0_303 = arith.constant 0 : index
    %c0_304 = arith.constant 0 : index
    %336 = vector.load %arg13[%c6_302, %c0_303, %c0_304] : memref<9x16x16xbf16, #tpu.memory_space<vmem>>, vector<1x16x16xbf16>
    %337 = vector.shape_cast %336 : vector<1x16x16xbf16> to vector<16x16xbf16>
    %cst_305 = arith.constant dense<0.000000e+00> : vector<24x16xf32>
    %338 = tpu.matmul %335, %337, %cst_305 {dimension_numbers = #tpu.dot_dimension_numbers<[1], [0], [0], [1], [0, 0, 1, 1], [], []>} : vector<24x16xbf16>, vector<16x16xbf16>, vector<24x16xf32> -> vector<24x16xf32>
    %339 = arith.addf %333, %338 : vector<24x16xf32>
    %c13_306 = arith.constant 13 : index
    %c0_307 = arith.constant 0 : index
    %340 = vector.load %arg17[%c13_306, %c0_307] : memref<38x16xf32, #tpu.memory_space<vmem>>, vector<24x16xf32>
    %341 = arith.truncf %340 : vector<24x16xf32> to vector<24x16xbf16>
    %c7_308 = arith.constant 7 : index
    %c0_309 = arith.constant 0 : index
    %c0_310 = arith.constant 0 : index
    %342 = vector.load %arg13[%c7_308, %c0_309, %c0_310] : memref<9x16x16xbf16, #tpu.memory_space<vmem>>, vector<1x16x16xbf16>
    %343 = vector.shape_cast %342 : vector<1x16x16xbf16> to vector<16x16xbf16>
    %cst_311 = arith.constant dense<0.000000e+00> : vector<24x16xf32>
    %344 = tpu.matmul %341, %343, %cst_311 {dimension_numbers = #tpu.dot_dimension_numbers<[1], [0], [0], [1], [0, 0, 1, 1], [], []>} : vector<24x16xbf16>, vector<16x16xbf16>, vector<24x16xf32> -> vector<24x16xf32>
    %345 = arith.addf %339, %344 : vector<24x16xf32>
    %c14_312 = arith.constant 14 : index
    %c0_313 = arith.constant 0 : index
    %346 = vector.load %arg17[%c14_312, %c0_313] : memref<38x16xf32, #tpu.memory_space<vmem>>, vector<24x16xf32>
    %347 = arith.truncf %346 : vector<24x16xf32> to vector<24x16xbf16>
    %c8_314 = arith.constant 8 : index
    %c0_315 = arith.constant 0 : index
    %c0_316 = arith.constant 0 : index
    %348 = vector.load %arg13[%c8_314, %c0_315, %c0_316] : memref<9x16x16xbf16, #tpu.memory_space<vmem>>, vector<1x16x16xbf16>
    %349 = vector.shape_cast %348 : vector<1x16x16xbf16> to vector<16x16xbf16>
    %cst_317 = arith.constant dense<0.000000e+00> : vector<24x16xf32>
    %350 = tpu.matmul %347, %349, %cst_317 {dimension_numbers = #tpu.dot_dimension_numbers<[1], [0], [0], [1], [0, 0, 1, 1], [], []>} : vector<24x16xbf16>, vector<16x16xbf16>, vector<24x16xf32> -> vector<24x16xf32>
    %351 = arith.addf %345, %350 : vector<24x16xf32>
    %c0_318 = arith.constant 0 : index
    %c0_319 = arith.constant 0 : index
    %352 = vector.load %arg14[%c0_318, %c0_319] : memref<1x16xf32, #tpu.memory_space<vmem>>, vector<1x16xf32>
    %353 = vector.broadcast %352 : vector<1x16xf32> to vector<24x16xf32>
    %354 = arith.mulf %351, %353 : vector<24x16xf32>
    %c0_320 = arith.constant 0 : index
    %c0_321 = arith.constant 0 : index
    %355 = vector.load %arg15[%c0_320, %c0_321] : memref<1x16xf32, #tpu.memory_space<vmem>>, vector<1x16xf32>
    %356 = vector.broadcast %355 : vector<1x16xf32> to vector<24x16xf32>
    %357 = arith.addf %354, %356 : vector<24x16xf32>
    %c7_322 = arith.constant 7 : index
    %c0_323 = arith.constant 0 : index
    %358 = vector.load %arg18[%c7_322, %c0_323] : memref<38x16xf32, #tpu.memory_space<vmem>>, vector<4x16xf32>
    %359 = vector.extract_strided_slice %357 {offsets = [0, 0], sizes = [4, 16], strides = [1, 1]} : vector<24x16xf32> to vector<4x16xf32>
    %360 = arith.addf %359, %358 : vector<4x16xf32>
    %cst_324 = arith.constant 0.000000e+00 : f32
    %361 = vector.broadcast %cst_324 : f32 to vector<4x16xf32>
    %362 = arith.maximumf %360, %361 : vector<4x16xf32>
    %c0_325 = arith.constant 0 : index
    %c0_326 = arith.constant 0 : index
    %c0_327 = arith.constant 0 : index
    %c0_328 = arith.constant 0 : index
    %363 = vector.load %arg16[%c0_325, %c0_326, %c0_327, %c0_328] : memref<1x4x4x16xf32, #tpu.memory_space<vmem>>, vector<1x1x4x16xf32>
    %364 = vector.shape_cast %363 : vector<1x1x4x16xf32> to vector<4x16xf32>
    %365 = vector.shape_cast %362 : vector<4x16xf32> to vector<1x1x4x16xf32>
    tpu.vector_store %arg16[%c0_325, %c0_326, %c0_327, %c0_328], %365 {strides = array<i32>} : memref<1x4x4x16xf32, #tpu.memory_space<vmem>>, vector<1x1x4x16xf32>,
    %c13_329 = arith.constant 13 : index
    %c0_330 = arith.constant 0 : index
    %366 = vector.load %arg18[%c13_329, %c0_330] : memref<38x16xf32, #tpu.memory_space<vmem>>, vector<4x16xf32>
    %367 = vector.extract_strided_slice %357 {offsets = [6, 0], sizes = [4, 16], strides = [1, 1]} : vector<24x16xf32> to vector<4x16xf32>
    %368 = arith.addf %367, %366 : vector<4x16xf32>
    %cst_331 = arith.constant 0.000000e+00 : f32
    %369 = vector.broadcast %cst_331 : f32 to vector<4x16xf32>
    %370 = arith.maximumf %368, %369 : vector<4x16xf32>
    %c0_332 = arith.constant 0 : index
    %c1_333 = arith.constant 1 : index
    %c0_334 = arith.constant 0 : index
    %c0_335 = arith.constant 0 : index
    %371 = vector.load %arg16[%c0_332, %c1_333, %c0_334, %c0_335] : memref<1x4x4x16xf32, #tpu.memory_space<vmem>>, vector<1x1x4x16xf32>
    %372 = vector.shape_cast %371 : vector<1x1x4x16xf32> to vector<4x16xf32>
    %373 = vector.shape_cast %370 : vector<4x16xf32> to vector<1x1x4x16xf32>
    tpu.vector_store %arg16[%c0_332, %c1_333, %c0_334, %c0_335], %373 {strides = array<i32>} : memref<1x4x4x16xf32, #tpu.memory_space<vmem>>, vector<1x1x4x16xf32>,
    %c19_336 = arith.constant 19 : index
    %c0_337 = arith.constant 0 : index
    %374 = vector.load %arg18[%c19_336, %c0_337] : memref<38x16xf32, #tpu.memory_space<vmem>>, vector<4x16xf32>
    %375 = vector.extract_strided_slice %357 {offsets = [12, 0], sizes = [4, 16], strides = [1, 1]} : vector<24x16xf32> to vector<4x16xf32>
    %376 = arith.addf %375, %374 : vector<4x16xf32>
    %cst_338 = arith.constant 0.000000e+00 : f32
    %377 = vector.broadcast %cst_338 : f32 to vector<4x16xf32>
    %378 = arith.maximumf %376, %377 : vector<4x16xf32>
    %c0_339 = arith.constant 0 : index
    %c2_340 = arith.constant 2 : index
    %c0_341 = arith.constant 0 : index
    %c0_342 = arith.constant 0 : index
    %379 = vector.load %arg16[%c0_339, %c2_340, %c0_341, %c0_342] : memref<1x4x4x16xf32, #tpu.memory_space<vmem>>, vector<1x1x4x16xf32>
    %380 = vector.shape_cast %379 : vector<1x1x4x16xf32> to vector<4x16xf32>
    %381 = vector.shape_cast %378 : vector<4x16xf32> to vector<1x1x4x16xf32>
    tpu.vector_store %arg16[%c0_339, %c2_340, %c0_341, %c0_342], %381 {strides = array<i32>} : memref<1x4x4x16xf32, #tpu.memory_space<vmem>>, vector<1x1x4x16xf32>,
    %c25_343 = arith.constant 25 : index
    %c0_344 = arith.constant 0 : index
    %382 = vector.load %arg18[%c25_343, %c0_344] : memref<38x16xf32, #tpu.memory_space<vmem>>, vector<4x16xf32>
    %383 = vector.extract_strided_slice %357 {offsets = [18, 0], sizes = [4, 16], strides = [1, 1]} : vector<24x16xf32> to vector<4x16xf32>
    %384 = arith.addf %383, %382 : vector<4x16xf32>
    %cst_345 = arith.constant 0.000000e+00 : f32
    %385 = vector.broadcast %cst_345 : f32 to vector<4x16xf32>
    %386 = arith.maximumf %384, %385 : vector<4x16xf32>
    %c0_346 = arith.constant 0 : index
    %c3_347 = arith.constant 3 : index
    %c0_348 = arith.constant 0 : index
    %c0_349 = arith.constant 0 : index
    %387 = vector.load %arg16[%c0_346, %c3_347, %c0_348, %c0_349] : memref<1x4x4x16xf32, #tpu.memory_space<vmem>>, vector<1x1x4x16xf32>
    %388 = vector.shape_cast %387 : vector<1x1x4x16xf32> to vector<4x16xf32>
    %389 = vector.shape_cast %386 : vector<4x16xf32> to vector<1x1x4x16xf32>
    tpu.vector_store %arg16[%c0_346, %c3_347, %c0_348, %c0_349], %389 {strides = array<i32>} : memref<1x4x4x16xf32, #tpu.memory_space<vmem>>, vector<1x1x4x16xf32>,
    return
  }
  func.func @transform_0(%arg0: i32) -> (i32, i32, i32) {
    %c0_i32 = arith.constant 0 : i32
    %c0_i32_0 = arith.constant 0 : i32
    %c0_i32_1 = arith.constant 0 : i32
    return %arg0, %c0_i32, %c0_i32_0 : i32, i32, i32
  }
  func.func @transform_1(%arg0: i32) -> (i32, i32, i32) {
    %c0_i32 = arith.constant 0 : i32
    %c0_i32_0 = arith.constant 0 : i32
    %c0_i32_1 = arith.constant 0 : i32
    %c0_i32_2 = arith.constant 0 : i32
    return %c0_i32, %c0_i32_0, %c0_i32_1 : i32, i32, i32
  }
  func.func @transform_2(%arg0: i32) -> (i32, i32) {
    %c0_i32 = arith.constant 0 : i32
    %c0_i32_0 = arith.constant 0 : i32
    %c0_i32_1 = arith.constant 0 : i32
    return %c0_i32, %c0_i32_0 : i32, i32
  }
  func.func @transform_3(%arg0: i32) -> (i32, i32) {
    %c0_i32 = arith.constant 0 : i32
    %c0_i32_0 = arith.constant 0 : i32
    %c0_i32_1 = arith.constant 0 : i32
    return %c0_i32, %c0_i32_0 : i32, i32
  }
  func.func @transform_4(%arg0: i32) -> (i32, i32, i32) {
    %c0_i32 = arith.constant 0 : i32
    %c0_i32_0 = arith.constant 0 : i32
    %c0_i32_1 = arith.constant 0 : i32
    %c0_i32_2 = arith.constant 0 : i32
    return %c0_i32, %c0_i32_0, %c0_i32_1 : i32, i32, i32
  }
  func.func @transform_5(%arg0: i32) -> (i32, i32) {
    %c0_i32 = arith.constant 0 : i32
    %c0_i32_0 = arith.constant 0 : i32
    %c0_i32_1 = arith.constant 0 : i32
    return %c0_i32, %c0_i32_0 : i32, i32
  }
  func.func @transform_6(%arg0: i32) -> (i32, i32, i32) {
    %c0_i32 = arith.constant 0 : i32
    %c0_i32_0 = arith.constant 0 : i32
    %c0_i32_1 = arith.constant 0 : i32
    %c0_i32_2 = arith.constant 0 : i32
    return %c0_i32, %c0_i32_0, %c0_i32_1 : i32, i32, i32
  }
  func.func @transform_7(%arg0: i32) -> (i32, i32) {
    %c0_i32 = arith.constant 0 : i32
    %c0_i32_0 = arith.constant 0 : i32
    %c0_i32_1 = arith.constant 0 : i32
    return %c0_i32, %c0_i32_0 : i32, i32
  }
  func.func @transform_8(%arg0: i32) -> (i32, i32) {
    %c0_i32 = arith.constant 0 : i32
    %c0_i32_0 = arith.constant 0 : i32
    %c0_i32_1 = arith.constant 0 : i32
    return %c0_i32, %c0_i32_0 : i32, i32
  }
  func.func @transform_9(%arg0: i32) -> (i32, i32, i32) {
    %c0_i32 = arith.constant 0 : i32
    %c0_i32_0 = arith.constant 0 : i32
    %c0_i32_1 = arith.constant 0 : i32
    %c0_i32_2 = arith.constant 0 : i32
    return %c0_i32, %c0_i32_0, %c0_i32_1 : i32, i32, i32
  }
  func.func @transform_10(%arg0: i32) -> (i32, i32) {
    %c0_i32 = arith.constant 0 : i32
    %c0_i32_0 = arith.constant 0 : i32
    %c0_i32_1 = arith.constant 0 : i32
    return %c0_i32, %c0_i32_0 : i32, i32
  }
  func.func @transform_11(%arg0: i32) -> (i32, i32) {
    %c0_i32 = arith.constant 0 : i32
    %c0_i32_0 = arith.constant 0 : i32
    %c0_i32_1 = arith.constant 0 : i32
    return %c0_i32, %c0_i32_0 : i32, i32
  }
  func.func @transform_12(%arg0: i32) -> (i32, i32, i32) {
    %c0_i32 = arith.constant 0 : i32
    %c0_i32_0 = arith.constant 0 : i32
    %c0_i32_1 = arith.constant 0 : i32
    %c0_i32_2 = arith.constant 0 : i32
    return %c0_i32, %c0_i32_0, %c0_i32_1 : i32, i32, i32
  }
  func.func @transform_13(%arg0: i32) -> (i32, i32) {
    %c0_i32 = arith.constant 0 : i32
    %c0_i32_0 = arith.constant 0 : i32
    %c0_i32_1 = arith.constant 0 : i32
    return %c0_i32, %c0_i32_0 : i32, i32
  }
  func.func @transform_14(%arg0: i32) -> (i32, i32) {
    %c0_i32 = arith.constant 0 : i32
    %c0_i32_0 = arith.constant 0 : i32
    %c0_i32_1 = arith.constant 0 : i32
    return %c0_i32, %c0_i32_0 : i32, i32
  }
  func.func @transform_15(%arg0: i32) -> (i32, i32, i32, i32) {
    %c0_i32 = arith.constant 0 : i32
    %c0_i32_0 = arith.constant 0 : i32
    %c0_i32_1 = arith.constant 0 : i32
    %c0_i32_2 = arith.constant 0 : i32
    return %arg0, %c0_i32, %c0_i32_0, %c0_i32_1 : i32, i32, i32, i32
  }
}

module attributes {stable_mosaic.version = 11 : i64} {
  func.func @kernel(%arg0: i32, %arg1: memref<1x44x16xf32, #tpu.memory_space<vmem>>, %arg2: memref<9x16x32xbf16, #tpu.memory_space<vmem>>, %arg3: memref<1x32xf32, #tpu.memory_space<vmem>>, %arg4: memref<1x32xf32, #tpu.memory_space<vmem>>, %arg5: memref<9x16x32xbf16, #tpu.memory_space<vmem>>, %arg6: memref<1x32xf32, #tpu.memory_space<vmem>>, %arg7: memref<9x32x32xbf16, #tpu.memory_space<vmem>>, %arg8: memref<1x32xf32, #tpu.memory_space<vmem>>, %arg9: memref<1x32xf32, #tpu.memory_space<vmem>>, %arg10: memref<9x32x32xbf16, #tpu.memory_space<vmem>>, %arg11: memref<1x32xf32, #tpu.memory_space<vmem>>, %arg12: memref<1x32xf32, #tpu.memory_space<vmem>>, %arg13: memref<9x32x32xbf16, #tpu.memory_space<vmem>>, %arg14: memref<1x32xf32, #tpu.memory_space<vmem>>, %arg15: memref<1x32xf32, #tpu.memory_space<vmem>>, %arg16: memref<1x2x2x32xf32, #tpu.memory_space<vmem>>, %arg17: memref<18x32xf32, #tpu.memory_space<vmem>>, %arg18: memref<18x32xf32, #tpu.memory_space<vmem>>) attributes {dimension_semantics = [#tpu.dimension_semantics<parallel>], iteration_bounds = array<i64: 2>, scalar_prefetch = 0 : i64, scratch_operands = 2 : i64, tpu.core_type = #tpu.core_type<tc>, window_params = [{transform_indices = @transform_0, window_bounds = array<i64: 1, 44, 16>}, {pipeline_mode = #tpu.pipeline_mode<synchronous>, transform_indices = @transform_1, window_bounds = array<i64: 9, 16, 32>}, {pipeline_mode = #tpu.pipeline_mode<synchronous>, transform_indices = @transform_2, window_bounds = array<i64: 1, 32>}, {pipeline_mode = #tpu.pipeline_mode<synchronous>, transform_indices = @transform_3, window_bounds = array<i64: 1, 32>}, {pipeline_mode = #tpu.pipeline_mode<synchronous>, transform_indices = @transform_4, window_bounds = array<i64: 9, 16, 32>}, {pipeline_mode = #tpu.pipeline_mode<synchronous>, transform_indices = @transform_5, window_bounds = array<i64: 1, 32>}, {pipeline_mode = #tpu.pipeline_mode<synchronous>, transform_indices = @transform_6, window_bounds = array<i64: 9, 32, 32>}, {pipeline_mode = #tpu.pipeline_mode<synchronous>, transform_indices = @transform_7, window_bounds = array<i64: 1, 32>}, {pipeline_mode = #tpu.pipeline_mode<synchronous>, transform_indices = @transform_8, window_bounds = array<i64: 1, 32>}, {pipeline_mode = #tpu.pipeline_mode<synchronous>, transform_indices = @transform_9, window_bounds = array<i64: 9, 32, 32>}, {pipeline_mode = #tpu.pipeline_mode<synchronous>, transform_indices = @transform_10, window_bounds = array<i64: 1, 32>}, {pipeline_mode = #tpu.pipeline_mode<synchronous>, transform_indices = @transform_11, window_bounds = array<i64: 1, 32>}, {pipeline_mode = #tpu.pipeline_mode<synchronous>, transform_indices = @transform_12, window_bounds = array<i64: 9, 32, 32>}, {pipeline_mode = #tpu.pipeline_mode<synchronous>, transform_indices = @transform_13, window_bounds = array<i64: 1, 32>}, {pipeline_mode = #tpu.pipeline_mode<synchronous>, transform_indices = @transform_14, window_bounds = array<i64: 1, 32>}, {transform_indices = @transform_15, window_bounds = array<i64: 1, 2, 2, 32>}]} {
    %cst = arith.constant 0.000000e+00 : f32
    %0 = vector.broadcast %cst : f32 to vector<18x32xf32>
    %c0 = arith.constant 0 : index
    %c0_0 = arith.constant 0 : index
    %1 = vector.load %arg17[%c0, %c0_0] : memref<18x32xf32, #tpu.memory_space<vmem>>, vector<18x32xf32>
    tpu.vector_store %arg17[%c0, %c0_0], %0 {strides = array<i32>} : memref<18x32xf32, #tpu.memory_space<vmem>>, vector<18x32xf32>,
    %cst_1 = arith.constant 0.000000e+00 : f32
    %2 = vector.broadcast %cst_1 : f32 to vector<18x32xf32>
    %c0_2 = arith.constant 0 : index
    %c0_3 = arith.constant 0 : index
    %3 = vector.load %arg18[%c0_2, %c0_3] : memref<18x32xf32, #tpu.memory_space<vmem>>, vector<18x32xf32>
    tpu.vector_store %arg18[%c0_2, %c0_3], %2 {strides = array<i32>} : memref<18x32xf32, #tpu.memory_space<vmem>>, vector<18x32xf32>,
    %c0_4 = arith.constant 0 : index
    %c0_5 = arith.constant 0 : index
    %c0_6 = arith.constant 0 : index
    %4 = vector.load %arg1[%c0_4, %c0_5, %c0_6] : memref<1x44x16xf32, #tpu.memory_space<vmem>>, vector<1x6x16xf32>
    %5 = vector.shape_cast %4 : vector<1x6x16xf32> to vector<6x16xf32>
    %6 = arith.truncf %5 : vector<6x16xf32> to vector<6x16xbf16>
    %c0_7 = arith.constant 0 : index
    %c0_8 = arith.constant 0 : index
    %c0_9 = arith.constant 0 : index
    %7 = vector.load %arg2[%c0_7, %c0_8, %c0_9] : memref<9x16x32xbf16, #tpu.memory_space<vmem>>, vector<1x16x32xbf16>
    %8 = vector.shape_cast %7 : vector<1x16x32xbf16> to vector<16x32xbf16>
    %cst_10 = arith.constant dense<0.000000e+00> : vector<6x32xf32>
    %9 = tpu.matmul %6, %8, %cst_10 {dimension_numbers = #tpu.dot_dimension_numbers<[1], [0], [0], [1], [0, 0, 1, 1], [], []>} : vector<6x16xbf16>, vector<16x32xbf16>, vector<6x32xf32> -> vector<6x32xf32>
    %c0_11 = arith.constant 0 : index
    %c11 = arith.constant 11 : index
    %c0_12 = arith.constant 0 : index
    %10 = vector.load %arg1[%c0_11, %c11, %c0_12] : memref<1x44x16xf32, #tpu.memory_space<vmem>>, vector<1x6x16xf32>
    %11 = vector.shape_cast %10 : vector<1x6x16xf32> to vector<6x16xf32>
    %12 = arith.truncf %11 : vector<6x16xf32> to vector<6x16xbf16>
    %c1 = arith.constant 1 : index
    %c0_13 = arith.constant 0 : index
    %c0_14 = arith.constant 0 : index
    %13 = vector.load %arg2[%c1, %c0_13, %c0_14] : memref<9x16x32xbf16, #tpu.memory_space<vmem>>, vector<1x16x32xbf16>
    %14 = vector.shape_cast %13 : vector<1x16x32xbf16> to vector<16x32xbf16>
    %cst_15 = arith.constant dense<0.000000e+00> : vector<6x32xf32>
    %15 = tpu.matmul %12, %14, %cst_15 {dimension_numbers = #tpu.dot_dimension_numbers<[1], [0], [0], [1], [0, 0, 1, 1], [], []>} : vector<6x16xbf16>, vector<16x32xbf16>, vector<6x32xf32> -> vector<6x32xf32>
    %16 = arith.addf %9, %15 : vector<6x32xf32>
    %c0_16 = arith.constant 0 : index
    %c1_17 = arith.constant 1 : index
    %c0_18 = arith.constant 0 : index
    %17 = vector.load %arg1[%c0_16, %c1_17, %c0_18] : memref<1x44x16xf32, #tpu.memory_space<vmem>>, vector<1x6x16xf32>
    %18 = vector.shape_cast %17 : vector<1x6x16xf32> to vector<6x16xf32>
    %19 = arith.truncf %18 : vector<6x16xf32> to vector<6x16xbf16>
    %c2 = arith.constant 2 : index
    %c0_19 = arith.constant 0 : index
    %c0_20 = arith.constant 0 : index
    %20 = vector.load %arg2[%c2, %c0_19, %c0_20] : memref<9x16x32xbf16, #tpu.memory_space<vmem>>, vector<1x16x32xbf16>
    %21 = vector.shape_cast %20 : vector<1x16x32xbf16> to vector<16x32xbf16>
    %cst_21 = arith.constant dense<0.000000e+00> : vector<6x32xf32>
    %22 = tpu.matmul %19, %21, %cst_21 {dimension_numbers = #tpu.dot_dimension_numbers<[1], [0], [0], [1], [0, 0, 1, 1], [], []>} : vector<6x16xbf16>, vector<16x32xbf16>, vector<6x32xf32> -> vector<6x32xf32>
    %23 = arith.addf %16, %22 : vector<6x32xf32>
    %c0_22 = arith.constant 0 : index
    %c22 = arith.constant 22 : index
    %c0_23 = arith.constant 0 : index
    %24 = vector.load %arg1[%c0_22, %c22, %c0_23] : memref<1x44x16xf32, #tpu.memory_space<vmem>>, vector<1x6x16xf32>
    %25 = vector.shape_cast %24 : vector<1x6x16xf32> to vector<6x16xf32>
    %26 = arith.truncf %25 : vector<6x16xf32> to vector<6x16xbf16>
    %c3 = arith.constant 3 : index
    %c0_24 = arith.constant 0 : index
    %c0_25 = arith.constant 0 : index
    %27 = vector.load %arg2[%c3, %c0_24, %c0_25] : memref<9x16x32xbf16, #tpu.memory_space<vmem>>, vector<1x16x32xbf16>
    %28 = vector.shape_cast %27 : vector<1x16x32xbf16> to vector<16x32xbf16>
    %cst_26 = arith.constant dense<0.000000e+00> : vector<6x32xf32>
    %29 = tpu.matmul %26, %28, %cst_26 {dimension_numbers = #tpu.dot_dimension_numbers<[1], [0], [0], [1], [0, 0, 1, 1], [], []>} : vector<6x16xbf16>, vector<16x32xbf16>, vector<6x32xf32> -> vector<6x32xf32>
    %30 = arith.addf %23, %29 : vector<6x32xf32>
    %c0_27 = arith.constant 0 : index
    %c33 = arith.constant 33 : index
    %c0_28 = arith.constant 0 : index
    %31 = vector.load %arg1[%c0_27, %c33, %c0_28] : memref<1x44x16xf32, #tpu.memory_space<vmem>>, vector<1x6x16xf32>
    %32 = vector.shape_cast %31 : vector<1x6x16xf32> to vector<6x16xf32>
    %33 = arith.truncf %32 : vector<6x16xf32> to vector<6x16xbf16>
    %c4 = arith.constant 4 : index
    %c0_29 = arith.constant 0 : index
    %c0_30 = arith.constant 0 : index
    %34 = vector.load %arg2[%c4, %c0_29, %c0_30] : memref<9x16x32xbf16, #tpu.memory_space<vmem>>, vector<1x16x32xbf16>
    %35 = vector.shape_cast %34 : vector<1x16x32xbf16> to vector<16x32xbf16>
    %cst_31 = arith.constant dense<0.000000e+00> : vector<6x32xf32>
    %36 = tpu.matmul %33, %35, %cst_31 {dimension_numbers = #tpu.dot_dimension_numbers<[1], [0], [0], [1], [0, 0, 1, 1], [], []>} : vector<6x16xbf16>, vector<16x32xbf16>, vector<6x32xf32> -> vector<6x32xf32>
    %37 = arith.addf %30, %36 : vector<6x32xf32>
    %c0_32 = arith.constant 0 : index
    %c23 = arith.constant 23 : index
    %c0_33 = arith.constant 0 : index
    %38 = vector.load %arg1[%c0_32, %c23, %c0_33] : memref<1x44x16xf32, #tpu.memory_space<vmem>>, vector<1x6x16xf32>
    %39 = vector.shape_cast %38 : vector<1x6x16xf32> to vector<6x16xf32>
    %40 = arith.truncf %39 : vector<6x16xf32> to vector<6x16xbf16>
    %c5 = arith.constant 5 : index
    %c0_34 = arith.constant 0 : index
    %c0_35 = arith.constant 0 : index
    %41 = vector.load %arg2[%c5, %c0_34, %c0_35] : memref<9x16x32xbf16, #tpu.memory_space<vmem>>, vector<1x16x32xbf16>
    %42 = vector.shape_cast %41 : vector<1x16x32xbf16> to vector<16x32xbf16>
    %cst_36 = arith.constant dense<0.000000e+00> : vector<6x32xf32>
    %43 = tpu.matmul %40, %42, %cst_36 {dimension_numbers = #tpu.dot_dimension_numbers<[1], [0], [0], [1], [0, 0, 1, 1], [], []>} : vector<6x16xbf16>, vector<16x32xbf16>, vector<6x32xf32> -> vector<6x32xf32>
    %44 = arith.addf %37, %43 : vector<6x32xf32>
    %c0_37 = arith.constant 0 : index
    %c3_38 = arith.constant 3 : index
    %c0_39 = arith.constant 0 : index
    %45 = vector.load %arg1[%c0_37, %c3_38, %c0_39] : memref<1x44x16xf32, #tpu.memory_space<vmem>>, vector<1x6x16xf32>
    %46 = vector.shape_cast %45 : vector<1x6x16xf32> to vector<6x16xf32>
    %47 = arith.truncf %46 : vector<6x16xf32> to vector<6x16xbf16>
    %c6 = arith.constant 6 : index
    %c0_40 = arith.constant 0 : index
    %c0_41 = arith.constant 0 : index
    %48 = vector.load %arg2[%c6, %c0_40, %c0_41] : memref<9x16x32xbf16, #tpu.memory_space<vmem>>, vector<1x16x32xbf16>
    %49 = vector.shape_cast %48 : vector<1x16x32xbf16> to vector<16x32xbf16>
    %cst_42 = arith.constant dense<0.000000e+00> : vector<6x32xf32>
    %50 = tpu.matmul %47, %49, %cst_42 {dimension_numbers = #tpu.dot_dimension_numbers<[1], [0], [0], [1], [0, 0, 1, 1], [], []>} : vector<6x16xbf16>, vector<16x32xbf16>, vector<6x32xf32> -> vector<6x32xf32>
    %51 = arith.addf %44, %50 : vector<6x32xf32>
    %c0_43 = arith.constant 0 : index
    %c14 = arith.constant 14 : index
    %c0_44 = arith.constant 0 : index
    %52 = vector.load %arg1[%c0_43, %c14, %c0_44] : memref<1x44x16xf32, #tpu.memory_space<vmem>>, vector<1x6x16xf32>
    %53 = vector.shape_cast %52 : vector<1x6x16xf32> to vector<6x16xf32>
    %54 = arith.truncf %53 : vector<6x16xf32> to vector<6x16xbf16>
    %c7 = arith.constant 7 : index
    %c0_45 = arith.constant 0 : index
    %c0_46 = arith.constant 0 : index
    %55 = vector.load %arg2[%c7, %c0_45, %c0_46] : memref<9x16x32xbf16, #tpu.memory_space<vmem>>, vector<1x16x32xbf16>
    %56 = vector.shape_cast %55 : vector<1x16x32xbf16> to vector<16x32xbf16>
    %cst_47 = arith.constant dense<0.000000e+00> : vector<6x32xf32>
    %57 = tpu.matmul %54, %56, %cst_47 {dimension_numbers = #tpu.dot_dimension_numbers<[1], [0], [0], [1], [0, 0, 1, 1], [], []>} : vector<6x16xbf16>, vector<16x32xbf16>, vector<6x32xf32> -> vector<6x32xf32>
    %58 = arith.addf %51, %57 : vector<6x32xf32>
    %c0_48 = arith.constant 0 : index
    %c4_49 = arith.constant 4 : index
    %c0_50 = arith.constant 0 : index
    %59 = vector.load %arg1[%c0_48, %c4_49, %c0_50] : memref<1x44x16xf32, #tpu.memory_space<vmem>>, vector<1x6x16xf32>
    %60 = vector.shape_cast %59 : vector<1x6x16xf32> to vector<6x16xf32>
    %61 = arith.truncf %60 : vector<6x16xf32> to vector<6x16xbf16>
    %c8 = arith.constant 8 : index
    %c0_51 = arith.constant 0 : index
    %c0_52 = arith.constant 0 : index
    %62 = vector.load %arg2[%c8, %c0_51, %c0_52] : memref<9x16x32xbf16, #tpu.memory_space<vmem>>, vector<1x16x32xbf16>
    %63 = vector.shape_cast %62 : vector<1x16x32xbf16> to vector<16x32xbf16>
    %cst_53 = arith.constant dense<0.000000e+00> : vector<6x32xf32>
    %64 = tpu.matmul %61, %63, %cst_53 {dimension_numbers = #tpu.dot_dimension_numbers<[1], [0], [0], [1], [0, 0, 1, 1], [], []>} : vector<6x16xbf16>, vector<16x32xbf16>, vector<6x32xf32> -> vector<6x32xf32>
    %65 = arith.addf %58, %64 : vector<6x32xf32>
    %c0_54 = arith.constant 0 : index
    %c0_55 = arith.constant 0 : index
    %c0_56 = arith.constant 0 : index
    %66 = vector.load %arg1[%c0_54, %c0_55, %c0_56] : memref<1x44x16xf32, #tpu.memory_space<vmem>>, vector<1x6x16xf32>
    %67 = vector.shape_cast %66 : vector<1x6x16xf32> to vector<6x16xf32>
    %68 = arith.truncf %67 : vector<6x16xf32> to vector<6x16xbf16>
    %c0_57 = arith.constant 0 : index
    %c0_58 = arith.constant 0 : index
    %c0_59 = arith.constant 0 : index
    %69 = vector.load %arg5[%c0_57, %c0_58, %c0_59] : memref<9x16x32xbf16, #tpu.memory_space<vmem>>, vector<1x16x32xbf16>
    %70 = vector.shape_cast %69 : vector<1x16x32xbf16> to vector<16x32xbf16>
    %cst_60 = arith.constant dense<0.000000e+00> : vector<6x32xf32>
    %71 = tpu.matmul %68, %70, %cst_60 {dimension_numbers = #tpu.dot_dimension_numbers<[1], [0], [0], [1], [0, 0, 1, 1], [], []>} : vector<6x16xbf16>, vector<16x32xbf16>, vector<6x32xf32> -> vector<6x32xf32>
    %c0_61 = arith.constant 0 : index
    %c11_62 = arith.constant 11 : index
    %c0_63 = arith.constant 0 : index
    %72 = vector.load %arg1[%c0_61, %c11_62, %c0_63] : memref<1x44x16xf32, #tpu.memory_space<vmem>>, vector<1x6x16xf32>
    %73 = vector.shape_cast %72 : vector<1x6x16xf32> to vector<6x16xf32>
    %74 = arith.truncf %73 : vector<6x16xf32> to vector<6x16xbf16>
    %c1_64 = arith.constant 1 : index
    %c0_65 = arith.constant 0 : index
    %c0_66 = arith.constant 0 : index
    %75 = vector.load %arg5[%c1_64, %c0_65, %c0_66] : memref<9x16x32xbf16, #tpu.memory_space<vmem>>, vector<1x16x32xbf16>
    %76 = vector.shape_cast %75 : vector<1x16x32xbf16> to vector<16x32xbf16>
    %cst_67 = arith.constant dense<0.000000e+00> : vector<6x32xf32>
    %77 = tpu.matmul %74, %76, %cst_67 {dimension_numbers = #tpu.dot_dimension_numbers<[1], [0], [0], [1], [0, 0, 1, 1], [], []>} : vector<6x16xbf16>, vector<16x32xbf16>, vector<6x32xf32> -> vector<6x32xf32>
    %78 = arith.addf %71, %77 : vector<6x32xf32>
    %c0_68 = arith.constant 0 : index
    %c1_69 = arith.constant 1 : index
    %c0_70 = arith.constant 0 : index
    %79 = vector.load %arg1[%c0_68, %c1_69, %c0_70] : memref<1x44x16xf32, #tpu.memory_space<vmem>>, vector<1x6x16xf32>
    %80 = vector.shape_cast %79 : vector<1x6x16xf32> to vector<6x16xf32>
    %81 = arith.truncf %80 : vector<6x16xf32> to vector<6x16xbf16>
    %c2_71 = arith.constant 2 : index
    %c0_72 = arith.constant 0 : index
    %c0_73 = arith.constant 0 : index
    %82 = vector.load %arg5[%c2_71, %c0_72, %c0_73] : memref<9x16x32xbf16, #tpu.memory_space<vmem>>, vector<1x16x32xbf16>
    %83 = vector.shape_cast %82 : vector<1x16x32xbf16> to vector<16x32xbf16>
    %cst_74 = arith.constant dense<0.000000e+00> : vector<6x32xf32>
    %84 = tpu.matmul %81, %83, %cst_74 {dimension_numbers = #tpu.dot_dimension_numbers<[1], [0], [0], [1], [0, 0, 1, 1], [], []>} : vector<6x16xbf16>, vector<16x32xbf16>, vector<6x32xf32> -> vector<6x32xf32>
    %85 = arith.addf %78, %84 : vector<6x32xf32>
    %c0_75 = arith.constant 0 : index
    %c22_76 = arith.constant 22 : index
    %c0_77 = arith.constant 0 : index
    %86 = vector.load %arg1[%c0_75, %c22_76, %c0_77] : memref<1x44x16xf32, #tpu.memory_space<vmem>>, vector<1x6x16xf32>
    %87 = vector.shape_cast %86 : vector<1x6x16xf32> to vector<6x16xf32>
    %88 = arith.truncf %87 : vector<6x16xf32> to vector<6x16xbf16>
    %c3_78 = arith.constant 3 : index
    %c0_79 = arith.constant 0 : index
    %c0_80 = arith.constant 0 : index
    %89 = vector.load %arg5[%c3_78, %c0_79, %c0_80] : memref<9x16x32xbf16, #tpu.memory_space<vmem>>, vector<1x16x32xbf16>
    %90 = vector.shape_cast %89 : vector<1x16x32xbf16> to vector<16x32xbf16>
    %cst_81 = arith.constant dense<0.000000e+00> : vector<6x32xf32>
    %91 = tpu.matmul %88, %90, %cst_81 {dimension_numbers = #tpu.dot_dimension_numbers<[1], [0], [0], [1], [0, 0, 1, 1], [], []>} : vector<6x16xbf16>, vector<16x32xbf16>, vector<6x32xf32> -> vector<6x32xf32>
    %92 = arith.addf %85, %91 : vector<6x32xf32>
    %c0_82 = arith.constant 0 : index
    %c33_83 = arith.constant 33 : index
    %c0_84 = arith.constant 0 : index
    %93 = vector.load %arg1[%c0_82, %c33_83, %c0_84] : memref<1x44x16xf32, #tpu.memory_space<vmem>>, vector<1x6x16xf32>
    %94 = vector.shape_cast %93 : vector<1x6x16xf32> to vector<6x16xf32>
    %95 = arith.truncf %94 : vector<6x16xf32> to vector<6x16xbf16>
    %c4_85 = arith.constant 4 : index
    %c0_86 = arith.constant 0 : index
    %c0_87 = arith.constant 0 : index
    %96 = vector.load %arg5[%c4_85, %c0_86, %c0_87] : memref<9x16x32xbf16, #tpu.memory_space<vmem>>, vector<1x16x32xbf16>
    %97 = vector.shape_cast %96 : vector<1x16x32xbf16> to vector<16x32xbf16>
    %cst_88 = arith.constant dense<0.000000e+00> : vector<6x32xf32>
    %98 = tpu.matmul %95, %97, %cst_88 {dimension_numbers = #tpu.dot_dimension_numbers<[1], [0], [0], [1], [0, 0, 1, 1], [], []>} : vector<6x16xbf16>, vector<16x32xbf16>, vector<6x32xf32> -> vector<6x32xf32>
    %99 = arith.addf %92, %98 : vector<6x32xf32>
    %c0_89 = arith.constant 0 : index
    %c23_90 = arith.constant 23 : index
    %c0_91 = arith.constant 0 : index
    %100 = vector.load %arg1[%c0_89, %c23_90, %c0_91] : memref<1x44x16xf32, #tpu.memory_space<vmem>>, vector<1x6x16xf32>
    %101 = vector.shape_cast %100 : vector<1x6x16xf32> to vector<6x16xf32>
    %102 = arith.truncf %101 : vector<6x16xf32> to vector<6x16xbf16>
    %c5_92 = arith.constant 5 : index
    %c0_93 = arith.constant 0 : index
    %c0_94 = arith.constant 0 : index
    %103 = vector.load %arg5[%c5_92, %c0_93, %c0_94] : memref<9x16x32xbf16, #tpu.memory_space<vmem>>, vector<1x16x32xbf16>
    %104 = vector.shape_cast %103 : vector<1x16x32xbf16> to vector<16x32xbf16>
    %cst_95 = arith.constant dense<0.000000e+00> : vector<6x32xf32>
    %105 = tpu.matmul %102, %104, %cst_95 {dimension_numbers = #tpu.dot_dimension_numbers<[1], [0], [0], [1], [0, 0, 1, 1], [], []>} : vector<6x16xbf16>, vector<16x32xbf16>, vector<6x32xf32> -> vector<6x32xf32>
    %106 = arith.addf %99, %105 : vector<6x32xf32>
    %c0_96 = arith.constant 0 : index
    %c3_97 = arith.constant 3 : index
    %c0_98 = arith.constant 0 : index
    %107 = vector.load %arg1[%c0_96, %c3_97, %c0_98] : memref<1x44x16xf32, #tpu.memory_space<vmem>>, vector<1x6x16xf32>
    %108 = vector.shape_cast %107 : vector<1x6x16xf32> to vector<6x16xf32>
    %109 = arith.truncf %108 : vector<6x16xf32> to vector<6x16xbf16>
    %c6_99 = arith.constant 6 : index
    %c0_100 = arith.constant 0 : index
    %c0_101 = arith.constant 0 : index
    %110 = vector.load %arg5[%c6_99, %c0_100, %c0_101] : memref<9x16x32xbf16, #tpu.memory_space<vmem>>, vector<1x16x32xbf16>
    %111 = vector.shape_cast %110 : vector<1x16x32xbf16> to vector<16x32xbf16>
    %cst_102 = arith.constant dense<0.000000e+00> : vector<6x32xf32>
    %112 = tpu.matmul %109, %111, %cst_102 {dimension_numbers = #tpu.dot_dimension_numbers<[1], [0], [0], [1], [0, 0, 1, 1], [], []>} : vector<6x16xbf16>, vector<16x32xbf16>, vector<6x32xf32> -> vector<6x32xf32>
    %113 = arith.addf %106, %112 : vector<6x32xf32>
    %c0_103 = arith.constant 0 : index
    %c14_104 = arith.constant 14 : index
    %c0_105 = arith.constant 0 : index
    %114 = vector.load %arg1[%c0_103, %c14_104, %c0_105] : memref<1x44x16xf32, #tpu.memory_space<vmem>>, vector<1x6x16xf32>
    %115 = vector.shape_cast %114 : vector<1x6x16xf32> to vector<6x16xf32>
    %116 = arith.truncf %115 : vector<6x16xf32> to vector<6x16xbf16>
    %c7_106 = arith.constant 7 : index
    %c0_107 = arith.constant 0 : index
    %c0_108 = arith.constant 0 : index
    %117 = vector.load %arg5[%c7_106, %c0_107, %c0_108] : memref<9x16x32xbf16, #tpu.memory_space<vmem>>, vector<1x16x32xbf16>
    %118 = vector.shape_cast %117 : vector<1x16x32xbf16> to vector<16x32xbf16>
    %cst_109 = arith.constant dense<0.000000e+00> : vector<6x32xf32>
    %119 = tpu.matmul %116, %118, %cst_109 {dimension_numbers = #tpu.dot_dimension_numbers<[1], [0], [0], [1], [0, 0, 1, 1], [], []>} : vector<6x16xbf16>, vector<16x32xbf16>, vector<6x32xf32> -> vector<6x32xf32>
    %120 = arith.addf %113, %119 : vector<6x32xf32>
    %c0_110 = arith.constant 0 : index
    %c4_111 = arith.constant 4 : index
    %c0_112 = arith.constant 0 : index
    %121 = vector.load %arg1[%c0_110, %c4_111, %c0_112] : memref<1x44x16xf32, #tpu.memory_space<vmem>>, vector<1x6x16xf32>
    %122 = vector.shape_cast %121 : vector<1x6x16xf32> to vector<6x16xf32>
    %123 = arith.truncf %122 : vector<6x16xf32> to vector<6x16xbf16>
    %c8_113 = arith.constant 8 : index
    %c0_114 = arith.constant 0 : index
    %c0_115 = arith.constant 0 : index
    %124 = vector.load %arg5[%c8_113, %c0_114, %c0_115] : memref<9x16x32xbf16, #tpu.memory_space<vmem>>, vector<1x16x32xbf16>
    %125 = vector.shape_cast %124 : vector<1x16x32xbf16> to vector<16x32xbf16>
    %cst_116 = arith.constant dense<0.000000e+00> : vector<6x32xf32>
    %126 = tpu.matmul %123, %125, %cst_116 {dimension_numbers = #tpu.dot_dimension_numbers<[1], [0], [0], [1], [0, 0, 1, 1], [], []>} : vector<6x16xbf16>, vector<16x32xbf16>, vector<6x32xf32> -> vector<6x32xf32>
    %127 = arith.addf %120, %126 : vector<6x32xf32>
    %c0_117 = arith.constant 0 : index
    %c0_118 = arith.constant 0 : index
    %128 = vector.load %arg6[%c0_117, %c0_118] : memref<1x32xf32, #tpu.memory_space<vmem>>, vector<1x32xf32>
    %129 = vector.broadcast %128 : vector<1x32xf32> to vector<6x32xf32>
    %130 = arith.addf %127, %129 : vector<6x32xf32>
    %c0_119 = arith.constant 0 : index
    %c0_120 = arith.constant 0 : index
    %131 = vector.load %arg3[%c0_119, %c0_120] : memref<1x32xf32, #tpu.memory_space<vmem>>, vector<1x32xf32>
    %132 = vector.broadcast %131 : vector<1x32xf32> to vector<6x32xf32>
    %133 = arith.mulf %65, %132 : vector<6x32xf32>
    %c0_121 = arith.constant 0 : index
    %c0_122 = arith.constant 0 : index
    %134 = vector.load %arg4[%c0_121, %c0_122] : memref<1x32xf32, #tpu.memory_space<vmem>>, vector<1x32xf32>
    %135 = vector.broadcast %134 : vector<1x32xf32> to vector<6x32xf32>
    %136 = arith.addf %133, %135 : vector<6x32xf32>
    %cst_123 = arith.constant 0.000000e+00 : f32
    %137 = vector.broadcast %cst_123 : f32 to vector<6x32xf32>
    %138 = arith.maximumf %136, %137 : vector<6x32xf32>
    %139 = vector.extract_strided_slice %138 {offsets = [0, 0], sizes = [2, 32], strides = [1, 1]} : vector<6x32xf32> to vector<2x32xf32>
    %c5_124 = arith.constant 5 : index
    %c0_125 = arith.constant 0 : index
    %140 = vector.load %arg17[%c5_124, %c0_125] : memref<18x32xf32, #tpu.memory_space<vmem>>, vector<2x32xf32>
    tpu.vector_store %arg17[%c5_124, %c0_125], %139 {strides = array<i32>} : memref<18x32xf32, #tpu.memory_space<vmem>>, vector<2x32xf32>,
    %141 = vector.extract_strided_slice %138 {offsets = [3, 0], sizes = [2, 32], strides = [1, 1]} : vector<6x32xf32> to vector<2x32xf32>
    %c9 = arith.constant 9 : index
    %c0_126 = arith.constant 0 : index
    %142 = vector.load %arg17[%c9, %c0_126] : memref<18x32xf32, #tpu.memory_space<vmem>>, vector<2x32xf32>
    tpu.vector_store %arg17[%c9, %c0_126], %141 {strides = array<i32>} : memref<18x32xf32, #tpu.memory_space<vmem>>, vector<2x32xf32>,
    %c0_127 = arith.constant 0 : index
    %c0_128 = arith.constant 0 : index
    %143 = vector.load %arg17[%c0_127, %c0_128] : memref<18x32xf32, #tpu.memory_space<vmem>>, vector<8x32xf32>
    %144 = arith.truncf %143 : vector<8x32xf32> to vector<8x32xbf16>
    %c0_129 = arith.constant 0 : index
    %c0_130 = arith.constant 0 : index
    %c0_131 = arith.constant 0 : index
    %145 = vector.load %arg7[%c0_129, %c0_130, %c0_131] : memref<9x32x32xbf16, #tpu.memory_space<vmem>>, vector<1x32x32xbf16>
    %146 = vector.shape_cast %145 : vector<1x32x32xbf16> to vector<32x32xbf16>
    %cst_132 = arith.constant dense<0.000000e+00> : vector<8x32xf32>
    %147 = tpu.matmul %144, %146, %cst_132 {dimension_numbers = #tpu.dot_dimension_numbers<[1], [0], [0], [1], [0, 0, 1, 1], [], []>} : vector<8x32xbf16>, vector<32x32xbf16>, vector<8x32xf32> -> vector<8x32xf32>
    %c1_133 = arith.constant 1 : index
    %c0_134 = arith.constant 0 : index
    %148 = vector.load %arg17[%c1_133, %c0_134] : memref<18x32xf32, #tpu.memory_space<vmem>>, vector<8x32xf32>
    %149 = arith.truncf %148 : vector<8x32xf32> to vector<8x32xbf16>
    %c1_135 = arith.constant 1 : index
    %c0_136 = arith.constant 0 : index
    %c0_137 = arith.constant 0 : index
    %150 = vector.load %arg7[%c1_135, %c0_136, %c0_137] : memref<9x32x32xbf16, #tpu.memory_space<vmem>>, vector<1x32x32xbf16>
    %151 = vector.shape_cast %150 : vector<1x32x32xbf16> to vector<32x32xbf16>
    %cst_138 = arith.constant dense<0.000000e+00> : vector<8x32xf32>
    %152 = tpu.matmul %149, %151, %cst_138 {dimension_numbers = #tpu.dot_dimension_numbers<[1], [0], [0], [1], [0, 0, 1, 1], [], []>} : vector<8x32xbf16>, vector<32x32xbf16>, vector<8x32xf32> -> vector<8x32xf32>
    %153 = arith.addf %147, %152 : vector<8x32xf32>
    %c2_139 = arith.constant 2 : index
    %c0_140 = arith.constant 0 : index
    %154 = vector.load %arg17[%c2_139, %c0_140] : memref<18x32xf32, #tpu.memory_space<vmem>>, vector<8x32xf32>
    %155 = arith.truncf %154 : vector<8x32xf32> to vector<8x32xbf16>
    %c2_141 = arith.constant 2 : index
    %c0_142 = arith.constant 0 : index
    %c0_143 = arith.constant 0 : index
    %156 = vector.load %arg7[%c2_141, %c0_142, %c0_143] : memref<9x32x32xbf16, #tpu.memory_space<vmem>>, vector<1x32x32xbf16>
    %157 = vector.shape_cast %156 : vector<1x32x32xbf16> to vector<32x32xbf16>
    %cst_144 = arith.constant dense<0.000000e+00> : vector<8x32xf32>
    %158 = tpu.matmul %155, %157, %cst_144 {dimension_numbers = #tpu.dot_dimension_numbers<[1], [0], [0], [1], [0, 0, 1, 1], [], []>} : vector<8x32xbf16>, vector<32x32xbf16>, vector<8x32xf32> -> vector<8x32xf32>
    %159 = arith.addf %153, %158 : vector<8x32xf32>
    %c4_145 = arith.constant 4 : index
    %c0_146 = arith.constant 0 : index
    %160 = vector.load %arg17[%c4_145, %c0_146] : memref<18x32xf32, #tpu.memory_space<vmem>>, vector<8x32xf32>
    %161 = arith.truncf %160 : vector<8x32xf32> to vector<8x32xbf16>
    %c3_147 = arith.constant 3 : index
    %c0_148 = arith.constant 0 : index
    %c0_149 = arith.constant 0 : index
    %162 = vector.load %arg7[%c3_147, %c0_148, %c0_149] : memref<9x32x32xbf16, #tpu.memory_space<vmem>>, vector<1x32x32xbf16>
    %163 = vector.shape_cast %162 : vector<1x32x32xbf16> to vector<32x32xbf16>
    %cst_150 = arith.constant dense<0.000000e+00> : vector<8x32xf32>
    %164 = tpu.matmul %161, %163, %cst_150 {dimension_numbers = #tpu.dot_dimension_numbers<[1], [0], [0], [1], [0, 0, 1, 1], [], []>} : vector<8x32xbf16>, vector<32x32xbf16>, vector<8x32xf32> -> vector<8x32xf32>
    %165 = arith.addf %159, %164 : vector<8x32xf32>
    %c5_151 = arith.constant 5 : index
    %c0_152 = arith.constant 0 : index
    %166 = vector.load %arg17[%c5_151, %c0_152] : memref<18x32xf32, #tpu.memory_space<vmem>>, vector<8x32xf32>
    %167 = arith.truncf %166 : vector<8x32xf32> to vector<8x32xbf16>
    %c4_153 = arith.constant 4 : index
    %c0_154 = arith.constant 0 : index
    %c0_155 = arith.constant 0 : index
    %168 = vector.load %arg7[%c4_153, %c0_154, %c0_155] : memref<9x32x32xbf16, #tpu.memory_space<vmem>>, vector<1x32x32xbf16>
    %169 = vector.shape_cast %168 : vector<1x32x32xbf16> to vector<32x32xbf16>
    %cst_156 = arith.constant dense<0.000000e+00> : vector<8x32xf32>
    %170 = tpu.matmul %167, %169, %cst_156 {dimension_numbers = #tpu.dot_dimension_numbers<[1], [0], [0], [1], [0, 0, 1, 1], [], []>} : vector<8x32xbf16>, vector<32x32xbf16>, vector<8x32xf32> -> vector<8x32xf32>
    %171 = arith.addf %165, %170 : vector<8x32xf32>
    %c6_157 = arith.constant 6 : index
    %c0_158 = arith.constant 0 : index
    %172 = vector.load %arg17[%c6_157, %c0_158] : memref<18x32xf32, #tpu.memory_space<vmem>>, vector<8x32xf32>
    %173 = arith.truncf %172 : vector<8x32xf32> to vector<8x32xbf16>
    %c5_159 = arith.constant 5 : index
    %c0_160 = arith.constant 0 : index
    %c0_161 = arith.constant 0 : index
    %174 = vector.load %arg7[%c5_159, %c0_160, %c0_161] : memref<9x32x32xbf16, #tpu.memory_space<vmem>>, vector<1x32x32xbf16>
    %175 = vector.shape_cast %174 : vector<1x32x32xbf16> to vector<32x32xbf16>
    %cst_162 = arith.constant dense<0.000000e+00> : vector<8x32xf32>
    %176 = tpu.matmul %173, %175, %cst_162 {dimension_numbers = #tpu.dot_dimension_numbers<[1], [0], [0], [1], [0, 0, 1, 1], [], []>} : vector<8x32xbf16>, vector<32x32xbf16>, vector<8x32xf32> -> vector<8x32xf32>
    %177 = arith.addf %171, %176 : vector<8x32xf32>
    %c8_163 = arith.constant 8 : index
    %c0_164 = arith.constant 0 : index
    %178 = vector.load %arg17[%c8_163, %c0_164] : memref<18x32xf32, #tpu.memory_space<vmem>>, vector<8x32xf32>
    %179 = arith.truncf %178 : vector<8x32xf32> to vector<8x32xbf16>
    %c6_165 = arith.constant 6 : index
    %c0_166 = arith.constant 0 : index
    %c0_167 = arith.constant 0 : index
    %180 = vector.load %arg7[%c6_165, %c0_166, %c0_167] : memref<9x32x32xbf16, #tpu.memory_space<vmem>>, vector<1x32x32xbf16>
    %181 = vector.shape_cast %180 : vector<1x32x32xbf16> to vector<32x32xbf16>
    %cst_168 = arith.constant dense<0.000000e+00> : vector<8x32xf32>
    %182 = tpu.matmul %179, %181, %cst_168 {dimension_numbers = #tpu.dot_dimension_numbers<[1], [0], [0], [1], [0, 0, 1, 1], [], []>} : vector<8x32xbf16>, vector<32x32xbf16>, vector<8x32xf32> -> vector<8x32xf32>
    %183 = arith.addf %177, %182 : vector<8x32xf32>
    %c9_169 = arith.constant 9 : index
    %c0_170 = arith.constant 0 : index
    %184 = vector.load %arg17[%c9_169, %c0_170] : memref<18x32xf32, #tpu.memory_space<vmem>>, vector<8x32xf32>
    %185 = arith.truncf %184 : vector<8x32xf32> to vector<8x32xbf16>
    %c7_171 = arith.constant 7 : index
    %c0_172 = arith.constant 0 : index
    %c0_173 = arith.constant 0 : index
    %186 = vector.load %arg7[%c7_171, %c0_172, %c0_173] : memref<9x32x32xbf16, #tpu.memory_space<vmem>>, vector<1x32x32xbf16>
    %187 = vector.shape_cast %186 : vector<1x32x32xbf16> to vector<32x32xbf16>
    %cst_174 = arith.constant dense<0.000000e+00> : vector<8x32xf32>
    %188 = tpu.matmul %185, %187, %cst_174 {dimension_numbers = #tpu.dot_dimension_numbers<[1], [0], [0], [1], [0, 0, 1, 1], [], []>} : vector<8x32xbf16>, vector<32x32xbf16>, vector<8x32xf32> -> vector<8x32xf32>
    %189 = arith.addf %183, %188 : vector<8x32xf32>
    %c10 = arith.constant 10 : index
    %c0_175 = arith.constant 0 : index
    %190 = vector.load %arg17[%c10, %c0_175] : memref<18x32xf32, #tpu.memory_space<vmem>>, vector<8x32xf32>
    %191 = arith.truncf %190 : vector<8x32xf32> to vector<8x32xbf16>
    %c8_176 = arith.constant 8 : index
    %c0_177 = arith.constant 0 : index
    %c0_178 = arith.constant 0 : index
    %192 = vector.load %arg7[%c8_176, %c0_177, %c0_178] : memref<9x32x32xbf16, #tpu.memory_space<vmem>>, vector<1x32x32xbf16>
    %193 = vector.shape_cast %192 : vector<1x32x32xbf16> to vector<32x32xbf16>
    %cst_179 = arith.constant dense<0.000000e+00> : vector<8x32xf32>
    %194 = tpu.matmul %191, %193, %cst_179 {dimension_numbers = #tpu.dot_dimension_numbers<[1], [0], [0], [1], [0, 0, 1, 1], [], []>} : vector<8x32xbf16>, vector<32x32xbf16>, vector<8x32xf32> -> vector<8x32xf32>
    %195 = arith.addf %189, %194 : vector<8x32xf32>
    %c0_180 = arith.constant 0 : index
    %c0_181 = arith.constant 0 : index
    %196 = vector.load %arg8[%c0_180, %c0_181] : memref<1x32xf32, #tpu.memory_space<vmem>>, vector<1x32xf32>
    %197 = vector.broadcast %196 : vector<1x32xf32> to vector<8x32xf32>
    %198 = arith.mulf %195, %197 : vector<8x32xf32>
    %c0_182 = arith.constant 0 : index
    %c0_183 = arith.constant 0 : index
    %199 = vector.load %arg9[%c0_182, %c0_183] : memref<1x32xf32, #tpu.memory_space<vmem>>, vector<1x32xf32>
    %200 = vector.broadcast %199 : vector<1x32xf32> to vector<8x32xf32>
    %201 = arith.addf %198, %200 : vector<8x32xf32>
    %202 = vector.extract_strided_slice %130 {offsets = [0, 0], sizes = [2, 32], strides = [1, 1]} : vector<6x32xf32> to vector<2x32xf32>
    %203 = vector.extract_strided_slice %201 {offsets = [0, 0], sizes = [2, 32], strides = [1, 1]} : vector<8x32xf32> to vector<2x32xf32>
    %204 = arith.addf %203, %202 : vector<2x32xf32>
    %cst_184 = arith.constant 0.000000e+00 : f32
    %205 = vector.broadcast %cst_184 : f32 to vector<2x32xf32>
    %206 = arith.maximumf %204, %205 : vector<2x32xf32>
    %c5_185 = arith.constant 5 : index
    %c0_186 = arith.constant 0 : index
    %207 = vector.load %arg18[%c5_185, %c0_186] : memref<18x32xf32, #tpu.memory_space<vmem>>, vector<2x32xf32>
    tpu.vector_store %arg18[%c5_185, %c0_186], %206 {strides = array<i32>} : memref<18x32xf32, #tpu.memory_space<vmem>>, vector<2x32xf32>,
    %208 = vector.extract_strided_slice %130 {offsets = [3, 0], sizes = [2, 32], strides = [1, 1]} : vector<6x32xf32> to vector<2x32xf32>
    %209 = vector.extract_strided_slice %201 {offsets = [4, 0], sizes = [2, 32], strides = [1, 1]} : vector<8x32xf32> to vector<2x32xf32>
    %210 = arith.addf %209, %208 : vector<2x32xf32>
    %cst_187 = arith.constant 0.000000e+00 : f32
    %211 = vector.broadcast %cst_187 : f32 to vector<2x32xf32>
    %212 = arith.maximumf %210, %211 : vector<2x32xf32>
    %c9_188 = arith.constant 9 : index
    %c0_189 = arith.constant 0 : index
    %213 = vector.load %arg18[%c9_188, %c0_189] : memref<18x32xf32, #tpu.memory_space<vmem>>, vector<2x32xf32>
    tpu.vector_store %arg18[%c9_188, %c0_189], %212 {strides = array<i32>} : memref<18x32xf32, #tpu.memory_space<vmem>>, vector<2x32xf32>,
    %c0_190 = arith.constant 0 : index
    %c0_191 = arith.constant 0 : index
    %214 = vector.load %arg18[%c0_190, %c0_191] : memref<18x32xf32, #tpu.memory_space<vmem>>, vector<8x32xf32>
    %215 = arith.truncf %214 : vector<8x32xf32> to vector<8x32xbf16>
    %c0_192 = arith.constant 0 : index
    %c0_193 = arith.constant 0 : index
    %c0_194 = arith.constant 0 : index
    %216 = vector.load %arg10[%c0_192, %c0_193, %c0_194] : memref<9x32x32xbf16, #tpu.memory_space<vmem>>, vector<1x32x32xbf16>
    %217 = vector.shape_cast %216 : vector<1x32x32xbf16> to vector<32x32xbf16>
    %cst_195 = arith.constant dense<0.000000e+00> : vector<8x32xf32>
    %218 = tpu.matmul %215, %217, %cst_195 {dimension_numbers = #tpu.dot_dimension_numbers<[1], [0], [0], [1], [0, 0, 1, 1], [], []>} : vector<8x32xbf16>, vector<32x32xbf16>, vector<8x32xf32> -> vector<8x32xf32>
    %c1_196 = arith.constant 1 : index
    %c0_197 = arith.constant 0 : index
    %219 = vector.load %arg18[%c1_196, %c0_197] : memref<18x32xf32, #tpu.memory_space<vmem>>, vector<8x32xf32>
    %220 = arith.truncf %219 : vector<8x32xf32> to vector<8x32xbf16>
    %c1_198 = arith.constant 1 : index
    %c0_199 = arith.constant 0 : index
    %c0_200 = arith.constant 0 : index
    %221 = vector.load %arg10[%c1_198, %c0_199, %c0_200] : memref<9x32x32xbf16, #tpu.memory_space<vmem>>, vector<1x32x32xbf16>
    %222 = vector.shape_cast %221 : vector<1x32x32xbf16> to vector<32x32xbf16>
    %cst_201 = arith.constant dense<0.000000e+00> : vector<8x32xf32>
    %223 = tpu.matmul %220, %222, %cst_201 {dimension_numbers = #tpu.dot_dimension_numbers<[1], [0], [0], [1], [0, 0, 1, 1], [], []>} : vector<8x32xbf16>, vector<32x32xbf16>, vector<8x32xf32> -> vector<8x32xf32>
    %224 = arith.addf %218, %223 : vector<8x32xf32>
    %c2_202 = arith.constant 2 : index
    %c0_203 = arith.constant 0 : index
    %225 = vector.load %arg18[%c2_202, %c0_203] : memref<18x32xf32, #tpu.memory_space<vmem>>, vector<8x32xf32>
    %226 = arith.truncf %225 : vector<8x32xf32> to vector<8x32xbf16>
    %c2_204 = arith.constant 2 : index
    %c0_205 = arith.constant 0 : index
    %c0_206 = arith.constant 0 : index
    %227 = vector.load %arg10[%c2_204, %c0_205, %c0_206] : memref<9x32x32xbf16, #tpu.memory_space<vmem>>, vector<1x32x32xbf16>
    %228 = vector.shape_cast %227 : vector<1x32x32xbf16> to vector<32x32xbf16>
    %cst_207 = arith.constant dense<0.000000e+00> : vector<8x32xf32>
    %229 = tpu.matmul %226, %228, %cst_207 {dimension_numbers = #tpu.dot_dimension_numbers<[1], [0], [0], [1], [0, 0, 1, 1], [], []>} : vector<8x32xbf16>, vector<32x32xbf16>, vector<8x32xf32> -> vector<8x32xf32>
    %230 = arith.addf %224, %229 : vector<8x32xf32>
    %c4_208 = arith.constant 4 : index
    %c0_209 = arith.constant 0 : index
    %231 = vector.load %arg18[%c4_208, %c0_209] : memref<18x32xf32, #tpu.memory_space<vmem>>, vector<8x32xf32>
    %232 = arith.truncf %231 : vector<8x32xf32> to vector<8x32xbf16>
    %c3_210 = arith.constant 3 : index
    %c0_211 = arith.constant 0 : index
    %c0_212 = arith.constant 0 : index
    %233 = vector.load %arg10[%c3_210, %c0_211, %c0_212] : memref<9x32x32xbf16, #tpu.memory_space<vmem>>, vector<1x32x32xbf16>
    %234 = vector.shape_cast %233 : vector<1x32x32xbf16> to vector<32x32xbf16>
    %cst_213 = arith.constant dense<0.000000e+00> : vector<8x32xf32>
    %235 = tpu.matmul %232, %234, %cst_213 {dimension_numbers = #tpu.dot_dimension_numbers<[1], [0], [0], [1], [0, 0, 1, 1], [], []>} : vector<8x32xbf16>, vector<32x32xbf16>, vector<8x32xf32> -> vector<8x32xf32>
    %236 = arith.addf %230, %235 : vector<8x32xf32>
    %c5_214 = arith.constant 5 : index
    %c0_215 = arith.constant 0 : index
    %237 = vector.load %arg18[%c5_214, %c0_215] : memref<18x32xf32, #tpu.memory_space<vmem>>, vector<8x32xf32>
    %238 = arith.truncf %237 : vector<8x32xf32> to vector<8x32xbf16>
    %c4_216 = arith.constant 4 : index
    %c0_217 = arith.constant 0 : index
    %c0_218 = arith.constant 0 : index
    %239 = vector.load %arg10[%c4_216, %c0_217, %c0_218] : memref<9x32x32xbf16, #tpu.memory_space<vmem>>, vector<1x32x32xbf16>
    %240 = vector.shape_cast %239 : vector<1x32x32xbf16> to vector<32x32xbf16>
    %cst_219 = arith.constant dense<0.000000e+00> : vector<8x32xf32>
    %241 = tpu.matmul %238, %240, %cst_219 {dimension_numbers = #tpu.dot_dimension_numbers<[1], [0], [0], [1], [0, 0, 1, 1], [], []>} : vector<8x32xbf16>, vector<32x32xbf16>, vector<8x32xf32> -> vector<8x32xf32>
    %242 = arith.addf %236, %241 : vector<8x32xf32>
    %c6_220 = arith.constant 6 : index
    %c0_221 = arith.constant 0 : index
    %243 = vector.load %arg18[%c6_220, %c0_221] : memref<18x32xf32, #tpu.memory_space<vmem>>, vector<8x32xf32>
    %244 = arith.truncf %243 : vector<8x32xf32> to vector<8x32xbf16>
    %c5_222 = arith.constant 5 : index
    %c0_223 = arith.constant 0 : index
    %c0_224 = arith.constant 0 : index
    %245 = vector.load %arg10[%c5_222, %c0_223, %c0_224] : memref<9x32x32xbf16, #tpu.memory_space<vmem>>, vector<1x32x32xbf16>
    %246 = vector.shape_cast %245 : vector<1x32x32xbf16> to vector<32x32xbf16>
    %cst_225 = arith.constant dense<0.000000e+00> : vector<8x32xf32>
    %247 = tpu.matmul %244, %246, %cst_225 {dimension_numbers = #tpu.dot_dimension_numbers<[1], [0], [0], [1], [0, 0, 1, 1], [], []>} : vector<8x32xbf16>, vector<32x32xbf16>, vector<8x32xf32> -> vector<8x32xf32>
    %248 = arith.addf %242, %247 : vector<8x32xf32>
    %c8_226 = arith.constant 8 : index
    %c0_227 = arith.constant 0 : index
    %249 = vector.load %arg18[%c8_226, %c0_227] : memref<18x32xf32, #tpu.memory_space<vmem>>, vector<8x32xf32>
    %250 = arith.truncf %249 : vector<8x32xf32> to vector<8x32xbf16>
    %c6_228 = arith.constant 6 : index
    %c0_229 = arith.constant 0 : index
    %c0_230 = arith.constant 0 : index
    %251 = vector.load %arg10[%c6_228, %c0_229, %c0_230] : memref<9x32x32xbf16, #tpu.memory_space<vmem>>, vector<1x32x32xbf16>
    %252 = vector.shape_cast %251 : vector<1x32x32xbf16> to vector<32x32xbf16>
    %cst_231 = arith.constant dense<0.000000e+00> : vector<8x32xf32>
    %253 = tpu.matmul %250, %252, %cst_231 {dimension_numbers = #tpu.dot_dimension_numbers<[1], [0], [0], [1], [0, 0, 1, 1], [], []>} : vector<8x32xbf16>, vector<32x32xbf16>, vector<8x32xf32> -> vector<8x32xf32>
    %254 = arith.addf %248, %253 : vector<8x32xf32>
    %c9_232 = arith.constant 9 : index
    %c0_233 = arith.constant 0 : index
    %255 = vector.load %arg18[%c9_232, %c0_233] : memref<18x32xf32, #tpu.memory_space<vmem>>, vector<8x32xf32>
    %256 = arith.truncf %255 : vector<8x32xf32> to vector<8x32xbf16>
    %c7_234 = arith.constant 7 : index
    %c0_235 = arith.constant 0 : index
    %c0_236 = arith.constant 0 : index
    %257 = vector.load %arg10[%c7_234, %c0_235, %c0_236] : memref<9x32x32xbf16, #tpu.memory_space<vmem>>, vector<1x32x32xbf16>
    %258 = vector.shape_cast %257 : vector<1x32x32xbf16> to vector<32x32xbf16>
    %cst_237 = arith.constant dense<0.000000e+00> : vector<8x32xf32>
    %259 = tpu.matmul %256, %258, %cst_237 {dimension_numbers = #tpu.dot_dimension_numbers<[1], [0], [0], [1], [0, 0, 1, 1], [], []>} : vector<8x32xbf16>, vector<32x32xbf16>, vector<8x32xf32> -> vector<8x32xf32>
    %260 = arith.addf %254, %259 : vector<8x32xf32>
    %c10_238 = arith.constant 10 : index
    %c0_239 = arith.constant 0 : index
    %261 = vector.load %arg18[%c10_238, %c0_239] : memref<18x32xf32, #tpu.memory_space<vmem>>, vector<8x32xf32>
    %262 = arith.truncf %261 : vector<8x32xf32> to vector<8x32xbf16>
    %c8_240 = arith.constant 8 : index
    %c0_241 = arith.constant 0 : index
    %c0_242 = arith.constant 0 : index
    %263 = vector.load %arg10[%c8_240, %c0_241, %c0_242] : memref<9x32x32xbf16, #tpu.memory_space<vmem>>, vector<1x32x32xbf16>
    %264 = vector.shape_cast %263 : vector<1x32x32xbf16> to vector<32x32xbf16>
    %cst_243 = arith.constant dense<0.000000e+00> : vector<8x32xf32>
    %265 = tpu.matmul %262, %264, %cst_243 {dimension_numbers = #tpu.dot_dimension_numbers<[1], [0], [0], [1], [0, 0, 1, 1], [], []>} : vector<8x32xbf16>, vector<32x32xbf16>, vector<8x32xf32> -> vector<8x32xf32>
    %266 = arith.addf %260, %265 : vector<8x32xf32>
    %c0_244 = arith.constant 0 : index
    %c0_245 = arith.constant 0 : index
    %267 = vector.load %arg11[%c0_244, %c0_245] : memref<1x32xf32, #tpu.memory_space<vmem>>, vector<1x32xf32>
    %268 = vector.broadcast %267 : vector<1x32xf32> to vector<8x32xf32>
    %269 = arith.mulf %266, %268 : vector<8x32xf32>
    %c0_246 = arith.constant 0 : index
    %c0_247 = arith.constant 0 : index
    %270 = vector.load %arg12[%c0_246, %c0_247] : memref<1x32xf32, #tpu.memory_space<vmem>>, vector<1x32xf32>
    %271 = vector.broadcast %270 : vector<1x32xf32> to vector<8x32xf32>
    %272 = arith.addf %269, %271 : vector<8x32xf32>
    %cst_248 = arith.constant 0.000000e+00 : f32
    %273 = vector.broadcast %cst_248 : f32 to vector<8x32xf32>
    %274 = arith.maximumf %272, %273 : vector<8x32xf32>
    %275 = vector.extract_strided_slice %274 {offsets = [0, 0], sizes = [2, 32], strides = [1, 1]} : vector<8x32xf32> to vector<2x32xf32>
    %c5_249 = arith.constant 5 : index
    %c0_250 = arith.constant 0 : index
    %276 = vector.load %arg17[%c5_249, %c0_250] : memref<18x32xf32, #tpu.memory_space<vmem>>, vector<2x32xf32>
    tpu.vector_store %arg17[%c5_249, %c0_250], %275 {strides = array<i32>} : memref<18x32xf32, #tpu.memory_space<vmem>>, vector<2x32xf32>,
    %277 = vector.extract_strided_slice %274 {offsets = [4, 0], sizes = [2, 32], strides = [1, 1]} : vector<8x32xf32> to vector<2x32xf32>
    %c9_251 = arith.constant 9 : index
    %c0_252 = arith.constant 0 : index
    %278 = vector.load %arg17[%c9_251, %c0_252] : memref<18x32xf32, #tpu.memory_space<vmem>>, vector<2x32xf32>
    tpu.vector_store %arg17[%c9_251, %c0_252], %277 {strides = array<i32>} : memref<18x32xf32, #tpu.memory_space<vmem>>, vector<2x32xf32>,
    %c0_253 = arith.constant 0 : index
    %c0_254 = arith.constant 0 : index
    %279 = vector.load %arg17[%c0_253, %c0_254] : memref<18x32xf32, #tpu.memory_space<vmem>>, vector<8x32xf32>
    %280 = arith.truncf %279 : vector<8x32xf32> to vector<8x32xbf16>
    %c0_255 = arith.constant 0 : index
    %c0_256 = arith.constant 0 : index
    %c0_257 = arith.constant 0 : index
    %281 = vector.load %arg13[%c0_255, %c0_256, %c0_257] : memref<9x32x32xbf16, #tpu.memory_space<vmem>>, vector<1x32x32xbf16>
    %282 = vector.shape_cast %281 : vector<1x32x32xbf16> to vector<32x32xbf16>
    %cst_258 = arith.constant dense<0.000000e+00> : vector<8x32xf32>
    %283 = tpu.matmul %280, %282, %cst_258 {dimension_numbers = #tpu.dot_dimension_numbers<[1], [0], [0], [1], [0, 0, 1, 1], [], []>} : vector<8x32xbf16>, vector<32x32xbf16>, vector<8x32xf32> -> vector<8x32xf32>
    %c1_259 = arith.constant 1 : index
    %c0_260 = arith.constant 0 : index
    %284 = vector.load %arg17[%c1_259, %c0_260] : memref<18x32xf32, #tpu.memory_space<vmem>>, vector<8x32xf32>
    %285 = arith.truncf %284 : vector<8x32xf32> to vector<8x32xbf16>
    %c1_261 = arith.constant 1 : index
    %c0_262 = arith.constant 0 : index
    %c0_263 = arith.constant 0 : index
    %286 = vector.load %arg13[%c1_261, %c0_262, %c0_263] : memref<9x32x32xbf16, #tpu.memory_space<vmem>>, vector<1x32x32xbf16>
    %287 = vector.shape_cast %286 : vector<1x32x32xbf16> to vector<32x32xbf16>
    %cst_264 = arith.constant dense<0.000000e+00> : vector<8x32xf32>
    %288 = tpu.matmul %285, %287, %cst_264 {dimension_numbers = #tpu.dot_dimension_numbers<[1], [0], [0], [1], [0, 0, 1, 1], [], []>} : vector<8x32xbf16>, vector<32x32xbf16>, vector<8x32xf32> -> vector<8x32xf32>
    %289 = arith.addf %283, %288 : vector<8x32xf32>
    %c2_265 = arith.constant 2 : index
    %c0_266 = arith.constant 0 : index
    %290 = vector.load %arg17[%c2_265, %c0_266] : memref<18x32xf32, #tpu.memory_space<vmem>>, vector<8x32xf32>
    %291 = arith.truncf %290 : vector<8x32xf32> to vector<8x32xbf16>
    %c2_267 = arith.constant 2 : index
    %c0_268 = arith.constant 0 : index
    %c0_269 = arith.constant 0 : index
    %292 = vector.load %arg13[%c2_267, %c0_268, %c0_269] : memref<9x32x32xbf16, #tpu.memory_space<vmem>>, vector<1x32x32xbf16>
    %293 = vector.shape_cast %292 : vector<1x32x32xbf16> to vector<32x32xbf16>
    %cst_270 = arith.constant dense<0.000000e+00> : vector<8x32xf32>
    %294 = tpu.matmul %291, %293, %cst_270 {dimension_numbers = #tpu.dot_dimension_numbers<[1], [0], [0], [1], [0, 0, 1, 1], [], []>} : vector<8x32xbf16>, vector<32x32xbf16>, vector<8x32xf32> -> vector<8x32xf32>
    %295 = arith.addf %289, %294 : vector<8x32xf32>
    %c4_271 = arith.constant 4 : index
    %c0_272 = arith.constant 0 : index
    %296 = vector.load %arg17[%c4_271, %c0_272] : memref<18x32xf32, #tpu.memory_space<vmem>>, vector<8x32xf32>
    %297 = arith.truncf %296 : vector<8x32xf32> to vector<8x32xbf16>
    %c3_273 = arith.constant 3 : index
    %c0_274 = arith.constant 0 : index
    %c0_275 = arith.constant 0 : index
    %298 = vector.load %arg13[%c3_273, %c0_274, %c0_275] : memref<9x32x32xbf16, #tpu.memory_space<vmem>>, vector<1x32x32xbf16>
    %299 = vector.shape_cast %298 : vector<1x32x32xbf16> to vector<32x32xbf16>
    %cst_276 = arith.constant dense<0.000000e+00> : vector<8x32xf32>
    %300 = tpu.matmul %297, %299, %cst_276 {dimension_numbers = #tpu.dot_dimension_numbers<[1], [0], [0], [1], [0, 0, 1, 1], [], []>} : vector<8x32xbf16>, vector<32x32xbf16>, vector<8x32xf32> -> vector<8x32xf32>
    %301 = arith.addf %295, %300 : vector<8x32xf32>
    %c5_277 = arith.constant 5 : index
    %c0_278 = arith.constant 0 : index
    %302 = vector.load %arg17[%c5_277, %c0_278] : memref<18x32xf32, #tpu.memory_space<vmem>>, vector<8x32xf32>
    %303 = arith.truncf %302 : vector<8x32xf32> to vector<8x32xbf16>
    %c4_279 = arith.constant 4 : index
    %c0_280 = arith.constant 0 : index
    %c0_281 = arith.constant 0 : index
    %304 = vector.load %arg13[%c4_279, %c0_280, %c0_281] : memref<9x32x32xbf16, #tpu.memory_space<vmem>>, vector<1x32x32xbf16>
    %305 = vector.shape_cast %304 : vector<1x32x32xbf16> to vector<32x32xbf16>
    %cst_282 = arith.constant dense<0.000000e+00> : vector<8x32xf32>
    %306 = tpu.matmul %303, %305, %cst_282 {dimension_numbers = #tpu.dot_dimension_numbers<[1], [0], [0], [1], [0, 0, 1, 1], [], []>} : vector<8x32xbf16>, vector<32x32xbf16>, vector<8x32xf32> -> vector<8x32xf32>
    %307 = arith.addf %301, %306 : vector<8x32xf32>
    %c6_283 = arith.constant 6 : index
    %c0_284 = arith.constant 0 : index
    %308 = vector.load %arg17[%c6_283, %c0_284] : memref<18x32xf32, #tpu.memory_space<vmem>>, vector<8x32xf32>
    %309 = arith.truncf %308 : vector<8x32xf32> to vector<8x32xbf16>
    %c5_285 = arith.constant 5 : index
    %c0_286 = arith.constant 0 : index
    %c0_287 = arith.constant 0 : index
    %310 = vector.load %arg13[%c5_285, %c0_286, %c0_287] : memref<9x32x32xbf16, #tpu.memory_space<vmem>>, vector<1x32x32xbf16>
    %311 = vector.shape_cast %310 : vector<1x32x32xbf16> to vector<32x32xbf16>
    %cst_288 = arith.constant dense<0.000000e+00> : vector<8x32xf32>
    %312 = tpu.matmul %309, %311, %cst_288 {dimension_numbers = #tpu.dot_dimension_numbers<[1], [0], [0], [1], [0, 0, 1, 1], [], []>} : vector<8x32xbf16>, vector<32x32xbf16>, vector<8x32xf32> -> vector<8x32xf32>
    %313 = arith.addf %307, %312 : vector<8x32xf32>
    %c8_289 = arith.constant 8 : index
    %c0_290 = arith.constant 0 : index
    %314 = vector.load %arg17[%c8_289, %c0_290] : memref<18x32xf32, #tpu.memory_space<vmem>>, vector<8x32xf32>
    %315 = arith.truncf %314 : vector<8x32xf32> to vector<8x32xbf16>
    %c6_291 = arith.constant 6 : index
    %c0_292 = arith.constant 0 : index
    %c0_293 = arith.constant 0 : index
    %316 = vector.load %arg13[%c6_291, %c0_292, %c0_293] : memref<9x32x32xbf16, #tpu.memory_space<vmem>>, vector<1x32x32xbf16>
    %317 = vector.shape_cast %316 : vector<1x32x32xbf16> to vector<32x32xbf16>
    %cst_294 = arith.constant dense<0.000000e+00> : vector<8x32xf32>
    %318 = tpu.matmul %315, %317, %cst_294 {dimension_numbers = #tpu.dot_dimension_numbers<[1], [0], [0], [1], [0, 0, 1, 1], [], []>} : vector<8x32xbf16>, vector<32x32xbf16>, vector<8x32xf32> -> vector<8x32xf32>
    %319 = arith.addf %313, %318 : vector<8x32xf32>
    %c9_295 = arith.constant 9 : index
    %c0_296 = arith.constant 0 : index
    %320 = vector.load %arg17[%c9_295, %c0_296] : memref<18x32xf32, #tpu.memory_space<vmem>>, vector<8x32xf32>
    %321 = arith.truncf %320 : vector<8x32xf32> to vector<8x32xbf16>
    %c7_297 = arith.constant 7 : index
    %c0_298 = arith.constant 0 : index
    %c0_299 = arith.constant 0 : index
    %322 = vector.load %arg13[%c7_297, %c0_298, %c0_299] : memref<9x32x32xbf16, #tpu.memory_space<vmem>>, vector<1x32x32xbf16>
    %323 = vector.shape_cast %322 : vector<1x32x32xbf16> to vector<32x32xbf16>
    %cst_300 = arith.constant dense<0.000000e+00> : vector<8x32xf32>
    %324 = tpu.matmul %321, %323, %cst_300 {dimension_numbers = #tpu.dot_dimension_numbers<[1], [0], [0], [1], [0, 0, 1, 1], [], []>} : vector<8x32xbf16>, vector<32x32xbf16>, vector<8x32xf32> -> vector<8x32xf32>
    %325 = arith.addf %319, %324 : vector<8x32xf32>
    %c10_301 = arith.constant 10 : index
    %c0_302 = arith.constant 0 : index
    %326 = vector.load %arg17[%c10_301, %c0_302] : memref<18x32xf32, #tpu.memory_space<vmem>>, vector<8x32xf32>
    %327 = arith.truncf %326 : vector<8x32xf32> to vector<8x32xbf16>
    %c8_303 = arith.constant 8 : index
    %c0_304 = arith.constant 0 : index
    %c0_305 = arith.constant 0 : index
    %328 = vector.load %arg13[%c8_303, %c0_304, %c0_305] : memref<9x32x32xbf16, #tpu.memory_space<vmem>>, vector<1x32x32xbf16>
    %329 = vector.shape_cast %328 : vector<1x32x32xbf16> to vector<32x32xbf16>
    %cst_306 = arith.constant dense<0.000000e+00> : vector<8x32xf32>
    %330 = tpu.matmul %327, %329, %cst_306 {dimension_numbers = #tpu.dot_dimension_numbers<[1], [0], [0], [1], [0, 0, 1, 1], [], []>} : vector<8x32xbf16>, vector<32x32xbf16>, vector<8x32xf32> -> vector<8x32xf32>
    %331 = arith.addf %325, %330 : vector<8x32xf32>
    %c0_307 = arith.constant 0 : index
    %c0_308 = arith.constant 0 : index
    %332 = vector.load %arg14[%c0_307, %c0_308] : memref<1x32xf32, #tpu.memory_space<vmem>>, vector<1x32xf32>
    %333 = vector.broadcast %332 : vector<1x32xf32> to vector<8x32xf32>
    %334 = arith.mulf %331, %333 : vector<8x32xf32>
    %c0_309 = arith.constant 0 : index
    %c0_310 = arith.constant 0 : index
    %335 = vector.load %arg15[%c0_309, %c0_310] : memref<1x32xf32, #tpu.memory_space<vmem>>, vector<1x32xf32>
    %336 = vector.broadcast %335 : vector<1x32xf32> to vector<8x32xf32>
    %337 = arith.addf %334, %336 : vector<8x32xf32>
    %c5_311 = arith.constant 5 : index
    %c0_312 = arith.constant 0 : index
    %338 = vector.load %arg18[%c5_311, %c0_312] : memref<18x32xf32, #tpu.memory_space<vmem>>, vector<2x32xf32>
    %339 = vector.extract_strided_slice %337 {offsets = [0, 0], sizes = [2, 32], strides = [1, 1]} : vector<8x32xf32> to vector<2x32xf32>
    %340 = arith.addf %339, %338 : vector<2x32xf32>
    %cst_313 = arith.constant 0.000000e+00 : f32
    %341 = vector.broadcast %cst_313 : f32 to vector<2x32xf32>
    %342 = arith.maximumf %340, %341 : vector<2x32xf32>
    %c0_314 = arith.constant 0 : index
    %c0_315 = arith.constant 0 : index
    %c0_316 = arith.constant 0 : index
    %c0_317 = arith.constant 0 : index
    %343 = vector.load %arg16[%c0_314, %c0_315, %c0_316, %c0_317] : memref<1x2x2x32xf32, #tpu.memory_space<vmem>>, vector<1x1x2x32xf32>
    %344 = vector.shape_cast %343 : vector<1x1x2x32xf32> to vector<2x32xf32>
    %345 = vector.shape_cast %342 : vector<2x32xf32> to vector<1x1x2x32xf32>
    tpu.vector_store %arg16[%c0_314, %c0_315, %c0_316, %c0_317], %345 {strides = array<i32>} : memref<1x2x2x32xf32, #tpu.memory_space<vmem>>, vector<1x1x2x32xf32>,
    %c9_318 = arith.constant 9 : index
    %c0_319 = arith.constant 0 : index
    %346 = vector.load %arg18[%c9_318, %c0_319] : memref<18x32xf32, #tpu.memory_space<vmem>>, vector<2x32xf32>
    %347 = vector.extract_strided_slice %337 {offsets = [4, 0], sizes = [2, 32], strides = [1, 1]} : vector<8x32xf32> to vector<2x32xf32>
    %348 = arith.addf %347, %346 : vector<2x32xf32>
    %cst_320 = arith.constant 0.000000e+00 : f32
    %349 = vector.broadcast %cst_320 : f32 to vector<2x32xf32>
    %350 = arith.maximumf %348, %349 : vector<2x32xf32>
    %c0_321 = arith.constant 0 : index
    %c1_322 = arith.constant 1 : index
    %c0_323 = arith.constant 0 : index
    %c0_324 = arith.constant 0 : index
    %351 = vector.load %arg16[%c0_321, %c1_322, %c0_323, %c0_324] : memref<1x2x2x32xf32, #tpu.memory_space<vmem>>, vector<1x1x2x32xf32>
    %352 = vector.shape_cast %351 : vector<1x1x2x32xf32> to vector<2x32xf32>
    %353 = vector.shape_cast %350 : vector<2x32xf32> to vector<1x1x2x32xf32>
    tpu.vector_store %arg16[%c0_321, %c1_322, %c0_323, %c0_324], %353 {strides = array<i32>} : memref<1x2x2x32xf32, #tpu.memory_space<vmem>>, vector<1x1x2x32xf32>,
    return
  }
  func.func @transform_0(%arg0: i32) -> (i32, i32, i32) {
    %c0_i32 = arith.constant 0 : i32
    %c0_i32_0 = arith.constant 0 : i32
    %c0_i32_1 = arith.constant 0 : i32
    return %arg0, %c0_i32, %c0_i32_0 : i32, i32, i32
  }
  func.func @transform_1(%arg0: i32) -> (i32, i32, i32) {
    %c0_i32 = arith.constant 0 : i32
    %c0_i32_0 = arith.constant 0 : i32
    %c0_i32_1 = arith.constant 0 : i32
    %c0_i32_2 = arith.constant 0 : i32
    return %c0_i32, %c0_i32_0, %c0_i32_1 : i32, i32, i32
  }
  func.func @transform_2(%arg0: i32) -> (i32, i32) {
    %c0_i32 = arith.constant 0 : i32
    %c0_i32_0 = arith.constant 0 : i32
    %c0_i32_1 = arith.constant 0 : i32
    return %c0_i32, %c0_i32_0 : i32, i32
  }
  func.func @transform_3(%arg0: i32) -> (i32, i32) {
    %c0_i32 = arith.constant 0 : i32
    %c0_i32_0 = arith.constant 0 : i32
    %c0_i32_1 = arith.constant 0 : i32
    return %c0_i32, %c0_i32_0 : i32, i32
  }
  func.func @transform_4(%arg0: i32) -> (i32, i32, i32) {
    %c0_i32 = arith.constant 0 : i32
    %c0_i32_0 = arith.constant 0 : i32
    %c0_i32_1 = arith.constant 0 : i32
    %c0_i32_2 = arith.constant 0 : i32
    return %c0_i32, %c0_i32_0, %c0_i32_1 : i32, i32, i32
  }
  func.func @transform_5(%arg0: i32) -> (i32, i32) {
    %c0_i32 = arith.constant 0 : i32
    %c0_i32_0 = arith.constant 0 : i32
    %c0_i32_1 = arith.constant 0 : i32
    return %c0_i32, %c0_i32_0 : i32, i32
  }
  func.func @transform_6(%arg0: i32) -> (i32, i32, i32) {
    %c0_i32 = arith.constant 0 : i32
    %c0_i32_0 = arith.constant 0 : i32
    %c0_i32_1 = arith.constant 0 : i32
    %c0_i32_2 = arith.constant 0 : i32
    return %c0_i32, %c0_i32_0, %c0_i32_1 : i32, i32, i32
  }
  func.func @transform_7(%arg0: i32) -> (i32, i32) {
    %c0_i32 = arith.constant 0 : i32
    %c0_i32_0 = arith.constant 0 : i32
    %c0_i32_1 = arith.constant 0 : i32
    return %c0_i32, %c0_i32_0 : i32, i32
  }
  func.func @transform_8(%arg0: i32) -> (i32, i32) {
    %c0_i32 = arith.constant 0 : i32
    %c0_i32_0 = arith.constant 0 : i32
    %c0_i32_1 = arith.constant 0 : i32
    return %c0_i32, %c0_i32_0 : i32, i32
  }
  func.func @transform_9(%arg0: i32) -> (i32, i32, i32) {
    %c0_i32 = arith.constant 0 : i32
    %c0_i32_0 = arith.constant 0 : i32
    %c0_i32_1 = arith.constant 0 : i32
    %c0_i32_2 = arith.constant 0 : i32
    return %c0_i32, %c0_i32_0, %c0_i32_1 : i32, i32, i32
  }
  func.func @transform_10(%arg0: i32) -> (i32, i32) {
    %c0_i32 = arith.constant 0 : i32
    %c0_i32_0 = arith.constant 0 : i32
    %c0_i32_1 = arith.constant 0 : i32
    return %c0_i32, %c0_i32_0 : i32, i32
  }
  func.func @transform_11(%arg0: i32) -> (i32, i32) {
    %c0_i32 = arith.constant 0 : i32
    %c0_i32_0 = arith.constant 0 : i32
    %c0_i32_1 = arith.constant 0 : i32
    return %c0_i32, %c0_i32_0 : i32, i32
  }
  func.func @transform_12(%arg0: i32) -> (i32, i32, i32) {
    %c0_i32 = arith.constant 0 : i32
    %c0_i32_0 = arith.constant 0 : i32
    %c0_i32_1 = arith.constant 0 : i32
    %c0_i32_2 = arith.constant 0 : i32
    return %c0_i32, %c0_i32_0, %c0_i32_1 : i32, i32, i32
  }
  func.func @transform_13(%arg0: i32) -> (i32, i32) {
    %c0_i32 = arith.constant 0 : i32
    %c0_i32_0 = arith.constant 0 : i32
    %c0_i32_1 = arith.constant 0 : i32
    return %c0_i32, %c0_i32_0 : i32, i32
  }
  func.func @transform_14(%arg0: i32) -> (i32, i32) {
    %c0_i32 = arith.constant 0 : i32
    %c0_i32_0 = arith.constant 0 : i32
    %c0_i32_1 = arith.constant 0 : i32
    return %c0_i32, %c0_i32_0 : i32, i32
  }
  func.func @transform_15(%arg0: i32) -> (i32, i32, i32, i32) {
    %c0_i32 = arith.constant 0 : i32
    %c0_i32_0 = arith.constant 0 : i32
    %c0_i32_1 = arith.constant 0 : i32
    %c0_i32_2 = arith.constant 0 : i32
    return %arg0, %c0_i32, %c0_i32_0, %c0_i32_1 : i32, i32, i32, i32
  }
}

</mosaic_0001>

<bundles_post_ra>
// kernel: resnet_bev_forward.4
= control target key start
LH: loop header
LB: loop body
LE: loop exit
PB: predicated region body
PF: predicated region fallthrough
CT: control target
= control target key end

     0   :  { %s4613_s18 = smov 0   ;;  %s5065_s0 = inlined_call_operand.vmem [shape: f32[2,108,8], index: 0, kind: input, shape index: {}]   ;;  %s5066_s1 = inlined_call_operand.vmem [shape: bf16[9,8,16], index: 1, kind: input, shape index: {}]   ;;  %s5067_s2 = inlined_call_operand.vmem [shape: f32[1,16], index: 2, kind: input, shape index: {}]   ;;  %s5068_s3 = inlined_call_operand.vmem [shape: f32[1,16], index: 3, kind: input, shape index: {}]   ;;  %s5069_s4 = inlined_call_operand.vmem [shape: bf16[9,8,16], index: 4, kind: input, shape index: {}]   ;;  %s5070_s5 = inlined_call_operand.vmem [shape: f32[1,16], index: 5, kind: input, shape index: {}]   ;;  %s5071_s6 = inlined_call_operand.vmem [shape: bf16[9,16,16], index: 6, kind: input, shape index: {}]   ;;  %s5072_s7 = inlined_call_operand.vmem [shape: f32[1,16], index: 7, kind: input, shape index: {}]   ;;  %s5073_s8 = inlined_call_operand.vmem [shape: f32[1,16], index: 8, kind: input, shape index: {}]   ;;  %s5074_s9 = inlined_call_operand.vmem [shape: bf16[9,16,16], index: 9, kind: input, shape index: {}]   ;;  %s5075_s10 = inlined_call_operand.vmem [shape: f32[1,16], index: 10, kind: input, shape index: {}]   ;;  %s5076_s11 = inlined_call_operand.vmem [shape: f32[1,16], index: 11, kind: input, shape index: {}]   ;;  %s5077_s12 = inlined_call_operand.vmem [shape: bf16[9,16,16], index: 12, kind: input, shape index: {}]   ;;  %s5078_s13 = inlined_call_operand.vmem [shape: f32[1,16], index: 13, kind: input, shape index: {}]   ;;  %s5079_s14 = inlined_call_operand.vmem [shape: f32[1,16], index: 14, kind: input, shape index: {}]   ;;  %s5080_s15 = inlined_call_operand.vmem [shape: f32[2,4,4,16], index: 15, kind: output, shape index: {}]  }
   0x1 LB: > { %s3732_s19 = sadd.s32 4294967295, %s4530_s18   ;;  %p3736_p0 = scmp.ge.s32.totalorder %s4530_s18, 1  ;;  %s4530_s18 = sphi %s4613_s18, %s25_s18  }
   0x2   : > { %p437_p1 = scmp.lt.s32.totalorder %s4530_s18, 3 }
   0x4   : > { %p438_p2 = pnand %p3736_p0, %p437_p1 }
   0x5   : > { %vm528_vm0 = vcmask (!%p438_p2), 1043456   ;;  %v3751_v0 = vld [vmem:[%s5066_s1 + $0x10] sm:$0xf] (!%p438_p2)  ;;  %v3740_v1 = vld [vmem:[%s5066_s1 + $0x4] sm:$0xf] (!%p438_p2)  ;;  %p485_p3 = scmp.lt.s32.totalorder (!%p438_p2), %s3732_s19, 1 }
   0x6   : > { %441 = sbr.rel (%p438_p2) target bundleno = 1283 (0x503), region = 80  ;;  %4473 = vmatprep.subr.msk.bf16.mxu0 (!%p438_p2), %vm528_vm0, %v3751_v0  ;;  %4469 = vmatprep.subr.msk.bf16.mxu1 (!%p438_p2), %vm528_vm0, %v3740_v1  ;;  %v785_v2 = vsel (!%p438_p2), %vm528_vm0, %v3751_v0, 0  ;;  %v530_v3 = vsel (!%p438_p2), %vm528_vm0, %v3740_v1, 0  ;;  %v3754_v4 = vld [vmem:[%s5066_s1 + $0x14] sm:$0xf] (!%p438_p2)  ;;  %vm521_vm1 = vcmask (!%p438_p2), 64512  }
   0x7   : > { %4097 = vmatpush3.bf16.msra.mxu0 (!%p438_p2), %v785_v2  ;;  %4073 = vmatpush3.bf16.msra.mxu1 (!%p438_p2), %v530_v3  ;;  %v513_v5 = vld [vmem:[%s5066_s1] sm:$0xf] (!%p438_p2)  ;;  %v852_v20 = vsel (!%p438_p2), %vm528_vm0, %v3754_v4, 0  ;;  %v3757_v24 = vld [vmem:[%s5066_s1 + $0x18] sm:$0xf] (!%p438_p2)  ;;  %vm496_vm2 = vcmask (!%p438_p2), 130048  }
   0x8   : > { %4474 = vmatprep.subr.msk.bf16.mxu0 (!%p438_p2), %vm528_vm0, %v3754_v4  ;;  %4470 = vmatprep.subr.msk.bf16.mxu1 (!%p438_p2), %vm528_vm0, %v513_v5  ;;  %v587_v16 = vsel (!%p438_p2), %vm528_vm0, %v513_v5, 0  ;;  %v3745_v25 = vld [vmem:[%s5066_s1 + $0x8] sm:$0xf] (!%p438_p2)  ;;  %v919_v28 = vsel (!%p438_p2), %vm528_vm0, %v3757_v24, 0  ;;  %v3760_v37 = vld [vmem:[%s5066_s1 + $0x1c] sm:$0xf] (!%p438_p2) }
   0x9   : > { %v651_v29 = vsel (!%p438_p2), %vm528_vm0, %v3745_v25, 0  ;;  %v3748_v39 = vld [vmem:[%s5066_s1 + $0xc] sm:$0xf] (!%p438_p2)  ;;  %v986_v50 = vsel (!%p438_p2), %vm528_vm0, %v3760_v37, 0  ;;  %v3763_v52 = vld [vmem:[%s5066_s1 + $0x20] sm:$0xf] (!%p438_p2) }
   0xa   : > { %v718_v48 = vsel (!%p438_p2), %vm528_vm0, %v3748_v39, 0  ;;  %v1053_v60 = vsel (!%p438_p2), %vm528_vm0, %v3763_v52, 0  ;;  %v3766_v63 = vld [vmem:[%s5069_s4 + $0x4] sm:$0xf] (!%p438_p2)  ;;  %v4532_v1 = vmov (!%p438_p2), 0.0   ;;  %vm501_vm3 = vcmask (!%p438_p2), 128000  }
   0xb   : > { %v1110_v0 = vsel (!%p438_p2), %vm528_vm0, %v3766_v63, 0  ;;  %499 = vst.msk [vmem:[#allocation2 + $0x10] sm:$0xff] (!%p438_p2), %vm496_vm2, %v4532_v1  ;;  %500 = vst.msk [vmem:[#allocation2 + $0x18] sm:$0xff] (!%p438_p2), %vm496_vm2, %v4532_v1  ;;  %v1106_v2 = vld [vmem:[%s5069_s4] sm:$0xf] (!%p438_p2)  ;;  %vm1646_vm4 = vcmask (!%p438_p2), 124928  }
   0xc   : > { %497 = vst.msk [vmem:[#allocation2] sm:$0xff] (!%p438_p2), %vm496_vm2, %v4532_v1  ;;  %498 = vst.msk [vmem:[#allocation2 + $0x8] sm:$0xff] (!%p438_p2), %vm496_vm2, %v4532_v1  ;;  %v1161_v3 = vsel (!%p438_p2), %vm528_vm0, %v1106_v2, 0  ;;  %v3771_v4 = vld [vmem:[%s5069_s4 + $0x8] sm:$0xf] (!%p438_p2)  ;;  %vm1636_vm5 = vcmask (!%p438_p2), 125952  }
   0xd   : > { %s5082_s19 = smov (!%p485_p3, %s3732_s19), 1  ;;  %503 = vst.msk [vmem:[#allocation3] sm:$0xff] %vm496_vm2, %v4532_v1  ;;  %504 = vst.msk [vmem:[#allocation3 + $0x8] sm:$0xff] %vm496_vm2, %v4532_v1  ;;  %v1214_v5 = vsel %vm528_vm0, %v3771_v4, 0  ;;  %vm1638_vm6 = vcmask 130053   ;;  %vm1640_vm7 = vcmask 122880  }
   0xe   : > { %s4487_s28 = smul.u32 112, %s5082_s19  ;;  %505 = vst.msk [vmem:[#allocation3 + $0x10] sm:$0xff] %vm496_vm2, %v4532_v1  ;;  %506 = vst.msk [vmem:[#allocation3 + $0x18] sm:$0xff] %vm496_vm2, %v4532_v1  ;;  %vm1642_vm8 = vcmask 128002   ;;  %vm1644_vm9 = vcmask 130055   ;;  %vm2326_vm10 = vcmask 1042432  }
   0xf   : > { %502 = vst.msk [vmem:[#allocation2 + $0x20] sm:$0x3f] %vm501_vm3, %v4532_v1  ;;  %507 = vst.msk [vmem:[#allocation3 + $0x20] sm:$0x3f] %vm501_vm3, %v4532_v1  ;;  %vm2305_vm11 = vcmask 1040384   ;;  %vm2315_vm12 = vcmask 130054  }
  0x10   : > { %s4645_s16 = scalar_lea.vmem %s5065_s0, %s4487_s28  ;;  %vm2317_vm13 = vcmask 123904   ;;  %vm2323_vm14 = vcmask 130052   ;;  %s3936_s28 = sshll.u32 %s5082_s19, 4 }
  0x11   : > { %v514_v6 = vld [vmem:[%s4645_s16 + $0x1b] sm:$0xff]  ;;  %v515_v7 = vld [vmem:[%s4645_s16 + $0x23] sm:$0xff]  ;;  %v771_v8 = vld [vmem:[%s4645_s16 + $0x51] sm:$0xff] }
  0x12   : > { %v4650_v9 = vpack.c.bf16 %v515_v7, %v514_v6  ;;  %v772_v10 = vld [vmem:[%s4645_s16 + $0x59] sm:$0xff]  ;;  %v516_v11 = vld [vmem:[%s4645_s16 + $0x2b] sm:$0xf]  ;;  %v773_v12 = vld [vmem:[%s4645_s16 + $0x61] sm:$0xf] }
  0x13   : > { %v4655_v13 = vpack.c.bf16 %v772_v10, %v771_v8  ;;  %v4657_v14 = vpack.c.bf16 %v516_v11, %v516_v11  ;;  %v4659_v15 = vpack.c.bf16 %v773_v12, %v773_v12  ;;  %v508_v17 = vld [vmem:[%s4645_s16] sm:$0xff]  ;;  %v509_v18 = vld [vmem:[%s4645_s16 + $0x8] sm:$0xff]  ;;  %v838_v19 = vld [vmem:[%s4645_s16 + $0x37] sm:$0xff] }
  0x14   : > { %4074 = vmatprep.mubr.msk.bf16.mxu1 %vm521_vm1, %v4650_v9  ;;  %v4668_v21 = vpack.c.bf16 %v509_v18, %v508_v17  ;;  %v839_v22 = vld [vmem:[%s4645_s16 + $0x3f] sm:$0xff]  ;;  %v510_v26 = vld [vmem:[%s4645_s16 + $0x10] sm:$0xf]  ;;  %v840_v27 = vld [vmem:[%s4645_s16 + $0x47] sm:$0xf] }
  0x15   : > { %4098 = vmatprep.mubr.msk.bf16.mxu0 %vm521_vm1, %v4655_v13  ;;  %4075 = vmatmul.mubr.msk.bf16.vlgmr.msra.gmra.mrb[0].mxu1 %vm521_vm1, %v4657_v14  ;;  %v4675_v23 = vpack.c.bf16 %v839_v22, %v838_v19  ;;  %v637_v30 = vld [vmem:[%s4645_s16 + $0x1] sm:$0xff]  ;;  %v638_v31 = vld [vmem:[%s4645_s16 + $0x9] sm:$0xff]  ;;  %v4699_v34 = vpack.c.bf16 %v510_v26, %v510_v26  ;;  %v4701_v35 = vpack.c.bf16 %v840_v27, %v840_v27  ;;  %v639_v40 = vld [vmem:[%s4645_s16 + $0x11] sm:$0xf] }
  0x16   : > { %4099 = vmatmul.mubr.msk.bf16.vlgmr.msra.gmra.mrb[0].mxu0 %vm521_vm1, %v4659_v15  ;;  %4079 = vmatpush3.bf16.msra.mxu1 %v587_v16  ;;  %v905_v32 = vld [vmem:[%s4645_s16 + $0x5] sm:$0xff]  ;;  %v906_v33 = vld [vmem:[%s4645_s16 + $0xd] sm:$0xff]  ;;  %v4703_v36 = vpack.c.bf16 %v638_v31, %v637_v30  ;;  %v907_v41 = vld [vmem:[%s4645_s16 + $0x15] sm:$0xf]  ;;  %v4729_v46 = vpack.c.bf16 %v639_v40, %v639_v40 }
  0x17   : > { %4103 = vmatpush3.bf16.msra.mxu0 %v852_v20  ;;  %4080 = vmatprep.mubr.msk.bf16.mxu1 %vm521_vm1, %v4668_v21  ;;  %v4708_v38 = vpack.c.bf16 %v906_v33, %v905_v32  ;;  %v704_v42 = vld [vmem:[%s4645_s16 + $0x36] sm:$0xff]  ;;  %v705_v43 = vld [vmem:[%s4645_s16 + $0x3e] sm:$0xff]  ;;  %v973_v45 = vld [vmem:[%s4645_s16 + $0x28] sm:$0xff]  ;;  %v4731_v47 = vpack.c.bf16 %v907_v41, %v907_v41 }
  0x18   : > { %4104 = vmatprep.mubr.msk.bf16.mxu0 %vm521_vm1, %v4675_v23  ;;  %4475 = vmatprep.subr.msk.bf16.mxu0 %vm528_vm0, %v3757_v24  ;;  %v972_v44 = vld [vmem:[%s4645_s16 + $0x20] sm:$0xff]  ;;  %v4734_v49 = vpack.c.bf16 %v705_v43, %v704_v42  ;;  %v974_v54 = vld [vmem:[%s4645_s16 + $0x30] sm:$0xf]  ;;  %v1041_v61 = vld [vmem:[%s4645_s16 + $0x16] sm:$0xf] }
  0x19   : > { %4471 = vmatprep.subr.msk.bf16.mxu1 %vm528_vm0, %v3745_v25  ;;  %v4737_v51 = vpack.c.bf16 %v973_v45, %v972_v44  ;;  %v706_v53 = vld [vmem:[%s4645_s16 + $0x46] sm:$0xf]  ;;  %v1040_v56 = vld [vmem:[%s4645_s16 + $0xe] sm:$0xff]  ;;  %v4755_v58 = vpack.c.bf16 %v974_v54, %v974_v54  ;;  %v4768_v62 = vpack.c.bf16 %v1041_v61, %v1041_v61  ;;  %v3789_v18 = vld [vmem:[%s5069_s4 + $0x20] sm:$0xf] }
  0x1a   : > { %v1039_v55 = vld [vmem:[%s4645_s16 + $0x6] sm:$0xff]  ;;  %v708_v57 = vpack.c.bf16 %v706_v53, %v706_v53  ;;  %v3777_v10 = vld [vmem:[%s5069_s4 + $0x10] sm:$0xf]  ;;  %v3780_v12 = vld [vmem:[%s5069_s4 + $0x14] sm:$0xf]  ;;  %v1550_v19 = vsel %vm528_vm0, %v3789_v18, 0  ;;  %s494_s16 = scalar_lea.vmem %s5080_s15, %s3936_s28 }
  0x1b   : > { %v4757_v59 = vpack.c.bf16 %v1040_v56, %v1039_v55  ;;  %v4497_v6 = vld [vmem:[%s5071_s6 + $0x8] sm:$0xff]   ;;  %v1326_v11 = vsel %vm528_vm0, %v3777_v10, 0  ;;  %v3793_v25 = vld [vmem:[%s5067_s2] ss:$0 sm:$0xff]  ;;  %v4500_v55 = vld [vmem:[%s5071_s6 + $0x18] sm:$0xff]  }
  0x1c   : > { %v3774_v7 = vld [vmem:[%s5069_s4 + $0xc] sm:$0xf]  ;;  %v4501_v61 = vld [vmem:[%s5071_s6 + $0x20] sm:$0xff]  }
  0x1d   : > { %v1270_v8 = vsel %vm528_vm0, %v3774_v7, 0 }
  0x21   : > { %4081 = vmatmul.mubr.msk.bf16.vlgmr.msra.gmra.mrb[0].mxu1 %vm521_vm1, %v4699_v34 }
  0x22   : > { %4105 = vmatmul.mubr.msk.bf16.vlgmr.msra.gmra.mrb[0].mxu0 %vm521_vm1, %v4701_v35  ;;  %4085 = vmatpush3.bf16.msra.mxu1 %v651_v29 }
  0x23   : > { %4109 = vmatpush3.bf16.msra.mxu0 %v919_v28  ;;  %4086 = vmatprep.mubr.msk.bf16.mxu1 %vm521_vm1, %v4703_v36  ;;  %v3794_v28 = vld [vmem:[%s5068_s3] ss:$0 sm:$0xff] }
  0x24   : > { %4110 = vmatprep.mubr.msk.bf16.mxu0 %vm521_vm1, %v4708_v38  ;;  %4476 = vmatprep.subr.msk.bf16.mxu0 %vm528_vm0, %v3760_v37 }
  0x25   : > { %4472 = vmatprep.subr.msk.bf16.mxu1 %vm528_vm0, %v3748_v39 }
  0x2d   : > { %4087 = vmatmul.mubr.msk.bf16.vlgmr.msra.gmra.mrb[0].mxu1 %vm521_vm1, %v4729_v46 }
  0x2e   : > { %4111 = vmatmul.mubr.msk.bf16.vlgmr.msra.gmra.mrb[0].mxu0 %vm521_vm1, %v4731_v47  ;;  %4091 = vmatpush3.bf16.msra.mxu1 %v718_v48 }
  0x2f   : > { %4115 = vmatpush3.bf16.msra.mxu0 %v986_v50  ;;  %4092 = vmatprep.mubr.msk.bf16.mxu1 %vm521_vm1, %v4734_v49 }
  0x30   : > { %4116 = vmatprep.mubr.msk.bf16.mxu0 %vm521_vm1, %v4737_v51  ;;  %4477 = vmatprep.subr.msk.bf16.mxu0 %vm528_vm0, %v3763_v52 }
  0x31   : > { %4478 = vmatprep.subr.msk.bf16.mxu1 %vm528_vm0, %v3766_v63 }
  0x39   : > { %4093 = vmatmul.mubr.msk.bf16.vlgmr.msra.gmra.mrb[0].mxu1 %vm521_vm1, %v708_v57 }
  0x3a   : > { %4117 = vmatmul.mubr.msk.bf16.vlgmr.msra.gmra.mrb[0].mxu0 %vm521_vm1, %v4755_v58  ;;  %4128 = vmatprep.mubr.msk.bf16.mxu1 %vm521_vm1, %v4650_v9  ;;  %v4818_v9 = vld [vmem:[%s5071_s6] sm:$0xff]  }
  0x3b   : > { %4121 = vmatpush3.bf16.msra.mxu0 %v1053_v60  ;;  %4122 = vmatprep.mubr.msk.bf16.mxu0 %vm521_vm1, %v4757_v59 }
  0x3c   : > { %4127 = vmatpush3.bf16.msra.mxu1 %v1110_v0  ;;  %4180 = vmatprep.subr.bf16.mxu0 %v4497_v6 }
  0x3d   : > { %4479 = vmatprep.subr.msk.bf16.mxu1 %vm528_vm0, %v1106_v2 }
  0x41   : > { %4129 = vmatmul.mubr.msk.bf16.vlgmr.msra.gmra.mrb[4].mxu1 %vm521_vm1, %v4657_v14  ;;  %v1382_v14 = vsel %vm528_vm0, %v3780_v12, 0 }
  0x42   : > { %4134 = vmatprep.mubr.msk.bf16.mxu1 %vm521_vm1, %v4668_v21  ;;  %4133 = vmatpush3.bf16.msra.mxu1 %v1161_v3  ;;  %v4502_v3 = vld [vmem:[%s5071_s6 + $0x28] sm:$0xff]  }
  0x43   : > { %4480 = vmatprep.subr.msk.bf16.mxu1 %vm528_vm0, %v3771_v4 }
  0x46   : > { %4123 = vmatmul.mubr.msk.bf16.vlgmr.msra.gmra.mrb[0].mxu0 %vm521_vm1, %v4768_v62 }
  0x47   : > { %4181 = vmatpush3.bf16.msra.mxu0 %v4497_v6 }
  0x48   : > { %4186 = vmatprep.subr.bf16.mxu0 %v4818_v9 }
  0x49   : > { %4135 = vmatmul.mubr.msk.bf16.vlgmr.msra.gmra.mrb[8].mxu1 %vm521_vm1, %v4699_v34 }
  0x4a   : > { %4140 = vmatprep.mubr.msk.bf16.mxu1 %vm521_vm1, %v4703_v36  ;;  %4139 = vmatpush3.bf16.msra.mxu1 %v1214_v5 }
  0x4b   : > { %4481 = vmatprep.subr.msk.bf16.mxu1 %vm528_vm0, %v3774_v7  ;;  %v4503_v7 = vld [vmem:[%s5071_s6 + $0x30] sm:$0xff]  }
  0x51   : > { %4141 = vmatmul.mubr.msk.bf16.vlgmr.msra.gmra.mrb[12].mxu1 %vm521_vm1, %v4729_v46 }
  0x52   : > { %4145 = vmatpush3.bf16.msra.mxu1 %v1270_v8  ;;  %4146 = vmatprep.mubr.msk.bf16.mxu1 %vm521_vm1, %v4734_v49  ;;  %v4499_v49 = vld [vmem:[%s5071_s6 + $0x10] sm:$0xff]  }
  0x53   : > { %4482 = vmatprep.subr.msk.bf16.mxu1 %vm528_vm0, %v3777_v10 }
  0x59   : > { %4147 = vmatmul.mubr.msk.bf16.vlgmr.msra.gmra.mrb[16].mxu1 %vm521_vm1, %v708_v57 }
  0x5a   : > { %4152 = vmatprep.mubr.msk.bf16.mxu1 %vm521_vm1, %v4655_v13  ;;  %4151 = vmatpush3.bf16.msra.mxu1 %v1326_v11  ;;  %v3783_v13 = vld [vmem:[%s5069_s4 + $0x18] sm:$0xf] }
  0x5b   : > { %4483 = vmatprep.subr.msk.bf16.mxu1 %vm528_vm0, %v3780_v12  ;;  %v1438_v16 = vsel %vm528_vm0, %v3783_v13, 0 }
  0x61   : > { %4153 = vmatmul.mubr.msk.bf16.vlgmr.msra.gmra.mrb[20].mxu1 %vm521_vm1, %v4659_v15  ;;  %v3786_v15 = vld [vmem:[%s5069_s4 + $0x1c] sm:$0xf] }
  0x62   : > { %4158 = vmatprep.mubr.msk.bf16.mxu1 %vm521_vm1, %v4675_v23  ;;  %4157 = vmatpush3.bf16.msra.mxu1 %v1382_v14  ;;  %v1494_v17 = vsel %vm528_vm0, %v3786_v15, 0 }
  0x63   : > { %4484 = vmatprep.subr.msk.bf16.mxu1 %vm528_vm0, %v3783_v13 }
  0x69   : > { %4159 = vmatmul.mubr.msk.bf16.vlgmr.msra.gmra.mrb[24].mxu1 %vm521_vm1, %v4701_v35 }
  0x6a   : > { %4163 = vmatpush3.bf16.msra.mxu1 %v1438_v16  ;;  %4164 = vmatprep.mubr.msk.bf16.mxu1 %vm521_vm1, %v4708_v38 }
  0x6b   : > { %4485 = vmatprep.subr.msk.bf16.mxu1 %vm528_vm0, %v3786_v15  ;;  %v4504_v15 = vld [vmem:[%s5071_s6 + $0x38] sm:$0xff]  }
  0x71   : > { %4165 = vmatmul.mubr.msk.bf16.vlgmr.msra.gmra.mrb[28].mxu1 %vm521_vm1, %v4731_v47 }
  0x72   : > { %4170 = vmatprep.mubr.msk.bf16.mxu1 %vm521_vm1, %v4737_v51  ;;  %4169 = vmatpush3.bf16.msra.mxu1 %v1494_v17 }
  0x73   : > { %4486 = vmatprep.subr.msk.bf16.mxu1 %vm528_vm0, %v3789_v18 }
  0x79   : > { %4171 = vmatmul.mubr.msk.bf16.vlgmr.msra.gmra.mrb[32].mxu1 %vm521_vm1, %v4755_v58 }
  0x7a   : > { %4176 = vmatprep.mubr.msk.bf16.mxu1 %vm521_vm1, %v4757_v59  ;;  %4175 = vmatpush3.bf16.msra.mxu1 %v1550_v19 }
  0x81   : > { %4177 = vmatmul.mubr.msk.bf16.vlgmr.msra.gmra.mrb[36].mxu1 %vm521_vm1, %v4768_v62 }
 0x10c   : > { %v4094_v20 = vpop.f32.mrb[0].mxu1 }
 0x10d   : > { %v754_v21 = vpop.f32.mrb[1].mxu1 }
 0x10e   : > { %v4095_v22 = vpop.f32.mrb[2].mxu1 }
 0x10f   : > { %v757_v23 = vpop.f32.mrb[3].mxu1 }
 0x114   : > { %v4130_v10 = vpop.f32.mrb[4].mxu1 }
 0x115   : > { %v1146_v14 = vpop.f32.mrb[5].mxu1 }
 0x116   : > { %v4131_v13 = vpop.f32.mrb[6].mxu1 }
 0x117   : > { %v1149_v17 = vpop.f32.mrb[7].mxu1 }
 0x119   : > { %v4124_v24 = vpop.f32.mrb[0].mxu0 }
 0x11a   : > { %v4342_v26 = vadd.f32 %v4124_v24, %v4094_v20  ;;  %v1089_v27 = vpop.f32.mrb[1].mxu0 }
 0x11b   : > { %v4343_v29 = vadd.f32 %v1089_v27, %v754_v21  ;;  %v4125_v30 = vpop.f32.mrb[2].mxu0 }
 0x11c   : > { %v1622_v31 = vmul.f32 %v4342_v26, %v3793_v25  ;;  %v1092_v32 = vpop.f32.mrb[3].mxu0  ;;  %v4136_v20 = vpop.f32.mrb[8].mxu1 }
 0x11d   : > { %v1620_v33 = vmul.f32 %v4343_v29, %v3793_v25  ;;  %v4344_v34 = vadd.f32 %v1092_v32, %v757_v23  ;;  %v1206_v23 = vadd.f32 %v4136_v20, %v4130_v10  ;;  %v1197_v24 = vpop.f32.mrb[9].mxu1 }
 0x11e   : > { %v1632_v35 = vadd.f32 %v3794_v28, %v1622_v31  ;;  %v4137_v26 = vpop.f32.mrb[10].mxu1 }
 0x11f   : > { %v1630_v36 = vadd.f32 %v3794_v28, %v1620_v33  ;;  %v1621_v37 = vmul.f32 %v4344_v34, %v3793_v25  ;;  %v1198_v25 = vadd.f32 %v1197_v24, %v1146_v14  ;;  %v1200_v29 = vpop.f32.mrb[11].mxu1 }
 0x120   : > { %v1635_v38 = vmax.f32 %v1632_v35, 0.0  ;;  %v1201_v31 = vadd.f32 %v1200_v29, %v1149_v17  ;;  %v2140_v35 = vld [vmem:[#allocation2 + $0x1d] sm:$0xff] }
 0x121   : > { %v1633_v39 = vmax.f32 %v1630_v36, 0.0  ;;  %v1631_v40 = vadd.f32 %v3794_v28, %v1621_v37  ;;  %v4505_v28 = vld [vmem:[%s5071_s6 + $0x40] sm:$0xff]  }
 0x122   : > { %1647 = vst.msk [vmem:[#allocation2 + $0x1a] sm:$0x7] %vm1646_vm4, %v1635_v38 }
 0x123   : > { %1637 = vst.msk [vmem:[#allocation2 + $0x7] sm:$0xf] %vm1636_vm5, %v1633_v39  ;;  %v1634_v41 = vmax.f32 %v1631_v40, 0.0  ;;  %v4919_v40 = vpack.c.bf16 %v2140_v35, %v2140_v35 }
 0x124   : > { %1639 = vst.msk [vmem:[#allocation2 + $0x8] sm:$0xe0] %vm1638_vm6, %v1633_v39  ;;  %v4142_v32 = vpop.f32.mrb[12].mxu1 }
 0x125   : > { %1641 = vst.msk [vmem:[#allocation2 + $0x10] sm:$0x1] %vm1640_vm7, %v1634_v41  ;;  %v1266_v33 = vadd.f32 %v4142_v32, %v1206_v23  ;;  %v1250_v34 = vpop.f32.mrb[13].mxu1  ;;  %v4506_v32 = vld [vmem:[%s5074_s9 + $0x8] sm:$0xff]  }
 0x126   : > { %1643 = vst.msk [vmem:[#allocation2 + $0x11] sm:$0x3c] %vm1642_vm8, %v1634_v41  ;;  %v1264_v36 = vadd.f32 %v1250_v34, %v1198_v25  ;;  %v4143_v37 = vpop.f32.mrb[14].mxu1  ;;  %4234 = vmatprep.subr.bf16.mxu1 %v4506_v32  ;;  %v3838_v34 = vld [vmem:[%s5072_s7] ss:$0 sm:$0xff] }
 0x127   : > { %1645 = vst.msk [vmem:[#allocation2 + $0x12] sm:$0x80] %vm1644_vm9, %v1634_v41  ;;  %v1253_v38 = vpop.f32.mrb[15].mxu1  ;;  %4235 = vmatpush3.bf16.msra.mxu1 %v4506_v32 }
 0x128   : > { %v1265_v39 = vadd.f32 %v1253_v38, %v1201_v31 }
 0x129   : > { %v2069_v19 = vld [vmem:[#allocation2 + $0x1c] sm:$0xff] }
 0x12a   : > { %v1655_v42 = vld [vmem:[#allocation2 + $0x1] sm:$0xff]  ;;  %v2071_v27 = vpack.c.bf16 %v2069_v19, %v2069_v19 }
 0x12b   : > { %v1648_v43 = vld [vmem:[#allocation2] sm:$0xff]  ;;  %v1649_v46 = vld [vmem:[#allocation2 + $0x8] sm:$0xff] }
 0x12c   : > { %v1656_v44 = vld [vmem:[#allocation2 + $0x9] sm:$0xff]  ;;  %v1651_v50 = vpack.c.bf16 %v1649_v46, %v1648_v43 }
 0x12d   : > { %v1657_v45 = vld [vmem:[#allocation2 + $0x11] sm:$0xff]  ;;  %v1658_v47 = vpack.c.bf16 %v1656_v44, %v1655_v42  ;;  %v1783_v54 = vld [vmem:[#allocation2 + $0x2] sm:$0xff]  ;;  %v4148_v42 = vpop.f32.mrb[16].mxu1 }
 0x12e   : > { %v1659_v48 = vpack.c.bf16 %v1657_v45, %v1657_v45  ;;  %v1650_v51 = vld [vmem:[#allocation2 + $0x10] sm:$0xff]  ;;  %v1854_v60 = vld [vmem:[#allocation2 + $0x6] sm:$0xff]  ;;  %v1322_v43 = vadd.f32 %v4148_v42, %v1266_v33  ;;  %v1306_v44 = vpop.f32.mrb[17].mxu1 }
 0x12f   : > { %4182 = vmatprep.mubr.msk.bf16.mxu0 %vm496_vm2, %v1658_v47  ;;  %v1784_v52 = vld [vmem:[#allocation2 + $0xa] sm:$0xff]  ;;  %v1652_v53 = vpack.c.bf16 %v1650_v51, %v1650_v51  ;;  %v1785_v57 = vld [vmem:[#allocation2 + $0x12] sm:$0xff]  ;;  %v1999_v8 = vpack.c.bf16 %v1650_v51, %v1649_v46  ;;  %v1320_v45 = vadd.f32 %v1306_v44, %v1264_v36  ;;  %v4149_v46 = vpop.f32.mrb[18].mxu1  ;;  %v4507_v33 = vld [vmem:[%s5074_s9] sm:$0xff]  }
 0x130   : > { %4183 = vmatmul.mubr.msk.bf16.vlgmr.msra.gmra.mrb[4].mxu0 %vm496_vm2, %v1659_v48  ;;  %v1786_v56 = vpack.c.bf16 %v1784_v52, %v1783_v54  ;;  %v4887_v58 = vld [vmem:[#allocation2 + $0xe] sm:$0xff]  ;;  %v1787_v59 = vpack.c.bf16 %v1785_v57, %v1785_v57  ;;  %v4895_v63 = vld [vmem:[#allocation2 + $0x16] sm:$0xff]  ;;  %v1309_v47 = vpop.f32.mrb[19].mxu1  ;;  %4240 = vmatprep.subr.bf16.mxu1 %v4507_v33  ;;  %v3839_v36 = vld [vmem:[%s5073_s8] ss:$0 sm:$0xff] }
 0x131   : > { %4187 = vmatpush3.bf16.msra.mxu0 %v4818_v9  ;;  %4188 = vmatprep.mubr.msk.bf16.mxu0 %vm496_vm2, %v1651_v50  ;;  %v1857_v62 = vpack.c.bf16 %v4887_v58, %v1854_v60  ;;  %v1926_v0 = vld [vmem:[#allocation2 + $0xf] sm:$0xff]  ;;  %v1858_v1 = vpack.c.bf16 %v4895_v63, %v4895_v63  ;;  %v1925_v2 = vld [vmem:[#allocation2 + $0x7] sm:$0xff]  ;;  %v1927_v5 = vld [vmem:[#allocation2 + $0x17] sm:$0xff]  ;;  %v2212_v41 = vpack.c.bf16 %v4895_v63, %v4887_v58 }
 0x132   : > { %4192 = vmatprep.subr.bf16.mxu0 %v4499_v49  ;;  %v1928_v4 = vpack.c.bf16 %v1926_v0, %v1925_v2  ;;  %v1929_v6 = vpack.c.bf16 %v1927_v5, %v1927_v5  ;;  %v1998_v9 = vld [vmem:[#allocation2 + $0x18] sm:$0xff]  ;;  %v2067_v11 = vld [vmem:[#allocation2 + $0xc] sm:$0xff]  ;;  %v1321_v48 = vadd.f32 %v1309_v47, %v1265_v39 }
 0x133   : > { %v2068_v12 = vld [vmem:[#allocation2 + $0x14] sm:$0xff]  ;;  %v2000_v16 = vpack.c.bf16 %v1998_v9, %v1998_v9 }
 0x134   : > { %v2070_v18 = vpack.c.bf16 %v2068_v12, %v2067_v11  ;;  %v2138_v21 = vld [vmem:[#allocation2 + $0xd] sm:$0xff]  ;;  %v2139_v22 = vld [vmem:[#allocation2 + $0x15] sm:$0xff]  ;;  %v4154_v50 = vpop.f32.mrb[20].mxu1 }
 0x135   : > { %v2141_v30 = vpack.c.bf16 %v2139_v22, %v2138_v21  ;;  %v1378_v52 = vadd.f32 %v4154_v50, %v1322_v43 }
 0x13c   : > { %4189 = vmatmul.mubr.msk.bf16.vlgmr.msra.gmra.mrb[4].mxu0 %vm496_vm2, %v1652_v53  ;;  %v1362_v53 = vpop.f32.mrb[21].mxu1 }
 0x13d   : > { %4193 = vmatpush3.bf16.msra.mxu0 %v4499_v49  ;;  %4194 = vmatprep.mubr.msk.bf16.mxu0 %vm496_vm2, %v1786_v56  ;;  %v2211_v49 = vld [vmem:[#allocation2 + $0x1e] sm:$0xff]  ;;  %v1376_v54 = vadd.f32 %v1362_v53, %v1320_v45 }
 0x13e   : > { %4198 = vmatprep.subr.bf16.mxu0 %v4500_v55  ;;  %v4926_v51 = vpack.c.bf16 %v2211_v49, %v2211_v49 }
 0x148   : > { %4195 = vmatmul.mubr.msk.bf16.vlgmr.msra.gmra.mrb[4].mxu0 %vm496_vm2, %v1787_v59 }
 0x149   : > { %4199 = vmatpush3.bf16.msra.mxu0 %v4500_v55  ;;  %4200 = vmatprep.mubr.msk.bf16.mxu0 %vm496_vm2, %v1857_v62  ;;  %v4155_v55 = vpop.f32.mrb[22].mxu1 }
 0x14a   : > { %4204 = vmatprep.subr.bf16.mxu0 %v4501_v61  ;;  %v1365_v56 = vpop.f32.mrb[23].mxu1 }
 0x14b   : > { %v1377_v57 = vadd.f32 %v1365_v56, %v1321_v48  ;;  %v4160_v58 = vpop.f32.mrb[24].mxu1 }
 0x14c   : > { %v1434_v59 = vadd.f32 %v4160_v58, %v1378_v52  ;;  %v1418_v60 = vpop.f32.mrb[25].mxu1 }
 0x14d   : > { %v4161_v62 = vpop.f32.mrb[26].mxu1 }
 0x14e   : > { %v1421_v63 = vpop.f32.mrb[27].mxu1 }
 0x14f   : > { %v1433_v0 = vadd.f32 %v1421_v63, %v1377_v57 }
 0x154   : > { %4201 = vmatmul.mubr.msk.bf16.vlgmr.msra.gmra.mrb[4].mxu0 %vm496_vm2, %v1858_v1  ;;  %v4166_v1 = vpop.f32.mrb[28].mxu1 }
 0x155   : > { %4205 = vmatpush3.bf16.msra.mxu0 %v4501_v61  ;;  %4206 = vmatprep.mubr.msk.bf16.mxu0 %vm496_vm2, %v1928_v4  ;;  %v1432_v61 = vadd.f32 %v1418_v60, %v1376_v54  ;;  %v1490_v2 = vadd.f32 %v4166_v1, %v1434_v59 }
 0x156   : > { %4210 = vmatprep.subr.bf16.mxu0 %v4502_v3 }
 0x160   : > { %4207 = vmatmul.mubr.msk.bf16.vlgmr.msra.gmra.mrb[4].mxu0 %vm496_vm2, %v1929_v6 }
 0x161   : > { %4211 = vmatpush3.bf16.msra.mxu0 %v4502_v3  ;;  %4212 = vmatprep.mubr.msk.bf16.mxu0 %vm496_vm2, %v1999_v8  ;;  %v1474_v3 = vpop.f32.mrb[29].mxu1 }
 0x162   : > { %4216 = vmatprep.subr.bf16.mxu0 %v4503_v7  ;;  %v1488_v4 = vadd.f32 %v1474_v3, %v1432_v61  ;;  %v4167_v5 = vpop.f32.mrb[30].mxu1 }
 0x163   : > { %v1477_v6 = vpop.f32.mrb[31].mxu1 }
 0x164   : > { %v4172_v8 = vpop.f32.mrb[32].mxu1 }
 0x165   : > { %v1546_v9 = vadd.f32 %v4172_v8, %v1490_v2  ;;  %v1530_v10 = vpop.f32.mrb[33].mxu1  ;;  %v4508_v2 = vld [vmem:[%s5074_s9 + $0x10] sm:$0xff]   ;;  %v4509_v8 = vld [vmem:[%s5074_s9 + $0x18] sm:$0xff]  }
 0x166   : > { %v1544_v11 = vadd.f32 %v1530_v10, %v1488_v4  ;;  %v4173_v12 = vpop.f32.mrb[34].mxu1 }
 0x167   : > { %v1533_v14 = vpop.f32.mrb[35].mxu1 }
 0x16c   : > { %4213 = vmatmul.mubr.msk.bf16.vlgmr.msra.gmra.mrb[4].mxu0 %vm496_vm2, %v2000_v16  ;;  %v4178_v16 = vpop.f32.mrb[36].mxu1 }
 0x16d   : > { %4217 = vmatpush3.bf16.msra.mxu0 %v4503_v7  ;;  %4218 = vmatprep.mubr.msk.bf16.mxu0 %vm496_vm2, %v2070_v18  ;;  %v1489_v7 = vadd.f32 %v1477_v6, %v1433_v0  ;;  %v1586_v17 = vpop.f32.mrb[37].mxu1  ;;  %v3792_v18 = vld [vmem:[%s5070_s5] ss:$0 sm:$0xff] }
 0x16e   : > { %4222 = vmatprep.subr.bf16.mxu0 %v4504_v15  ;;  %v1600_v19 = vadd.f32 %v1586_v17, %v1544_v11  ;;  %v4179_v20 = vpop.f32.mrb[38].mxu1 }
 0x16f   : > { %v1545_v13 = vadd.f32 %v1533_v14, %v1489_v7  ;;  %v1589_v21 = vpop.f32.mrb[39].mxu1  ;;  %v4511_v20 = vld [vmem:[%s5074_s9 + $0x28] sm:$0xff]  }
 0x170   : > { %v1610_v24 = vadd.f32 %v3792_v18, %v1600_v19 }
 0x171   : > { %v1601_v22 = vadd.f32 %v1589_v21, %v1545_v13  ;;  %v4510_v13 = vld [vmem:[%s5074_s9 + $0x20] sm:$0xff]  }
 0x173   : > { %v1611_v25 = vadd.f32 %v3792_v18, %v1601_v22 }
 0x175   : > { %v2327_v29 = vrot.slane %v1611_v25, 5  ;;  %v2319_v50 = vrot.slane %v1611_v25, 6 }
 0x178   : > { %4219 = vmatmul.mubr.msk.bf16.vlgmr.msra.gmra.mrb[4].mxu0 %vm496_vm2, %v2071_v27  ;;  %v2306_v27 = vrot.slane %v1610_v24, 7 }
 0x179   : > { %4223 = vmatpush3.bf16.msra.mxu0 %v4504_v15  ;;  %4224 = vmatprep.mubr.msk.bf16.mxu0 %vm496_vm2, %v2141_v30  ;;  %v1602_v15 = vadd.f32 %v4178_v16, %v1546_v9 }
 0x17a   : > { %4228 = vmatprep.subr.bf16.mxu0 %v4505_v28 }
 0x17b   : > { %v1612_v23 = vadd.f32 %v3792_v18, %v1602_v15 }
 0x17d   : > { %v2328_v26 = vrot.slane %v1612_v23, 5 }
 0x17f   : > { %v2329_v30 = vsel %vm2326_vm10, %v2327_v29, %v2328_v26 }
 0x184   : > { %4225 = vmatmul.mubr.msk.bf16.vlgmr.msra.gmra.mrb[4].mxu0 %vm496_vm2, %v4919_v40 }
 0x185   : > { %4229 = vmatpush3.bf16.msra.mxu0 %v4505_v28  ;;  %4230 = vmatprep.mubr.msk.bf16.mxu0 %vm496_vm2, %v2212_v41  ;;  %v2307_v28 = vrot.slane %v1611_v25, 7 }
 0x187   : > { %v2308_v31 = vsel %vm2305_vm11, %v2306_v27, %v2307_v28 }
 0x190   : > { %4231 = vmatmul.mubr.msk.bf16.vlgmr.msra.gmra.mrb[4].mxu0 %vm496_vm2, %v4926_v51 }
 0x263   : > { %v4232_v35 = vpop.f32.mrb[4].mxu0 }
 0x264   : > { %v2289_v37 = vmul.f32 %v4232_v35, %v3838_v34  ;;  %v2263_v38 = vpop.f32.mrb[5].mxu0 }
 0x265   : > { %v2287_v39 = vmul.f32 %v3838_v34, %v2263_v38  ;;  %v4233_v41 = vpop.f32.mrb[6].mxu0  ;;  %v2826_v38 = vld [vmem:[#allocation3 + $0x1d] sm:$0xff] }
 0x266   : > { %v2299_v42 = vadd.f32 %v3839_v36, %v2289_v37  ;;  %v2266_v43 = vpop.f32.mrb[7].mxu0 }
 0x267   : > { %v2297_v44 = vadd.f32 %v3839_v36, %v2287_v39  ;;  %v2288_v45 = vmul.f32 %v3838_v34, %v2266_v43  ;;  %v2828_v39 = vpack.c.bf16 %v2826_v38, %v2826_v38 }
 0x268   : > { %v2331_v46 = vadd.f32 %v2329_v30, %v2299_v42  ;;  %v4513_v30 = vld [vmem:[%s5074_s9 + $0x38] sm:$0xff]   ;;  %v2897_v42 = vld [vmem:[#allocation3 + $0x1e] sm:$0xff] }
 0x269   : > { %v2300_v47 = vadd.f32 %v2297_v44, %v1610_v24  ;;  %v2311_v48 = vadd.f32 %v2306_v27, %v2297_v44  ;;  %v2298_v49 = vadd.f32 %v3839_v36, %v2288_v45  ;;  %v4512_v24 = vld [vmem:[%s5074_s9 + $0x30] sm:$0xff]   ;;  %v4514_v36 = vld [vmem:[%s5074_s9 + $0x40] sm:$0xff]   ;;  %v2899_v43 = vpack.c.bf16 %v2897_v42, %v2897_v42  ;;  %v4515_v44 = vld [vmem:[%s5077_s12 + $0x8] sm:$0xff]  }
 0x26a   : > { %v2332_v52 = vmax.f32 %v2331_v46, 0.0  ;;  %4288 = vmatprep.subr.bf16.mxu0 %v4515_v44  ;;  %v4516_v45 = vld [vmem:[%s5077_s12] sm:$0xff]  }
 0x26b   : > { %v2301_v53 = vmax.f32 %v2300_v47, 0.0  ;;  %v2313_v54 = vmax.f32 %v2311_v48, 0.0  ;;  %v2312_v55 = vadd.f32 %v2308_v31, %v2298_v49  ;;  %v2321_v56 = vadd.f32 %v2319_v50, %v2298_v49  ;;  %4289 = vmatpush3.bf16.msra.mxu0 %v4515_v44  ;;  %v3883_v46 = vld [vmem:[%s5075_s10] ss:$0 sm:$0xff] }
 0x26c   : > { %2333 = vst.msk [vmem:[#allocation3 + $0x17] sm:$0x3c] %vm1642_vm8, %v2332_v52  ;;  %4294 = vmatprep.subr.bf16.mxu0 %v4516_v45  ;;  %v3884_v48 = vld [vmem:[%s5076_s11] ss:$0 sm:$0xff] }
 0x26d   : > { %2302 = vst.msk [vmem:[#allocation3 + $0x7] sm:$0xf] %vm1636_vm5, %v2301_v53  ;;  %v2314_v57 = vmax.f32 %v2312_v55, 0.0  ;;  %v2322_v58 = vmax.f32 %v2321_v56, 0.0 }
 0x26e   : > { %2316 = vst.msk [vmem:[#allocation3 + $0x7] sm:$0xc0] %vm2315_vm12, %v2313_v54 }
 0x26f   : > { %2318 = vst.msk [vmem:[#allocation3 + $0xf] sm:$0x3] %vm2317_vm13, %v2314_v57 }
 0x270   : > { %2324 = vst.msk [vmem:[#allocation3 + $0xf] sm:$0xf0] %vm2323_vm14, %v2322_v58 }
 0x273   : > { %v2613_v22 = vld [vmem:[#allocation3 + $0x17] sm:$0xff] }
 0x274   : > { %v2341_v59 = vld [vmem:[#allocation3 + $0x1] sm:$0xff]  ;;  %v2615_v23 = vpack.c.bf16 %v2613_v22, %v2613_v22  ;;  %v2684_v26 = vld [vmem:[#allocation3 + $0x18] sm:$0xff] }
 0x275   : > { %v2334_v1 = vld [vmem:[#allocation3] sm:$0xff]  ;;  %v2686_v29 = vpack.c.bf16 %v2684_v26, %v2684_v26 }
 0x276   : > { %v2342_v60 = vld [vmem:[#allocation3 + $0x9] sm:$0xff]  ;;  %v2755_v32 = vld [vmem:[#allocation3 + $0x1c] sm:$0xff] }
 0x277   : > { %v2343_v61 = vld [vmem:[#allocation3 + $0x11] sm:$0xff]  ;;  %v2335_v62 = vld [vmem:[#allocation3 + $0x8] sm:$0xff]  ;;  %v2344_v63 = vpack.c.bf16 %v2342_v60, %v2341_v59  ;;  %v2757_v35 = vpack.c.bf16 %v2755_v32, %v2755_v32 }
 0x278   : > { %v2345_v0 = vpack.c.bf16 %v2343_v61, %v2343_v61  ;;  %v2337_v3 = vpack.c.bf16 %v2335_v62, %v2334_v1  ;;  %v2336_v4 = vld [vmem:[#allocation3 + $0x10] sm:$0xff]  ;;  %v2469_v7 = vld [vmem:[#allocation3 + $0x2] sm:$0xff] }
 0x279   : > { %4236 = vmatprep.mubr.msk.bf16.mxu1 %vm496_vm2, %v2344_v63  ;;  %v2470_v5 = vld [vmem:[#allocation3 + $0xa] sm:$0xff]  ;;  %v2338_v6 = vpack.c.bf16 %v2336_v4, %v2336_v4  ;;  %v2471_v10 = vld [vmem:[#allocation3 + $0x12] sm:$0xff]  ;;  %v2685_v25 = vpack.c.bf16 %v2336_v4, %v2335_v62 }
 0x27a   : > { %4237 = vmatmul.mubr.msk.bf16.vlgmr.msra.gmra.mrb[40].mxu1 %vm496_vm2, %v2345_v0  ;;  %v2472_v9 = vpack.c.bf16 %v2470_v5, %v2469_v7  ;;  %v2541_v11 = vld [vmem:[#allocation3 + $0xe] sm:$0xff]  ;;  %v2473_v12 = vpack.c.bf16 %v2471_v10, %v2471_v10  ;;  %v2540_v14 = vld [vmem:[#allocation3 + $0x6] sm:$0xff]  ;;  %v2542_v15 = vld [vmem:[#allocation3 + $0x16] sm:$0xff] }
 0x27b   : > { %4241 = vmatpush3.bf16.msra.mxu1 %v4507_v33  ;;  %4242 = vmatprep.mubr.msk.bf16.mxu1 %vm496_vm2, %v2337_v3  ;;  %v2543_v16 = vpack.c.bf16 %v2541_v11, %v2540_v14  ;;  %v2612_v17 = vld [vmem:[#allocation3 + $0xf] sm:$0xff]  ;;  %v2544_v18 = vpack.c.bf16 %v2542_v15, %v2542_v15  ;;  %v2611_v19 = vld [vmem:[#allocation3 + $0x7] sm:$0xff]  ;;  %v2898_v41 = vpack.c.bf16 %v2542_v15, %v2541_v11 }
 0x27c   : > { %4246 = vmatprep.subr.bf16.mxu1 %v4508_v2  ;;  %v2614_v21 = vpack.c.bf16 %v2612_v17, %v2611_v19  ;;  %v2753_v27 = vld [vmem:[#allocation3 + $0xc] sm:$0xff]  ;;  %v2754_v28 = vld [vmem:[#allocation3 + $0x14] sm:$0xff] }
 0x27d   : > { %v2756_v31 = vpack.c.bf16 %v2754_v28, %v2753_v27  ;;  %v2824_v33 = vld [vmem:[#allocation3 + $0xd] sm:$0xff]  ;;  %v2825_v34 = vld [vmem:[#allocation3 + $0x15] sm:$0xff] }
 0x27e   : > { %v2827_v37 = vpack.c.bf16 %v2825_v34, %v2824_v33  ;;  %v4517_v5 = vld [vmem:[%s5077_s12 + $0x10] sm:$0xff]   ;;  %v4518_v11 = vld [vmem:[%s5077_s12 + $0x18] sm:$0xff]   ;;  %v4519_v17 = vld [vmem:[%s5077_s12 + $0x20] sm:$0xff]  }
 0x27f   : > { %v4521_v27 = vld [vmem:[%s5077_s12 + $0x30] sm:$0xff]   ;;  %v4522_v33 = vld [vmem:[%s5077_s12 + $0x38] sm:$0xff]  }
 0x286   : > { %4243 = vmatmul.mubr.msk.bf16.vlgmr.msra.gmra.mrb[40].mxu1 %vm496_vm2, %v2338_v6 }
 0x287   : > { %4247 = vmatpush3.bf16.msra.mxu1 %v4508_v2  ;;  %4248 = vmatprep.mubr.msk.bf16.mxu1 %vm496_vm2, %v2472_v9 }
 0x288   : > { %4252 = vmatprep.subr.bf16.mxu1 %v4509_v8 }
 0x292   : > { %4249 = vmatmul.mubr.msk.bf16.vlgmr.msra.gmra.mrb[40].mxu1 %vm496_vm2, %v2473_v12 }
 0x293   : > { %4253 = vmatpush3.bf16.msra.mxu1 %v4509_v8  ;;  %4254 = vmatprep.mubr.msk.bf16.mxu1 %vm496_vm2, %v2543_v16 }
 0x294   : > { %4258 = vmatprep.subr.bf16.mxu1 %v4510_v13 }
 0x29e   : > { %4255 = vmatmul.mubr.msk.bf16.vlgmr.msra.gmra.mrb[40].mxu1 %vm496_vm2, %v2544_v18 }
 0x29f   : > { %4259 = vmatpush3.bf16.msra.mxu1 %v4510_v13  ;;  %4260 = vmatprep.mubr.msk.bf16.mxu1 %vm496_vm2, %v2614_v21 }
 0x2a0   : > { %4264 = vmatprep.subr.bf16.mxu1 %v4511_v20 }
 0x2aa   : > { %4261 = vmatmul.mubr.msk.bf16.vlgmr.msra.gmra.mrb[40].mxu1 %vm496_vm2, %v2615_v23  ;;  %v4520_v23 = vld [vmem:[%s5077_s12 + $0x28] sm:$0xff]  }
 0x2ab   : > { %4265 = vmatpush3.bf16.msra.mxu1 %v4511_v20  ;;  %4266 = vmatprep.mubr.msk.bf16.mxu1 %vm496_vm2, %v2685_v25 }
 0x2ac   : > { %4270 = vmatprep.subr.bf16.mxu1 %v4512_v24 }
 0x2b6   : > { %4267 = vmatmul.mubr.msk.bf16.vlgmr.msra.gmra.mrb[40].mxu1 %vm496_vm2, %v2686_v29 }
 0x2b7   : > { %4271 = vmatpush3.bf16.msra.mxu1 %v4512_v24  ;;  %4272 = vmatprep.mubr.msk.bf16.mxu1 %vm496_vm2, %v2756_v31 }
 0x2b8   : > { %4276 = vmatprep.subr.bf16.mxu1 %v4513_v30 }
 0x2c2   : > { %4273 = vmatmul.mubr.msk.bf16.vlgmr.msra.gmra.mrb[40].mxu1 %vm496_vm2, %v2757_v35 }
 0x2c3   : > { %4277 = vmatpush3.bf16.msra.mxu1 %v4513_v30  ;;  %4278 = vmatprep.mubr.msk.bf16.mxu1 %vm496_vm2, %v2827_v37 }
 0x2c4   : > { %4282 = vmatprep.subr.bf16.mxu1 %v4514_v36 }
 0x2ce   : > { %4279 = vmatmul.mubr.msk.bf16.vlgmr.msra.gmra.mrb[40].mxu1 %vm496_vm2, %v2828_v39  ;;  %v4523_v39 = vld [vmem:[%s5077_s12 + $0x40] sm:$0xff]  }
 0x2cf   : > { %4283 = vmatpush3.bf16.msra.mxu1 %v4514_v36  ;;  %4284 = vmatprep.mubr.msk.bf16.mxu1 %vm496_vm2, %v2898_v41 }
 0x2da   : > { %4285 = vmatmul.mubr.msk.bf16.vlgmr.msra.gmra.mrb[40].mxu1 %vm496_vm2, %v2899_v43  ;;  %v3928_v43 = vld [vmem:[%s5078_s13] ss:$0 sm:$0xff] }
 0x3ad   : > { %v4286_v47 = vpop.f32.mrb[40].mxu1 }
 0x3ae   : > { %v2975_v49 = vmul.f32 %v4286_v47, %v3883_v46  ;;  %v2949_v50 = vpop.f32.mrb[41].mxu1 }
 0x3af   : > { %v2973_v52 = vmul.f32 %v3883_v46, %v2949_v50  ;;  %v4287_v53 = vpop.f32.mrb[42].mxu1 }
 0x3b0   : > { %v2985_v54 = vadd.f32 %v3884_v48, %v2975_v49  ;;  %v2952_v55 = vpop.f32.mrb[43].mxu1  ;;  %v3650_v49 = vld [vmem:[#allocation3 + $0xd] sm:$0xf] }
 0x3b1   : > { %v2983_v56 = vadd.f32 %v3884_v48, %v2973_v52  ;;  %v2974_v57 = vmul.f32 %v3883_v46, %v2952_v55  ;;  %v3669_v46 = vld [vmem:[#allocation3 + $0x19] sm:$0xf] }
 0x3b2   : > { %v2988_v58 = vmax.f32 %v2985_v54, 0.0  ;;  %v3671_v53 = vrot.slane %v3669_v46, 6 }
 0x3b3   : > { %v2986_v59 = vmax.f32 %v2983_v56, 0.0  ;;  %v2984_v60 = vadd.f32 %v3884_v48, %v2974_v57  ;;  %v3652_v56 = vrot.slane %v3650_v49, 2 }
 0x3b4   : > { %2993 = vst.msk [vmem:[#allocation2 + $0x17] sm:$0x3c] %vm1642_vm8, %v2988_v58 }
 0x3b5   : > { %2989 = vst.msk [vmem:[#allocation2 + $0x7] sm:$0xf] %vm1636_vm5, %v2986_v59  ;;  %v2987_v61 = vmax.f32 %v2984_v60, 0.0 }
 0x3b6   : > { %2990 = vst.msk [vmem:[#allocation2 + $0x7] sm:$0xc0] %vm2315_vm12, %v2986_v59  ;;  %v3646_v59 = vld [vmem:[#allocation3 + $0x7] sm:$0xf] }
 0x3b7   : > { %2991 = vst.msk [vmem:[#allocation2 + $0xf] sm:$0x3] %vm2317_vm13, %v2987_v61 }
 0x3b8   : > { %2992 = vst.msk [vmem:[#allocation2 + $0xf] sm:$0xf0] %vm2323_vm14, %v2987_v61 }
 0x3bb   : > { %v3273_v25 = vld [vmem:[#allocation2 + $0x17] sm:$0xff] }
 0x3bc   : > { %v3001_v62 = vld [vmem:[#allocation2 + $0x1] sm:$0xff]  ;;  %v3275_v26 = vpack.c.bf16 %v3273_v25, %v3273_v25  ;;  %v3344_v29 = vld [vmem:[#allocation2 + $0x18] sm:$0xff] }
 0x3bd   : > { %v2994_v4 = vld [vmem:[#allocation2] sm:$0xff]  ;;  %v3346_v32 = vpack.c.bf16 %v3344_v29, %v3344_v29 }
 0x3be   : > { %v3002_v63 = vld [vmem:[#allocation2 + $0x9] sm:$0xff]  ;;  %v3415_v35 = vld [vmem:[#allocation2 + $0x1c] sm:$0xff] }
 0x3bf   : > { %v3003_v0 = vld [vmem:[#allocation2 + $0x11] sm:$0xff]  ;;  %v2995_v1 = vld [vmem:[#allocation2 + $0x8] sm:$0xff]  ;;  %v3004_v2 = vpack.c.bf16 %v3002_v63, %v3001_v62  ;;  %v3417_v38 = vpack.c.bf16 %v3415_v35, %v3415_v35 }
 0x3c0   : > { %v3005_v3 = vpack.c.bf16 %v3003_v0, %v3003_v0  ;;  %v2997_v6 = vpack.c.bf16 %v2995_v1, %v2994_v4  ;;  %v2996_v7 = vld [vmem:[#allocation2 + $0x10] sm:$0xff]  ;;  %v3129_v10 = vld [vmem:[#allocation2 + $0x2] sm:$0xff] }
 0x3c1   : > { %4290 = vmatprep.mubr.msk.bf16.mxu0 %vm496_vm2, %v3004_v2  ;;  %v3130_v8 = vld [vmem:[#allocation2 + $0xa] sm:$0xff]  ;;  %v2998_v9 = vpack.c.bf16 %v2996_v7, %v2996_v7  ;;  %v3131_v14 = vld [vmem:[#allocation2 + $0x12] sm:$0xff]  ;;  %v3345_v28 = vpack.c.bf16 %v2996_v7, %v2995_v1 }
 0x3c2   : > { %4291 = vmatmul.mubr.msk.bf16.vlgmr.msra.gmra.mrb[8].mxu0 %vm496_vm2, %v3005_v3  ;;  %v3132_v12 = vpack.c.bf16 %v3130_v8, %v3129_v10  ;;  %v3201_v13 = vld [vmem:[#allocation2 + $0xe] sm:$0xff]  ;;  %v3133_v16 = vpack.c.bf16 %v3131_v14, %v3131_v14  ;;  %v3200_v15 = vld [vmem:[#allocation2 + $0x6] sm:$0xff]  ;;  %v3202_v19 = vld [vmem:[#allocation2 + $0x16] sm:$0xff] }
 0x3c3   : > { %4295 = vmatpush3.bf16.msra.mxu0 %v4516_v45  ;;  %4296 = vmatprep.mubr.msk.bf16.mxu0 %vm496_vm2, %v2997_v6  ;;  %v3203_v18 = vpack.c.bf16 %v3201_v13, %v3200_v15  ;;  %v3272_v20 = vld [vmem:[#allocation2 + $0xf] sm:$0xff]  ;;  %v3204_v21 = vpack.c.bf16 %v3202_v19, %v3202_v19  ;;  %v3271_v22 = vld [vmem:[#allocation2 + $0x7] sm:$0xff]  ;;  %v3558_v42 = vpack.c.bf16 %v3202_v19, %v3201_v13  ;;  %v3929_v45 = vld [vmem:[%s5079_s14] ss:$0 sm:$0xff] }
 0x3c4   : > { %4300 = vmatprep.subr.bf16.mxu0 %v4517_v5  ;;  %v3274_v24 = vpack.c.bf16 %v3272_v20, %v3271_v22  ;;  %v3413_v30 = vld [vmem:[#allocation2 + $0xc] sm:$0xff]  ;;  %v3414_v31 = vld [vmem:[#allocation2 + $0x14] sm:$0xff] }
 0x3c5   : > { %v3416_v34 = vpack.c.bf16 %v3414_v31, %v3413_v30  ;;  %v3484_v36 = vld [vmem:[#allocation2 + $0xd] sm:$0xff]  ;;  %v3485_v37 = vld [vmem:[#allocation2 + $0x15] sm:$0xff] }
 0x3c6   : > { %v3487_v41 = vpack.c.bf16 %v3485_v37, %v3484_v36 }
 0x3ce   : > { %4297 = vmatmul.mubr.msk.bf16.vlgmr.msra.gmra.mrb[8].mxu0 %vm496_vm2, %v2998_v9 }
 0x3cf   : > { %4301 = vmatpush3.bf16.msra.mxu0 %v4517_v5  ;;  %4302 = vmatprep.mubr.msk.bf16.mxu0 %vm496_vm2, %v3132_v12 }
 0x3d0   : > { %4306 = vmatprep.subr.bf16.mxu0 %v4518_v11 }
 0x3da   : > { %4303 = vmatmul.mubr.msk.bf16.vlgmr.msra.gmra.mrb[8].mxu0 %vm496_vm2, %v3133_v16 }
 0x3db   : > { %4307 = vmatpush3.bf16.msra.mxu0 %v4518_v11  ;;  %4308 = vmatprep.mubr.msk.bf16.mxu0 %vm496_vm2, %v3203_v18 }
 0x3dc   : > { %4312 = vmatprep.subr.bf16.mxu0 %v4519_v17 }
 0x3e6   : > { %4309 = vmatmul.mubr.msk.bf16.vlgmr.msra.gmra.mrb[8].mxu0 %vm496_vm2, %v3204_v21 }
 0x3e7   : > { %4313 = vmatpush3.bf16.msra.mxu0 %v4519_v17  ;;  %4314 = vmatprep.mubr.msk.bf16.mxu0 %vm496_vm2, %v3274_v24 }
 0x3e8   : > { %4318 = vmatprep.subr.bf16.mxu0 %v4520_v23 }
 0x3f2   : > { %4315 = vmatmul.mubr.msk.bf16.vlgmr.msra.gmra.mrb[8].mxu0 %vm496_vm2, %v3275_v26 }
 0x3f3   : > { %4319 = vmatpush3.bf16.msra.mxu0 %v4520_v23  ;;  %4320 = vmatprep.mubr.msk.bf16.mxu0 %vm496_vm2, %v3345_v28 }
 0x3f4   : > { %4324 = vmatprep.subr.bf16.mxu0 %v4521_v27 }
 0x3fe   : > { %4321 = vmatmul.mubr.msk.bf16.vlgmr.msra.gmra.mrb[8].mxu0 %vm496_vm2, %v3346_v32 }
 0x3ff   : > { %4325 = vmatpush3.bf16.msra.mxu0 %v4521_v27  ;;  %4326 = vmatprep.mubr.msk.bf16.mxu0 %vm496_vm2, %v3416_v34 }
 0x400   : > { %4330 = vmatprep.subr.bf16.mxu0 %v4522_v33 }
 0x40a   : > { %4327 = vmatmul.mubr.msk.bf16.vlgmr.msra.gmra.mrb[8].mxu0 %vm496_vm2, %v3417_v38 }
 0x40b   : > { %4331 = vmatpush3.bf16.msra.mxu0 %v4522_v33  ;;  %4332 = vmatprep.mubr.msk.bf16.mxu0 %vm496_vm2, %v3487_v41 }
 0x40c   : > { %4336 = vmatprep.subr.bf16.mxu0 %v4523_v39 }
 0x416   : > { %4333 = vmatmul.mubr.msk.bf16.vlgmr.msra.gmra.mrb[8].mxu0 %vm496_vm2, %v4919_v40 }
 0x417   : > { %4337 = vmatpush3.bf16.msra.mxu0 %v4523_v39  ;;  %4338 = vmatprep.mubr.msk.bf16.mxu0 %vm496_vm2, %v3558_v42 }
 0x422   : > { %4339 = vmatmul.mubr.msk.bf16.vlgmr.msra.gmra.mrb[8].mxu0 %vm496_vm2, %v4926_v51  ;;  %v3661_v51 = vld [vmem:[#allocation3 + $0x13] sm:$0xf] }
 0x423   : > { %v3663_v63 = vrot.slane %v3661_v51, 4 }
 0x4f5   : > { %v4340_v44 = vpop.f32.mrb[8].mxu0 }
 0x4f6   : > { %v3635_v47 = vmul.f32 %v4340_v44, %v3928_v43  ;;  %v3609_v48 = vpop.f32.mrb[9].mxu0 }
 0x4f7   : > { %v3633_v40 = vmul.f32 %v3928_v43, %v3609_v48  ;;  %v4341_v50 = vpop.f32.mrb[10].mxu0 }
 0x4f8   : > { %v3645_v52 = vadd.f32 %v3929_v45, %v3635_v47  ;;  %v3612_v54 = vpop.f32.mrb[11].mxu0 }
 0x4f9   : > { %v3643_v55 = vadd.f32 %v3929_v45, %v3633_v40  ;;  %v3634_v57 = vmul.f32 %v3928_v43, %v3612_v54 }
 0x4fa   : > { %v3673_v58 = vadd.f32 %v3671_v53, %v3645_v52 }
 0x4fb   : > { %v3647_v60 = vadd.f32 %v3646_v59, %v3643_v55  ;;  %v3654_v61 = vadd.f32 %v3652_v56, %v3643_v55  ;;  %v3644_v62 = vadd.f32 %v3929_v45, %v3634_v57 }
 0x4fc   : > { %v3674_v0 = vmax.f32 %v3673_v58, 0.0 }
 0x4fd   : > { %v3648_v1 = vmax.f32 %v3647_v60, 0.0  ;;  %v3656_v2 = vmax.f32 %v3654_v61, 0.0  ;;  %v3655_v3 = vadd.f32 %v3652_v56, %v3644_v62  ;;  %v3665_v4 = vadd.f32 %v3663_v63, %v3644_v62 }
 0x4fe   : > { %3933 = vst.msk [vmem:[%s494_s16 + $0xa] sm:$0x3c] %vm1642_vm8, %v3674_v0 }
 0x4ff   : > { %3649 = vst.msk [vmem:[%s494_s16] sm:$0xf] %vm1636_vm5, %v3648_v1  ;;  %v3657_v5 = vmax.f32 %v3655_v3, 0.0  ;;  %v3666_v6 = vmax.f32 %v3665_v4, 0.0 }
 0x500   : > { %3930 = vst.msk [vmem:[%s494_s16 - $0x2] sm:$0xc0] %vm2315_vm12, %v3656_v2 }
 0x501   : > { %3931 = vst.msk [vmem:[%s494_s16 + $0x6] sm:$0x3] %vm2317_vm13, %v3657_v5 }
 0x502   : > { %3932 = vst.msk [vmem:[%s494_s16 + $0x4] sm:$0xf0] %vm2323_vm14, %v3666_v6 }
 0x503 PF: > { %s25_s18 = sadd.s32 1, %s4530_s18  }
 0x504   : > { %p22_p4 = scmp.ge.s32.totalorder %s25_s18, 4  }
 0x506   :  { %24 = sbr.rel (!%p22_p4) target bundleno = 1 (0x1), region = 153 }

// kernel: resnet_bev_forward.5
= control target key start
LH: loop header
LB: loop body
LE: loop exit
PB: predicated region body
PF: predicated region fallthrough
CT: control target
= control target key end

     0   :  { %s5012_s0 = inlined_call_operand.vmem [shape: f32[2,44,16], index: 0, kind: input, shape index: {}]   ;;  %s5013_s1 = inlined_call_operand.vmem [shape: bf16[9,16,32], index: 1, kind: input, shape index: {}]   ;;  %s5014_s2 = inlined_call_operand.vmem [shape: f32[1,32], index: 2, kind: input, shape index: {}]   ;;  %s5015_s3 = inlined_call_operand.vmem [shape: f32[1,32], index: 3, kind: input, shape index: {}]   ;;  %s5016_s4 = inlined_call_operand.vmem [shape: bf16[9,16,32], index: 4, kind: input, shape index: {}]   ;;  %s5017_s5 = inlined_call_operand.vmem [shape: f32[1,32], index: 5, kind: input, shape index: {}]   ;;  %s5018_s6 = inlined_call_operand.vmem [shape: bf16[9,32,32], index: 6, kind: input, shape index: {}]   ;;  %s5019_s7 = inlined_call_operand.vmem [shape: f32[1,32], index: 7, kind: input, shape index: {}]   ;;  %s5020_s8 = inlined_call_operand.vmem [shape: f32[1,32], index: 8, kind: input, shape index: {}]   ;;  %s5021_s9 = inlined_call_operand.vmem [shape: bf16[9,32,32], index: 9, kind: input, shape index: {}]   ;;  %s5022_s10 = inlined_call_operand.vmem [shape: f32[1,32], index: 10, kind: input, shape index: {}]   ;;  %s5023_s11 = inlined_call_operand.vmem [shape: f32[1,32], index: 11, kind: input, shape index: {}]   ;;  %s5024_s12 = inlined_call_operand.vmem [shape: bf16[9,32,32], index: 12, kind: input, shape index: {}]   ;;  %s5025_s13 = inlined_call_operand.vmem [shape: f32[1,32], index: 13, kind: input, shape index: {}]   ;;  %s5026_s14 = inlined_call_operand.vmem [shape: f32[1,32], index: 14, kind: input, shape index: {}]   ;;  %s5027_s15 = inlined_call_operand.hbm [shape: f32[2,2,2,32], index: 15, kind: output, shape index: {}]  }
   0x1   :  { %5031 = sst [smem:[#allocation10_spill]] %s5012_s0 }
   0x2   :  { %20 = vsyncpa [#allocation5], 0 }
   0x3   :  { %22 = vsyncpa [#allocation5 + $0x1], 0  ;;  %s4409_s18 = smov 0   ;;  %s4411_s19 = smov 0  }
   0x4   :  { %s4413_s20 = smov 0   ;;  %s4415_s21 = smov 0  }
   0x5 LB: > { %5032 = sst [smem:[#allocation7_spill]] %s4318_s20  ;;  %s4430_s22 = sadd.s32 4294967295, %s4322_s21   ;;  %s4322_s21 = sphi %s4415_s21, %s5038_s21   ;;  %s4318_s20 = sphi %s4413_s20, %s5043_s20   ;;  %s4314_s19 = sphi %s4411_s19, %s5042_s19   ;;  %s4310_s18 = sphi %s4409_s18, %s5041_s18  }
   0x6   : > { %s3311_s23 = sadd.s32 4294967294, %s4322_s21   ;;  %s4434_s24 = sadd.s32 1, %s4322_s21  }
   0x7   : > { %5033 = sst [smem:[#allocation8_spill]] %s4434_s24  ;;  %s355_s25 = sadd.s32 1, %s4318_s20 }
   0x8   : > { %s352_s26 = ssub.s32 %s4322_s21, %s4434_s24  ;;  %p365_p0 = scmp.ne.s32.totalorder %s4318_s20, %s4314_s19 }
   0x9   : > { %p353_p1 = scmp.eq.s32.totalorder %s352_s26, 0  ;;  %p366_p2 = scmp.eq.s32.totalorder %s4430_s22, 1 }
   0xa   : > { %p371_p3 = scmp.ne.s32.totalorder %s4314_s19, %s4310_s18  ;;  %p372_p4 = scmp.eq.s32.totalorder %s3311_s23, 1 }
   0xb   : > { %s4445_s27 = scalar_select %p353_p1, %s4318_s20, %s355_s25  }
   0xc   : > { %p4447_p5 = por %p366_p2, %p365_p0  ;;  %p4451_p6 = por %p372_p4, %p371_p3 }
   0xd   : > { %5034 = sst [smem:[#allocation9_spill]] %s4445_s27  ;;  %p3314_p7 = scmp.ge.s32.totalorder %s4322_s21, 1 }
   0xe   : > { %p440_p8 = scmp.lt.s32.totalorder %s4322_s21, 3 }
  0x10   : > { %p441_p9 = pnand %p3314_p7, %p440_p8 }
  0x11   : > { %v4188_v0 = vld [vmem:[%s5013_s1 + $0x20] sm:$0xff] (!%p441_p9)   ;;  %v4324_v1 = vmov (!%p441_p9), 0.0   ;;  %v4189_v2 = vld [vmem:[%s5013_s1 + $0x8] sm:$0xff] (!%p441_p9)   ;;  %vm4325_vm0 = vmmov (!%p441_p9), 0   ;;  %p488_p10 = scmp.lt.s32.totalorder (!%p441_p9), %s4430_s22, 1  ;;  %s5037_s0 = sld [smem:[#allocation10_spill]] (!%p441_p9) }
  0x12   : > { %444 = sbr.rel (%p441_p9) target bundleno = 1293 (0x50d), region = 80  ;;  %3719 = vmatprep.subr.bf16.mxu0 (!%p441_p9), %v4324_v1  ;;  %3695 = vmatprep.subr.bf16.mxu1 (!%p441_p9), %v4324_v1  ;;  %v4190_v3 = vld [vmem:[%s5013_s1 + $0x28] sm:$0xff] (!%p441_p9)   ;;  %vm517_vm1 = vcmask (!%p441_p9), 130048   ;;  %v4191_v6 = vld [vmem:[%s5013_s1] sm:$0xff] (!%p441_p9)   ;;  %v4192_v11 = vld [vmem:[%s5013_s1 + $0x30] sm:$0xff] (!%p441_p9)   ;;  %vm494_vm2 = vcmask (!%p441_p9), 261120  }
  0x13   : > { %3720 = vmatpush3.bf16.msra.mxu0 (!%p441_p9), %v4188_v0  ;;  %3697 = vmatprep.mubr.msk.bf16.mxu1 (!%p441_p9), %vm4325_vm0, %v4324_v1  ;;  %v4193_v12 = vld [vmem:[%s5013_s1 + $0x10] sm:$0xff] (!%p441_p9)   ;;  %v4194_v17 = vld [vmem:[%s5013_s1 + $0x38] sm:$0xff] (!%p441_p9)   ;;  %v4196_v23 = vld [vmem:[%s5013_s1 + $0x40] sm:$0xff] (!%p441_p9)   ;;  %vm497_vm3 = vcmask (!%p441_p9), 254976   ;;  %495 = vst.msk [vmem:[#allocation2] sm:$0xff] (!%p441_p9), %vm494_vm2, %v4324_v1  ;;  %vm1468_vm4 = vcmask (!%p441_p9), 258051  }
  0x14   : > { %3696 = vmatpush3.bf16.msra.mxu1 (!%p441_p9), %v4189_v2  ;;  %3721 = vmatprep.mubr.msk.bf16.mxu0 (!%p441_p9), %vm4325_vm0, %v4324_v1  ;;  %v4195_v18 = vld [vmem:[%s5013_s1 + $0x18] sm:$0xff] (!%p441_p9)   ;;  %v4197_v28 = vld [vmem:[%s5016_s4 + $0x8] sm:$0xff] (!%p441_p9)   ;;  %496 = vst.msk [vmem:[#allocation2 + $0x8] sm:$0xff] (!%p441_p9), %vm494_vm2, %v4324_v1  ;;  %499 = vst.msk [vmem:[#allocation3] sm:$0xff] (!%p441_p9), %vm494_vm2, %v4324_v1  ;;  %vm2058_vm5 = vcmask (!%p441_p9), 259076   ;;  %s485_s16 = sand.u32 (!%p441_p9), 1, %s4314_s19  }
  0x15   : > { %3725 = vmatprep.subr.bf16.mxu0 (!%p441_p9), %v4324_v1  ;;  %3701 = vmatprep.subr.bf16.mxu1 (!%p441_p9), %v4324_v1  ;;  %498 = vst.msk [vmem:[#allocation2 + $0x10] sm:$0x3] (!%p441_p9), %vm497_vm3, %v4324_v1  ;;  %501 = vst.msk [vmem:[#allocation3 + $0x10] sm:$0x3] (!%p441_p9), %vm497_vm3, %v4324_v1  ;;  %v4198_v29 = vld [vmem:[%s5016_s4] sm:$0xff] (!%p441_p9)   ;;  %v4199_v30 = vld [vmem:[%s5018_s6 + $0x10] sm:$0xff] (!%p441_p9)  }
  0x16   : > { %500 = vst.msk [vmem:[#allocation3 + $0x8] sm:$0xff] (!%p441_p9), %vm494_vm2, %v4324_v1  ;;  %v4200_v31 = vld [vmem:[%s5016_s4 + $0x10] sm:$0xff] (!%p441_p9)   ;;  %v4201_v32 = vld [vmem:[%s5018_s6 + $0x18] sm:$0xff] (!%p441_p9)   ;;  %v4205_v34 = vld [vmem:[%s5016_s4 + $0x20] sm:$0xff] (!%p441_p9)   ;;  %s3315_s23 = sshll.u32 (!%p441_p9), %s485_s16, 2  ;;  %s4326_s27 = smov (!%p441_p9), [#allocation4]  }
  0x17   : > { %v4203_v33 = vld [vmem:[%s5016_s4 + $0x18] sm:$0xff] (!%p441_p9)   ;;  %v4208_v35 = vld [vmem:[%s5016_s4 + $0x28] sm:$0xff] (!%p441_p9)   ;;  %v4210_v36 = vld [vmem:[%s5016_s4 + $0x30] sm:$0xff] (!%p441_p9)  }
  0x18   : > { %v4212_v37 = vld [vmem:[%s5016_s4 + $0x38] sm:$0xff] (!%p441_p9)   ;;  %v4215_v38 = vld [vmem:[%s5016_s4 + $0x40] sm:$0xff] (!%p441_p9)   ;;  %v4204_v56 = vld [vmem:[%s5018_s6 + $0x8] sm:$0xff] (!%p441_p9)  }
  0x19   : > { %s489_s25 = scalar_select %p488_p10, %s4430_s22, 1  ;;  %v3386_v44 = vld [vmem:[%s5014_s2] ss:$0 sm:$0xff]  ;;  %v4207_v60 = vld [vmem:[%s5018_s6 + $0x28] sm:$0xff]   ;;  %v4209_v62 = vld [vmem:[%s5018_s6 + $0x30] sm:$0xff]  }
  0x1a   : > { %v3387_v47 = vld [vmem:[%s5015_s3] ss:$0 sm:$0xff]  ;;  %v4211_v0 = vld [vmem:[%s5018_s6 + $0x38] sm:$0xff]  }
  0x1b   : > { %s4144_s26 = smul.u32 48, %s489_s25  ;;  %v4202_v54 = vld [vmem:[%s5018_s6] sm:$0xff]   ;;  %s4264_s25 = sshll.u32 %s4326_s27, 4  ;;  %s4265_s25 = int_to_ptr.vmem [resolvable:$false] %s4264_s25 }
  0x1c   : > { %v4206_v58 = vld [vmem:[%s5018_s6 + $0x20] sm:$0xff]  }
  0x1d   : > { %s4476_s17 = scalar_lea.vmem %s5037_s0, %s4144_s26  ;;  %s487_s26 = scalar_lea.vmem [#allocation4], %s3315_s23 }
  0x1e   : > { %v506_v4 = vld [vmem:[%s4476_s17 + $0xb] sm:$0x3f]  ;;  %v720_v5 = vld [vmem:[%s4476_s17 + $0x21] sm:$0x3f]  ;;  %v775_v10 = vld [vmem:[%s4476_s17 + $0x17] sm:$0x3f] }
  0x1f   : > { %v4486_v7 = vpack.c.bf16 %v506_v4, %v506_v4  ;;  %v4488_v8 = vpack.c.bf16 %v720_v5, %v720_v5  ;;  %v502_v9 = vld [vmem:[%s4476_s17] sm:$0x3f]  ;;  %v4508_v14 = vpack.c.bf16 %v775_v10, %v775_v10  ;;  %v665_v21 = vld [vmem:[%s4476_s17 + $0x16] sm:$0x3f]  ;;  %v885_v22 = vld [vmem:[%s4476_s17 + $0xe] sm:$0x3f] }
  0x20   : > { %v503_v13 = vpack.c.bf16 %v502_v9, %v502_v9  ;;  %v610_v15 = vld [vmem:[%s4476_s17 + $0x1] sm:$0x3f]  ;;  %v666_v24 = vpack.c.bf16 %v665_v21, %v665_v21  ;;  %v4543_v25 = vpack.c.bf16 %v885_v22, %v885_v22  ;;  %v4214_v5 = vld [vmem:[%s5018_s6 + $0x48] sm:$0xff]   ;;  %v4217_v9 = vld [vmem:[%s5018_s6 + $0x58] sm:$0xff]   ;;  %s3249_s30 = sshll.u32 %s487_s26, 4  ;;  %s4967_s30 = int_to_ptr.vmem [resolvable:$true] %s3249_s30 }
  0x21   : > { %3698 = vmatmul.mubr.msk.bf16.vlgmr.msra.gmra.mrb[0].mxu1 %vm517_vm1, %v4486_v7  ;;  %3722 = vmatmul.mubr.msk.bf16.vlgmr.msra.gmra.mrb[0].mxu0 %vm517_vm1, %v4488_v8  ;;  %v830_v16 = vld [vmem:[%s4476_s17 + $0x3] sm:$0x3f]  ;;  %v611_v19 = vpack.c.bf16 %v610_v15, %v610_v15  ;;  %v4221_v21 = vld [vmem:[%s5018_s6 + $0x78] sm:$0xff]   ;;  %s4260_s23 = scalar_lea.vmem %s4967_s30, 64  ;;  %p4267_p0 = scmp.lt.s32.totalorder %s4967_s30, %s4265_s25 }
  0x22   : > { %3726 = vmatpush3.bf16.msra.mxu0 %v4190_v3  ;;  %3702 = vmatpush3.bf16.msra.mxu1 %v4191_v6  ;;  %v4527_v20 = vpack.c.bf16 %v830_v16, %v830_v16  ;;  %v940_v26 = vld [vmem:[%s4476_s17 + $0x4] sm:$0x3f]  ;;  %s3577_s17 = sshll.u32 %s4430_s22, 6  ;;  %s4971_s22 = scalar_lea.sflag [#allocation5], %s485_s16 }
  0x23   : > { %3703 = vmatprep.mubr.msk.bf16.mxu1 %vm4325_vm0, %v4324_v1  ;;  %3727 = vmatprep.mubr.msk.bf16.mxu0 %vm4325_vm0, %v4324_v1  ;;  %v941_v27 = vpack.c.bf16 %v940_v26, %v940_v26  ;;  %v4213_v3 = vld [vmem:[%s5018_s6 + $0x40] sm:$0xff]   ;;  %s4965_s0 = scalar_lea.hbm %s5027_s15, %s3577_s17  ;;  %p4261_p11 = scmp.ne.s32.totalorder %s4967_s30, %s4260_s23 }
  0x24   : > { %3731 = vmatprep.subr.bf16.mxu0 %v4324_v1  ;;  %3707 = vmatprep.subr.bf16.mxu1 %v4324_v1  ;;  %s4266_s17 = scalar_lea.vmem %s4265_s25, 128 }
  0x25   : > { %p4262_p12 = pnand %p4261_p11, %p4447_p5  ;;  %p4268_p1 = scmp.lt.s32.totalorder %s4266_s17, %s4260_s23 }
  0x27   : > { %p4263_p13 = pneg %p4262_p12  ;;  %p4269_p2 = por %p4268_p1, %p4267_p0 }
  0x29   : > { %p4270_p3 = pnand %p4269_p2, %p4263_p13 }
  0x2d   : > { %3704 = vmatmul.mubr.msk.bf16.vlgmr.msra.gmra.mrb[0].mxu1 %vm517_vm1, %v503_v13  ;;  %3728 = vmatmul.mubr.msk.bf16.vlgmr.msra.gmra.mrb[0].mxu0 %vm517_vm1, %v4508_v14 }
  0x2e   : > { %3732 = vmatpush3.bf16.msra.mxu0 %v4192_v11  ;;  %3708 = vmatpush3.bf16.msra.mxu1 %v4193_v12  ;;  %v4218_v11 = vld [vmem:[%s5018_s6 + $0x60] sm:$0xff]  }
  0x2f   : > { %3709 = vmatprep.mubr.msk.bf16.mxu1 %vm4325_vm0, %v4324_v1  ;;  %3733 = vmatprep.mubr.msk.bf16.mxu0 %vm4325_vm0, %v4324_v1 }
  0x30   : > { %3737 = vmatprep.subr.bf16.mxu0 %v4324_v1  ;;  %3713 = vmatprep.subr.bf16.mxu1 %v4324_v1 }
  0x39   : > { %3710 = vmatmul.mubr.msk.bf16.vlgmr.msra.gmra.mrb[0].mxu1 %vm517_vm1, %v611_v19  ;;  %3734 = vmatmul.mubr.msk.bf16.vlgmr.msra.gmra.mrb[0].mxu0 %vm517_vm1, %v4527_v20 }
  0x3a   : > { %3738 = vmatpush3.bf16.msra.mxu0 %v4194_v17  ;;  %3714 = vmatpush3.bf16.msra.mxu1 %v4195_v18 }
  0x3b   : > { %3715 = vmatprep.mubr.msk.bf16.mxu1 %vm4325_vm0, %v4324_v1  ;;  %3739 = vmatprep.mubr.msk.bf16.mxu0 %vm4325_vm0, %v4324_v1 }
  0x3c   : > { %3743 = vmatprep.subr.bf16.mxu0 %v4324_v1  ;;  %3749 = vmatprep.subr.bf16.mxu1 %v4324_v1 }
  0x45   : > { %3716 = vmatmul.mubr.msk.bf16.vlgmr.msra.gmra.mrb[0].mxu1 %vm517_vm1, %v666_v24  ;;  %3740 = vmatmul.mubr.msk.bf16.vlgmr.msra.gmra.mrb[0].mxu0 %vm517_vm1, %v4543_v25 }
  0x46   : > { %3744 = vmatpush3.bf16.msra.mxu0 %v4196_v23  ;;  %3745 = vmatprep.mubr.msk.bf16.mxu0 %vm4325_vm0, %v4324_v1 }
  0x47   : > { %3751 = vmatprep.mubr.msk.bf16.mxu1 %vm4325_vm0, %v4324_v1  ;;  %3803 = vmatprep.subr.bf16.mxu0 %v4324_v1 }
  0x48   : > { %3750 = vmatpush3.bf16.msra.mxu1 %v4197_v28  ;;  %v4222_v28 = vld [vmem:[%s5018_s6 + $0x80] sm:$0xff]  }
  0x49   : > { %3755 = vmatprep.subr.bf16.mxu1 %v4324_v1 }
  0x4d   : > { %3752 = vmatmul.mubr.msk.bf16.vlgmr.msra.gmra.mrb[4].mxu1 %vm517_vm1, %v4486_v7  ;;  %v4216_v7 = vld [vmem:[%s5018_s6 + $0x50] sm:$0xff]  }
  0x4e   : > { %3757 = vmatprep.mubr.msk.bf16.mxu1 %vm4325_vm0, %v4324_v1  ;;  %3756 = vmatpush3.bf16.msra.mxu1 %v4198_v29 }
  0x4f   : > { %3761 = vmatprep.subr.bf16.mxu1 %v4324_v1 }
  0x51   : > { %3746 = vmatmul.mubr.msk.bf16.vlgmr.msra.gmra.mrb[0].mxu0 %vm517_vm1, %v941_v27 }
  0x52   : > { %3807 = vmatprep.mubr.msk.bf16.mxu0 %vm4325_vm0, %v4324_v1  ;;  %3804 = vmatpush3.bf16.msra.mxu0 %v4199_v30 }
  0x53   : > { %3805 = vmatprep.subr.bf16.mxu0 %v4324_v1 }
  0x55   : > { %3758 = vmatmul.mubr.msk.bf16.vlgmr.msra.gmra.mrb[8].mxu1 %vm517_vm1, %v503_v13 }
  0x56   : > { %3763 = vmatprep.mubr.msk.bf16.mxu1 %vm4325_vm0, %v4324_v1  ;;  %3762 = vmatpush3.bf16.msra.mxu1 %v4200_v31 }
  0x57   : > { %3767 = vmatprep.subr.bf16.mxu1 %v4324_v1  ;;  %3806 = vmatpush3.bf16.msra.mxu0 %v4201_v32 }
  0x58   : > { %3811 = vmatprep.subr.bf16.mxu0 %v4324_v1 }
  0x5d   : > { %3764 = vmatmul.mubr.msk.bf16.vlgmr.msra.gmra.mrb[12].mxu1 %vm517_vm1, %v611_v19  ;;  %v4220_v19 = vld [vmem:[%s5018_s6 + $0x70] sm:$0xff]  }
  0x5e   : > { %3769 = vmatprep.mubr.msk.bf16.mxu1 %vm4325_vm0, %v4324_v1  ;;  %3768 = vmatpush3.bf16.msra.mxu1 %v4203_v33 }
  0x5f   : > { %3773 = vmatprep.subr.bf16.mxu1 %v4324_v1 }
  0x65   : > { %3770 = vmatmul.mubr.msk.bf16.vlgmr.msra.gmra.mrb[16].mxu1 %vm517_vm1, %v666_v24 }
  0x66   : > { %3774 = vmatpush3.bf16.msra.mxu1 %v4205_v34  ;;  %3775 = vmatprep.mubr.msk.bf16.mxu1 %vm4325_vm0, %v4324_v1 }
  0x67   : > { %3779 = vmatprep.subr.bf16.mxu1 %v4324_v1 }
  0x6d   : > { %3776 = vmatmul.mubr.msk.bf16.vlgmr.msra.gmra.mrb[20].mxu1 %vm517_vm1, %v4488_v8 }
  0x6e   : > { %3781 = vmatprep.mubr.msk.bf16.mxu1 %vm4325_vm0, %v4324_v1  ;;  %3780 = vmatpush3.bf16.msra.mxu1 %v4208_v35  ;;  %v4223_v35 = vld [vmem:[%s5018_s6 + $0x88] sm:$0xff]  }
  0x6f   : > { %3785 = vmatprep.subr.bf16.mxu1 %v4324_v1 }
  0x75   : > { %3782 = vmatmul.mubr.msk.bf16.vlgmr.msra.gmra.mrb[24].mxu1 %vm517_vm1, %v4508_v14  ;;  %v4219_v14 = vld [vmem:[%s5018_s6 + $0x68] sm:$0xff]  }
  0x76   : > { %3787 = vmatprep.mubr.msk.bf16.mxu1 %vm4325_vm0, %v4324_v1  ;;  %3786 = vmatpush3.bf16.msra.mxu1 %v4210_v36 }
  0x77   : > { %3791 = vmatprep.subr.bf16.mxu1 %v4324_v1 }
  0x7d   : > { %3788 = vmatmul.mubr.msk.bf16.vlgmr.msra.gmra.mrb[28].mxu1 %vm517_vm1, %v4527_v20 }
  0x7e   : > { %3792 = vmatpush3.bf16.msra.mxu1 %v4212_v37  ;;  %3793 = vmatprep.mubr.msk.bf16.mxu1 %vm4325_vm0, %v4324_v1 }
  0x7f   : > { %3797 = vmatprep.subr.bf16.mxu1 %v4324_v1 }
  0x85   : > { %3794 = vmatmul.mubr.msk.bf16.vlgmr.msra.gmra.mrb[32].mxu1 %vm517_vm1, %v4543_v25 }
  0x86   : > { %3799 = vmatprep.mubr.msk.bf16.mxu1 %vm4325_vm0, %v4324_v1  ;;  %3798 = vmatpush3.bf16.msra.mxu1 %v4215_v38 }
  0x87   : > { %3875 = vmatprep.subr.bf16.mxu1 %v4324_v1 }
  0x8d   : > { %3800 = vmatmul.mubr.msk.bf16.vlgmr.msra.gmra.mrb[36].mxu1 %vm517_vm1, %v941_v27 }
  0x8e   : > { %3879 = vmatprep.mubr.msk.bf16.mxu1 %vm4325_vm0, %v4324_v1 }
 0x118   : > { %v713_v39 = vpop.f32.mrb[0].mxu1 }
 0x119   : > { %v3717_v40 = vpop.f32.mrb[1].mxu1 }
 0x11a   : > { %v716_v41 = vpop.f32.mrb[2].mxu1 }
 0x11b   : > { %v3718_v42 = vpop.f32.mrb[3].mxu1 }
 0x120   : > { %v1040_v13 = vpop.f32.mrb[4].mxu1 }
 0x121   : > { %v3753_v15 = vpop.f32.mrb[5].mxu1 }
 0x122   : > { %v1043_v16 = vpop.f32.mrb[6].mxu1 }
 0x123   : > { %v3754_v17 = vpop.f32.mrb[7].mxu1 }
 0x124   : > { %v988_v43 = vpop.f32.mrb[0].mxu0 }
 0x125   : > { %v4019_v45 = vadd.f32 %v988_v43, %v713_v39  ;;  %v3747_v46 = vpop.f32.mrb[1].mxu0 }
 0x126   : > { %v991_v48 = vpop.f32.mrb[2].mxu0 }
 0x127   : > { %v1457_v49 = vmul.f32 %v4019_v45, %v3386_v44  ;;  %v3748_v50 = vpop.f32.mrb[3].mxu0 }
 0x128   : > { %v1086_v22 = vpop.f32.mrb[8].mxu1 }
 0x129   : > { %v1465_v51 = vadd.f32 %v3387_v47, %v1457_v49  ;;  %v1087_v23 = vadd.f32 %v1086_v22, %v1040_v13  ;;  %v3759_v24 = vpop.f32.mrb[9].mxu1 }
 0x12a   : > { %v1089_v25 = vpop.f32.mrb[10].mxu1 }
 0x12b   : > { %v1466_v52 = vmax.f32 %v1465_v51, 0.0  ;;  %v3760_v26 = vpop.f32.mrb[11].mxu1  ;;  %v4227_v25 = vld [vmem:[%s5021_s9 + $0x8] sm:$0xff]  }
 0x12d   : > { %1467 = vst.msk [vmem:[#allocation2 + $0x5] sm:$0x3] %vm497_vm3, %v1466_v52 }
 0x12e   : > { %1469 = vst.msk [vmem:[#allocation2 + $0x6] sm:$0x18] %vm1468_vm4, %v1466_v52 }
 0x130   : > { %v1135_v29 = vpop.f32.mrb[12].mxu1 }
 0x131   : > { %v1141_v31 = vadd.f32 %v1135_v29, %v1087_v23  ;;  %v3765_v32 = vpop.f32.mrb[13].mxu1  ;;  %v4226_v23 = vld [vmem:[%s5021_s9] sm:$0xff]   ;;  %v4229_v29 = vld [vmem:[%s5021_s9 + $0x28] sm:$0xff]  }
 0x132   : > { %v1138_v33 = vpop.f32.mrb[14].mxu1 }
 0x133   : > { %v3766_v34 = vpop.f32.mrb[15].mxu1  ;;  %v4231_v33 = vld [vmem:[%s5021_s9 + $0x38] sm:$0xff]  }
 0x134   : > { %v1476_v53 = vld [vmem:[#allocation2 + $0x1] sm:$0xff] }
 0x135   : > { %v1477_v55 = vpack.c.bf16 %v1476_v53, %v1476_v53  ;;  %v1470_v57 = vld [vmem:[#allocation2] sm:$0xff]  ;;  %v1845_v18 = vld [vmem:[#allocation2 + $0x8] sm:$0xff] }
 0x136   : > { %v1471_v59 = vpack.c.bf16 %v1470_v57, %v1470_v57  ;;  %v1593_v61 = vld [vmem:[#allocation2 + $0x2] sm:$0xff]  ;;  %v1846_v20 = vpack.c.bf16 %v1845_v18, %v1845_v18  ;;  %v1971_v39 = vld [vmem:[#allocation2 + $0xa] sm:$0xff] }
 0x137   : > { %3808 = vmatmul.mubr.msk.bf16.vlgmr.msra.gmra.mrb[4].mxu0 %vm494_vm2, %v1477_v55  ;;  %v1594_v63 = vpack.c.bf16 %v1593_v61, %v1593_v61  ;;  %v1656_v2 = vld [vmem:[#allocation2 + $0x4] sm:$0xff]  ;;  %v1972_v42 = vpack.c.bf16 %v1971_v39, %v1971_v39  ;;  %v4234_v39 = vld [vmem:[%s5021_s9 + $0x50] sm:$0xff]  }
 0x138   : > { %3812 = vmatpush3.bf16.msra.mxu0 %v4202_v54  ;;  %3815 = vmatprep.mubr.msk.bf16.mxu0 %vm4325_vm0, %v4324_v1  ;;  %v1657_v4 = vpack.c.bf16 %v1656_v2, %v1656_v2  ;;  %v1719_v6 = vld [vmem:[#allocation2 + $0x5] sm:$0xff]  ;;  %v1185_v36 = vpop.f32.mrb[16].mxu1 }
 0x139   : > { %3813 = vmatprep.subr.bf16.mxu0 %v4324_v1  ;;  %v1720_v8 = vpack.c.bf16 %v1719_v6, %v1719_v6  ;;  %v1782_v10 = vld [vmem:[#allocation2 + $0x6] sm:$0xff]  ;;  %v1191_v37 = vadd.f32 %v1185_v36, %v1141_v31  ;;  %v3771_v38 = vpop.f32.mrb[17].mxu1  ;;  %v4225_v6 = vld [vmem:[%s5021_s9 + $0x18] sm:$0xff]   ;;  %v4230_v31 = vld [vmem:[%s5021_s9 + $0x30] sm:$0xff]  }
 0x13a   : > { %v1783_v12 = vpack.c.bf16 %v1782_v10, %v1782_v10  ;;  %v1908_v27 = vld [vmem:[#allocation2 + $0x9] sm:$0xff]  ;;  %v1188_v40 = vpop.f32.mrb[18].mxu1 }
 0x13b   : > { %v1909_v30 = vpack.c.bf16 %v1908_v27, %v1908_v27  ;;  %v3772_v41 = vpop.f32.mrb[19].mxu1  ;;  %v4228_v27 = vld [vmem:[%s5021_s9 + $0x20] sm:$0xff]  }
 0x13c   : > { %3814 = vmatpush3.bf16.msra.mxu0 %v4204_v56  ;;  %v4235_v41 = vld [vmem:[%s5021_s9 + $0x58] sm:$0xff]  }
 0x13d   : > { %3819 = vmatprep.subr.bf16.mxu0 %v4324_v1 }
 0x140   : > { %v1235_v43 = vpop.f32.mrb[20].mxu1 }
 0x141   : > { %v1241_v44 = vadd.f32 %v1235_v43, %v1191_v37  ;;  %v3777_v45 = vpop.f32.mrb[21].mxu1  ;;  %v4233_v37 = vld [vmem:[%s5021_s9 + $0x48] sm:$0xff]   ;;  %v4236_v43 = vld [vmem:[%s5021_s9 + $0x60] sm:$0xff]  }
 0x142   : > { %v1238_v46 = vpop.f32.mrb[22].mxu1  ;;  %v4237_v45 = vld [vmem:[%s5021_s9 + $0x68] sm:$0xff]  }
 0x143   : > { %3816 = vmatmul.mubr.msk.bf16.vlgmr.msra.gmra.mrb[4].mxu0 %vm494_vm2, %v1471_v59  ;;  %v3778_v47 = vpop.f32.mrb[23].mxu1 }
 0x144   : > { %3820 = vmatpush3.bf16.msra.mxu0 %v4206_v58  ;;  %3823 = vmatprep.mubr.msk.bf16.mxu0 %vm4325_vm0, %v4324_v1  ;;  %v4238_v47 = vld [vmem:[%s5021_s9 + $0x70] sm:$0xff]  }
 0x145   : > { %3821 = vmatprep.subr.bf16.mxu0 %v4324_v1 }
 0x148   : > { %3822 = vmatpush3.bf16.msra.mxu0 %v4207_v60  ;;  %v1285_v48 = vpop.f32.mrb[24].mxu1 }
 0x149   : > { %3827 = vmatprep.subr.bf16.mxu0 %v4324_v1  ;;  %v1291_v49 = vadd.f32 %v1285_v48, %v1241_v44  ;;  %v3783_v50 = vpop.f32.mrb[25].mxu1 }
 0x14a   : > { %v1288_v51 = vpop.f32.mrb[26].mxu1 }
 0x14b   : > { %v3784_v52 = vpop.f32.mrb[27].mxu1  ;;  %v4240_v51 = vld [vmem:[%s5021_s9 + $0x80] sm:$0xff]  }
 0x14f   : > { %3824 = vmatmul.mubr.msk.bf16.vlgmr.msra.gmra.mrb[4].mxu0 %vm494_vm2, %v1594_v63 }
 0x150   : > { %3828 = vmatpush3.bf16.msra.mxu0 %v4209_v62  ;;  %3831 = vmatprep.mubr.msk.bf16.mxu0 %vm4325_vm0, %v4324_v1  ;;  %v1335_v53 = vpop.f32.mrb[28].mxu1 }
 0x151   : > { %3829 = vmatprep.subr.bf16.mxu0 %v4324_v1  ;;  %v1341_v54 = vadd.f32 %v1335_v53, %v1291_v49  ;;  %v3789_v55 = vpop.f32.mrb[29].mxu1  ;;  %v4239_v49 = vld [vmem:[%s5021_s9 + $0x78] sm:$0xff]   ;;  %v4241_v53 = vld [vmem:[%s5021_s9 + $0x88] sm:$0xff]  }
 0x152   : > { %v1338_v56 = vpop.f32.mrb[30].mxu1 }
 0x153   : > { %v3790_v57 = vpop.f32.mrb[31].mxu1  ;;  %v4242_v56 = vld [vmem:[%s5024_s12 + $0x10] sm:$0xff]  }
 0x154   : > { %3830 = vmatpush3.bf16.msra.mxu0 %v4211_v0  ;;  %v4243_v57 = vld [vmem:[%s5024_s12 + $0x18] sm:$0xff]  }
 0x155   : > { %3835 = vmatprep.subr.bf16.mxu0 %v4324_v1 }
 0x158   : > { %v1385_v58 = vpop.f32.mrb[32].mxu1 }
 0x159   : > { %v1391_v59 = vadd.f32 %v1385_v58, %v1341_v54  ;;  %v3795_v60 = vpop.f32.mrb[33].mxu1  ;;  %v3508_v58 = vld [vmem:[%s5022_s10] ss:$0 sm:$0xff] }
 0x15a   : > { %v1388_v61 = vpop.f32.mrb[34].mxu1  ;;  %v3509_v60 = vld [vmem:[%s5023_s11] ss:$0 sm:$0xff] }
 0x15b   : > { %3832 = vmatmul.mubr.msk.bf16.vlgmr.msra.gmra.mrb[4].mxu0 %vm494_vm2, %v1657_v4  ;;  %v3796_v62 = vpop.f32.mrb[35].mxu1 }
 0x15c   : > { %3836 = vmatpush3.bf16.msra.mxu0 %v4213_v3  ;;  %3839 = vmatprep.mubr.msk.bf16.mxu0 %vm4325_vm0, %v4324_v1 }
 0x15d   : > { %3837 = vmatprep.subr.bf16.mxu0 %v4324_v1 }
 0x160   : > { %3838 = vmatpush3.bf16.msra.mxu0 %v4214_v5  ;;  %v1435_v63 = vpop.f32.mrb[36].mxu1  ;;  %v4224_v5 = vld [vmem:[%s5021_s9 + $0x10] sm:$0xff]  }
 0x161   : > { %3843 = vmatprep.subr.bf16.mxu0 %v4324_v1  ;;  %v1441_v0 = vadd.f32 %v1435_v63, %v1391_v59  ;;  %v3801_v2 = vpop.f32.mrb[37].mxu1  ;;  %3876 = vmatpush3.bf16.msra.mxu1 %v4224_v5  ;;  %v4244_v5 = vld [vmem:[%s5024_s12] sm:$0xff]  }
 0x162   : > { %v1438_v3 = vpop.f32.mrb[38].mxu1  ;;  %3877 = vmatprep.subr.bf16.mxu1 %v4324_v1 }
 0x163   : > { %v3802_v4 = vpop.f32.mrb[39].mxu1 }
 0x165   : > { %3878 = vmatpush3.bf16.msra.mxu1 %v4225_v6 }
 0x166   : > { %3883 = vmatprep.subr.bf16.mxu1 %v4324_v1 }
 0x167   : > { %3840 = vmatmul.mubr.msk.bf16.vlgmr.msra.gmra.mrb[4].mxu0 %vm494_vm2, %v1720_v8  ;;  %v3447_v8 = vld [vmem:[%s5019_s7] ss:$0 sm:$0xff] }
 0x168   : > { %3844 = vmatpush3.bf16.msra.mxu0 %v4216_v7  ;;  %3847 = vmatprep.mubr.msk.bf16.mxu0 %vm4325_vm0, %v4324_v1  ;;  %v3385_v7 = vld [vmem:[%s5017_s5] ss:$0 sm:$0xff] }
 0x169   : > { %3845 = vmatprep.subr.bf16.mxu0 %v4324_v1 }
 0x16c   : > { %3846 = vmatpush3.bf16.msra.mxu0 %v4217_v9  ;;  %v1449_v9 = vadd.f32 %v3385_v7, %v1441_v0  ;;  %v4245_v7 = vld [vmem:[%s5024_s12 + $0x8] sm:$0xff]  }
 0x16d   : > { %3851 = vmatprep.subr.bf16.mxu0 %v4324_v1 }
 0x16e   : > { %v2054_v15 = vrot.slane %v1449_v9, 7 }
 0x173   : > { %3848 = vmatmul.mubr.msk.bf16.vlgmr.msra.gmra.mrb[4].mxu0 %vm494_vm2, %v1783_v12 }
 0x174   : > { %3852 = vmatpush3.bf16.msra.mxu0 %v4218_v11  ;;  %3855 = vmatprep.mubr.msk.bf16.mxu0 %vm4325_vm0, %v4324_v1  ;;  %v3448_v11 = vld [vmem:[%s5020_s8] ss:$0 sm:$0xff] }
 0x175   : > { %3853 = vmatprep.subr.bf16.mxu0 %v4324_v1 }
 0x178   : > { %3854 = vmatpush3.bf16.msra.mxu0 %v4219_v14 }
 0x179   : > { %3859 = vmatprep.subr.bf16.mxu0 %v4324_v1 }
 0x17f   : > { %3856 = vmatmul.mubr.msk.bf16.vlgmr.msra.gmra.mrb[4].mxu0 %vm494_vm2, %v1846_v20 }
 0x180   : > { %3860 = vmatpush3.bf16.msra.mxu0 %v4220_v19  ;;  %3863 = vmatprep.mubr.msk.bf16.mxu0 %vm4325_vm0, %v4324_v1 }
 0x181   : > { %3861 = vmatprep.subr.bf16.mxu0 %v4324_v1 }
 0x184   : > { %3862 = vmatpush3.bf16.msra.mxu0 %v4221_v21 }
 0x185   : > { %3867 = vmatprep.subr.bf16.mxu0 %v4324_v1 }
 0x18b   : > { %3864 = vmatmul.mubr.msk.bf16.vlgmr.msra.gmra.mrb[4].mxu0 %vm494_vm2, %v1909_v30 }
 0x18c   : > { %3868 = vmatpush3.bf16.msra.mxu0 %v4222_v28  ;;  %3871 = vmatprep.mubr.msk.bf16.mxu0 %vm4325_vm0, %v4324_v1 }
 0x18d   : > { %3869 = vmatprep.subr.bf16.mxu0 %v4324_v1 }
 0x190   : > { %3870 = vmatpush3.bf16.msra.mxu0 %v4223_v35  ;;  %v4232_v35 = vld [vmem:[%s5021_s9 + $0x40] sm:$0xff]  }
 0x191   : > { %3947 = vmatprep.subr.bf16.mxu0 %v4324_v1 }
 0x197   : > { %3872 = vmatmul.mubr.msk.bf16.vlgmr.msra.gmra.mrb[4].mxu0 %vm494_vm2, %v1972_v42 }
 0x198   : > { %3951 = vmatprep.mubr.msk.bf16.mxu0 %vm4325_vm0, %v4324_v1  ;;  %3948 = vmatpush3.bf16.msra.mxu0 %v4242_v56 }
 0x199   : > { %3949 = vmatprep.subr.bf16.mxu0 %v4324_v1 }
 0x19c   : > { %3950 = vmatpush3.bf16.msra.mxu0 %v4243_v57 }
 0x19d   : > { %3955 = vmatprep.subr.bf16.mxu0 %v4324_v1 }
 0x26a   : > { %v2027_v10 = vpop.f32.mrb[4].mxu0 }
 0x26b   : > { %v2041_v12 = vmul.f32 %v3447_v8, %v2027_v10  ;;  %v3873_v13 = vpop.f32.mrb[5].mxu0 }
 0x26c   : > { %v2030_v14 = vpop.f32.mrb[6].mxu0  ;;  %v4248_v13 = vld [vmem:[%s5024_s12 + $0x30] sm:$0xff]  }
 0x26d   : > { %v2049_v16 = vadd.f32 %v3448_v11, %v2041_v12  ;;  %v3874_v17 = vpop.f32.mrb[7].mxu0  ;;  %v4247_v11 = vld [vmem:[%s5024_s12 + $0x28] sm:$0xff]  }
 0x26e   : > { %v4250_v17 = vld [vmem:[%s5024_s12 + $0x40] sm:$0xff]  }
 0x26f   : > { %v2050_v18 = vadd.f32 %v2049_v16, %v1449_v9  ;;  %v2056_v19 = vadd.f32 %v2054_v15, %v2049_v16  ;;  %v4246_v9 = vld [vmem:[%s5024_s12 + $0x20] sm:$0xff]   ;;  %v4249_v15 = vld [vmem:[%s5024_s12 + $0x38] sm:$0xff]  }
 0x271   : > { %v2051_v20 = vmax.f32 %v2050_v18, 0.0  ;;  %v2057_v21 = vmax.f32 %v2056_v19, 0.0  ;;  %v4251_v19 = vld [vmem:[%s5024_s12 + $0x48] sm:$0xff]  }
 0x273   : > { %2052 = vst.msk [vmem:[#allocation3 + $0x5] sm:$0x3] %vm497_vm3, %v2051_v20 }
 0x274   : > { %2059 = vst.msk [vmem:[#allocation3 + $0x5] sm:$0x30] %vm2058_vm5, %v2057_v21  ;;  %v4252_v21 = vld [vmem:[%s5024_s12 + $0x50] sm:$0xff]  }
 0x27a   : > { %v2066_v22 = vld [vmem:[#allocation3 + $0x1] sm:$0xff] }
 0x27b   : > { %v2067_v24 = vpack.c.bf16 %v2066_v22, %v2066_v22  ;;  %v2060_v26 = vld [vmem:[#allocation3] sm:$0xff]  ;;  %v2435_v46 = vld [vmem:[#allocation3 + $0x8] sm:$0xff] }
 0x27c   : > { %v2061_v28 = vpack.c.bf16 %v2060_v26, %v2060_v26  ;;  %v2183_v30 = vld [vmem:[#allocation3 + $0x2] sm:$0xff]  ;;  %v2436_v48 = vpack.c.bf16 %v2435_v46, %v2435_v46  ;;  %v2561_v54 = vld [vmem:[#allocation3 + $0xa] sm:$0xff] }
 0x27d   : > { %3880 = vmatmul.mubr.msk.bf16.vlgmr.msra.gmra.mrb[40].mxu1 %vm494_vm2, %v2067_v24  ;;  %v2184_v32 = vpack.c.bf16 %v2183_v30, %v2183_v30  ;;  %v2246_v34 = vld [vmem:[#allocation3 + $0x4] sm:$0xff]  ;;  %v2562_v55 = vpack.c.bf16 %v2561_v54, %v2561_v54 }
 0x27e   : > { %3884 = vmatpush3.bf16.msra.mxu1 %v4226_v23  ;;  %3887 = vmatprep.mubr.msk.bf16.mxu1 %vm4325_vm0, %v4324_v1  ;;  %v2247_v36 = vpack.c.bf16 %v2246_v34, %v2246_v34  ;;  %v2309_v38 = vld [vmem:[#allocation3 + $0x5] sm:$0xff] }
 0x27f   : > { %3885 = vmatprep.subr.bf16.mxu1 %v4324_v1  ;;  %v2310_v40 = vpack.c.bf16 %v2309_v38, %v2309_v38  ;;  %v2372_v42 = vld [vmem:[#allocation3 + $0x6] sm:$0xff] }
 0x280   : > { %v2373_v44 = vpack.c.bf16 %v2372_v42, %v2372_v42  ;;  %v2498_v50 = vld [vmem:[#allocation3 + $0x9] sm:$0xff]  ;;  %v4253_v23 = vld [vmem:[%s5024_s12 + $0x58] sm:$0xff]   ;;  %v3569_v38 = vld [vmem:[%s5025_s13] ss:$0 sm:$0xff] }
 0x281   : > { %v2499_v52 = vpack.c.bf16 %v2498_v50, %v2498_v50 }
 0x282   : > { %3886 = vmatpush3.bf16.msra.mxu1 %v4227_v25  ;;  %v4254_v25 = vld [vmem:[%s5024_s12 + $0x60] sm:$0xff]  }
 0x283   : > { %3891 = vmatprep.subr.bf16.mxu1 %v4324_v1 }
 0x289   : > { %3888 = vmatmul.mubr.msk.bf16.vlgmr.msra.gmra.mrb[40].mxu1 %vm494_vm2, %v2061_v28 }
 0x28a   : > { %3892 = vmatpush3.bf16.msra.mxu1 %v4228_v27  ;;  %3895 = vmatprep.mubr.msk.bf16.mxu1 %vm4325_vm0, %v4324_v1  ;;  %v4255_v27 = vld [vmem:[%s5024_s12 + $0x68] sm:$0xff]  }
 0x28b   : > { %3893 = vmatprep.subr.bf16.mxu1 %v4324_v1 }
 0x28e   : > { %3894 = vmatpush3.bf16.msra.mxu1 %v4229_v29  ;;  %v4256_v29 = vld [vmem:[%s5024_s12 + $0x70] sm:$0xff]  }
 0x28f   : > { %3899 = vmatprep.subr.bf16.mxu1 %v4324_v1 }
 0x295   : > { %3896 = vmatmul.mubr.msk.bf16.vlgmr.msra.gmra.mrb[40].mxu1 %vm494_vm2, %v2184_v32 }
 0x296   : > { %3900 = vmatpush3.bf16.msra.mxu1 %v4230_v31  ;;  %3903 = vmatprep.mubr.msk.bf16.mxu1 %vm4325_vm0, %v4324_v1  ;;  %v4257_v31 = vld [vmem:[%s5024_s12 + $0x78] sm:$0xff]  }
 0x297   : > { %3901 = vmatprep.subr.bf16.mxu1 %v4324_v1 }
 0x29a   : > { %3902 = vmatpush3.bf16.msra.mxu1 %v4231_v33  ;;  %v4258_v33 = vld [vmem:[%s5024_s12 + $0x80] sm:$0xff]  }
 0x29b   : > { %3907 = vmatprep.subr.bf16.mxu1 %v4324_v1 }
 0x2a1   : > { %3904 = vmatmul.mubr.msk.bf16.vlgmr.msra.gmra.mrb[40].mxu1 %vm494_vm2, %v2247_v36 }
 0x2a2   : > { %3908 = vmatpush3.bf16.msra.mxu1 %v4232_v35  ;;  %3911 = vmatprep.mubr.msk.bf16.mxu1 %vm4325_vm0, %v4324_v1  ;;  %v4259_v35 = vld [vmem:[%s5024_s12 + $0x88] sm:$0xff]  }
 0x2a3   : > { %3909 = vmatprep.subr.bf16.mxu1 %v4324_v1 }
 0x2a6   : > { %3910 = vmatpush3.bf16.msra.mxu1 %v4233_v37 }
 0x2a7   : > { %3915 = vmatprep.subr.bf16.mxu1 %v4324_v1 }
 0x2ad   : > { %3912 = vmatmul.mubr.msk.bf16.vlgmr.msra.gmra.mrb[40].mxu1 %vm494_vm2, %v2310_v40  ;;  %v3570_v40 = vld [vmem:[%s5026_s14] ss:$0 sm:$0xff] }
 0x2ae   : > { %3916 = vmatpush3.bf16.msra.mxu1 %v4234_v39  ;;  %3919 = vmatprep.mubr.msk.bf16.mxu1 %vm4325_vm0, %v4324_v1 }
 0x2af   : > { %3917 = vmatprep.subr.bf16.mxu1 %v4324_v1 }
 0x2b2   : > { %3918 = vmatpush3.bf16.msra.mxu1 %v4235_v41  ;;  %v3227_v41 = vld [vmem:[#allocation3 + $0x9] sm:$0x3] }
 0x2b3   : > { %3923 = vmatprep.subr.bf16.mxu1 %v4324_v1 }
 0x2b9   : > { %3920 = vmatmul.mubr.msk.bf16.vlgmr.msra.gmra.mrb[40].mxu1 %vm494_vm2, %v2373_v44 }
 0x2ba   : > { %3924 = vmatpush3.bf16.msra.mxu1 %v4236_v43  ;;  %3927 = vmatprep.mubr.msk.bf16.mxu1 %vm4325_vm0, %v4324_v1 }
 0x2bb   : > { %3925 = vmatprep.subr.bf16.mxu1 %v4324_v1 }
 0x2be   : > { %3926 = vmatpush3.bf16.msra.mxu1 %v4237_v45  ;;  %v3229_v45 = vrot.slane %v3227_v41, 4 }
 0x2bf   : > { %3931 = vmatprep.subr.bf16.mxu1 %v4324_v1 }
 0x2c5   : > { %3928 = vmatmul.mubr.msk.bf16.vlgmr.msra.gmra.mrb[40].mxu1 %vm494_vm2, %v2436_v48 }
 0x2c6   : > { %3932 = vmatpush3.bf16.msra.mxu1 %v4238_v47  ;;  %3935 = vmatprep.mubr.msk.bf16.mxu1 %vm4325_vm0, %v4324_v1  ;;  %v3223_v47 = vld [vmem:[#allocation3 + $0x5] sm:$0x3] }
 0x2c7   : > { %3933 = vmatprep.subr.bf16.mxu1 %v4324_v1 }
 0x2ca   : > { %3934 = vmatpush3.bf16.msra.mxu1 %v4239_v49 }
 0x2cb   : > { %3939 = vmatprep.subr.bf16.mxu1 %v4324_v1 }
 0x2d1   : > { %3936 = vmatmul.mubr.msk.bf16.vlgmr.msra.gmra.mrb[40].mxu1 %vm494_vm2, %v2499_v52 }
 0x2d2   : > { %3940 = vmatpush3.bf16.msra.mxu1 %v4240_v51  ;;  %3943 = vmatprep.mubr.msk.bf16.mxu1 %vm4325_vm0, %v4324_v1 }
 0x2d3   : > { %3941 = vmatprep.subr.bf16.mxu1 %v4324_v1 }
 0x2d6   : > { %3942 = vmatpush3.bf16.msra.mxu1 %v4241_v53 }
 0x2dd   : > { %3944 = vmatmul.mubr.msk.bf16.vlgmr.msra.gmra.mrb[40].mxu1 %vm494_vm2, %v2562_v55 }
 0x3b0   : > { %v2617_v59 = vpop.f32.mrb[40].mxu1 }
 0x3b1   : > { %v2631_v61 = vmul.f32 %v3508_v58, %v2617_v59  ;;  %v3945_v62 = vpop.f32.mrb[41].mxu1 }
 0x3b2   : > { %v2620_v63 = vpop.f32.mrb[42].mxu1 }
 0x3b3   : > { %v2639_v0 = vadd.f32 %v3509_v60, %v2631_v61  ;;  %v3946_v2 = vpop.f32.mrb[43].mxu1 }
 0x3b5   : > { %v2640_v3 = vmax.f32 %v2639_v0, 0.0 }
 0x3b7   : > { %2641 = vst.msk [vmem:[#allocation2 + $0x5] sm:$0x3] %vm497_vm3, %v2640_v3 }
 0x3b8   : > { %2642 = vst.msk [vmem:[#allocation2 + $0x5] sm:$0x30] %vm2058_vm5, %v2640_v3 }
 0x3be   : > { %v2649_v4 = vld [vmem:[#allocation2 + $0x1] sm:$0xff] }
 0x3bf   : > { %v2650_v6 = vpack.c.bf16 %v2649_v4, %v2649_v4  ;;  %v2643_v8 = vld [vmem:[#allocation2] sm:$0xff]  ;;  %v3018_v28 = vld [vmem:[#allocation2 + $0x8] sm:$0xff] }
 0x3c0   : > { %v2644_v10 = vpack.c.bf16 %v2643_v8, %v2643_v8  ;;  %v2766_v12 = vld [vmem:[#allocation2 + $0x2] sm:$0xff]  ;;  %v3019_v30 = vpack.c.bf16 %v3018_v28, %v3018_v28  ;;  %v3144_v36 = vld [vmem:[#allocation2 + $0xa] sm:$0xff] }
 0x3c1   : > { %3952 = vmatmul.mubr.msk.bf16.vlgmr.msra.gmra.mrb[8].mxu0 %vm494_vm2, %v2650_v6  ;;  %v2767_v14 = vpack.c.bf16 %v2766_v12, %v2766_v12  ;;  %v2829_v16 = vld [vmem:[#allocation2 + $0x4] sm:$0xff]  ;;  %v3145_v37 = vpack.c.bf16 %v3144_v36, %v3144_v36 }
 0x3c2   : > { %3956 = vmatpush3.bf16.msra.mxu0 %v4244_v5  ;;  %3959 = vmatprep.mubr.msk.bf16.mxu0 %vm4325_vm0, %v4324_v1  ;;  %v2830_v18 = vpack.c.bf16 %v2829_v16, %v2829_v16  ;;  %v2892_v20 = vld [vmem:[#allocation2 + $0x5] sm:$0xff] }
 0x3c3   : > { %3957 = vmatprep.subr.bf16.mxu0 %v4324_v1  ;;  %v2893_v22 = vpack.c.bf16 %v2892_v20, %v2892_v20  ;;  %v2955_v24 = vld [vmem:[#allocation2 + $0x6] sm:$0xff] }
 0x3c4   : > { %v2956_v26 = vpack.c.bf16 %v2955_v24, %v2955_v24  ;;  %v3081_v32 = vld [vmem:[#allocation2 + $0x9] sm:$0xff] }
 0x3c5   : > { %v3082_v34 = vpack.c.bf16 %v3081_v32, %v3081_v32 }
 0x3c6   : > { %3958 = vmatpush3.bf16.msra.mxu0 %v4245_v7 }
 0x3c7   : > { %3963 = vmatprep.subr.bf16.mxu0 %v4324_v1 }
 0x3cd   : > { %3960 = vmatmul.mubr.msk.bf16.vlgmr.msra.gmra.mrb[8].mxu0 %vm494_vm2, %v2644_v10 }
 0x3ce   : > { %3964 = vmatpush3.bf16.msra.mxu0 %v4246_v9  ;;  %3967 = vmatprep.mubr.msk.bf16.mxu0 %vm4325_vm0, %v4324_v1 }
 0x3cf   : > { %3965 = vmatprep.subr.bf16.mxu0 %v4324_v1 }
 0x3d2   : > { %3966 = vmatpush3.bf16.msra.mxu0 %v4247_v11 }
 0x3d3   : > { %3971 = vmatprep.subr.bf16.mxu0 %v4324_v1 }
 0x3d9   : > { %3968 = vmatmul.mubr.msk.bf16.vlgmr.msra.gmra.mrb[8].mxu0 %vm494_vm2, %v2767_v14 }
 0x3da   : > { %3972 = vmatpush3.bf16.msra.mxu0 %v4248_v13  ;;  %3975 = vmatprep.mubr.msk.bf16.mxu0 %vm4325_vm0, %v4324_v1 }
 0x3db   : > { %3973 = vmatprep.subr.bf16.mxu0 %v4324_v1 }
 0x3de   : > { %3974 = vmatpush3.bf16.msra.mxu0 %v4249_v15 }
 0x3df   : > { %3979 = vmatprep.subr.bf16.mxu0 %v4324_v1 }
 0x3e5   : > { %3976 = vmatmul.mubr.msk.bf16.vlgmr.msra.gmra.mrb[8].mxu0 %vm494_vm2, %v2830_v18 }
 0x3e6   : > { %3980 = vmatpush3.bf16.msra.mxu0 %v4250_v17  ;;  %3983 = vmatprep.mubr.msk.bf16.mxu0 %vm4325_vm0, %v4324_v1 }
 0x3e7   : > { %3981 = vmatprep.subr.bf16.mxu0 %v4324_v1 }
 0x3ea   : > { %3982 = vmatpush3.bf16.msra.mxu0 %v4251_v19 }
 0x3eb   : > { %3987 = vmatprep.subr.bf16.mxu0 %v4324_v1 }
 0x3f1   : > { %3984 = vmatmul.mubr.msk.bf16.vlgmr.msra.gmra.mrb[8].mxu0 %vm494_vm2, %v2893_v22 }
 0x3f2   : > { %3988 = vmatpush3.bf16.msra.mxu0 %v4252_v21  ;;  %3991 = vmatprep.mubr.msk.bf16.mxu0 %vm4325_vm0, %v4324_v1 }
 0x3f3   : > { %3989 = vmatprep.subr.bf16.mxu0 %v4324_v1 }
 0x3f6   : > { %3990 = vmatpush3.bf16.msra.mxu0 %v4253_v23 }
 0x3f7   : > { %3995 = vmatprep.subr.bf16.mxu0 %v4324_v1 }
 0x3fd   : > { %3992 = vmatmul.mubr.msk.bf16.vlgmr.msra.gmra.mrb[8].mxu0 %vm494_vm2, %v2956_v26 }
 0x3fe   : > { %3996 = vmatpush3.bf16.msra.mxu0 %v4254_v25  ;;  %3999 = vmatprep.mubr.msk.bf16.mxu0 %vm4325_vm0, %v4324_v1 }
 0x3ff   : > { %3997 = vmatprep.subr.bf16.mxu0 %v4324_v1 }
 0x402   : > { %3998 = vmatpush3.bf16.msra.mxu0 %v4255_v27 }
 0x403   : > { %4003 = vmatprep.subr.bf16.mxu0 %v4324_v1 }
 0x409   : > { %4000 = vmatmul.mubr.msk.bf16.vlgmr.msra.gmra.mrb[8].mxu0 %vm494_vm2, %v3019_v30 }
 0x40a   : > { %4004 = vmatpush3.bf16.msra.mxu0 %v4256_v29  ;;  %4007 = vmatprep.mubr.msk.bf16.mxu0 %vm4325_vm0, %v4324_v1 }
 0x40b   : > { %4005 = vmatprep.subr.bf16.mxu0 %v4324_v1 }
 0x40e   : > { %4006 = vmatpush3.bf16.msra.mxu0 %v4257_v31 }
 0x40f   : > { %4011 = vmatprep.subr.bf16.mxu0 %v4324_v1 }
 0x415   : > { %4008 = vmatmul.mubr.msk.bf16.vlgmr.msra.gmra.mrb[8].mxu0 %vm494_vm2, %v3082_v34 }
 0x416   : > { %4012 = vmatpush3.bf16.msra.mxu0 %v4258_v33  ;;  %4015 = vmatprep.mubr.msk.bf16.mxu0 %vm4325_vm0, %v4324_v1 }
 0x417   : > { %4013 = vmatprep.subr.bf16.mxu0 %v4324_v1 }
 0x41a   : > { %4014 = vmatpush3.bf16.msra.mxu0 %v4259_v35 }
 0x421   : > { %4016 = vmatmul.mubr.msk.bf16.vlgmr.msra.gmra.mrb[8].mxu0 %vm494_vm2, %v3145_v37 }
 0x4f4   : > { %v3200_v39 = vpop.f32.mrb[8].mxu0 }
 0x4f5   : > { %v3214_v42 = vmul.f32 %v3569_v38, %v3200_v39  ;;  %v4017_v1 = vpop.f32.mrb[9].mxu0 }
 0x4f6   : > { %v3203_v43 = vpop.f32.mrb[10].mxu0 }
 0x4f7   : > { %v3222_v44 = vadd.f32 %v3570_v40, %v3214_v42  ;;  %v4018_v46 = vpop.f32.mrb[11].mxu0 }
 0x4f9   : > { %v3224_v48 = vadd.f32 %v3223_v47, %v3222_v44  ;;  %v3231_v49 = vadd.f32 %v3229_v45, %v3222_v44 }
 0x4fb   : > { %v3225_v50 = vmax.f32 %v3224_v48, 0.0  ;;  %v3232_v51 = vmax.f32 %v3231_v49, 0.0 }
 0x4fd   : > { %3226 = vst.msk [vmem:[%s487_s26] sm:$0x3] %vm497_vm3, %v3225_v50 }
 0x4fe   : > { %3571 = vst.msk [vmem:[%s487_s26 - $0x2] sm:$0x30] %vm2058_vm5, %v3232_v51 }
 0x4ff   : > { %4273 = shalt.err (!%p4270_p3)
}
 0x500   : > { %s4274_s16 = scalar_lea.hbm %s4965_s0, 64  ;;  %s4278_s24 = scalar_lea.hbm %s5027_s15, 128 }
 0x501   : > { %p4275_p4 = scmp.ne.s32.totalorder %s4965_s0, %s4274_s16  ;;  %p4279_p9 = scmp.lt.u32.totalorder %s4965_s0, %s5027_s15 }
 0x502   : > { %p4280_p10 = scmp.lt.u32.totalorder %s4278_s24, %s4274_s16  ;;  %p4282_p12 = scmp.lt.u32.totalorder %s4274_s16, %s4965_s0 }
 0x503   : > { %p4276_p7 = pnand %p4275_p4, %p4447_p5 }
 0x504   : > { %p4281_p11 = por %p4280_p10, %p4279_p9 }
 0x505   : > { %p4277_p8 = pneg %p4276_p7 }
 0x506   : > { %p4283_p13 = por %p4282_p12, %p4281_p11 }
 0x508   : > { %p4284_p0 = pnand %p4283_p13, %p4277_p8 }
 0x50a   : > { %4287 = shalt.err (!%p4284_p0)
}
 0x50b   : > { %s4327_s23 = smov 32   ;;  %s4328_s17 = smov 2  }
 0x50c   : > { %4145 = dma.vmem_to_hbm [thread:$0]  (%p4447_p5), %s4967_s30, 64, %s4965_s0, %s4971_s22, %s4327_s23, %s4327_s23, %s4328_s17  }
 0x50d PF: > { %p4151_p1 = scmp.ge.s32.totalorder %s4322_s21, 2  ;;  %s3264_s26 = sand.u32 1, %s4310_s18  }
 0x50e   : > { %s3265_s16 = scalar_lea.sflag [#allocation5], %s3264_s26 }
 0x50f   : > { %p4148_p2 = pnand %p4151_p1, %p4451_p6 }
 0x511   : > { %4305 = dma.done.wait (!%p4148_p2), %s3265_s16, 64  }
 0x512   : > { %4307 = vsyncadd (!%p4148_p2), %s3265_s16, 4294967232  ;;  %s5038_s21 = sld [smem:[#allocation8_spill]]  ;;  %s5039_s20 = sld [smem:[#allocation7_spill]] }
 0x513   : > { %s5040_s24 = sld [smem:[#allocation9_spill]]  ;;  %s5041_s18 = smov %s4314_s19 }
 0x518   : > { %p25_p3 = scmp.ge.s32.totalorder %s5038_s21, 4   ;;  %s5042_s19 = smov %s5039_s20 }
 0x519   : > { %s5043_s20 = smov %s5040_s24 }
 0x51a   :  { %27 = sbr.rel (!%p25_p3) target bundleno = 5 (0x5), region = 156 }
 0x521   :  { %3270 = vsyncpa [#allocation5], 1 }
 0x522   :  { %3272 = vsyncpa [#allocation5 + $0x1], 1 }

// kernel: resnet_bev_forward.3
= control target key start
LH: loop header
LB: loop body
LE: loop exit
PB: predicated region body
PF: predicated region fallthrough
CT: control target
= control target key end

     0   :  { %s8141_s18 = smov 0   ;;  %s9765_s0 = inlined_call_operand.vmem [shape: f32[2,332,4], index: 0, kind: input, shape index: {}]   ;;  %s9766_s1 = inlined_call_operand.vmem [shape: bf16[9,4,8], index: 1, kind: input, shape index: {}]   ;;  %s9767_s2 = inlined_call_operand.vmem [shape: f32[1,8], index: 2, kind: input, shape index: {}]   ;;  %s9768_s3 = inlined_call_operand.vmem [shape: f32[1,8], index: 3, kind: input, shape index: {}]   ;;  %s9769_s4 = inlined_call_operand.vmem [shape: bf16[9,4,8], index: 4, kind: input, shape index: {}]   ;;  %s9770_s5 = inlined_call_operand.vmem [shape: f32[1,8], index: 5, kind: input, shape index: {}]   ;;  %s9771_s6 = inlined_call_operand.vmem [shape: bf16[9,8,8], index: 6, kind: input, shape index: {}]   ;;  %s9772_s7 = inlined_call_operand.vmem [shape: f32[1,8], index: 7, kind: input, shape index: {}]   ;;  %s9773_s8 = inlined_call_operand.vmem [shape: f32[1,8], index: 8, kind: input, shape index: {}]   ;;  %s9774_s9 = inlined_call_operand.vmem [shape: bf16[9,8,8], index: 9, kind: input, shape index: {}]   ;;  %s9775_s10 = inlined_call_operand.vmem [shape: f32[1,8], index: 10, kind: input, shape index: {}]   ;;  %s9776_s11 = inlined_call_operand.vmem [shape: f32[1,8], index: 11, kind: input, shape index: {}]   ;;  %s9777_s12 = inlined_call_operand.vmem [shape: bf16[9,8,8], index: 12, kind: input, shape index: {}]   ;;  %s9778_s13 = inlined_call_operand.vmem [shape: f32[1,8], index: 13, kind: input, shape index: {}]   ;;  %s9779_s14 = inlined_call_operand.vmem [shape: f32[1,8], index: 14, kind: input, shape index: {}]   ;;  %s9780_s15 = inlined_call_operand.vmem [shape: f32[2,8,8,8], index: 15, kind: output, shape index: {}]  }
   0x1 LB: > { %s5851_s19 = sadd.s32 4294967295, %s8057_s18   ;;  %p5855_p0 = scmp.ge.s32.totalorder %s8057_s18, 1  ;;  %s8057_s18 = sphi %s8141_s18, %s25_s18  }
   0x2   : > { %p437_p1 = scmp.lt.s32.totalorder %s8057_s18, 3 }
   0x4   : > { %p438_p2 = pnand %p5855_p0, %p437_p1 }
   0x5   : > { %vm571_vm0 = vcmask (!%p438_p2), 1041408   ;;  %v5882_v0 = vld [vmem:[%s9766_s1 + $0x8] sm:$0x3] (!%p438_p2)  ;;  %v5859_v1 = vld [vmem:[%s9766_s1 + $0x2] sm:$0x3] (!%p438_p2)  ;;  %v8059_v2 = vmov (!%p438_p2), 0.0  }
   0x6   : > { %441 = sbr.rel (%p438_p2) target bundleno = 2071 (0x817), region = 80  ;;  %6507 = vmatprep.subr.bf16.mxu0 (!%p438_p2), %v8059_v2  ;;  %6419 = vmatprep.subr.bf16.mxu1 (!%p438_p2), %v8059_v2  ;;  %v8158_v3 = vsel (!%p438_p2), %vm571_vm0, %v5882_v0, 0  ;;  %v573_v4 = vsel (!%p438_p2), %vm571_vm0, %v5859_v1, 0  ;;  %p485_p3 = scmp.lt.s32.totalorder (!%p438_p2), %s5851_s19, 1  ;;  %vm8060_vm1 = vmmov (!%p438_p2), 0   ;;  %vm555_vm2 = vcmask (!%p438_p2), 31744  }
   0x7   : > { %6508 = vmatpush3.bf16.msra.mxu0 (!%p438_p2), %v8158_v3  ;;  %6420 = vmatpush3.bf16.msra.mxu1 (!%p438_p2), %v573_v4  ;;  %v5888_v5 = vld [vmem:[%s9766_s1 + $0xa] sm:$0x3] (!%p438_p2)  ;;  %v538_v6 = vld [vmem:[%s9766_s1] sm:$0x3] (!%p438_p2)  ;;  %v5894_v32 = vld [vmem:[%s9766_s1 + $0xc] sm:$0x3] (!%p438_p2) }
   0x8   : > { %6421 = vmatprep.mubr.msk.bf16.mxu1 (!%p438_p2), %vm8060_vm1, %v8059_v2  ;;  %6509 = vmatprep.mubr.msk.bf16.mxu0 (!%p438_p2), %vm8060_vm1, %v8059_v2  ;;  %v1114_v13 = vsel (!%p438_p2), %vm571_vm0, %v5888_v5, 0  ;;  %v663_v14 = vsel (!%p438_p2), %vm571_vm0, %v538_v6, 0  ;;  %v1229_v34 = vsel (!%p438_p2), %vm571_vm0, %v5894_v32, 0  ;;  %v5870_v45 = vld [vmem:[%s9766_s1 + $0x4] sm:$0x3] (!%p438_p2)  ;;  %vm2430_vm3 = vcmask (!%p438_p2), 1043456  }
   0x9   : > { %6529 = vmatprep.subr.bf16.mxu0 (!%p438_p2), %v8059_v2  ;;  %6441 = vmatprep.subr.bf16.mxu1 (!%p438_p2), %v8059_v2  ;;  %v769_v47 = vsel (!%p438_p2), %vm571_vm0, %v5870_v45, 0  ;;  %v5900_v0 = vld [vmem:[%s9766_s1 + $0xe] sm:$0x3] (!%p438_p2)  ;;  %vm496_vm4 = vcmask (!%p438_p2), 64512   ;;  %vm509_vm5 = vcmask (!%p438_p2), 62464   ;;  %vm2355_vm6 = vcmask (!%p438_p2), 64513  }
   0xa   : > { %v1344_v4 = vsel (!%p438_p2), %vm571_vm0, %v5900_v0, 0  ;;  %498 = vst.msk [vmem:[#allocation2 + $0x8] sm:$0xff] (!%p438_p2), %vm496_vm4, %v8059_v2  ;;  %499 = vst.msk [vmem:[#allocation2 + $0x10] sm:$0xff] (!%p438_p2), %vm496_vm4, %v8059_v2  ;;  %vm2357_vm7 = vcmask (!%p438_p2), 57344   ;;  %vm2359_vm8 = vcmask (!%p438_p2), 64514   ;;  %vm2361_vm9 = vcmask (!%p438_p2), 58368  }
   0xb   : > { %497 = vst.msk [vmem:[#allocation2] sm:$0xff] (!%p438_p2), %vm496_vm4, %v8059_v2  ;;  %500 = vst.msk [vmem:[#allocation2 + $0x18] sm:$0xff] (!%p438_p2), %vm496_vm4, %v8059_v2  ;;  %vm2363_vm10 = vcmask (!%p438_p2), 64515   ;;  %vm2365_vm11 = vcmask (!%p438_p2), 59392   ;;  %vm2367_vm12 = vcmask (!%p438_p2), 64516   ;;  %vm2369_vm13 = vcmask (!%p438_p2), 60416  }
   0xc   : > { %501 = vst.msk [vmem:[#allocation2 + $0x20] sm:$0xff] (!%p438_p2), %vm496_vm4, %v8059_v2  ;;  %502 = vst.msk [vmem:[#allocation2 + $0x28] sm:$0xff] (!%p438_p2), %vm496_vm4, %v8059_v2  ;;  %vm2371_vm14 = vcmask (!%p438_p2), 64517   ;;  %vm2373_vm15 = vcmask (!%p438_p2), 61440  }
   0xd   : > { %s9782_s19 = smov (!%p485_p3, %s5851_s19), 1  ;;  %503 = vst.msk [vmem:[#allocation2 + $0x30] sm:$0xff] %vm496_vm4, %v8059_v2  ;;  %504 = vst.msk [vmem:[#allocation2 + $0x38] sm:$0xff] %vm496_vm4, %v8059_v2 }
   0xe   : > { %s8040_s24 = smul.u32 336, %s9782_s19  ;;  %505 = vst.msk [vmem:[#allocation2 + $0x40] sm:$0xff] %vm496_vm4, %v8059_v2  ;;  %506 = vst.msk [vmem:[#allocation2 + $0x48] sm:$0xff] %vm496_vm4, %v8059_v2  ;;  %s6148_s29 = sshll.u32 %s9782_s19, 6 }
   0xf   : > { %507 = vst.msk [vmem:[#allocation2 + $0x50] sm:$0xff] %vm496_vm4, %v8059_v2  ;;  %508 = vst.msk [vmem:[#allocation2 + $0x58] sm:$0xff] %vm496_vm4, %v8059_v2  ;;  %s9714_s17 = scalar_lea.vmem %s9780_s15, %s6148_s29 }
  0x10   : > { %s8174_s27 = scalar_lea.vmem %s9765_s0, %s8040_s24  ;;  %511 = vst.msk [vmem:[#allocation3] sm:$0xff] %vm496_vm4, %v8059_v2  ;;  %512 = vst.msk [vmem:[#allocation3 + $0x8] sm:$0xff] %vm496_vm4, %v8059_v2 }
  0x11   : > { %v539_v7 = vld [vmem:[%s8174_s27 + $0x53] sm:$0xff]  ;;  %v540_v8 = vld [vmem:[%s8174_s27 + $0x5b] sm:$0xff]  ;;  %v541_v15 = vld [vmem:[%s8174_s27 + $0x63] sm:$0xff]  ;;  %513 = vst.msk [vmem:[#allocation3 + $0x10] sm:$0xff] %vm496_vm4, %v8059_v2 }
  0x12   : > { %v967_v9 = vld [vmem:[%s8174_s27 + $0xf9] sm:$0xff]  ;;  %v8185_v10 = vpack.c.bf16 %v540_v8, %v539_v7  ;;  %v968_v11 = vld [vmem:[%s8174_s27 + $0x101] sm:$0xff]  ;;  %v542_v16 = vld [vmem:[%s8174_s27 + $0x6b] sm:$0xff]  ;;  %514 = vst.msk [vmem:[#allocation3 + $0x18] sm:$0xff] %vm496_vm4, %v8059_v2 }
  0x13   : > { %v8188_v12 = vpack.c.bf16 %v968_v11, %v967_v9  ;;  %v969_v17 = vld [vmem:[%s8174_s27 + $0x109] sm:$0xff]  ;;  %v970_v18 = vld [vmem:[%s8174_s27 + $0x111] sm:$0xff]  ;;  %v8205_v19 = vpack.c.bf16 %v542_v16, %v541_v15  ;;  %v544_v22 = vld [vmem:[%s8174_s27 + $0x7b] sm:$0xff]  ;;  %515 = vst.msk [vmem:[#allocation3 + $0x20] sm:$0xff] %vm496_vm4, %v8059_v2 }
  0x14   : > { %6422 = vmatmul.mubr.msk.bf16.vlgmr.msra.gmra.mrb[0].mxu1 %vm555_vm2, %v8185_v10  ;;  %v8208_v20 = vpack.c.bf16 %v970_v18, %v969_v17  ;;  %v543_v21 = vld [vmem:[%s8174_s27 + $0x73] sm:$0xff]  ;;  %v972_v24 = vld [vmem:[%s8174_s27 + $0x121] sm:$0xff]  ;;  %v546_v28 = vld [vmem:[%s8174_s27 + $0x8b] sm:$0xff]  ;;  %516 = vst.msk [vmem:[#allocation3 + $0x28] sm:$0xff] %vm496_vm4, %v8059_v2 }
  0x15   : > { %6510 = vmatmul.mubr.msk.bf16.vlgmr.msra.gmra.mrb[0].mxu0 %vm555_vm2, %v8188_v12  ;;  %6425 = vmatprep.mubr.msk.bf16.mxu1 %vm8060_vm1, %v8059_v2  ;;  %v971_v23 = vld [vmem:[%s8174_s27 + $0x119] sm:$0xff]  ;;  %v8222_v25 = vpack.c.bf16 %v544_v22, %v543_v21  ;;  %v545_v27 = vld [vmem:[%s8174_s27 + $0x83] sm:$0xff]  ;;  %v1083_v30 = vld [vmem:[%s8174_s27 + $0xaf] sm:$0xff]  ;;  %517 = vst.msk [vmem:[#allocation3 + $0x30] sm:$0xff] %vm496_vm4, %v8059_v2 }
  0x16   : > { %6530 = vmatpush3.bf16.msra.mxu0 %v1114_v13  ;;  %6513 = vmatprep.mubr.msk.bf16.mxu0 %vm8060_vm1, %v8059_v2  ;;  %v8224_v26 = vpack.c.bf16 %v972_v24, %v971_v23  ;;  %v1082_v29 = vld [vmem:[%s8174_s27 + $0xa7] sm:$0xff]  ;;  %v8238_v31 = vpack.c.bf16 %v546_v28, %v545_v27  ;;  %v547_v35 = vld [vmem:[%s8174_s27 + $0x93] sm:$0xff]  ;;  %v1085_v37 = vld [vmem:[%s8174_s27 + $0xbf] sm:$0xff]  ;;  %518 = vst.msk [vmem:[#allocation3 + $0x38] sm:$0xff] %vm496_vm4, %v8059_v2 }
  0x17   : > { %6442 = vmatpush3.bf16.msra.mxu1 %v663_v14  ;;  %6551 = vmatprep.subr.bf16.mxu0 %v8059_v2  ;;  %v8243_v33 = vpack.c.bf16 %v1083_v30, %v1082_v29  ;;  %v1084_v36 = vld [vmem:[%s8174_s27 + $0xb7] sm:$0xff]  ;;  %v8258_v38 = vpack.c.bf16 %v547_v35, %v547_v35  ;;  %v524_v40 = vld [vmem:[%s8174_s27] sm:$0xff]  ;;  %v525_v41 = vld [vmem:[%s8174_s27 + $0x8] sm:$0xff]  ;;  %519 = vst.msk [vmem:[#allocation3 + $0x40] sm:$0xff] %vm496_vm4, %v8059_v2 }
  0x18   : > { %6463 = vmatprep.subr.bf16.mxu1 %v8059_v2  ;;  %v8260_v39 = vpack.c.bf16 %v1085_v37, %v1084_v36  ;;  %v1086_v42 = vld [vmem:[%s8174_s27 + $0xc7] sm:$0xff]  ;;  %v1087_v43 = vld [vmem:[%s8174_s27 + $0xcf] sm:$0xff]  ;;  %v8274_v44 = vpack.c.bf16 %v525_v41, %v524_v40  ;;  %v527_v49 = vld [vmem:[%s8174_s27 + $0x18] sm:$0xff]  ;;  %520 = vst.msk [vmem:[#allocation3 + $0x48] sm:$0xff] %vm496_vm4, %v8059_v2 }
  0x19   : > { %v8279_v46 = vpack.c.bf16 %v1087_v43, %v1086_v42  ;;  %v526_v48 = vld [vmem:[%s8174_s27 + $0x10] sm:$0xff]  ;;  %v1089_v51 = vld [vmem:[%s8174_s27 + $0xdf] sm:$0xff]  ;;  %v529_v55 = vld [vmem:[%s8174_s27 + $0x28] sm:$0xff]  ;;  %521 = vst.msk [vmem:[#allocation3 + $0x50] sm:$0xff] %vm496_vm4, %v8059_v2 }
  0x1a   : > { %v1088_v50 = vld [vmem:[%s8174_s27 + $0xd7] sm:$0xff]  ;;  %v8295_v52 = vpack.c.bf16 %v527_v49, %v526_v48  ;;  %v528_v54 = vld [vmem:[%s8174_s27 + $0x20] sm:$0xff]  ;;  %v1197_v61 = vld [vmem:[%s8174_s27 + $0x9] sm:$0xff]  ;;  %522 = vst.msk [vmem:[#allocation3 + $0x58] sm:$0xff] %vm496_vm4, %v8059_v2 }
  0x1b   : > { %v8297_v53 = vpack.c.bf16 %v1089_v51, %v1088_v50  ;;  %v1090_v56 = vld [vmem:[%s8174_s27 + $0xe7] sm:$0xff]  ;;  %v8310_v57 = vpack.c.bf16 %v529_v55, %v528_v54  ;;  %v530_v59 = vld [vmem:[%s8174_s27 + $0x30] sm:$0xff]  ;;  %v531_v60 = vld [vmem:[%s8174_s27 + $0x38] sm:$0xff]  ;;  %510 = vst.msk [vmem:[#allocation2 + $0x60] sm:$0x3f] %vm509_vm5, %v8059_v2 }
  0x1c   : > { %6426 = vmatmul.mubr.msk.bf16.gmra.mrb[4].mxu1 %vm555_vm2, %v8205_v19  ;;  %v8312_v58 = vpack.c.bf16 %v1090_v56, %v1090_v56  ;;  %v1198_v62 = vld [vmem:[%s8174_s27 + $0x11] sm:$0xff]  ;;  %v8326_v63 = vpack.c.bf16 %v531_v60, %v530_v59  ;;  %v532_v5 = vld [vmem:[%s8174_s27 + $0x40] sm:$0xff]  ;;  %v1201_v13 = vld [vmem:[%s8174_s27 + $0x29] sm:$0xff]  ;;  %523 = vst.msk [vmem:[#allocation3 + $0x60] sm:$0x3f] %vm509_vm5, %v8059_v2 }
  0x1d   : > { %6514 = vmatmul.mubr.msk.bf16.gmra.mrb[4].mxu0 %vm555_vm2, %v8208_v20  ;;  %6429 = vmatprep.mubr.msk.bf16.mxu1 %vm8060_vm1, %v8059_v2  ;;  %v8331_v1 = vpack.c.bf16 %v1198_v62, %v1197_v61  ;;  %v1199_v6 = vld [vmem:[%s8174_s27 + $0x19] sm:$0xff]  ;;  %v1200_v7 = vld [vmem:[%s8174_s27 + $0x21] sm:$0xff]  ;;  %v8346_v8 = vpack.c.bf16 %v532_v5, %v532_v5  ;;  %v1202_v14 = vld [vmem:[%s8174_s27 + $0x31] sm:$0xff] }
  0x1e   : > { %6517 = vmatprep.mubr.msk.bf16.mxu0 %vm8060_vm1, %v8059_v2  ;;  %v8348_v9 = vpack.c.bf16 %v1200_v7, %v1199_v6  ;;  %v737_v11 = vld [vmem:[%s8174_s27 + $0x1] sm:$0xff]  ;;  %v8366_v17 = vpack.c.bf16 %v1202_v14, %v1201_v13  ;;  %v1203_v21 = vld [vmem:[%s8174_s27 + $0x39] sm:$0xff]  ;;  %v8380_v23 = vpack.c.bf16 %v1199_v6, %v1198_v62  ;;  %v1205_v27 = vld [vmem:[%s8174_s27 + $0x49] sm:$0xff]  ;;  %v8393_v28 = vpack.c.bf16 %v1201_v13, %v1200_v7 }
  0x1f   : > { %v8361_v15 = vpack.c.bf16 %v1197_v61, %v737_v11  ;;  %v5876_v16 = vld [vmem:[%s9766_s1 + $0x6] sm:$0x3]  ;;  %v8395_v29 = vpack.c.bf16 %v1205_v27, %v1205_v27  ;;  %v1312_v30 = vld [vmem:[%s8174_s27 + $0x5c] sm:$0xff]  ;;  %v5906_v35 = vld [vmem:[%s9766_s1 + $0x10] sm:$0x3] }
  0x20   : > { %v884_v18 = vsel %vm571_vm0, %v5876_v16, 0  ;;  %v1204_v22 = vld [vmem:[%s8174_s27 + $0x41] sm:$0xff]  ;;  %v1459_v37 = vsel %vm571_vm0, %v5906_v35, 0  ;;  %v1314_v40 = vld [vmem:[%s8174_s27 + $0x6c] sm:$0xff]  ;;  %v1315_v41 = vld [vmem:[%s8174_s27 + $0x74] sm:$0xff] }
  0x21   : > { %v8382_v24 = vpack.c.bf16 %v1204_v22, %v1203_v21  ;;  %v1313_v32 = vld [vmem:[%s8174_s27 + $0x64] sm:$0xff]  ;;  %v8426_v42 = vpack.c.bf16 %v1204_v22, %v1204_v22  ;;  %v8428_v43 = vpack.c.bf16 %v1315_v41, %v1314_v40  ;;  %v1316_v48 = vld [vmem:[%s8174_s27 + $0x7c] sm:$0xff]  ;;  %v1318_v56 = vld [vmem:[%s8174_s27 + $0x8c] sm:$0xff] }
  0x22   : > { %v8412_v36 = vpack.c.bf16 %v1313_v32, %v1312_v30  ;;  %v852_v45 = vld [vmem:[%s8174_s27 + $0xa6] sm:$0xff]  ;;  %v854_v54 = vld [vmem:[%s8174_s27 + $0xb6] sm:$0xff]  ;;  %v855_v55 = vld [vmem:[%s8174_s27 + $0xbe] sm:$0xff] }
  0x23   : > { %v1317_v49 = vld [vmem:[%s8174_s27 + $0x84] sm:$0xff]  ;;  %v1319_v59 = vld [vmem:[%s8174_s27 + $0x94] sm:$0xff]  ;;  %v8460_v60 = vpack.c.bf16 %v855_v55, %v854_v54  ;;  %v1320_v0 = vld [vmem:[%s8174_s27 + $0x9c] sm:$0xff] }
  0x24   : > { %6430 = vmatmul.mubr.msk.bf16.gmra.mrb[8].mxu1 %vm555_vm2, %v8222_v25  ;;  %v8444_v51 = vpack.c.bf16 %v1317_v49, %v1316_v48  ;;  %v8462_v61 = vpack.c.bf16 %v1319_v59, %v1318_v56  ;;  %v857_v62 = vld [vmem:[%s8174_s27 + $0xce] sm:$0xff]  ;;  %v8477_v5 = vpack.c.bf16 %v1320_v0, %v1320_v0  ;;  %v858_v6 = vld [vmem:[%s8174_s27 + $0xd6] sm:$0xff]  ;;  %v859_v7 = vld [vmem:[%s8174_s27 + $0xde] sm:$0xff] }
  0x25   : > { %6518 = vmatmul.mubr.msk.bf16.gmra.mrb[8].mxu0 %vm555_vm2, %v8224_v26  ;;  %6433 = vmatprep.mubr.msk.bf16.mxu1 %vm8060_vm1, %v8059_v2  ;;  %v1427_v11 = vld [vmem:[%s8174_s27 + $0xa] sm:$0xff]  ;;  %v1428_v13 = vld [vmem:[%s8174_s27 + $0x12] sm:$0xff]  ;;  %v1430_v22 = vld [vmem:[%s8174_s27 + $0x22] sm:$0xff] }
  0x26   : > { %6531 = vmatprep.mubr.msk.bf16.mxu0 %vm8060_vm1, %v8059_v2  ;;  %v8493_v16 = vpack.c.bf16 %v1428_v13, %v1427_v11  ;;  %v973_v32 = vld [vmem:[%s8174_s27 + $0x129] sm:$0xff]  ;;  %v974_v35 = vld [vmem:[%s8174_s27 + $0x131] sm:$0xff]  ;;  %v975_v49 = vld [vmem:[%s8174_s27 + $0x139] sm:$0xff] }
  0x27   : > { %v1432_v40 = vld [vmem:[%s8174_s27 + $0x32] sm:$0xff]  ;;  %v8522_v41 = vpack.c.bf16 %v974_v35, %v973_v32  ;;  %v1433_v54 = vld [vmem:[%s8174_s27 + $0x3a] sm:$0xff]  ;;  %v1434_v55 = vld [vmem:[%s8174_s27 + $0x42] sm:$0xff]  ;;  %v8542_v56 = vpack.c.bf16 %v975_v49, %v975_v49 }
  0x28   : > { %v8544_v59 = vpack.c.bf16 %v1434_v55, %v1433_v54 }
  0x2c   : > { %6434 = vmatmul.mubr.msk.bf16.gmra.mrb[12].mxu1 %vm555_vm2, %v8238_v31 }
  0x2d   : > { %6532 = vmatmul.mubr.msk.bf16.vlgmr.msra.gmra.mrb[0].mxu0 %vm555_vm2, %v8243_v33  ;;  %6437 = vmatprep.mubr.msk.bf16.mxu1 %vm8060_vm1, %v8059_v2 }
  0x2e   : > { %6552 = vmatpush3.bf16.msra.mxu0 %v1229_v34  ;;  %6535 = vmatprep.mubr.msk.bf16.mxu0 %vm8060_vm1, %v8059_v2  ;;  %v8407_v34 = vpack.c.bf16 %v1203_v21, %v1202_v14  ;;  %v8491_v14 = vpack.c.bf16 %v859_v7, %v858_v6  ;;  %v1429_v21 = vld [vmem:[%s8174_s27 + $0x1a] sm:$0xff] }
  0x2f   : > { %6573 = vmatprep.subr.bf16.mxu0 %v8059_v2  ;;  %v8508_v30 = vpack.c.bf16 %v1430_v22, %v1429_v21  ;;  %v8743_v22 = vld [vmem:[%s9768_s3] ss:$0 sm:$0xff] }
  0x34   : > { %6438 = vmatmul.mubr.msk.bf16.gmra.mrb[16].mxu1 %vm555_vm2, %v8258_v38 }
  0x35   : > { %6536 = vmatmul.mubr.msk.bf16.gmra.mrb[4].mxu0 %vm555_vm2, %v8260_v39  ;;  %6443 = vmatprep.mubr.msk.bf16.mxu1 %vm8060_vm1, %v8059_v2 }
  0x36   : > { %6539 = vmatprep.mubr.msk.bf16.mxu0 %vm8060_vm1, %v8059_v2 }
  0x3c   : > { %6444 = vmatmul.mubr.msk.bf16.vlgmr.msra.gmra.mrb[0].mxu1 %vm555_vm2, %v8274_v44 }
  0x3d   : > { %6540 = vmatmul.mubr.msk.bf16.gmra.mrb[8].mxu0 %vm555_vm2, %v8279_v46  ;;  %6447 = vmatprep.mubr.msk.bf16.mxu1 %vm8060_vm1, %v8059_v2 }
  0x3e   : > { %6543 = vmatprep.mubr.msk.bf16.mxu0 %vm8060_vm1, %v8059_v2  ;;  %6464 = vmatpush3.bf16.msra.mxu1 %v769_v47  ;;  %v853_v47 = vld [vmem:[%s8174_s27 + $0xae] sm:$0xff] }
  0x3f   : > { %6485 = vmatprep.subr.bf16.mxu1 %v8059_v2  ;;  %v8442_v50 = vpack.c.bf16 %v853_v47, %v852_v45  ;;  %v5912_v45 = vld [vmem:[%s9769_s4 + $0x2] sm:$0x3] }
  0x40   : > { %v1546_v48 = vsel %vm571_vm0, %v5912_v45, 0 }
  0x44   : > { %6448 = vmatmul.mubr.msk.bf16.gmra.mrb[4].mxu1 %vm555_vm2, %v8295_v52 }
  0x45   : > { %6544 = vmatmul.mubr.msk.bf16.gmra.mrb[12].mxu0 %vm555_vm2, %v8297_v53  ;;  %6451 = vmatprep.mubr.msk.bf16.mxu1 %vm8060_vm1, %v8059_v2 }
  0x46   : > { %6547 = vmatprep.mubr.msk.bf16.mxu0 %vm8060_vm1, %v8059_v2 }
  0x4c   : > { %6452 = vmatmul.mubr.msk.bf16.gmra.mrb[8].mxu1 %vm555_vm2, %v8310_v57 }
  0x4d   : > { %6548 = vmatmul.mubr.msk.bf16.gmra.mrb[16].mxu0 %vm555_vm2, %v8312_v58  ;;  %6455 = vmatprep.mubr.msk.bf16.mxu1 %vm8060_vm1, %v8059_v2 }
  0x4e   : > { %6553 = vmatprep.mubr.msk.bf16.mxu0 %vm8060_vm1, %v8059_v2 }
  0x54   : > { %6456 = vmatmul.mubr.msk.bf16.gmra.mrb[12].mxu1 %vm555_vm2, %v8326_v63 }
  0x55   : > { %6554 = vmatmul.mubr.msk.bf16.vlgmr.msra.gmra.mrb[0].mxu0 %vm555_vm2, %v8331_v1  ;;  %6459 = vmatprep.mubr.msk.bf16.mxu1 %vm8060_vm1, %v8059_v2 }
  0x56   : > { %6574 = vmatpush3.bf16.msra.mxu0 %v1344_v4  ;;  %6557 = vmatprep.mubr.msk.bf16.mxu0 %vm8060_vm1, %v8059_v2 }
  0x57   : > { %6595 = vmatprep.subr.bf16.mxu0 %v8059_v2 }
  0x5c   : > { %6460 = vmatmul.mubr.msk.bf16.gmra.mrb[16].mxu1 %vm555_vm2, %v8346_v8 }
  0x5d   : > { %6558 = vmatmul.mubr.msk.bf16.gmra.mrb[4].mxu0 %vm555_vm2, %v8348_v9  ;;  %6465 = vmatprep.mubr.msk.bf16.mxu1 %vm8060_vm1, %v8059_v2 }
  0x5e   : > { %6561 = vmatprep.mubr.msk.bf16.mxu0 %vm8060_vm1, %v8059_v2 }
  0x64   : > { %6466 = vmatmul.mubr.msk.bf16.vlgmr.msra.gmra.mrb[0].mxu1 %vm555_vm2, %v8361_v15 }
  0x65   : > { %6562 = vmatmul.mubr.msk.bf16.gmra.mrb[8].mxu0 %vm555_vm2, %v8366_v17  ;;  %6469 = vmatprep.mubr.msk.bf16.mxu1 %vm8060_vm1, %v8059_v2 }
  0x66   : > { %6565 = vmatprep.mubr.msk.bf16.mxu0 %vm8060_vm1, %v8059_v2  ;;  %6486 = vmatpush3.bf16.msra.mxu1 %v884_v18  ;;  %v860_v18 = vld [vmem:[%s8174_s27 + $0xe6] sm:$0xff] }
  0x67   : > { %7409 = vmatprep.subr.bf16.mxu1 %v8059_v2  ;;  %v8506_v27 = vpack.c.bf16 %v860_v18, %v860_v18  ;;  %v8738_v18 = vld [vmem:[%s9767_s2] ss:$0 sm:$0xff] }
  0x6c   : > { %6470 = vmatmul.mubr.msk.bf16.gmra.mrb[4].mxu1 %vm555_vm2, %v8380_v23 }
  0x6d   : > { %6566 = vmatmul.mubr.msk.bf16.gmra.mrb[12].mxu0 %vm555_vm2, %v8382_v24  ;;  %6473 = vmatprep.mubr.msk.bf16.mxu1 %vm8060_vm1, %v8059_v2 }
  0x6e   : > { %6569 = vmatprep.mubr.msk.bf16.mxu0 %vm8060_vm1, %v8059_v2 }
  0x74   : > { %6474 = vmatmul.mubr.msk.bf16.gmra.mrb[8].mxu1 %vm555_vm2, %v8393_v28 }
  0x75   : > { %6570 = vmatmul.mubr.msk.bf16.gmra.mrb[16].mxu0 %vm555_vm2, %v8395_v29  ;;  %6477 = vmatprep.mubr.msk.bf16.mxu1 %vm8060_vm1, %v8059_v2 }
  0x76   : > { %6575 = vmatprep.mubr.msk.bf16.mxu0 %vm8060_vm1, %v8059_v2 }
  0x7c   : > { %6478 = vmatmul.mubr.msk.bf16.gmra.mrb[12].mxu1 %vm555_vm2, %v8407_v34 }
  0x7d   : > { %6576 = vmatmul.mubr.msk.bf16.vlgmr.msra.gmra.mrb[0].mxu0 %vm555_vm2, %v8412_v36  ;;  %6481 = vmatprep.mubr.msk.bf16.mxu1 %vm8060_vm1, %v8059_v2 }
  0x7e   : > { %6596 = vmatpush3.bf16.msra.mxu0 %v1459_v37  ;;  %6579 = vmatprep.mubr.msk.bf16.mxu0 %vm8060_vm1, %v8059_v2  ;;  %v1431_v37 = vld [vmem:[%s8174_s27 + $0x2a] sm:$0xff] }
  0x7f   : > { %6815 = vmatprep.subr.bf16.mxu0 %v8059_v2  ;;  %v8527_v47 = vpack.c.bf16 %v1432_v40, %v1431_v37 }
  0x84   : > { %6482 = vmatmul.mubr.msk.bf16.gmra.mrb[16].mxu1 %vm555_vm2, %v8426_v42 }
  0x85   : > { %6580 = vmatmul.mubr.msk.bf16.gmra.mrb[4].mxu0 %vm555_vm2, %v8428_v43  ;;  %6487 = vmatprep.mubr.msk.bf16.mxu1 %vm8060_vm1, %v8059_v2 }
  0x86   : > { %6583 = vmatprep.mubr.msk.bf16.mxu0 %vm8060_vm1, %v8059_v2 }
  0x8c   : > { %6488 = vmatmul.mubr.msk.bf16.vlgmr.msra.gmra.mrb[0].mxu1 %vm555_vm2, %v8442_v50 }
  0x8d   : > { %6584 = vmatmul.mubr.msk.bf16.gmra.mrb[8].mxu0 %vm555_vm2, %v8444_v51  ;;  %6491 = vmatprep.mubr.msk.bf16.mxu1 %vm8060_vm1, %v8059_v2 }
  0x8e   : > { %6587 = vmatprep.mubr.msk.bf16.mxu0 %vm8060_vm1, %v8059_v2  ;;  %7410 = vmatpush3.bf16.msra.mxu1 %v8158_v3  ;;  %v856_v3 = vld [vmem:[%s8174_s27 + $0xc6] sm:$0xff] }
  0x8f   : > { %6617 = vmatprep.subr.bf16.mxu1 %v8059_v2  ;;  %v8475_v4 = vpack.c.bf16 %v857_v62, %v856_v3  ;;  %v1435_v3 = vld [vmem:[%s8174_s27 + $0x4a] sm:$0xff]  ;;  %v1542_v62 = vld [vmem:[%s9769_s4] sm:$0x3] }
  0x90   : > { %v8558_v0 = vpack.c.bf16 %v1435_v3, %v1435_v3  ;;  %v1621_v6 = vsel %vm571_vm0, %v1542_v62, 0 }
  0x94   : > { %6492 = vmatmul.mubr.msk.bf16.gmra.mrb[4].mxu1 %vm555_vm2, %v8460_v60 }
  0x95   : > { %6588 = vmatmul.mubr.msk.bf16.gmra.mrb[12].mxu0 %vm555_vm2, %v8462_v61  ;;  %6495 = vmatprep.mubr.msk.bf16.mxu1 %vm8060_vm1, %v8059_v2 }
  0x96   : > { %6591 = vmatprep.mubr.msk.bf16.mxu0 %vm8060_vm1, %v8059_v2 }
  0x9c   : > { %6496 = vmatmul.mubr.msk.bf16.gmra.mrb[8].mxu1 %vm555_vm2, %v8475_v4 }
  0x9d   : > { %6592 = vmatmul.mubr.msk.bf16.gmra.mrb[16].mxu0 %vm555_vm2, %v8477_v5  ;;  %6499 = vmatprep.mubr.msk.bf16.mxu1 %vm8060_vm1, %v8059_v2 }
  0x9e   : > { %6597 = vmatprep.mubr.msk.bf16.mxu0 %vm8060_vm1, %v8059_v2 }
  0xa4   : > { %6500 = vmatmul.mubr.msk.bf16.gmra.mrb[12].mxu1 %vm555_vm2, %v8491_v14 }
  0xa5   : > { %6598 = vmatmul.mubr.msk.bf16.vlgmr.msra.gmra.mrb[0].mxu0 %vm555_vm2, %v8493_v16  ;;  %6503 = vmatprep.mubr.msk.bf16.mxu1 %vm8060_vm1, %v8059_v2 }
  0xa6   : > { %6601 = vmatprep.mubr.msk.bf16.mxu0 %vm8060_vm1, %v8059_v2 }
  0xac   : > { %6504 = vmatmul.mubr.msk.bf16.gmra.mrb[16].mxu1 %vm555_vm2, %v8506_v27 }
  0xad   : > { %6602 = vmatmul.mubr.msk.bf16.gmra.mrb[4].mxu0 %vm555_vm2, %v8508_v30  ;;  %6521 = vmatprep.mubr.msk.bf16.mxu1 %vm8060_vm1, %v8059_v2 }
  0xae   : > { %6605 = vmatprep.mubr.msk.bf16.mxu0 %vm8060_vm1, %v8059_v2 }
  0xb4   : > { %6522 = vmatmul.mubr.msk.bf16.vlgmr.msra.gmra.mrb[12].mxu1 %vm555_vm2, %v8522_v41 }
  0xb5   : > { %6606 = vmatmul.mubr.msk.bf16.gmra.mrb[8].mxu0 %vm555_vm2, %v8527_v47  ;;  %6525 = vmatprep.mubr.msk.bf16.mxu1 %vm8060_vm1, %v8059_v2 }
  0xb6   : > { %6609 = vmatprep.mubr.msk.bf16.mxu0 %vm8060_vm1, %v8059_v2  ;;  %6618 = vmatpush3.bf16.msra.mxu1 %v1546_v48 }
  0xb7   : > { %6639 = vmatprep.subr.bf16.mxu1 %v8059_v2 }
  0xbc   : > { %6526 = vmatmul.mubr.msk.bf16.gmra.mrb[16].mxu1 %vm555_vm2, %v8542_v56 }
  0xbd   : > { %6610 = vmatmul.mubr.msk.bf16.gmra.mrb[12].mxu0 %vm555_vm2, %v8544_v59  ;;  %6619 = vmatprep.mubr.msk.bf16.mxu1 %vm8060_vm1, %v8059_v2 }
  0xbe   : > { %6613 = vmatprep.mubr.msk.bf16.mxu0 %vm8060_vm1, %v8059_v2 }
  0xc4   : > { %6620 = vmatmul.mubr.msk.bf16.vlgmr.msra.gmra.mrb[20].mxu1 %vm555_vm2, %v8185_v10  ;;  %v5968_v10 = vld [vmem:[%s9771_s6 + $0x4] sm:$0xf] }
  0xc5   : > { %6614 = vmatmul.mubr.msk.bf16.gmra.mrb[16].mxu0 %vm555_vm2, %v8558_v0  ;;  %6623 = vmatprep.mubr.msk.bf16.mxu1 %vm8060_vm1, %v8059_v2 }
  0xc6   : > { %6640 = vmatpush3.bf16.msra.mxu1 %v1621_v6  ;;  %6817 = vmatprep.mubr.msk.bf16.mxu0 %vm8060_vm1, %v8059_v2 }
  0xc7   : > { %6661 = vmatprep.subr.bf16.mxu1 %v8059_v2 }
  0xcc   : > { %6624 = vmatmul.mubr.msk.bf16.gmra.mrb[24].mxu1 %vm555_vm2, %v8205_v19  ;;  %v2432_v19 = vsel %vm2430_vm3, %v5968_v10, 0 }
  0xcd   : > { %6627 = vmatprep.mubr.msk.bf16.mxu1 %vm8060_vm1, %v8059_v2  ;;  %6816 = vmatpush3.bf16.msra.mxu0 %v2432_v19 }
  0xce   : > { %6837 = vmatprep.subr.bf16.mxu0 %v8059_v2 }
  0xd4   : > { %6628 = vmatmul.mubr.msk.bf16.gmra.mrb[28].mxu1 %vm555_vm2, %v8222_v25  ;;  %v5923_v25 = vld [vmem:[%s9769_s4 + $0x4] sm:$0x3] }
  0xd5   : > { %6631 = vmatprep.mubr.msk.bf16.mxu1 %vm8060_vm1, %v8059_v2 }
  0xdc   : > { %6632 = vmatmul.mubr.msk.bf16.gmra.mrb[32].mxu1 %vm555_vm2, %v8238_v31  ;;  %v1698_v31 = vsel %vm571_vm0, %v5923_v25, 0 }
  0xdd   : > { %6635 = vmatprep.mubr.msk.bf16.mxu1 %vm8060_vm1, %v8059_v2 }
  0xe4   : > { %6636 = vmatmul.mubr.msk.bf16.gmra.mrb[36].mxu1 %vm555_vm2, %v8258_v38  ;;  %v5929_v38 = vld [vmem:[%s9769_s4 + $0x6] sm:$0x3] }
  0xe5   : > { %6641 = vmatprep.mubr.msk.bf16.mxu1 %vm8060_vm1, %v8059_v2 }
  0xec   : > { %6642 = vmatmul.mubr.msk.bf16.vlgmr.msra.gmra.mrb[40].mxu1 %vm555_vm2, %v8274_v44  ;;  %v1784_v44 = vsel %vm571_vm0, %v5929_v38, 0  ;;  %v2397_v38 = vld [vmem:[%s9771_s6] sm:$0xf] }
  0xed   : > { %6645 = vmatprep.mubr.msk.bf16.mxu1 %vm8060_vm1, %v8059_v2  ;;  %6662 = vmatpush3.bf16.msra.mxu1 %v1698_v31  ;;  %v2398_v31 = vld [vmem:[#allocation2 + $0x1] sm:$0xff] }
  0xee   : > { %6683 = vmatprep.subr.bf16.mxu1 %v8059_v2 }
  0xf4   : > { %6646 = vmatmul.mubr.msk.bf16.gmra.mrb[44].mxu1 %vm555_vm2, %v8295_v52  ;;  %v5935_v52 = vld [vmem:[%s9769_s4 + $0x8] sm:$0x3] }
  0xf5   : > { %6649 = vmatprep.mubr.msk.bf16.mxu1 %vm8060_vm1, %v8059_v2 }
  0xfc   : > { %6650 = vmatmul.mubr.msk.bf16.gmra.mrb[48].mxu1 %vm555_vm2, %v8310_v57  ;;  %v1870_v57 = vsel %vm571_vm0, %v5935_v52, 0 }
  0xfd   : > { %6653 = vmatprep.mubr.msk.bf16.mxu1 %vm8060_vm1, %v8059_v2 }
 0x104   : > { %6654 = vmatmul.mubr.msk.bf16.gmra.mrb[52].mxu1 %vm555_vm2, %v8326_v63 }
 0x105   : > { %6657 = vmatprep.mubr.msk.bf16.mxu1 %vm8060_vm1, %v8059_v2 }
 0x10c   : > { %6658 = vmatmul.mubr.msk.bf16.gmra.mrb[56].mxu1 %vm555_vm2, %v8346_v8  ;;  %v5941_v8 = vld [vmem:[%s9769_s4 + $0xa] sm:$0x3] }
 0x10d   : > { %6663 = vmatprep.mubr.msk.bf16.mxu1 %vm8060_vm1, %v8059_v2 }
 0x114   : > { %6664 = vmatmul.mubr.msk.bf16.vlgmr.msra.gmra.mrb[60].mxu1 %vm555_vm2, %v8361_v15 }
 0x115   : > { %6667 = vmatprep.mubr.msk.bf16.mxu1 %vm8060_vm1, %v8059_v2  ;;  %6684 = vmatpush3.bf16.msra.mxu1 %v1784_v44 }
 0x116   : > { %6705 = vmatprep.subr.bf16.mxu1 %v8059_v2 }
 0x11c   : > { %6668 = vmatmul.mubr.msk.bf16.gmra.mrb[64].mxu1 %vm555_vm2, %v8380_v23 }
 0x11d   : > { %6671 = vmatprep.mubr.msk.bf16.mxu1 %vm8060_vm1, %v8059_v2 }
 0x124   : > { %6672 = vmatmul.mubr.msk.bf16.gmra.mrb[68].mxu1 %vm555_vm2, %v8393_v28 }
 0x125   : > { %6675 = vmatprep.mubr.msk.bf16.mxu1 %vm8060_vm1, %v8059_v2 }
 0x12c   : > { %6676 = vmatmul.mubr.msk.bf16.gmra.mrb[72].mxu1 %vm555_vm2, %v8407_v34  ;;  %v1956_v34 = vsel %vm571_vm0, %v5941_v8, 0 }
 0x12d   : > { %6679 = vmatprep.mubr.msk.bf16.mxu1 %vm8060_vm1, %v8059_v2 }
 0x134   : > { %6680 = vmatmul.mubr.msk.bf16.gmra.mrb[76].mxu1 %vm555_vm2, %v8426_v42 }
 0x135   : > { %6685 = vmatprep.mubr.msk.bf16.mxu1 %vm8060_vm1, %v8059_v2 }
 0x13c   : > { %6686 = vmatmul.mubr.msk.bf16.vlgmr.msra.gmra.mrb[80].mxu1 %vm555_vm2, %v8442_v50 }
 0x13d   : > { %6689 = vmatprep.mubr.msk.bf16.mxu1 %vm8060_vm1, %v8059_v2  ;;  %6706 = vmatpush3.bf16.msra.mxu1 %v1870_v57 }
 0x13e   : > { %6727 = vmatprep.subr.bf16.mxu1 %v8059_v2 }
 0x144   : > { %6690 = vmatmul.mubr.msk.bf16.gmra.mrb[84].mxu1 %vm555_vm2, %v8460_v60 }
 0x145   : > { %6693 = vmatprep.mubr.msk.bf16.mxu1 %vm8060_vm1, %v8059_v2 }
 0x14c   : > { %6694 = vmatmul.mubr.msk.bf16.gmra.mrb[88].mxu1 %vm555_vm2, %v8475_v4 }
 0x14d   : > { %6697 = vmatprep.mubr.msk.bf16.mxu1 %vm8060_vm1, %v8059_v2 }
 0x154   : > { %6698 = vmatmul.mubr.msk.bf16.gmra.mrb[92].mxu1 %vm555_vm2, %v8491_v14 }
 0x155   : > { %6701 = vmatprep.mubr.msk.bf16.mxu1 %vm8060_vm1, %v8059_v2 }
 0x15c   : > { %6702 = vmatmul.mubr.msk.bf16.gmra.mrb[96].mxu1 %vm555_vm2, %v8506_v27 }
 0x15d   : > { %6707 = vmatprep.mubr.msk.bf16.mxu1 %vm8060_vm1, %v8059_v2 }
 0x15f   : > { %v920_v63 = vpop.f32.mrb[0].mxu1 }
 0x160   : > { %v6489_v15 = vpop.f32.mrb[1].mxu1 }
 0x161   : > { %v923_v23 = vpop.f32.mrb[2].mxu1  ;;  %v5947_v15 = vld [vmem:[%s9769_s4 + $0xc] sm:$0x3] }
 0x162   : > { %v6490_v28 = vpop.f32.mrb[3].mxu1 }
 0x164   : > { %6708 = vmatmul.mubr.msk.bf16.vlgmr.msra.gmra.mrb[100].mxu1 %vm555_vm2, %v8188_v12 }
 0x165   : > { %6711 = vmatprep.mubr.msk.bf16.mxu1 %vm8060_vm1, %v8059_v2  ;;  %6728 = vmatpush3.bf16.msra.mxu1 %v1956_v34 }
 0x166   : > { %6749 = vmatprep.subr.bf16.mxu1 %v8059_v2 }
 0x167   : > { %v928_v42 = vpop.f32.mrb[4].mxu1 }
 0x168   : > { %v6493_v50 = vpop.f32.mrb[5].mxu1 }
 0x169   : > { %v931_v60 = vpop.f32.mrb[6].mxu1 }
 0x16a   : > { %v6494_v4 = vpop.f32.mrb[7].mxu1 }
 0x16c   : > { %6712 = vmatmul.mubr.msk.bf16.gmra.mrb[104].mxu1 %vm555_vm2, %v8208_v20 }
 0x16d   : > { %6715 = vmatprep.mubr.msk.bf16.mxu1 %vm8060_vm1, %v8059_v2 }
 0x16f   : > { %v936_v7 = vpop.f32.mrb[8].mxu1 }
 0x170   : > { %v6497_v11 = vpop.f32.mrb[9].mxu1 }
 0x171   : > { %v939_v13 = vpop.f32.mrb[10].mxu1 }
 0x172   : > { %v6498_v12 = vpop.f32.mrb[11].mxu1 }
 0x174   : > { %6716 = vmatmul.mubr.msk.bf16.gmra.mrb[108].mxu1 %vm555_vm2, %v8224_v26 }
 0x175   : > { %6719 = vmatprep.mubr.msk.bf16.mxu1 %vm8060_vm1, %v8059_v2 }
 0x178   : > { %v1495_v14 = vpop.f32.mrb[0].mxu0 }
 0x179   : > { %v7411_v20 = vadd.f32 %v1495_v14, %v920_v63  ;;  %v6599_v21 = vpop.f32.mrb[1].mxu0 }
 0x17a   : > { %v1498_v27 = vpop.f32.mrb[2].mxu0  ;;  %v2042_v21 = vsel %vm571_vm0, %v5947_v15, 0 }
 0x17b   : > { %v2320_v32 = vmul.f32 %v7411_v20, %v8738_v18  ;;  %v7412_v26 = vadd.f32 %v1498_v27, %v923_v23  ;;  %v6600_v35 = vpop.f32.mrb[3].mxu0 }
 0x17c   : > { %6720 = vmatmul.mubr.msk.bf16.gmra.mrb[112].mxu1 %vm555_vm2, %v8522_v41 }
 0x17d   : > { %v2336_v37 = vadd.f32 %v8743_v22, %v2320_v32  ;;  %v2321_v40 = vmul.f32 %v7412_v26, %v8738_v18  ;;  %6723 = vmatprep.mubr.msk.bf16.mxu1 %vm8060_vm1, %v8059_v2 }
 0x17f   : > { %v2345_v45 = vmax.f32 %v2336_v37, 0.0  ;;  %v2337_v48 = vadd.f32 %v8743_v22, %v2321_v40 }
 0x180   : > { %v1503_v49 = vpop.f32.mrb[4].mxu0 }
 0x181   : > { %2354 = vst.msk [vmem:[#allocation2 + $0xb] sm:$0xff] %vm496_vm4, %v2345_v45  ;;  %v2346_v54 = vmax.f32 %v2337_v48, 0.0  ;;  %v7413_v55 = vadd.f32 %v1503_v49, %v928_v42  ;;  %v6603_v3 = vpop.f32.mrb[5].mxu0 }
 0x182   : > { %v1506_v62 = vpop.f32.mrb[6].mxu0 }
 0x183   : > { %2356 = vst.msk [vmem:[#allocation2 + $0x14] sm:$0xfe] %vm2355_vm6, %v2346_v54  ;;  %v2322_v41 = vmul.f32 %v7413_v55, %v8738_v18  ;;  %v7414_v6 = vadd.f32 %v1506_v62, %v931_v60  ;;  %v6604_v10 = vpop.f32.mrb[7].mxu0  ;;  %v2523_v60 = vsel %vm2430_vm3, %v2397_v38, 0  ;;  %vm2375_vm6 = vcmask 64518  }
 0x184   : > { %6724 = vmatmul.mubr.msk.bf16.gmra.mrb[116].mxu1 %vm555_vm2, %v8542_v56 }
 0x185   : > { %v2338_v19 = vadd.f32 %v8743_v22, %v2322_v41  ;;  %v2323_v25 = vmul.f32 %v7414_v6, %v8738_v18  ;;  %6729 = vmatprep.mubr.msk.bf16.mxu1 %vm8060_vm1, %v8059_v2 }
 0x187   : > { %v2347_v44 = vmax.f32 %v2338_v19, 0.0  ;;  %v2339_v52 = vadd.f32 %v8743_v22, %v2323_v25  ;;  %v1059_v57 = vpop.f32.mrb[12].mxu1 }
 0x188   : > { %v1511_v56 = vpop.f32.mrb[8].mxu0  ;;  %v6523_v63 = vpop.f32.mrb[13].mxu1  ;;  %v2399_v8 = vld [vmem:[#allocation2 + $0x9] sm:$0xff] }
 0x189   : > { %2358 = vst.msk [vmem:[#allocation2 + $0x1c] sm:$0x1] %vm2357_vm7, %v2347_v44  ;;  %v2348_v23 = vmax.f32 %v2339_v52, 0.0  ;;  %v7415_v28 = vadd.f32 %v1511_v56, %v936_v7  ;;  %v6607_v34 = vpop.f32.mrb[9].mxu0  ;;  %v1062_v42 = vpop.f32.mrb[14].mxu1  ;;  %v2408_v50 = vpack.c.bf16 %v2399_v8, %v2398_v31  ;;  %vm2378_vm7 = vcmask 64519  }
 0x18a   : > { %2360 = vst.msk [vmem:[#allocation2 + $0x1d] sm:$0xfc] %vm2359_vm8, %v2347_v44  ;;  %v1514_v4 = vpop.f32.mrb[10].mxu0  ;;  %v6524_v11 = vpop.f32.mrb[15].mxu1  ;;  %v2400_v37 = vld [vmem:[#allocation2 + $0x11] sm:$0xff] }
 0x18b   : > { %2362 = vst.msk [vmem:[#allocation2 + $0x25] sm:$0x3] %vm2361_vm9, %v2348_v23  ;;  %v2324_v12 = vmul.f32 %v7415_v28, %v8738_v18  ;;  %v7416_v14 = vadd.f32 %v1514_v4, %v939_v13  ;;  %v6608_v20 = vpop.f32.mrb[11].mxu0  ;;  %6818 = vmatmul.mubr.msk.bf16.vlgmr.msra.gmra.mrb[20].mxu0 %vm496_vm4, %v2408_v50 }
 0x18c   : > { %2364 = vst.msk [vmem:[#allocation2 + $0x26] sm:$0xf8] %vm2363_vm10, %v2348_v23  ;;  %6838 = vmatpush3.bf16.msra.mxu0 %v2523_v60  ;;  %6730 = vmatmul.mubr.msk.bf16.vlgmr.msra.gmra.mrb[120].mxu1 %vm555_vm2, %v8243_v33  ;;  %vm2380_vm10 = vcmask 63488  }
 0x18d   : > { %v2340_v7 = vadd.f32 %v8743_v22, %v2324_v12  ;;  %v2325_v27 = vmul.f32 %v7416_v14, %v8738_v18  ;;  %6821 = vmatprep.mubr.msk.bf16.mxu0 %vm8060_vm1, %v8059_v2  ;;  %6733 = vmatprep.mubr.msk.bf16.mxu1 %vm8060_vm1, %v8059_v2 }
 0x18e   : > { %6750 = vmatpush3.bf16.msra.mxu1 %v2042_v21  ;;  %6859 = vmatprep.subr.bf16.mxu0 %v8059_v2 }
 0x18f   : > { %v2349_v13 = vmax.f32 %v2340_v7, 0.0  ;;  %v2341_v32 = vadd.f32 %v8743_v22, %v2325_v27  ;;  %v1067_v26 = vpop.f32.mrb[16].mxu1  ;;  %6771 = vmatprep.subr.bf16.mxu1 %v8059_v2 }
 0x190   : > { %v1519_v33 = vpop.f32.mrb[12].mxu0  ;;  %v6527_v35 = vpop.f32.mrb[17].mxu1 }
 0x191   : > { %v2401_v40 = vld [vmem:[#allocation2 + $0x19] sm:$0xff]  ;;  %2366 = vst.msk [vmem:[#allocation2 + $0x2e] sm:$0x7] %vm2365_vm11, %v2349_v13  ;;  %v2350_v45 = vmax.f32 %v2341_v32, 0.0  ;;  %v7417_v48 = vadd.f32 %v1519_v33, %v1059_v57  ;;  %v6611_v49 = vpop.f32.mrb[13].mxu0  ;;  %v1070_v54 = vpop.f32.mrb[18].mxu1 }
 0x192   : > { %2368 = vst.msk [vmem:[#allocation2 + $0x2f] sm:$0xf0] %vm2367_vm12, %v2349_v13  ;;  %v2409_v55 = vpack.c.bf16 %v2401_v40, %v2400_v37  ;;  %v1522_v3 = vpop.f32.mrb[14].mxu0  ;;  %v6528_v62 = vpop.f32.mrb[19].mxu1  ;;  %v2383_v37 = vld [vmem:[#allocation2 + $0x8] sm:$0xff]  ;;  %vm3488_vm11 = vcmask 1042432  }
 0x193   : > { %2370 = vst.msk [vmem:[#allocation2 + $0x37] sm:$0xf] %vm2369_vm13, %v2350_v45  ;;  %v2326_v41 = vmul.f32 %v7417_v48, %v8738_v18  ;;  %v7418_v6 = vadd.f32 %v1522_v3, %v1062_v42  ;;  %v6612_v10 = vpop.f32.mrb[15].mxu0  ;;  %v5979_v40 = vld [vmem:[%s9771_s6 + $0x8] sm:$0xf] }
 0x194   : > { %2372 = vst.msk [vmem:[#allocation2 + $0x38] sm:$0xe0] %vm2371_vm14, %v2350_v45  ;;  %6822 = vmatmul.mubr.msk.bf16.gmra.mrb[24].mxu0 %vm496_vm4, %v2409_v55  ;;  %6734 = vmatmul.mubr.msk.bf16.gmra.mrb[124].mxu1 %vm555_vm2, %v8260_v39  ;;  %v2402_v39 = vld [vmem:[#allocation2 + $0x21] sm:$0xff]  ;;  %v5953_v48 = vld [vmem:[%s9769_s4 + $0xe] sm:$0x3]  ;;  %v2631_v54 = vsel %vm2430_vm3, %v5979_v40, 0 }
 0x195   : > { %6825 = vmatprep.mubr.msk.bf16.mxu0 %vm8060_vm1, %v8059_v2  ;;  %v2342_v19 = vadd.f32 %v8743_v22, %v2326_v41  ;;  %v2327_v25 = vmul.f32 %v7418_v6, %v8738_v18  ;;  %6737 = vmatprep.mubr.msk.bf16.mxu1 %vm8060_vm1, %v8059_v2  ;;  %v2128_v62 = vsel %vm571_vm0, %v5953_v48, 0  ;;  %v2385_v41 = vld [vmem:[#allocation2 + $0x18] sm:$0xff]  ;;  %v2384_v10 = vld [vmem:[#allocation2 + $0x10] sm:$0xff]  ;;  %vm3522_vm14 = vcmask 1045504  }
 0x197   : > { %v2351_v31 = vmax.f32 %v2342_v19, 0.0  ;;  %v2343_v38 = vadd.f32 %v8743_v22, %v2327_v25  ;;  %v8799_v44 = vpop.f32.mrb[20].mxu1  ;;  %v2393_v25 = vpack.c.bf16 %v2385_v41, %v2384_v10 }
 0x198   : > { %v1527_v52 = vpop.f32.mrb[16].mxu0  ;;  %v2403_v57 = vld [vmem:[#allocation2 + $0x29] sm:$0xff]  ;;  %v6621_v56 = vpop.f32.mrb[21].mxu1 }
 0x199   : > { %2374 = vst.msk [vmem:[#allocation2 + $0x40] sm:$0x1f] %vm2373_vm15, %v2351_v31  ;;  %v2352_v63 = vmax.f32 %v2343_v38, 0.0  ;;  %v7419_v8 = vadd.f32 %v1527_v52, %v1067_v26  ;;  %v6615_v15 = vpop.f32.mrb[17].mxu0  ;;  %v2410_v23 = vpack.c.bf16 %v2403_v57, %v2402_v39  ;;  %v8802_v28 = vpop.f32.mrb[22].mxu1  ;;  %v2386_v39 = vld [vmem:[#allocation2 + $0x20] sm:$0xff] }
 0x19a   : > { %2376 = vst.msk [vmem:[#allocation2 + $0x41] sm:$0xc0] %vm2375_vm6, %v2351_v31  ;;  %v1530_v34 = vpop.f32.mrb[18].mxu0  ;;  %v6622_v42 = vpop.f32.mrb[23].mxu1  ;;  %v2404_v14 = vld [vmem:[#allocation2 + $0x31] sm:$0xff]  ;;  %vm3535_vm15 = vcmask 1046528  }
 0x19b   : > { %2377 = vst.msk [vmem:[#allocation2 + $0x49] sm:$0x3f] %vm509_vm5, %v2352_v63  ;;  %v2328_v50 = vmul.f32 %v7419_v8, %v8738_v18  ;;  %v6616_v60 = vpop.f32.mrb[19].mxu0  ;;  %v8944_v10 = vld [vmem:[#allocation2 + $0x2a] sm:$0xff] }
 0x19c   : > { %2379 = vst.msk [vmem:[#allocation2 + $0x4a] sm:$0x80] %vm2378_vm7, %v2352_v63  ;;  %6826 = vmatmul.mubr.msk.bf16.gmra.mrb[28].mxu0 %vm496_vm4, %v2410_v23  ;;  %6738 = vmatmul.mubr.msk.bf16.gmra.mrb[128].mxu1 %vm555_vm2, %v8279_v46 }
 0x19d   : > { %6829 = vmatprep.mubr.msk.bf16.mxu0 %vm8060_vm1, %v8059_v2  ;;  %v2344_v4 = vadd.f32 %v8743_v22, %v2328_v50  ;;  %6741 = vmatprep.mubr.msk.bf16.mxu1 %vm8060_vm1, %v8059_v2 }
 0x19f   : > { %v2353_v11 = vmax.f32 %v2344_v4, 0.0  ;;  %v8814_v12 = vpop.f32.mrb[24].mxu1 }
 0x1a0   : > { %v2405_v18 = vld [vmem:[#allocation2 + $0x39] sm:$0xff]  ;;  %v6625_v20 = vpop.f32.mrb[25].mxu1 }
 0x1a1   : > { %2381 = vst.msk [vmem:[#allocation2 + $0x52] sm:$0x7f] %vm2380_vm10, %v2353_v11  ;;  %v2411_v21 = vpack.c.bf16 %v2405_v18, %v2404_v14  ;;  %v8816_v7 = vpop.f32.mrb[26].mxu1  ;;  %v2406_v13 = vld [vmem:[#allocation2 + $0x41] sm:$0xff] }
 0x1a2   : > { %v6626_v46 = vpop.f32.mrb[27].mxu1  ;;  %v2407_v22 = vld [vmem:[#allocation2 + $0x49] sm:$0xff]  ;;  %v2390_v14 = vld [vmem:[#allocation2 + $0x40] sm:$0xff] }
 0x1a3   : > { %v2412_v26 = vpack.c.bf16 %v2407_v22, %v2406_v13  ;;  %v5985_v13 = vld [vmem:[%s9771_s6 + $0xc] sm:$0xf] }
 0x1a4   : > { %6830 = vmatmul.mubr.msk.bf16.gmra.mrb[32].mxu0 %vm496_vm4, %v2411_v21  ;;  %6742 = vmatmul.mubr.msk.bf16.gmra.mrb[132].mxu1 %vm555_vm2, %v8297_v53  ;;  %v2382_v53 = vld [vmem:[#allocation2] sm:$0xff] }
 0x1a5   : > { %6833 = vmatprep.mubr.msk.bf16.mxu0 %vm8060_vm1, %v8059_v2  ;;  %6745 = vmatprep.mubr.msk.bf16.mxu1 %vm8060_vm1, %v8059_v2 }
 0x1a7   : > { %v8825_v27 = vpop.f32.mrb[28].mxu1 }
 0x1a8   : > { %v6629_v32 = vpop.f32.mrb[29].mxu1 }
 0x1a9   : > { %v8827_v33 = vpop.f32.mrb[30].mxu1 }
 0x1aa   : > { %v6630_v35 = vpop.f32.mrb[31].mxu1 }
 0x1ac   : > { %6834 = vmatmul.mubr.msk.bf16.gmra.mrb[36].mxu0 %vm496_vm4, %v2412_v26  ;;  %6746 = vmatmul.mubr.msk.bf16.gmra.mrb[136].mxu1 %vm555_vm2, %v8312_v58  ;;  %v2392_v58 = vpack.c.bf16 %v2383_v37, %v2382_v53  ;;  %v5959_v26 = vld [vmem:[%s9769_s4 + $0x10] sm:$0x3]  ;;  %v2749_v53 = vsel %vm2430_vm3, %v5985_v13, 0 }
 0x1ad   : > { %6839 = vmatprep.mubr.msk.bf16.mxu0 %vm8060_vm1, %v8059_v2  ;;  %6751 = vmatprep.mubr.msk.bf16.mxu1 %vm8060_vm1, %v8059_v2 }
 0x1af   : > { %v8839_v45 = vpop.f32.mrb[32].mxu1 }
 0x1b0   : > { %v6633_v49 = vpop.f32.mrb[33].mxu1 }
 0x1b1   : > { %v8845_v55 = vpop.f32.mrb[34].mxu1  ;;  %v2214_v49 = vsel %vm571_vm0, %v5959_v26, 0 }
 0x1b2   : > { %v6634_v3 = vpop.f32.mrb[35].mxu1 }
 0x1b4   : > { %6840 = vmatmul.mubr.msk.bf16.vlgmr.msra.gmra.mrb[20].mxu0 %vm496_vm4, %v2392_v58  ;;  %6752 = vmatmul.mubr.msk.bf16.vlgmr.msra.gmra.mrb[140].mxu1 %vm555_vm2, %v8331_v1  ;;  %v2387_v1 = vld [vmem:[#allocation2 + $0x28] sm:$0xff] }
 0x1b5   : > { %6860 = vmatpush3.bf16.msra.mxu0 %v2631_v54  ;;  %6843 = vmatprep.mubr.msk.bf16.mxu0 %vm8060_vm1, %v8059_v2  ;;  %v2394_v63 = vpack.c.bf16 %v2387_v1, %v2386_v39  ;;  %v2600_v54 = vld [vmem:[#allocation2 + $0x12] sm:$0xff] }
 0x1b6   : > { %6755 = vmatprep.mubr.msk.bf16.mxu1 %vm8060_vm1, %v8059_v2  ;;  %6772 = vmatpush3.bf16.msra.mxu1 %v2128_v62 }
 0x1b7   : > { %6881 = vmatprep.subr.bf16.mxu0 %v8059_v2  ;;  %6793 = vmatprep.subr.bf16.mxu1 %v8059_v2  ;;  %v8857_v6 = vpop.f32.mrb[36].mxu1 }
 0x1b8   : > { %v6637_v19 = vpop.f32.mrb[37].mxu1 }
 0x1b9   : > { %v1617_v31 = vpop.f32.mrb[38].mxu1  ;;  %v2602_v19 = vld [vmem:[#allocation2 + $0x22] sm:$0xff] }
 0x1ba   : > { %v6638_v38 = vpop.f32.mrb[39].mxu1 }
 0x1bb   : > { %v2610_v38 = vpack.c.bf16 %v8944_v10, %v2602_v19 }
 0x1bc   : > { %6844 = vmatmul.mubr.msk.bf16.gmra.mrb[24].mxu0 %vm496_vm4, %v2393_v25  ;;  %6756 = vmatmul.mubr.msk.bf16.gmra.mrb[144].mxu1 %vm555_vm2, %v8348_v9  ;;  %v2388_v9 = vld [vmem:[#allocation2 + $0x30] sm:$0xff] }
 0x1bd   : > { %6847 = vmatprep.mubr.msk.bf16.mxu0 %vm8060_vm1, %v8059_v2  ;;  %6759 = vmatprep.mubr.msk.bf16.mxu1 %vm8060_vm1, %v8059_v2 }
 0x1bf   : > { %v1657_v52 = vpop.f32.mrb[40].mxu1 }
 0x1c0   : > { %v8867_v57 = vadd.f32 %v1657_v52, %v8799_v44  ;;  %v6643_v56 = vpop.f32.mrb[41].mxu1  ;;  %v2389_v44 = vld [vmem:[#allocation2 + $0x38] sm:$0xff] }
 0x1c1   : > { %v1660_v8 = vpop.f32.mrb[42].mxu1  ;;  %v2395_v50 = vpack.c.bf16 %v2389_v44, %v2388_v9  ;;  %v2604_v56 = vld [vmem:[#allocation2 + $0x32] sm:$0xff] }
 0x1c2   : > { %v8870_v15 = vadd.f32 %v1660_v8, %v8802_v28  ;;  %v6644_v23 = vpop.f32.mrb[43].mxu1 }
 0x1c4   : > { %6848 = vmatmul.mubr.msk.bf16.gmra.mrb[28].mxu0 %vm496_vm4, %v2394_v63  ;;  %6760 = vmatmul.mubr.msk.bf16.gmra.mrb[148].mxu1 %vm555_vm2, %v8366_v17  ;;  %v2391_v17 = vld [vmem:[#allocation2 + $0x48] sm:$0xff] }
 0x1c5   : > { %6851 = vmatprep.mubr.msk.bf16.mxu0 %vm8060_vm1, %v8059_v2  ;;  %6763 = vmatprep.mubr.msk.bf16.mxu1 %vm8060_vm1, %v8059_v2  ;;  %v2396_v21 = vpack.c.bf16 %v2391_v17, %v2390_v14 }
 0x1c7   : > { %v1665_v34 = vpop.f32.mrb[44].mxu1 }
 0x1c8   : > { %v8880_v42 = vadd.f32 %v1665_v34, %v8814_v12  ;;  %v6647_v28 = vpop.f32.mrb[45].mxu1  ;;  %v8968_v34 = vld [vmem:[#allocation2 + $0x4a] sm:$0xff] }
 0x1c9   : > { %v1668_v60 = vpop.f32.mrb[46].mxu1 }
 0x1ca   : > { %v8883_v4 = vadd.f32 %v1668_v60, %v8816_v7  ;;  %v6648_v11 = vpop.f32.mrb[47].mxu1 }
 0x1cc   : > { %6852 = vmatmul.mubr.msk.bf16.gmra.mrb[32].mxu0 %vm496_vm4, %v2395_v50  ;;  %6764 = vmatmul.mubr.msk.bf16.gmra.mrb[152].mxu1 %vm555_vm2, %v8382_v24  ;;  %v2598_v24 = vld [vmem:[#allocation2 + $0x2] sm:$0xff] }
 0x1cd   : > { %6855 = vmatprep.mubr.msk.bf16.mxu0 %vm8060_vm1, %v8059_v2  ;;  %6767 = vmatprep.mubr.msk.bf16.mxu1 %vm8060_vm1, %v8059_v2 }
 0x1cf   : > { %v1673_v12 = vpop.f32.mrb[48].mxu1 }
 0x1d0   : > { %v8893_v18 = vadd.f32 %v1673_v12, %v8825_v27  ;;  %v6651_v20 = vpop.f32.mrb[49].mxu1  ;;  %v8905_v27 = vld [vmem:[#allocation2 + $0xa] sm:$0xff] }
 0x1d1   : > { %v1676_v7 = vpop.f32.mrb[50].mxu1  ;;  %v2608_v35 = vpack.c.bf16 %v8905_v27, %v2598_v24  ;;  %v2726_v20 = vpack.c.bf16 %v2600_v54, %v8905_v27 }
 0x1d2   : > { %v8896_v46 = vadd.f32 %v1676_v7, %v8827_v33  ;;  %v6652_v22 = vpop.f32.mrb[51].mxu1 }
 0x1d4   : > { %6856 = vmatmul.mubr.msk.bf16.gmra.mrb[36].mxu0 %vm496_vm4, %v2396_v21  ;;  %6768 = vmatmul.mubr.msk.bf16.gmra.mrb[156].mxu1 %vm555_vm2, %v8395_v29 }
 0x1d5   : > { %6861 = vmatprep.mubr.msk.bf16.mxu0 %vm8060_vm1, %v8059_v2  ;;  %6773 = vmatprep.mubr.msk.bf16.mxu1 %vm8060_vm1, %v8059_v2 }
 0x1d7   : > { %v1681_v32 = vpop.f32.mrb[52].mxu1 }
 0x1d8   : > { %v8914_v29 = vadd.f32 %v1681_v32, %v8839_v45  ;;  %v6655_v33 = vpop.f32.mrb[53].mxu1  ;;  %v8929_v45 = vld [vmem:[#allocation2 + $0x1a] sm:$0xff] }
 0x1d9   : > { %v1684_v37 = vpop.f32.mrb[54].mxu1  ;;  %v2727_v13 = vpack.c.bf16 %v2602_v19, %v8929_v45 }
 0x1da   : > { %v8919_v40 = vadd.f32 %v1684_v37, %v8845_v55  ;;  %v6656_v48 = vpop.f32.mrb[55].mxu1 }
 0x1dc   : > { %6862 = vmatmul.mubr.msk.bf16.vlgmr.msra.gmra.mrb[20].mxu0 %vm496_vm4, %v2608_v35  ;;  %6774 = vmatmul.mubr.msk.bf16.vlgmr.msra.gmra.mrb[160].mxu1 %vm555_vm2, %v8412_v36  ;;  %v2609_v36 = vpack.c.bf16 %v8929_v45, %v2600_v54  ;;  %v2728_v35 = vpack.c.bf16 %v2604_v56, %v8944_v10 }
 0x1dd   : > { %6882 = vmatpush3.bf16.msra.mxu0 %v2749_v53  ;;  %6865 = vmatprep.mubr.msk.bf16.mxu0 %vm8060_vm1, %v8059_v2 }
 0x1de   : > { %6777 = vmatprep.mubr.msk.bf16.mxu1 %vm8060_vm1, %v8059_v2  ;;  %6794 = vmatpush3.bf16.msra.mxu1 %v2214_v49 }
 0x1df   : > { %6903 = vmatprep.subr.bf16.mxu0 %v8059_v2  ;;  %v1689_v58 = vpop.f32.mrb[56].mxu1  ;;  %7013 = vmatprep.subr.bf16.mxu1 %v8059_v2 }
 0x1e0   : > { %v8934_v55 = vadd.f32 %v1689_v58, %v8857_v6  ;;  %v6659_v3 = vpop.f32.mrb[57].mxu1 }
 0x1e1   : > { %v1692_v62 = vpop.f32.mrb[58].mxu1 }
 0x1e2   : > { %v6660_v41 = vpop.f32.mrb[59].mxu1 }
 0x1e4   : > { %6866 = vmatmul.mubr.msk.bf16.gmra.mrb[24].mxu0 %vm496_vm4, %v2609_v36  ;;  %6778 = vmatmul.mubr.msk.bf16.gmra.mrb[164].mxu1 %vm555_vm2, %v8428_v43  ;;  %v8956_v43 = vld [vmem:[#allocation2 + $0x3a] sm:$0xff] }
 0x1e5   : > { %6869 = vmatprep.mubr.msk.bf16.mxu0 %vm8060_vm1, %v8059_v2  ;;  %6781 = vmatprep.mubr.msk.bf16.mxu1 %vm8060_vm1, %v8059_v2 }
 0x1e7   : > { %v1734_v6 = vpop.f32.mrb[60].mxu1 }
 0x1e8   : > { %v1772_v25 = vadd.f32 %v1734_v6, %v8867_v57  ;;  %v6665_v31 = vpop.f32.mrb[61].mxu1 }
 0x1e9   : > { %v1737_v1 = vpop.f32.mrb[62].mxu1 }
 0x1ea   : > { %v1773_v52 = vadd.f32 %v1737_v1, %v8870_v15  ;;  %v6666_v39 = vpop.f32.mrb[63].mxu1  ;;  %v2611_v15 = vpack.c.bf16 %v8956_v43, %v2604_v56 }
 0x1ec   : > { %6870 = vmatmul.mubr.msk.bf16.gmra.mrb[28].mxu0 %vm496_vm4, %v2610_v38  ;;  %6782 = vmatmul.mubr.msk.bf16.gmra.mrb[168].mxu1 %vm555_vm2, %v8444_v51  ;;  %v2606_v51 = vld [vmem:[#allocation2 + $0x42] sm:$0xff]  ;;  %v2834_v38 = vld [vmem:[#allocation2 + $0xb] sm:$0xff] }
 0x1ed   : > { %6873 = vmatprep.mubr.msk.bf16.mxu0 %vm8060_vm1, %v8059_v2  ;;  %6785 = vmatprep.mubr.msk.bf16.mxu1 %vm8060_vm1, %v8059_v2  ;;  %v2612_v60 = vpack.c.bf16 %v8968_v34, %v2606_v51  ;;  %v2729_v45 = vpack.c.bf16 %v2606_v51, %v8956_v43 }
 0x1ef   : > { %v1742_v57 = vpop.f32.mrb[64].mxu1 }
 0x1f0   : > { %v1774_v63 = vadd.f32 %v1742_v57, %v8880_v42  ;;  %v6669_v8 = vpop.f32.mrb[65].mxu1 }
 0x1f1   : > { %v1745_v23 = vpop.f32.mrb[66].mxu1 }
 0x1f2   : > { %v1775_v9 = vadd.f32 %v1745_v23, %v8883_v4  ;;  %v6670_v44 = vpop.f32.mrb[67].mxu1 }
 0x1f4   : > { %6874 = vmatmul.mubr.msk.bf16.gmra.mrb[32].mxu0 %vm496_vm4, %v2611_v15  ;;  %6786 = vmatmul.mubr.msk.bf16.gmra.mrb[172].mxu1 %vm555_vm2, %v8462_v61  ;;  %v5991_v61 = vld [vmem:[%s9771_s6 + $0x10] sm:$0xf]  ;;  %v2836_v15 = vld [vmem:[#allocation2 + $0x1b] sm:$0xff] }
 0x1f5   : > { %6877 = vmatprep.mubr.msk.bf16.mxu0 %vm8060_vm1, %v8059_v2  ;;  %6789 = vmatprep.mubr.msk.bf16.mxu1 %vm8060_vm1, %v8059_v2  ;;  %v2867_v21 = vsel %vm2430_vm3, %v5991_v61, 0 }
 0x1f7   : > { %v1750_v42 = vpop.f32.mrb[68].mxu1 }
 0x1f8   : > { %v1776_v28 = vadd.f32 %v1750_v42, %v8893_v18  ;;  %v6673_v50 = vpop.f32.mrb[69].mxu1  ;;  %v2839_v42 = vld [vmem:[#allocation2 + $0x33] sm:$0xff] }
 0x1f9   : > { %v1753_v4 = vpop.f32.mrb[70].mxu1  ;;  %v2838_v50 = vld [vmem:[#allocation2 + $0x2b] sm:$0xff] }
 0x1fa   : > { %v1777_v11 = vadd.f32 %v1753_v4, %v8896_v46  ;;  %v6674_v17 = vpop.f32.mrb[71].mxu1 }
 0x1fc   : > { %6878 = vmatmul.mubr.msk.bf16.gmra.mrb[36].mxu0 %vm496_vm4, %v2612_v60  ;;  %6790 = vmatmul.mubr.msk.bf16.gmra.mrb[176].mxu1 %vm555_vm2, %v8477_v5 }
 0x1fd   : > { %6883 = vmatprep.mubr.msk.bf16.mxu0 %vm8060_vm1, %v8059_v2  ;;  %6795 = vmatprep.mubr.msk.bf16.mxu1 %vm8060_vm1, %v8059_v2 }
 0x1ff   : > { %v1758_v12 = vpop.f32.mrb[72].mxu1 }
 0x200   : > { %v1778_v14 = vadd.f32 %v1758_v12, %v8914_v29  ;;  %v6677_v18 = vpop.f32.mrb[73].mxu1 }
 0x201   : > { %v1761_v7 = vpop.f32.mrb[74].mxu1 }
 0x202   : > { %v1779_v5 = vadd.f32 %v1761_v7, %v8919_v40  ;;  %v6678_v46 = vpop.f32.mrb[75].mxu1 }
 0x204   : > { %6884 = vmatmul.mubr.msk.bf16.vlgmr.msra.gmra.mrb[20].mxu0 %vm496_vm4, %v2726_v20  ;;  %6796 = vmatmul.mubr.msk.bf16.vlgmr.msra.gmra.mrb[180].mxu1 %vm555_vm2, %v8493_v16  ;;  %v2840_v20 = vld [vmem:[#allocation2 + $0x3b] sm:$0xff] }
 0x205   : > { %6904 = vmatpush3.bf16.msra.mxu0 %v2867_v21  ;;  %6887 = vmatprep.mubr.msk.bf16.mxu0 %vm8060_vm1, %v8059_v2 }
 0x206   : > { %6799 = vmatprep.mubr.msk.bf16.mxu1 %vm8060_vm1, %v8059_v2  ;;  %6925 = vmatprep.subr.bf16.mxu0 %v8059_v2 }
 0x207   : > { %v1766_v22 = vpop.f32.mrb[76].mxu1 }
 0x208   : > { %v1780_v24 = vadd.f32 %v1766_v22, %v8934_v55  ;;  %v6681_v27 = vpop.f32.mrb[77].mxu1 }
 0x209   : > { %v1769_v32 = vpop.f32.mrb[78].mxu1  ;;  %v2842_v27 = vld [vmem:[#allocation2 + $0x4b] sm:$0xff] }
 0x20a   : > { %v6682_v26 = vpop.f32.mrb[79].mxu1 }
 0x20c   : > { %6888 = vmatmul.mubr.msk.bf16.gmra.mrb[24].mxu0 %vm496_vm4, %v2727_v13  ;;  %6800 = vmatmul.mubr.msk.bf16.gmra.mrb[184].mxu1 %vm555_vm2, %v8508_v30  ;;  %v2843_v13 = vld [vmem:[#allocation2 + $0x53] sm:$0xff] }
 0x20d   : > { %6891 = vmatprep.mubr.msk.bf16.mxu0 %vm8060_vm1, %v8059_v2  ;;  %6803 = vmatprep.mubr.msk.bf16.mxu1 %vm8060_vm1, %v8059_v2 }
 0x20f   : > { %v1820_v16 = vpop.f32.mrb[80].mxu1 }
 0x210   : > { %v1858_v29 = vadd.f32 %v1820_v16, %v1772_v25  ;;  %v6687_v33 = vpop.f32.mrb[81].mxu1  ;;  %v5997_v25 = vld [vmem:[%s9771_s6 + $0x14] sm:$0xf] }
 0x211   : > { %v1823_v53 = vpop.f32.mrb[82].mxu1  ;;  %v2985_v43 = vsel %vm2430_vm3, %v5997_v25, 0 }
 0x212   : > { %v1859_v37 = vadd.f32 %v1823_v53, %v1773_v52  ;;  %v6688_v40 = vpop.f32.mrb[83].mxu1 }
 0x213   : > { %v6003_v40 = vld [vmem:[%s9771_s6 + $0x18] sm:$0xf] }
 0x214   : > { %6892 = vmatmul.mubr.msk.bf16.gmra.mrb[28].mxu0 %vm496_vm4, %v2728_v35  ;;  %6804 = vmatmul.mubr.msk.bf16.gmra.mrb[188].mxu1 %vm555_vm2, %v8527_v47  ;;  %v2725_v47 = vld [vmem:[#allocation2 + $0x52] sm:$0xff] }
 0x215   : > { %6895 = vmatprep.mubr.msk.bf16.mxu0 %vm8060_vm1, %v8059_v2  ;;  %6807 = vmatprep.mubr.msk.bf16.mxu1 %vm8060_vm1, %v8059_v2  ;;  %v2730_v41 = vpack.c.bf16 %v2725_v47, %v8968_v34 }
 0x217   : > { %v1828_v30 = vpop.f32.mrb[84].mxu1 }
 0x218   : > { %v1860_v48 = vadd.f32 %v1828_v30, %v1774_v63  ;;  %v6691_v49 = vpop.f32.mrb[85].mxu1  ;;  %v2837_v63 = vld [vmem:[#allocation2 + $0x23] sm:$0xff] }
 0x219   : > { %v1831_v58 = vpop.f32.mrb[86].mxu1  ;;  %v2845_v44 = vpack.c.bf16 %v2837_v63, %v2836_v15  ;;  %v9071_v63 = vld [vmem:[#allocation2 + $0x44] sm:$0xff] }
 0x21a   : > { %v1861_v54 = vadd.f32 %v1831_v58, %v1775_v9  ;;  %v6692_v55 = vpop.f32.mrb[87].mxu1 }
 0x21c   : > { %6896 = vmatmul.mubr.msk.bf16.gmra.mrb[32].mxu0 %vm496_vm4, %v2729_v45  ;;  %6808 = vmatmul.mubr.msk.bf16.gmra.mrb[192].mxu1 %vm555_vm2, %v8544_v59  ;;  %v2835_v59 = vld [vmem:[#allocation2 + $0x13] sm:$0xff] }
 0x21d   : > { %6899 = vmatprep.mubr.msk.bf16.mxu0 %vm8060_vm1, %v8059_v2  ;;  %6811 = vmatprep.mubr.msk.bf16.mxu1 %vm8060_vm1, %v8059_v2  ;;  %v2844_v39 = vpack.c.bf16 %v2835_v59, %v2834_v38 }
 0x21f   : > { %v1836_v3 = vpop.f32.mrb[88].mxu1 }
 0x220   : > { %v1862_v36 = vadd.f32 %v1836_v3, %v1776_v28  ;;  %v6695_v62 = vpop.f32.mrb[89].mxu1 }
 0x221   : > { %v1839_v10 = vpop.f32.mrb[90].mxu1 }
 0x222   : > { %v1863_v6 = vadd.f32 %v1839_v10, %v1777_v11  ;;  %v6696_v19 = vpop.f32.mrb[91].mxu1  ;;  %v2846_v11 = vpack.c.bf16 %v2839_v42, %v2838_v50  ;;  %v2961_v50 = vld [vmem:[#allocation2 + $0x54] sm:$0xff] }
 0x224   : > { %6900 = vmatmul.mubr.msk.bf16.gmra.mrb[36].mxu0 %vm496_vm4, %v2730_v41  ;;  %6812 = vmatmul.mubr.msk.bf16.gmra.mrb[196].mxu1 %vm555_vm2, %v8558_v0  ;;  %v2954_v41 = vld [vmem:[#allocation2 + $0x1c] sm:$0xff]  ;;  %vm3463_vm2 = vcmask 1040384  }
 0x225   : > { %6905 = vmatprep.mubr.msk.bf16.mxu0 %vm8060_vm1, %v8059_v2  ;;  %7015 = vmatprep.mubr.msk.bf16.mxu1 %vm8060_vm1, %v8059_v2 }
 0x227   : > { %v1844_v31 = vpop.f32.mrb[92].mxu1 }
 0x228   : > { %v1864_v1 = vadd.f32 %v1844_v31, %v1778_v14  ;;  %v6699_v52 = vpop.f32.mrb[93].mxu1  ;;  %v2841_v14 = vld [vmem:[#allocation2 + $0x43] sm:$0xff]  ;;  %v9065_v31 = vld [vmem:[#allocation2 + $0x34] sm:$0xff] }
 0x229   : > { %v1847_v57 = vpop.f32.mrb[94].mxu1 }
 0x22a   : > { %v1865_v0 = vadd.f32 %v1847_v57, %v1779_v5  ;;  %v6700_v56 = vpop.f32.mrb[95].mxu1  ;;  %v2847_v5 = vpack.c.bf16 %v2841_v14, %v2840_v20 }
 0x22c   : > { %6906 = vmatmul.mubr.msk.bf16.vlgmr.msra.gmra.mrb[20].mxu0 %vm496_vm4, %v2844_v39  ;;  %v2956_v39 = vld [vmem:[#allocation2 + $0x2c] sm:$0xff] }
 0x22d   : > { %6926 = vmatpush3.bf16.msra.mxu0 %v2985_v43  ;;  %6909 = vmatprep.mubr.msk.bf16.mxu0 %vm8060_vm1, %v8059_v2  ;;  %v2964_v57 = vpack.c.bf16 %v9065_v31, %v2956_v39 }
 0x22e   : > { %6947 = vmatprep.subr.bf16.mxu0 %v8059_v2 }
 0x22f   : > { %v1852_v8 = vpop.f32.mrb[96].mxu1 }
 0x230   : > { %v1866_v23 = vadd.f32 %v1852_v8, %v1780_v24  ;;  %v6703_v9 = vpop.f32.mrb[97].mxu1 }
 0x231   : > { %v1855_v51 = vpop.f32.mrb[98].mxu1  ;;  %v2958_v9 = vld [vmem:[#allocation2 + $0x3c] sm:$0xff] }
 0x232   : > { %v6704_v34 = vpop.f32.mrb[99].mxu1  ;;  %v2965_v51 = vpack.c.bf16 %v9071_v63, %v2958_v9 }
 0x234   : > { %6910 = vmatmul.mubr.msk.bf16.gmra.mrb[24].mxu0 %vm496_vm4, %v2845_v44 }
 0x235   : > { %6913 = vmatprep.mubr.msk.bf16.mxu0 %vm8060_vm1, %v8059_v2 }
 0x237   : > { %v1906_v28 = vpop.f32.mrb[100].mxu1 }
 0x238   : > { %v1944_v60 = vadd.f32 %v1906_v28, %v1858_v29  ;;  %v6709_v4 = vpop.f32.mrb[101].mxu1  ;;  %v2848_v29 = vpack.c.bf16 %v2843_v13, %v2842_v27  ;;  %v2960_v28 = vld [vmem:[#allocation2 + $0x4c] sm:$0xff]  ;;  %v6023_v13 = vld [vmem:[%s9774_s9 + $0x4] sm:$0xf] }
 0x239   : > { %v1909_v17 = vpop.f32.mrb[102].mxu1 }
 0x23a   : > { %v1945_v61 = vadd.f32 %v1909_v17, %v1859_v37  ;;  %v6710_v12 = vpop.f32.mrb[103].mxu1  ;;  %v9048_v37 = vld [vmem:[#allocation2 + $0x14] sm:$0xff] }
 0x23c   : > { %6914 = vmatmul.mubr.msk.bf16.gmra.mrb[28].mxu0 %vm496_vm4, %v2846_v11 }
 0x23d   : > { %6917 = vmatprep.mubr.msk.bf16.mxu0 %vm8060_vm1, %v8059_v2 }
 0x23f   : > { %v1914_v18 = vpop.f32.mrb[104].mxu1 }
 0x240   : > { %v1946_v21 = vadd.f32 %v1914_v18, %v1860_v48  ;;  %v6713_v7 = vpop.f32.mrb[105].mxu1  ;;  %v2952_v48 = vld [vmem:[#allocation2 + $0xc] sm:$0xff]  ;;  %v6009_v18 = vld [vmem:[%s9771_s6 + $0x1c] sm:$0xf] }
 0x241   : > { %v1917_v46 = vpop.f32.mrb[106].mxu1  ;;  %v2962_v58 = vpack.c.bf16 %v9048_v37, %v2952_v48 }
 0x242   : > { %v1947_v22 = vadd.f32 %v1917_v46, %v1861_v54  ;;  %v6714_v24 = vpop.f32.mrb[107].mxu1  ;;  %v3103_v54 = vsel %vm2430_vm3, %v6003_v40, 0  ;;  %v3080_v46 = vpack.c.bf16 %v2954_v41, %v9048_v37 }
 0x244   : > { %6918 = vmatmul.mubr.msk.bf16.gmra.mrb[32].mxu0 %vm496_vm4, %v2847_v5 }
 0x245   : > { %6921 = vmatprep.mubr.msk.bf16.mxu0 %vm8060_vm1, %v8059_v2 }
 0x247   : > { %v1922_v32 = vpop.f32.mrb[108].mxu1 }
 0x248   : > { %v1948_v26 = vadd.f32 %v1922_v32, %v1862_v36  ;;  %v6717_v16 = vpop.f32.mrb[109].mxu1  ;;  %v9059_v36 = vld [vmem:[#allocation2 + $0x24] sm:$0xff]  ;;  %v3596_v32 = vsel %vm2430_vm3, %v6023_v13, 0 }
 0x249   : > { %v1925_v33 = vpop.f32.mrb[110].mxu1  ;;  %v2963_v19 = vpack.c.bf16 %v9059_v36, %v2954_v41  ;;  %7014 = vmatpush3.bf16.msra.mxu1 %v3596_v32 }
 0x24a   : > { %v1949_v35 = vadd.f32 %v1925_v33, %v1863_v6  ;;  %v6718_v53 = vpop.f32.mrb[111].mxu1  ;;  %7035 = vmatprep.subr.bf16.mxu1 %v8059_v2  ;;  %v3081_v33 = vpack.c.bf16 %v2956_v39, %v9059_v36  ;;  %v3083_v36 = vpack.c.bf16 %v2960_v28, %v9071_v63  ;;  %v3189_v39 = vld [vmem:[#allocation2 + $0x1d] sm:$0xff] }
 0x24c   : > { %6922 = vmatmul.mubr.msk.bf16.gmra.mrb[36].mxu0 %vm496_vm4, %v2848_v29 }
 0x24d   : > { %6927 = vmatprep.mubr.msk.bf16.mxu0 %vm8060_vm1, %v8059_v2 }
 0x24f   : > { %v1930_v30 = vpop.f32.mrb[112].mxu1 }
 0x250   : > { %v1950_v49 = vadd.f32 %v1930_v30, %v1864_v1  ;;  %v6721_v45 = vpop.f32.mrb[113].mxu1 }
 0x251   : > { %v1933_v55 = vpop.f32.mrb[114].mxu1 }
 0x252   : > { %v1951_v47 = vadd.f32 %v1933_v55, %v1865_v0  ;;  %v6722_v3 = vpop.f32.mrb[115].mxu1 }
 0x254   : > { %6928 = vmatmul.mubr.msk.bf16.vlgmr.msra.gmra.mrb[20].mxu0 %vm496_vm4, %v2962_v58 }
 0x255   : > { %6948 = vmatpush3.bf16.msra.mxu0 %v3103_v54  ;;  %6931 = vmatprep.mubr.msk.bf16.mxu0 %vm8060_vm1, %v8059_v2 }
 0x256   : > { %6969 = vmatprep.subr.bf16.mxu0 %v8059_v2 }
 0x257   : > { %v1938_v62 = vpop.f32.mrb[116].mxu1 }
 0x258   : > { %v1952_v10 = vadd.f32 %v1938_v62, %v1866_v23  ;;  %v6725_v6 = vpop.f32.mrb[117].mxu1 }
 0x259   : > { %v1941_v59 = vpop.f32.mrb[118].mxu1 }
 0x25a   : > { %v6726_v25 = vpop.f32.mrb[119].mxu1 }
 0x25c   : > { %6932 = vmatmul.mubr.msk.bf16.gmra.mrb[24].mxu0 %vm496_vm4, %v2963_v19 }
 0x25d   : > { %6935 = vmatprep.mubr.msk.bf16.mxu0 %vm8060_vm1, %v8059_v2 }
 0x25f   : > { %v1992_v38 = vpop.f32.mrb[120].mxu1 }
 0x260   : > { %v2030_v1 = vadd.f32 %v1992_v38, %v1944_v60  ;;  %v6731_v52 = vpop.f32.mrb[121].mxu1 }
 0x261   : > { %v1995_v43 = vpop.f32.mrb[122].mxu1  ;;  %v3188_v52 = vld [vmem:[#allocation2 + $0x15] sm:$0xff] }
 0x262   : > { %v2031_v0 = vadd.f32 %v1995_v43, %v1945_v61  ;;  %v6732_v56 = vpop.f32.mrb[123].mxu1  ;;  %v2966_v61 = vpack.c.bf16 %v2961_v50, %v2960_v28  ;;  %v6015_v43 = vld [vmem:[%s9771_s6 + $0x20] sm:$0xf] }
 0x264   : > { %6936 = vmatmul.mubr.msk.bf16.gmra.mrb[28].mxu0 %vm496_vm4, %v2964_v57 }
 0x265   : > { %6939 = vmatprep.mubr.msk.bf16.mxu0 %vm8060_vm1, %v8059_v2 }
 0x267   : > { %v2000_v8 = vpop.f32.mrb[124].mxu1 }
 0x268   : > { %v2032_v15 = vadd.f32 %v2000_v8, %v1946_v21  ;;  %v6735_v23 = vpop.f32.mrb[125].mxu1  ;;  %v3198_v8 = vpack.c.bf16 %v3189_v39, %v3188_v52  ;;  %v3311_v52 = vld [vmem:[#allocation2 + $0x3e] sm:$0xff] }
 0x269   : > { %v2003_v44 = vpop.f32.mrb[126].mxu1 }
 0x26a   : > { %v2033_v34 = vadd.f32 %v2003_v44, %v1947_v22  ;;  %v6736_v42 = vpop.f32.mrb[127].mxu1  ;;  %v3221_v22 = vsel %vm2430_vm3, %v6009_v18, 0  ;;  %v3191_v44 = vld [vmem:[#allocation2 + $0x2d] sm:$0xff] }
 0x26b   : > { %v3190_v42 = vld [vmem:[#allocation2 + $0x25] sm:$0xff] }
 0x26c   : > { %6940 = vmatmul.mubr.msk.bf16.gmra.mrb[32].mxu0 %vm496_vm4, %v2965_v51 }
 0x26d   : > { %6943 = vmatprep.mubr.msk.bf16.mxu0 %vm8060_vm1, %v8059_v2 }
 0x26f   : > { %v2008_v60 = vpop.f32.mrb[128].mxu1 }
 0x270   : > { %v2034_v4 = vadd.f32 %v2008_v60, %v1948_v26  ;;  %v6739_v11 = vpop.f32.mrb[129].mxu1 }
 0x271   : > { %v2011_v17 = vpop.f32.mrb[130].mxu1  ;;  %v3193_v11 = vld [vmem:[#allocation2 + $0x3d] sm:$0xff] }
 0x272   : > { %v2035_v12 = vadd.f32 %v2011_v17, %v1949_v35  ;;  %v6740_v14 = vpop.f32.mrb[131].mxu1 }
 0x273   : > { %v3192_v14 = vld [vmem:[#allocation2 + $0x35] sm:$0xff] }
 0x274   : > { %6944 = vmatmul.mubr.msk.bf16.gmra.mrb[36].mxu0 %vm496_vm4, %v2966_v61 }
 0x275   : > { %6949 = vmatprep.mubr.msk.bf16.mxu0 %vm8060_vm1, %v8059_v2 }
 0x277   : > { %v2016_v20 = vpop.f32.mrb[132].mxu1 }
 0x278   : > { %v2036_v21 = vadd.f32 %v2016_v20, %v1950_v49  ;;  %v6743_v7 = vpop.f32.mrb[133].mxu1  ;;  %v3082_v49 = vpack.c.bf16 %v2958_v9, %v9065_v31  ;;  %v3200_v20 = vpack.c.bf16 %v3193_v11, %v3192_v14 }
 0x279   : > { %v2019_v5 = vpop.f32.mrb[134].mxu1 }
 0x27a   : > { %v2037_v24 = vadd.f32 %v2019_v5, %v1951_v47  ;;  %v6744_v27 = vpop.f32.mrb[135].mxu1  ;;  %v3195_v5 = vld [vmem:[#allocation2 + $0x4d] sm:$0xff] }
 0x27b   : > { %v3194_v27 = vld [vmem:[#allocation2 + $0x45] sm:$0xff] }
 0x27c   : > { %6950 = vmatmul.mubr.msk.bf16.vlgmr.msra.gmra.mrb[20].mxu0 %vm496_vm4, %v3080_v46  ;;  %v3201_v32 = vpack.c.bf16 %v3195_v5, %v3194_v27 }
 0x27d   : > { %6970 = vmatpush3.bf16.msra.mxu0 %v3221_v22  ;;  %6953 = vmatprep.mubr.msk.bf16.mxu0 %vm8060_vm1, %v8059_v2 }
 0x27e   : > { %6991 = vmatprep.subr.bf16.mxu0 %v8059_v2 }
 0x27f   : > { %v2024_v26 = vpop.f32.mrb[136].mxu1 }
 0x280   : > { %v2038_v16 = vadd.f32 %v2024_v26, %v1952_v10  ;;  %v6747_v29 = vpop.f32.mrb[137].mxu1  ;;  %v3079_v10 = vld [vmem:[#allocation2 + $0x5c] sm:$0xff] }
 0x281   : > { %v2027_v35 = vpop.f32.mrb[138].mxu1  ;;  %v3084_v31 = vpack.c.bf16 %v3079_v10, %v2961_v50  ;;  %v3199_v50 = vpack.c.bf16 %v3191_v44, %v3190_v42  ;;  %v3196_v29 = vld [vmem:[#allocation2 + $0x55] sm:$0xff] }
 0x282   : > { %v6748_v53 = vpop.f32.mrb[139].mxu1  ;;  %v3309_v10 = vld [vmem:[#allocation2 + $0x2e] sm:$0xff] }
 0x284   : > { %6954 = vmatmul.mubr.msk.bf16.gmra.mrb[24].mxu0 %vm496_vm4, %v3081_v33  ;;  %v3197_v33 = vld [vmem:[#allocation2 + $0x5d] sm:$0xff] }
 0x285   : > { %6957 = vmatprep.mubr.msk.bf16.mxu0 %vm8060_vm1, %v8059_v2 }
 0x287   : > { %v2078_v37 = vpop.f32.mrb[140].mxu1 }
 0x288   : > { %v2116_v40 = vadd.f32 %v2078_v37, %v2030_v1  ;;  %v6753_v30 = vpop.f32.mrb[141].mxu1 }
 0x289   : > { %v2081_v48 = vpop.f32.mrb[142].mxu1  ;;  %v3202_v30 = vpack.c.bf16 %v3197_v33, %v3196_v29 }
 0x28a   : > { %v2117_v45 = vadd.f32 %v2081_v48, %v2031_v0  ;;  %v6754_v58 = vpop.f32.mrb[143].mxu1 }
 0x28c   : > { %6958 = vmatmul.mubr.msk.bf16.gmra.mrb[28].mxu0 %vm496_vm4, %v3082_v49 }
 0x28d   : > { %6961 = vmatprep.mubr.msk.bf16.mxu0 %vm8060_vm1, %v8059_v2 }
 0x28f   : > { %v2086_v54 = vpop.f32.mrb[144].mxu1 }
 0x290   : > { %v2118_v55 = vadd.f32 %v2086_v54, %v2032_v15  ;;  %v6757_v47 = vpop.f32.mrb[145].mxu1  ;;  %v3339_v15 = vsel %vm2430_vm3, %v6015_v43, 0 }
 0x291   : > { %v2089_v3 = vpop.f32.mrb[146].mxu1  ;;  %v3306_v47 = vld [vmem:[#allocation2 + $0x16] sm:$0xff] }
 0x292   : > { %v2119_v62 = vadd.f32 %v2089_v3, %v2033_v34  ;;  %v6758_v41 = vpop.f32.mrb[147].mxu1 }
 0x294   : > { %6962 = vmatmul.mubr.msk.bf16.gmra.mrb[32].mxu0 %vm496_vm4, %v3083_v36 }
 0x295   : > { %6965 = vmatprep.mubr.msk.bf16.mxu0 %vm8060_vm1, %v8059_v2 }
 0x297   : > { %v2094_v6 = vpop.f32.mrb[148].mxu1 }
 0x298   : > { %v2120_v19 = vadd.f32 %v2094_v6, %v2034_v4  ;;  %v6761_v59 = vpop.f32.mrb[149].mxu1 }
 0x299   : > { %v2097_v25 = vpop.f32.mrb[150].mxu1  ;;  %v3308_v59 = vld [vmem:[#allocation2 + $0x26] sm:$0xff] }
 0x29a   : > { %v2121_v38 = vadd.f32 %v2097_v25, %v2035_v12  ;;  %v6762_v1 = vpop.f32.mrb[151].mxu1 }
 0x29c   : > { %6966 = vmatmul.mubr.msk.bf16.gmra.mrb[36].mxu0 %vm496_vm4, %v3084_v31  ;;  %v3317_v31 = vpack.c.bf16 %v3309_v10, %v3308_v59 }
 0x29d   : > { %6971 = vmatprep.mubr.msk.bf16.mxu0 %vm8060_vm1, %v8059_v2 }
 0x29f   : > { %v2102_v57 = vpop.f32.mrb[152].mxu1 }
 0x2a0   : > { %v2122_v0 = vadd.f32 %v2102_v57, %v2036_v21  ;;  %v6765_v56 = vpop.f32.mrb[153].mxu1 }
 0x2a1   : > { %v2105_v63 = vpop.f32.mrb[154].mxu1 }
 0x2a2   : > { %v2123_v23 = vadd.f32 %v2105_v63, %v2037_v24  ;;  %v6766_v9 = vpop.f32.mrb[155].mxu1 }
 0x2a3   : > { %v9153_v9 = vld [vmem:[%s9770_s5] ss:$0 sm:$0xff] }
 0x2a4   : > { %6972 = vmatmul.mubr.msk.bf16.vlgmr.msra.gmra.mrb[20].mxu0 %vm496_vm4, %v3198_v8 }
 0x2a5   : > { %6992 = vmatpush3.bf16.msra.mxu0 %v3339_v15  ;;  %6975 = vmatprep.mubr.msk.bf16.mxu0 %vm8060_vm1, %v8059_v2 }
 0x2a6   : > { %7211 = vmatprep.subr.bf16.mxu0 %v8059_v2 }
 0x2a7   : > { %v2110_v51 = vpop.f32.mrb[156].mxu1 }
 0x2a8   : > { %v2124_v34 = vadd.f32 %v2110_v51, %v2038_v16  ;;  %v6769_v28 = vpop.f32.mrb[157].mxu1 }
 0x2a9   : > { %v2113_v60 = vpop.f32.mrb[158].mxu1  ;;  %v3312_v28 = vld [vmem:[#allocation2 + $0x46] sm:$0xff] }
 0x2aa   : > { %v6770_v4 = vpop.f32.mrb[159].mxu1 }
 0x2ac   : > { %6976 = vmatmul.mubr.msk.bf16.gmra.mrb[24].mxu0 %vm496_vm4, %v3199_v50 }
 0x2ad   : > { %6979 = vmatprep.mubr.msk.bf16.mxu0 %vm8060_vm1, %v8059_v2 }
 0x2af   : > { %v2164_v17 = vpop.f32.mrb[160].mxu1 }
 0x2b0   : > { %v2202_v61 = vadd.f32 %v2164_v17, %v2116_v40  ;;  %v6775_v12 = vpop.f32.mrb[161].mxu1 }
 0x2b1   : > { %v2167_v18 = vpop.f32.mrb[162].mxu1 }
 0x2b2   : > { %v2203_v21 = vadd.f32 %v2167_v18, %v2117_v45  ;;  %v6776_v7 = vpop.f32.mrb[163].mxu1  ;;  %v3307_v45 = vld [vmem:[#allocation2 + $0x1e] sm:$0xff] }
 0x2b3   : > { %v3316_v36 = vpack.c.bf16 %v3307_v45, %v3306_v47  ;;  %v3315_v7 = vld [vmem:[#allocation2 + $0x5e] sm:$0xff] }
 0x2b4   : > { %6980 = vmatmul.mubr.msk.bf16.gmra.mrb[28].mxu0 %vm496_vm4, %v3200_v20 }
 0x2b5   : > { %6983 = vmatprep.mubr.msk.bf16.mxu0 %vm8060_vm1, %v8059_v2 }
 0x2b7   : > { %v2172_v46 = vpop.f32.mrb[164].mxu1 }
 0x2b8   : > { %v2204_v22 = vadd.f32 %v2172_v46, %v2118_v55  ;;  %v6779_v24 = vpop.f32.mrb[165].mxu1 }
 0x2b9   : > { %v2175_v13 = vpop.f32.mrb[166].mxu1 }
 0x2ba   : > { %v2205_v26 = vadd.f32 %v2175_v13, %v2119_v62  ;;  %v6780_v16 = vpop.f32.mrb[167].mxu1 }
 0x2bc   : > { %6984 = vmatmul.mubr.msk.bf16.gmra.mrb[32].mxu0 %vm496_vm4, %v3201_v32 }
 0x2bd   : > { %6987 = vmatprep.mubr.msk.bf16.mxu0 %vm8060_vm1, %v8059_v2 }
 0x2bf   : > { %v2180_v35 = vpop.f32.mrb[168].mxu1 }
 0x2c0   : > { %v9126_v53 = vadd.f32 %v2180_v35, %v2120_v19  ;;  %v6783_v37 = vpop.f32.mrb[169].mxu1 }
 0x2c1   : > { %v2183_v40 = vpop.f32.mrb[170].mxu1 }
 0x2c2   : > { %v9128_v48 = vadd.f32 %v2183_v40, %v2121_v38  ;;  %v6784_v49 = vpop.f32.mrb[171].mxu1 }
 0x2c4   : > { %6988 = vmatmul.mubr.msk.bf16.gmra.mrb[36].mxu0 %vm496_vm4, %v3202_v30 }
 0x2c5   : > { %6993 = vmatprep.mubr.msk.bf16.mxu0 %vm8060_vm1, %v8059_v2 }
 0x2c7   : > { %v2188_v58 = vpop.f32.mrb[172].mxu1 }
 0x2c8   : > { %v9133_v54 = vadd.f32 %v2188_v58, %v2122_v0  ;;  %v6787_v55 = vpop.f32.mrb[173].mxu1  ;;  %v3310_v0 = vld [vmem:[#allocation2 + $0x36] sm:$0xff] }
 0x2c9   : > { %v2191_v3 = vpop.f32.mrb[174].mxu1  ;;  %v3318_v63 = vpack.c.bf16 %v3311_v52, %v3310_v0 }
 0x2ca   : > { %v9135_v62 = vadd.f32 %v2191_v3, %v2123_v23  ;;  %v6788_v41 = vpop.f32.mrb[175].mxu1  ;;  %v3313_v23 = vld [vmem:[#allocation2 + $0x4e] sm:$0xff] }
 0x2cb   : > { %v3319_v60 = vpack.c.bf16 %v3313_v23, %v3312_v28 }
 0x2cc   : > { %6994 = vmatmul.mubr.msk.bf16.vlgmr.msra.gmra.mrb[20].mxu0 %vm496_vm4, %v3316_v36 }
 0x2cd   : > { %6997 = vmatprep.mubr.msk.bf16.mxu0 %vm8060_vm1, %v8059_v2 }
 0x2cf   : > { %v2196_v6 = vpop.f32.mrb[176].mxu1 }
 0x2d0   : > { %v9140_v19 = vadd.f32 %v2196_v6, %v2124_v34  ;;  %v6791_v25 = vpop.f32.mrb[177].mxu1 }
 0x2d1   : > { %v2199_v38 = vpop.f32.mrb[178].mxu1 }
 0x2d2   : > { %v6792_v1 = vpop.f32.mrb[179].mxu1 }
 0x2d4   : > { %6998 = vmatmul.mubr.msk.bf16.gmra.mrb[24].mxu0 %vm496_vm4, %v3317_v31 }
 0x2d5   : > { %7001 = vmatprep.mubr.msk.bf16.mxu0 %vm8060_vm1, %v8059_v2 }
 0x2d7   : > { %v2250_v39 = vpop.f32.mrb[180].mxu1 }
 0x2d8   : > { %v9145_v43 = vadd.f32 %v2250_v39, %v2202_v61  ;;  %v6797_v57 = vpop.f32.mrb[181].mxu1 }
 0x2d9   : > { %v2253_v56 = vpop.f32.mrb[182].mxu1 }
 0x2da   : > { %v2289_v8 = vadd.f32 %v2253_v56, %v2203_v21  ;;  %v6798_v15 = vpop.f32.mrb[183].mxu1  ;;  %v3314_v21 = vld [vmem:[#allocation2 + $0x56] sm:$0xff] }
 0x2db   : > { %v3320_v32 = vpack.c.bf16 %v3315_v7, %v3314_v21  ;;  %v9232_v15 = vld [vmem:[%s9773_s8] ss:$0 sm:$0xff] }
 0x2dc   : > { %7002 = vmatmul.mubr.msk.bf16.gmra.mrb[28].mxu0 %vm496_vm4, %v3318_v63  ;;  %v9156_v51 = vadd.f32 %v9153_v9, %v2289_v8 }
 0x2dd   : > { %7005 = vmatprep.mubr.msk.bf16.mxu0 %vm8060_vm1, %v8059_v2 }
 0x2de   : > { %v3464_v61 = vrot.slane %v9156_v51, 7 }
 0x2df   : > { %v2258_v44 = vpop.f32.mrb[184].mxu1 }
 0x2e0   : > { %v2290_v34 = vadd.f32 %v2258_v44, %v2204_v22  ;;  %v6801_v42 = vpop.f32.mrb[185].mxu1 }
 0x2e1   : > { %v2261_v50 = vpop.f32.mrb[186].mxu1  ;;  %v2304_v42 = vadd.f32 %v9153_v9, %v9145_v43 }
 0x2e2   : > { %v9159_v4 = vadd.f32 %v9153_v9, %v2290_v34  ;;  %v2291_v11 = vadd.f32 %v2261_v50, %v2205_v26  ;;  %v6802_v17 = vpop.f32.mrb[187].mxu1 }
 0x2e4   : > { %7006 = vmatmul.mubr.msk.bf16.gmra.mrb[32].mxu0 %vm496_vm4, %v3319_v60  ;;  %v3465_v12 = vrot.slane %v9159_v4, 7  ;;  %v9165_v14 = vadd.f32 %v9153_v9, %v2291_v11  ;;  %v3476_v18 = vrot.slane %v9159_v4, 6 }
 0x2e5   : > { %7009 = vmatprep.mubr.msk.bf16.mxu0 %vm8060_vm1, %v8059_v2 }
 0x2e6   : > { %v3477_v20 = vrot.slane %v9165_v14, 6  ;;  %v9173_v5 = vsel %vm3463_vm2, %v3464_v61, %v3465_v12  ;;  %v3489_v33 = vrot.slane %v9165_v14, 5 }
 0x2e7   : > { %v2266_v46 = vpop.f32.mrb[188].mxu1 }
 0x2e8   : > { %v2292_v22 = vadd.f32 %v2266_v46, %v9126_v53  ;;  %v6805_v24 = vpop.f32.mrb[189].mxu1  ;;  %v9179_v27 = vsel %vm571_vm0, %v3476_v18, %v3477_v20  ;;  %vm3509_vm0 = vcmask 1044480  }
 0x2e9   : > { %v2269_v13 = vpop.f32.mrb[190].mxu1 }
 0x2ea   : > { %v2308_v26 = vadd.f32 %v9153_v9, %v2292_v22  ;;  %v2293_v16 = vadd.f32 %v2269_v13, %v9128_v48  ;;  %v6806_v29 = vpop.f32.mrb[191].mxu1 }
 0x2ec   : > { %7010 = vmatmul.mubr.msk.bf16.gmra.mrb[36].mxu0 %vm496_vm4, %v3320_v32  ;;  %v3490_v35 = vrot.slane %v2308_v26, 5  ;;  %v2309_v53 = vadd.f32 %v9153_v9, %v2293_v16  ;;  %v3501_v37 = vrot.slane %v2308_v26, 4  ;;  %v3562_v26 = vld [vmem:[%s9774_s9] sm:$0xf]  ;;  %v3563_v16 = vld [vmem:[#allocation3 + $0x1] sm:$0xff] }
 0x2ed   : > { %7213 = vmatprep.mubr.msk.bf16.mxu0 %vm8060_vm1, %v8059_v2 }
 0x2ee   : > { %v3502_v40 = vrot.slane %v2309_v53, 4  ;;  %v9190_v30 = vsel %vm3488_vm11, %v3489_v33, %v3490_v35  ;;  %v3510_v41 = vrot.slane %v2309_v53, 3 }
 0x2ef   : > { %v2274_v49 = vpop.f32.mrb[192].mxu1 }
 0x2f0   : > { %v2294_v48 = vadd.f32 %v2274_v49, %v9133_v54  ;;  %v6809_v45 = vpop.f32.mrb[193].mxu1  ;;  %v9194_v58 = vsel %vm2430_vm3, %v3501_v37, %v3502_v40 }
 0x2f1   : > { %v2277_v55 = vpop.f32.mrb[194].mxu1 }
 0x2f2   : > { %v9197_v47 = vadd.f32 %v9153_v9, %v2294_v48  ;;  %v2295_v3 = vadd.f32 %v2277_v55, %v9135_v62  ;;  %v6810_v36 = vpop.f32.mrb[195].mxu1 }
 0x2f4   : > { %v3511_v10 = vrot.slane %v9197_v47, 3  ;;  %v9202_v6 = vadd.f32 %v9153_v9, %v2295_v3  ;;  %v3523_v54 = vrot.slane %v9197_v47, 2 }
 0x2f6   : > { %v3524_v59 = vrot.slane %v9202_v6, 2  ;;  %v9208_v25 = vsel %vm3509_vm0, %v3510_v41, %v3511_v10  ;;  %v3536_v0 = vrot.slane %v9202_v6, 1 }
 0x2f7   : > { %v2282_v31 = vpop.f32.mrb[196].mxu1 }
 0x2f8   : > { %v2296_v62 = vadd.f32 %v2282_v31, %v9140_v19  ;;  %v9213_v38 = vsel %vm3522_vm14, %v3523_v54, %v3524_v59  ;;  %v6813_v1 = vpop.f32.mrb[197].mxu1  ;;  %v9227_v19 = vld [vmem:[%s9772_s7] ss:$0 sm:$0xff] }
 0x2f9   : > { %v2285_v52 = vpop.f32.mrb[198].mxu1 }
 0x2fa   : > { %v9216_v39 = vadd.f32 %v9153_v9, %v2296_v62  ;;  %v6814_v57 = vpop.f32.mrb[199].mxu1 }
 0x2fc   : > { %v3537_v56 = vrot.slane %v9216_v39, 1  ;;  %v3547_v39 = vld [vmem:[#allocation3] sm:$0xff] }
 0x2fe   : > { %v9222_v63 = vsel %vm3535_vm15, %v3536_v0, %v3537_v56 }
 0x39f   : > { %v3375_v8 = vpop.f32.mrb[20].mxu0 }
 0x3a0   : > { %v3431_v23 = vmul.f32 %v9227_v19, %v3375_v8  ;;  %v6995_v44 = vpop.f32.mrb[21].mxu0 }
 0x3a1   : > { %v3378_v34 = vpop.f32.mrb[22].mxu0 }
 0x3a2   : > { %v3448_v28 = vadd.f32 %v9232_v15, %v3431_v23  ;;  %v3432_v50 = vmul.f32 %v9227_v19, %v3378_v34  ;;  %v6996_v60 = vpop.f32.mrb[23].mxu0 }
 0x3a4   : > { %v3458_v11 = vadd.f32 %v3448_v28, %v2304_v42  ;;  %v3449_v17 = vadd.f32 %v9232_v15, %v3432_v50 }
 0x3a6   : > { %v3459_v12 = vmax.f32 %v3458_v11, 0.0  ;;  %v3469_v20 = vadd.f32 %v3464_v61, %v3449_v17 }
 0x3a7   : > { %v3383_v21 = vpop.f32.mrb[24].mxu0 }
 0x3a8   : > { %3460 = vst.msk [vmem:[#allocation3 + $0xb] sm:$0xff] %vm496_vm4, %v3459_v12  ;;  %v3471_v7 = vmax.f32 %v3469_v20, 0.0  ;;  %v3433_v46 = vmul.f32 %v9227_v19, %v3383_v21  ;;  %v6999_v22 = vpop.f32.mrb[25].mxu0 }
 0x3a9   : > { %v3386_v43 = vpop.f32.mrb[26].mxu0 }
 0x3aa   : > { %3473 = vst.msk [vmem:[#allocation3 + $0x13] sm:$0xfc] %vm2359_vm8, %v3471_v7  ;;  %v3450_v9 = vadd.f32 %v9232_v15, %v3433_v46  ;;  %v3434_v24 = vmul.f32 %v9227_v19, %v3386_v43  ;;  %v7000_v13 = vpop.f32.mrb[27].mxu0 }
 0x3ac   : > { %v3470_v32 = vadd.f32 %v9173_v5, %v3450_v9  ;;  %v3481_v51 = vadd.f32 %v3476_v18, %v3450_v9  ;;  %v3451_v61 = vadd.f32 %v9232_v15, %v3434_v24  ;;  %v3687_v5 = vsel %vm2430_vm3, %v3562_v26, 0 }
 0x3ae   : > { %v3472_v29 = vmax.f32 %v3470_v32, 0.0  ;;  %v3483_v35 = vmax.f32 %v3481_v51, 0.0  ;;  %v3482_v53 = vadd.f32 %v9179_v27, %v3451_v61  ;;  %v3494_v37 = vadd.f32 %v3489_v33, %v3451_v61 }
 0x3af   : > { %v3391_v40 = vpop.f32.mrb[28].mxu0  ;;  %v3564_v49 = vld [vmem:[#allocation3 + $0x9] sm:$0xff] }
 0x3b0   : > { %3474 = vst.msk [vmem:[#allocation3 + $0x1b] sm:$0x3] %vm2361_vm9, %v3472_v29  ;;  %v3484_v4 = vmax.f32 %v3482_v53, 0.0  ;;  %v3496_v18 = vmax.f32 %v3494_v37, 0.0  ;;  %v3435_v48 = vmul.f32 %v9227_v19, %v3391_v40  ;;  %v7003_v45 = vpop.f32.mrb[29].mxu0  ;;  %v3573_v55 = vpack.c.bf16 %v3564_v49, %v3563_v16 }
 0x3b1   : > { %3485 = vst.msk [vmem:[#allocation3 + $0x1b] sm:$0xf0] %vm2367_vm12, %v3483_v35  ;;  %v3394_v3 = vpop.f32.mrb[30].mxu0  ;;  %v3565_v1 = vld [vmem:[#allocation3 + $0x11] sm:$0xff] }
 0x3b2   : > { %3486 = vst.msk [vmem:[#allocation3 + $0x23] sm:$0xf] %vm2369_vm13, %v3484_v4  ;;  %v3452_v14 = vadd.f32 %v9232_v15, %v3435_v48  ;;  %v3436_v27 = vmul.f32 %v9227_v19, %v3394_v3  ;;  %v7004_v33 = vpop.f32.mrb[31].mxu0  ;;  %7016 = vmatmul.mubr.msk.bf16.vlgmr.msra.gmra.mrb[200].mxu1 %vm496_vm4, %v3573_v55  ;;  %v3549_v40 = vld [vmem:[#allocation3 + $0x10] sm:$0xff] }
 0x3b3   : > { %3498 = vst.msk [vmem:[#allocation3 + $0x23] sm:$0xc0] %vm2375_vm6, %v3496_v18  ;;  %7036 = vmatpush3.bf16.msra.mxu1 %v3687_v5  ;;  %7019 = vmatprep.mubr.msk.bf16.mxu1 %vm8060_vm1, %v8059_v2  ;;  %v3762_v33 = vld [vmem:[#allocation3 + $0x2] sm:$0xff] }
 0x3b4   : > { %v3495_v36 = vadd.f32 %v9190_v30, %v3452_v14  ;;  %v3453_v41 = vadd.f32 %v9232_v15, %v3436_v27  ;;  %7057 = vmatprep.subr.bf16.mxu1 %v8059_v2 }
 0x3b6   : > { %v3497_v54 = vmax.f32 %v3495_v36, 0.0  ;;  %v3505_v31 = vadd.f32 %v9194_v58, %v3453_v41  ;;  %v3763_v36 = vld [vmem:[#allocation3 + $0xa] sm:$0xff]  ;;  %v6040_v41 = vld [vmem:[%s9774_s9 + $0xc] sm:$0xf] }
 0x3b7   : > { %v3399_v62 = vpop.f32.mrb[32].mxu0 }
 0x3b8   : > { %v3566_v52 = vld [vmem:[#allocation3 + $0x19] sm:$0xff]  ;;  %3499 = vst.msk [vmem:[#allocation3 + $0x2b] sm:$0x3f] %vm509_vm5, %v3497_v54  ;;  %v3506_v57 = vmax.f32 %v3505_v31, 0.0  ;;  %v3437_v0 = vmul.f32 %v9227_v19, %v3399_v62  ;;  %v7007_v8 = vpop.f32.mrb[33].mxu0  ;;  %v3772_v54 = vpack.c.bf16 %v3763_v36, %v3762_v33  ;;  %v3913_v31 = vsel %vm2430_vm3, %v6040_v41, 0 }
 0x3b9   : > { %v3574_v23 = vpack.c.bf16 %v3566_v52, %v3565_v1  ;;  %v3402_v44 = vpop.f32.mrb[34].mxu0  ;;  %v3567_v12 = vld [vmem:[#allocation3 + $0x21] sm:$0xff]  ;;  %v3550_v37 = vld [vmem:[#allocation3 + $0x18] sm:$0xff] }
 0x3ba   : > { %3507 = vst.msk [vmem:[#allocation3 + $0x33] sm:$0xff] %vm496_vm4, %v3506_v57  ;;  %v3454_v30 = vadd.f32 %v9232_v15, %v3437_v0  ;;  %v3438_v34 = vmul.f32 %v9227_v19, %v3402_v44  ;;  %v7008_v42 = vpop.f32.mrb[35].mxu0  ;;  %v3558_v49 = vpack.c.bf16 %v3550_v37, %v3549_v40  ;;  %v3551_v4 = vld [vmem:[#allocation3 + $0x20] sm:$0xff]  ;;  %v3764_v1 = vld [vmem:[#allocation3 + $0x12] sm:$0xff] }
 0x3bb   : > { %7020 = vmatmul.mubr.msk.bf16.gmra.mrb[204].mxu1 %vm496_vm4, %v3574_v23  ;;  %v3765_v62 = vld [vmem:[#allocation3 + $0x1a] sm:$0xff]  ;;  %v3766_v0 = vld [vmem:[#allocation3 + $0x22] sm:$0xff] }
 0x3bc   : > { %7023 = vmatprep.mubr.msk.bf16.mxu1 %vm8060_vm1, %v8059_v2  ;;  %v3515_v58 = vadd.f32 %v9208_v25, %v3454_v30  ;;  %v3455_v28 = vadd.f32 %v9232_v15, %v3438_v34  ;;  %v3773_v52 = vpack.c.bf16 %v3765_v62, %v3764_v1 }
 0x3be   : > { %v3517_v50 = vmax.f32 %v3515_v58, 0.0  ;;  %v3516_v60 = vadd.f32 %v3511_v10, %v3455_v28  ;;  %v3528_v11 = vadd.f32 %v9213_v38, %v3455_v28  ;;  %v6046_v28 = vld [vmem:[%s9774_s9 + $0x10] sm:$0xf] }
 0x3bf   : > { %v3407_v17 = vpop.f32.mrb[36].mxu0  ;;  %v3568_v20 = vld [vmem:[#allocation3 + $0x29] sm:$0xff] }
 0x3c0   : > { %3519 = vst.msk [vmem:[#allocation3 + $0x3b] sm:$0xfc] %vm2359_vm8, %v3517_v50  ;;  %v3518_v21 = vmax.f32 %v3516_v60, 0.0  ;;  %v3530_v7 = vmax.f32 %v3528_v11, 0.0  ;;  %v3439_v46 = vmul.f32 %v9227_v19, %v3407_v17  ;;  %v7011_v22 = vpop.f32.mrb[37].mxu0  ;;  %v3575_v43 = vpack.c.bf16 %v3568_v20, %v3567_v12  ;;  %v3552_v5 = vld [vmem:[#allocation3 + $0x28] sm:$0xff] }
 0x3c1   : > { %v3410_v25 = vpop.f32.mrb[38].mxu0  ;;  %v3569_v26 = vld [vmem:[#allocation3 + $0x31] sm:$0xff]  ;;  %v3559_v18 = vpack.c.bf16 %v3552_v5, %v3551_v4  ;;  %v3890_v50 = vpack.c.bf16 %v3764_v1, %v3763_v36  ;;  %v4031_v60 = vsel %vm2430_vm3, %v6046_v28, 0  ;;  %v3891_v11 = vpack.c.bf16 %v3766_v0, %v3765_v62  ;;  %v4353_v1 = vld [vmem:[#allocation3 + $0x1d] sm:$0xff] }
 0x3c2   : > { %3520 = vst.msk [vmem:[#allocation3 + $0x43] sm:$0x3] %vm2361_vm9, %v3518_v21  ;;  %v3456_v47 = vadd.f32 %v9232_v15, %v3439_v46  ;;  %v3440_v10 = vmul.f32 %v9227_v19, %v3410_v25  ;;  %v7012_v38 = vpop.f32.mrb[39].mxu0  ;;  %v3553_v45 = vld [vmem:[#allocation3 + $0x30] sm:$0xff]  ;;  %v6052_v46 = vld [vmem:[%s9774_s9 + $0x14] sm:$0xf] }
 0x3c3   : > { %3532 = vst.msk [vmem:[#allocation3 + $0x43] sm:$0xf0] %vm2367_vm12, %v3530_v7  ;;  %7024 = vmatmul.mubr.msk.bf16.gmra.mrb[208].mxu1 %vm496_vm4, %v3575_v43  ;;  %v3767_v57 = vld [vmem:[#allocation3 + $0x2a] sm:$0xff]  ;;  %v3768_v44 = vld [vmem:[#allocation3 + $0x32] sm:$0xff]  ;;  %v4149_v25 = vsel %vm2430_vm3, %v6052_v46, 0 }
 0x3c4   : > { %7027 = vmatprep.mubr.msk.bf16.mxu1 %vm8060_vm1, %v8059_v2  ;;  %v3529_v9 = vadd.f32 %v3524_v59, %v3456_v47  ;;  %v3541_v24 = vadd.f32 %v9222_v63, %v3456_v47  ;;  %v3457_v13 = vadd.f32 %v9232_v15, %v3440_v10  ;;  %v6034_v15 = vld [vmem:[%s9774_s9 + $0x8] sm:$0xf]  ;;  %v3774_v8 = vpack.c.bf16 %v3767_v57, %v3766_v0  ;;  %v3999_v7 = vld [vmem:[#allocation3 + $0x13] sm:$0xff]  ;;  %v9372_v22 = vld [vmem:[#allocation3 + $0xb] sm:$0xff] }
 0x3c5   : > { %v3795_v53 = vsel %vm2430_vm3, %v6034_v15, 0  ;;  %v3892_v17 = vpack.c.bf16 %v3768_v44, %v3767_v57  ;;  %v4008_v43 = vpack.c.bf16 %v3999_v7, %v9372_v22  ;;  %v4001_v47 = vld [vmem:[#allocation3 + $0x23] sm:$0xff]  ;;  %v4000_v10 = vld [vmem:[#allocation3 + $0x1b] sm:$0xff]  ;;  %v4473_v46 = vld [vmem:[#allocation3 + $0x2e] sm:$0xff] }
 0x3c6   : > { %v3531_v32 = vmax.f32 %v3529_v9, 0.0  ;;  %v3543_v51 = vmax.f32 %v3541_v24, 0.0  ;;  %v3542_v61 = vadd.f32 %v3537_v56, %v3457_v13  ;;  %v3548_v56 = vld [vmem:[#allocation3 + $0x8] sm:$0xff]  ;;  %v4009_v38 = vpack.c.bf16 %v4001_v47, %v4000_v10  ;;  %v9383_v9 = vld [vmem:[#allocation3 + $0x33] sm:$0xff]  ;;  %v4118_v15 = vld [vmem:[#allocation3 + $0x1c] sm:$0xff] }
 0x3c7   : > { %v3570_v19 = vld [vmem:[#allocation3 + $0x39] sm:$0xff]  ;;  %v3557_v35 = vpack.c.bf16 %v3548_v56, %v3547_v39  ;;  %v4002_v24 = vld [vmem:[#allocation3 + $0x2b] sm:$0xff] }
 0x3c8   : > { %3533 = vst.msk [vmem:[#allocation3 + $0x4b] sm:$0xf] %vm2369_vm13, %v3531_v32  ;;  %v3544_v16 = vmax.f32 %v3542_v61, 0.0  ;;  %v3576_v29 = vpack.c.bf16 %v3570_v19, %v3569_v26  ;;  %v3554_v48 = vld [vmem:[#allocation3 + $0x38] sm:$0xff]  ;;  %v4010_v13 = vpack.c.bf16 %v9383_v9, %v4002_v24  ;;  %v4119_v56 = vld [vmem:[#allocation3 + $0x24] sm:$0xff] }
 0x3c9   : > { %3545 = vst.msk [vmem:[#allocation3 + $0x4b] sm:$0xc0] %vm2375_vm6, %v3543_v51  ;;  %v3560_v55 = vpack.c.bf16 %v3554_v48, %v3553_v45  ;;  %v3769_v23 = vld [vmem:[#allocation3 + $0x3a] sm:$0xff] }
 0x3ca   : > { %3546 = vst.msk [vmem:[#allocation3 + $0x53] sm:$0x3f] %vm509_vm5, %v3544_v16  ;;  %v3571_v6 = vld [vmem:[#allocation3 + $0x41] sm:$0xff]  ;;  %v3775_v30 = vpack.c.bf16 %v3769_v23, %v3768_v44  ;;  %v4121_v37 = vld [vmem:[#allocation3 + $0x34] sm:$0xff] }
 0x3cb   : > { %7028 = vmatmul.mubr.msk.bf16.gmra.mrb[212].mxu1 %vm496_vm4, %v3576_v29  ;;  %v3555_v14 = vld [vmem:[#allocation3 + $0x40] sm:$0xff]  ;;  %v4117_v29 = vld [vmem:[#allocation3 + $0x14] sm:$0xff] }
 0x3cc   : > { %7031 = vmatprep.mubr.msk.bf16.mxu1 %vm8060_vm1, %v8059_v2  ;;  %v3770_v42 = vld [vmem:[#allocation3 + $0x42] sm:$0xff]  ;;  %v9443_v57 = vld [vmem:[#allocation3 + $0x15] sm:$0xff] }
 0x3cd   : > { %v3893_v12 = vpack.c.bf16 %v3770_v42, %v3769_v23  ;;  %v4005_v32 = vld [vmem:[#allocation3 + $0x43] sm:$0xff]  ;;  %v4004_v51 = vld [vmem:[#allocation3 + $0x3b] sm:$0xff]  ;;  %v4362_v0 = vpack.c.bf16 %v4353_v1, %v9443_v57  ;;  %v4355_v23 = vld [vmem:[#allocation3 + $0x2d] sm:$0xff] }
 0x3ce   : > { %v4011_v61 = vpack.c.bf16 %v4005_v32, %v4004_v51  ;;  %v4122_v5 = vld [vmem:[#allocation3 + $0x3c] sm:$0xff]  ;;  %v4354_v44 = vld [vmem:[#allocation3 + $0x25] sm:$0xff] }
 0x3cf   : > { %v3572_v59 = vld [vmem:[#allocation3 + $0x49] sm:$0xff]  ;;  %v4246_v41 = vpack.c.bf16 %v4122_v5, %v4121_v37  ;;  %v4475_v47 = vld [vmem:[#allocation3 + $0x3e] sm:$0xff]  ;;  %v4474_v10 = vld [vmem:[#allocation3 + $0x36] sm:$0xff] }
 0x3d0   : > { %v3577_v63 = vpack.c.bf16 %v3572_v59, %v3571_v6  ;;  %v3556_v3 = vld [vmem:[#allocation3 + $0x48] sm:$0xff]  ;;  %v6058_v6 = vld [vmem:[%s9774_s9 + $0x18] sm:$0xf] }
 0x3d1   : > { %v3561_v27 = vpack.c.bf16 %v3556_v3, %v3555_v14  ;;  %v3771_v34 = vld [vmem:[#allocation3 + $0x4a] sm:$0xff]  ;;  %v3889_v20 = vld [vmem:[#allocation3 + $0x52] sm:$0xff]  ;;  %v4267_v39 = vsel %vm2430_vm3, %v6058_v6, 0 }
 0x3d2   : > { %v3776_v58 = vpack.c.bf16 %v3771_v34, %v3770_v42  ;;  %v3894_v21 = vpack.c.bf16 %v3889_v20, %v3771_v34  ;;  %v4007_v26 = vld [vmem:[#allocation3 + $0x53] sm:$0xff]  ;;  %v4006_v19 = vld [vmem:[#allocation3 + $0x4b] sm:$0xff]  ;;  %v9453_v34 = vld [vmem:[#allocation3 + $0x3d] sm:$0xff] }
 0x3d3   : > { %7032 = vmatmul.mubr.msk.bf16.gmra.mrb[216].mxu1 %vm496_vm4, %v3577_v63  ;;  %v4012_v16 = vpack.c.bf16 %v4007_v26, %v4006_v19  ;;  %v4116_v59 = vld [vmem:[#allocation3 + $0xc] sm:$0xff]  ;;  %v6064_v14 = vld [vmem:[%s9774_s9 + $0x1c] sm:$0xf]  ;;  %v4471_v20 = vld [vmem:[#allocation3 + $0x1e] sm:$0xff] }
 0x3d4   : > { %7037 = vmatprep.mubr.msk.bf16.mxu1 %vm8060_vm1, %v8059_v2  ;;  %v4126_v63 = vpack.c.bf16 %v4117_v29, %v4116_v59  ;;  %v4124_v45 = vld [vmem:[#allocation3 + $0x4c] sm:$0xff]  ;;  %v4385_v33 = vsel %vm2430_vm3, %v6064_v14, 0  ;;  %v4356_v42 = vld [vmem:[#allocation3 + $0x35] sm:$0xff] }
 0x3d5   : > { %v4359_v28 = vld [vmem:[#allocation3 + $0x4d] sm:$0xff]  ;;  %v4478_v51 = vld [vmem:[#allocation3 + $0x56] sm:$0xff] }
 0x3d6   : > { %v4477_v24 = vld [vmem:[#allocation3 + $0x4e] sm:$0xff]  ;;  %v9481_v19 = vld [vmem:[%s9775_s10] ss:$0 sm:$0xff] }
 0x3db   : > { %7038 = vmatmul.mubr.msk.bf16.vlgmr.msra.gmra.mrb[200].mxu1 %vm496_vm4, %v3557_v35  ;;  %v4127_v35 = vpack.c.bf16 %v4119_v56, %v4118_v15 }
 0x3dc   : > { %7058 = vmatpush3.bf16.msra.mxu1 %v3795_v53  ;;  %7041 = vmatprep.mubr.msk.bf16.mxu1 %vm8060_vm1, %v8059_v2  ;;  %v4120_v53 = vld [vmem:[#allocation3 + $0x2c] sm:$0xff] }
 0x3dd   : > { %7079 = vmatprep.subr.bf16.mxu1 %v8059_v2  ;;  %v4128_v40 = vpack.c.bf16 %v4121_v37, %v4120_v53  ;;  %v4245_v36 = vpack.c.bf16 %v4120_v53, %v4119_v56 }
 0x3e3   : > { %7042 = vmatmul.mubr.msk.bf16.gmra.mrb[204].mxu1 %vm496_vm4, %v3558_v49  ;;  %v4123_v49 = vld [vmem:[#allocation3 + $0x44] sm:$0xff] }
 0x3e4   : > { %7045 = vmatprep.mubr.msk.bf16.mxu1 %vm8060_vm1, %v8059_v2  ;;  %v4129_v4 = vpack.c.bf16 %v4123_v49, %v4122_v5 }
 0x3eb   : > { %7046 = vmatmul.mubr.msk.bf16.gmra.mrb[208].mxu1 %vm496_vm4, %v3559_v18  ;;  %v6078_v18 = vld [vmem:[%s9777_s12 + $0x4] sm:$0xf] }
 0x3ec   : > { %7049 = vmatprep.mubr.msk.bf16.mxu1 %vm8060_vm1, %v8059_v2  ;;  %v4695_v48 = vsel %vm2430_vm3, %v6078_v18, 0 }
 0x3ed   : > { %7212 = vmatpush3.bf16.msra.mxu0 %v4695_v48 }
 0x3ee   : > { %7233 = vmatprep.subr.bf16.mxu0 %v8059_v2 }
 0x3f3   : > { %7050 = vmatmul.mubr.msk.bf16.gmra.mrb[212].mxu1 %vm496_vm4, %v3560_v55  ;;  %v4125_v55 = vld [vmem:[#allocation3 + $0x54] sm:$0xff] }
 0x3f4   : > { %7053 = vmatprep.mubr.msk.bf16.mxu1 %vm8060_vm1, %v8059_v2  ;;  %v4130_v3 = vpack.c.bf16 %v4125_v55, %v4124_v45 }
 0x3fb   : > { %7054 = vmatmul.mubr.msk.bf16.gmra.mrb[216].mxu1 %vm496_vm4, %v3561_v27  ;;  %v4244_v27 = vpack.c.bf16 %v4118_v15, %v4117_v29  ;;  %v9486_v29 = vld [vmem:[%s9776_s11] ss:$0 sm:$0xff] }
 0x3fc   : > { %7059 = vmatprep.mubr.msk.bf16.mxu1 %vm8060_vm1, %v8059_v2 }
 0x403   : > { %7060 = vmatmul.mubr.msk.bf16.vlgmr.msra.gmra.mrb[200].mxu1 %vm496_vm4, %v3772_v54  ;;  %v4247_v54 = vpack.c.bf16 %v4124_v45, %v4123_v49 }
 0x404   : > { %7080 = vmatpush3.bf16.msra.mxu1 %v3913_v31  ;;  %7063 = vmatprep.mubr.msk.bf16.mxu1 %vm8060_vm1, %v8059_v2  ;;  %v4243_v31 = vld [vmem:[#allocation3 + $0x5c] sm:$0xff] }
 0x405   : > { %7101 = vmatprep.subr.bf16.mxu1 %v8059_v2  ;;  %v4248_v62 = vpack.c.bf16 %v4243_v31, %v4125_v55  ;;  %v4662_v55 = vld [vmem:[#allocation2 + $0x1] sm:$0xff] }
 0x40b   : > { %7064 = vmatmul.mubr.msk.bf16.gmra.mrb[204].mxu1 %vm496_vm4, %v3773_v52  ;;  %v6070_v52 = vld [vmem:[%s9774_s9 + $0x20] sm:$0xf] }
 0x40c   : > { %7067 = vmatprep.mubr.msk.bf16.mxu1 %vm8060_vm1, %v8059_v2 }
 0x413   : > { %7068 = vmatmul.mubr.msk.bf16.gmra.mrb[208].mxu1 %vm496_vm4, %v3774_v8  ;;  %v4503_v8 = vsel %vm2430_vm3, %v6070_v52, 0 }
 0x414   : > { %7071 = vmatprep.mubr.msk.bf16.mxu1 %vm8060_vm1, %v8059_v2 }
 0x41b   : > { %7072 = vmatmul.mubr.msk.bf16.gmra.mrb[212].mxu1 %vm496_vm4, %v3775_v30  ;;  %v4363_v30 = vpack.c.bf16 %v4355_v23, %v4354_v44 }
 0x41c   : > { %7075 = vmatprep.mubr.msk.bf16.mxu1 %vm8060_vm1, %v8059_v2 }
 0x423   : > { %7076 = vmatmul.mubr.msk.bf16.gmra.mrb[216].mxu1 %vm496_vm4, %v3776_v58  ;;  %v4364_v58 = vpack.c.bf16 %v9453_v34, %v4356_v42 }
 0x424   : > { %7081 = vmatprep.mubr.msk.bf16.mxu1 %vm8060_vm1, %v8059_v2 }
 0x42b   : > { %7082 = vmatmul.mubr.msk.bf16.vlgmr.msra.gmra.mrb[200].mxu1 %vm496_vm4, %v3890_v50  ;;  %v4358_v50 = vld [vmem:[#allocation3 + $0x45] sm:$0xff] }
 0x42c   : > { %7102 = vmatpush3.bf16.msra.mxu1 %v4031_v60  ;;  %7085 = vmatprep.mubr.msk.bf16.mxu1 %vm8060_vm1, %v8059_v2  ;;  %v4365_v60 = vpack.c.bf16 %v4359_v28, %v4358_v50 }
 0x42d   : > { %7123 = vmatprep.subr.bf16.mxu1 %v8059_v2 }
 0x433   : > { %7086 = vmatmul.mubr.msk.bf16.gmra.mrb[204].mxu1 %vm496_vm4, %v3891_v11  ;;  %v4360_v11 = vld [vmem:[#allocation3 + $0x55] sm:$0xff] }
 0x434   : > { %7089 = vmatprep.mubr.msk.bf16.mxu1 %vm8060_vm1, %v8059_v2 }
 0x43b   : > { %7090 = vmatmul.mubr.msk.bf16.gmra.mrb[208].mxu1 %vm496_vm4, %v3892_v17  ;;  %v4361_v17 = vld [vmem:[#allocation3 + $0x5d] sm:$0xff] }
 0x43c   : > { %7093 = vmatprep.mubr.msk.bf16.mxu1 %vm8060_vm1, %v8059_v2 }
 0x443   : > { %7094 = vmatmul.mubr.msk.bf16.gmra.mrb[212].mxu1 %vm496_vm4, %v3893_v12  ;;  %v4366_v12 = vpack.c.bf16 %v4361_v17, %v4360_v11 }
 0x444   : > { %7097 = vmatprep.mubr.msk.bf16.mxu1 %vm8060_vm1, %v8059_v2 }
 0x44b   : > { %7098 = vmatmul.mubr.msk.bf16.gmra.mrb[216].mxu1 %vm496_vm4, %v3894_v21  ;;  %v4470_v21 = vld [vmem:[#allocation3 + $0x16] sm:$0xff] }
 0x44c   : > { %7103 = vmatprep.mubr.msk.bf16.mxu1 %vm8060_vm1, %v8059_v2  ;;  %v4480_v7 = vpack.c.bf16 %v4471_v20, %v4470_v21 }
 0x453   : > { %7104 = vmatmul.mubr.msk.bf16.vlgmr.msra.gmra.mrb[200].mxu1 %vm496_vm4, %v4008_v43  ;;  %v4472_v43 = vld [vmem:[#allocation3 + $0x26] sm:$0xff] }
 0x454   : > { %7124 = vmatpush3.bf16.msra.mxu1 %v4149_v25  ;;  %7107 = vmatprep.mubr.msk.bf16.mxu1 %vm8060_vm1, %v8059_v2  ;;  %v4481_v25 = vpack.c.bf16 %v4473_v46, %v4472_v43 }
 0x455   : > { %7145 = vmatprep.subr.bf16.mxu1 %v8059_v2 }
 0x45b   : > { %7108 = vmatmul.mubr.msk.bf16.gmra.mrb[204].mxu1 %vm496_vm4, %v4009_v38  ;;  %v4482_v38 = vpack.c.bf16 %v4475_v47, %v4474_v10 }
 0x45c   : > { %7111 = vmatprep.mubr.msk.bf16.mxu1 %vm8060_vm1, %v8059_v2 }
 0x463   : > { %7112 = vmatmul.mubr.msk.bf16.gmra.mrb[208].mxu1 %vm496_vm4, %v4010_v13  ;;  %v4476_v13 = vld [vmem:[#allocation3 + $0x46] sm:$0xff] }
 0x464   : > { %7115 = vmatprep.mubr.msk.bf16.mxu1 %vm8060_vm1, %v8059_v2  ;;  %v4483_v32 = vpack.c.bf16 %v4477_v24, %v4476_v13 }
 0x46b   : > { %7116 = vmatmul.mubr.msk.bf16.gmra.mrb[212].mxu1 %vm496_vm4, %v4011_v61  ;;  %v4479_v61 = vld [vmem:[#allocation3 + $0x5e] sm:$0xff] }
 0x46c   : > { %7119 = vmatprep.mubr.msk.bf16.mxu1 %vm8060_vm1, %v8059_v2  ;;  %v4484_v26 = vpack.c.bf16 %v4479_v61, %v4478_v51 }
 0x473   : > { %7120 = vmatmul.mubr.msk.bf16.gmra.mrb[216].mxu1 %vm496_vm4, %v4012_v16 }
 0x474   : > { %7125 = vmatprep.mubr.msk.bf16.mxu1 %vm8060_vm1, %v8059_v2 }
 0x47b   : > { %7126 = vmatmul.mubr.msk.bf16.vlgmr.msra.gmra.mrb[200].mxu1 %vm496_vm4, %v4126_v63 }
 0x47c   : > { %7146 = vmatpush3.bf16.msra.mxu1 %v4267_v39  ;;  %7129 = vmatprep.mubr.msk.bf16.mxu1 %vm8060_vm1, %v8059_v2 }
 0x47d   : > { %7167 = vmatprep.subr.bf16.mxu1 %v8059_v2 }
 0x483   : > { %7130 = vmatmul.mubr.msk.bf16.gmra.mrb[204].mxu1 %vm496_vm4, %v4127_v35 }
 0x484   : > { %7133 = vmatprep.mubr.msk.bf16.mxu1 %vm8060_vm1, %v8059_v2 }
 0x48b   : > { %7134 = vmatmul.mubr.msk.bf16.gmra.mrb[208].mxu1 %vm496_vm4, %v4128_v40 }
 0x48c   : > { %7137 = vmatprep.mubr.msk.bf16.mxu1 %vm8060_vm1, %v8059_v2 }
 0x493   : > { %7138 = vmatmul.mubr.msk.bf16.gmra.mrb[212].mxu1 %vm496_vm4, %v4129_v4 }
 0x494   : > { %7141 = vmatprep.mubr.msk.bf16.mxu1 %vm8060_vm1, %v8059_v2 }
 0x49b   : > { %7142 = vmatmul.mubr.msk.bf16.gmra.mrb[216].mxu1 %vm496_vm4, %v4130_v3  ;;  %v4661_v3 = vld [vmem:[%s9777_s12] sm:$0xf] }
 0x49c   : > { %7147 = vmatprep.mubr.msk.bf16.mxu1 %vm8060_vm1, %v8059_v2 }
 0x4a3   : > { %7148 = vmatmul.mubr.msk.bf16.vlgmr.msra.gmra.mrb[200].mxu1 %vm496_vm4, %v4244_v27 }
 0x4a4   : > { %7168 = vmatpush3.bf16.msra.mxu1 %v4385_v33  ;;  %7151 = vmatprep.mubr.msk.bf16.mxu1 %vm8060_vm1, %v8059_v2 }
 0x4a5   : > { %7189 = vmatprep.subr.bf16.mxu1 %v8059_v2 }
 0x4ab   : > { %7152 = vmatmul.mubr.msk.bf16.gmra.mrb[204].mxu1 %vm496_vm4, %v4245_v36 }
 0x4ac   : > { %7155 = vmatprep.mubr.msk.bf16.mxu1 %vm8060_vm1, %v8059_v2 }
 0x4b3   : > { %7156 = vmatmul.mubr.msk.bf16.gmra.mrb[208].mxu1 %vm496_vm4, %v4246_v41 }
 0x4b4   : > { %7159 = vmatprep.mubr.msk.bf16.mxu1 %vm8060_vm1, %v8059_v2 }
 0x4bb   : > { %7160 = vmatmul.mubr.msk.bf16.gmra.mrb[212].mxu1 %vm496_vm4, %v4247_v54  ;;  %v4786_v54 = vsel %vm2430_vm3, %v4661_v3, 0 }
 0x4bc   : > { %7163 = vmatprep.mubr.msk.bf16.mxu1 %vm8060_vm1, %v8059_v2 }
 0x4c3   : > { %7164 = vmatmul.mubr.msk.bf16.gmra.mrb[216].mxu1 %vm496_vm4, %v4248_v62 }
 0x4c4   : > { %7169 = vmatprep.mubr.msk.bf16.mxu1 %vm8060_vm1, %v8059_v2 }
 0x4cb   : > { %7170 = vmatmul.mubr.msk.bf16.vlgmr.msra.gmra.mrb[200].mxu1 %vm496_vm4, %v4362_v0 }
 0x4cc   : > { %7190 = vmatpush3.bf16.msra.mxu1 %v4503_v8  ;;  %7173 = vmatprep.mubr.msk.bf16.mxu1 %vm8060_vm1, %v8059_v2 }
 0x4d3   : > { %7174 = vmatmul.mubr.msk.bf16.gmra.mrb[204].mxu1 %vm496_vm4, %v4363_v30 }
 0x4d4   : > { %7177 = vmatprep.mubr.msk.bf16.mxu1 %vm8060_vm1, %v8059_v2 }
 0x4db   : > { %7178 = vmatmul.mubr.msk.bf16.gmra.mrb[208].mxu1 %vm496_vm4, %v4364_v58 }
 0x4dc   : > { %7181 = vmatprep.mubr.msk.bf16.mxu1 %vm8060_vm1, %v8059_v2 }
 0x4e3   : > { %7182 = vmatmul.mubr.msk.bf16.gmra.mrb[212].mxu1 %vm496_vm4, %v4365_v60 }
 0x4e4   : > { %7185 = vmatprep.mubr.msk.bf16.mxu1 %vm8060_vm1, %v8059_v2 }
 0x4eb   : > { %7186 = vmatmul.mubr.msk.bf16.gmra.mrb[216].mxu1 %vm496_vm4, %v4366_v12 }
 0x4ec   : > { %7191 = vmatprep.mubr.msk.bf16.mxu1 %vm8060_vm1, %v8059_v2 }
 0x4f3   : > { %7192 = vmatmul.mubr.msk.bf16.vlgmr.msra.gmra.mrb[200].mxu1 %vm496_vm4, %v4480_v7 }
 0x4f4   : > { %7195 = vmatprep.mubr.msk.bf16.mxu1 %vm8060_vm1, %v8059_v2 }
 0x4fb   : > { %7196 = vmatmul.mubr.msk.bf16.gmra.mrb[204].mxu1 %vm496_vm4, %v4481_v25 }
 0x4fc   : > { %7199 = vmatprep.mubr.msk.bf16.mxu1 %vm8060_vm1, %v8059_v2 }
 0x503   : > { %7200 = vmatmul.mubr.msk.bf16.gmra.mrb[208].mxu1 %vm496_vm4, %v4482_v38 }
 0x504   : > { %7203 = vmatprep.mubr.msk.bf16.mxu1 %vm8060_vm1, %v8059_v2 }
 0x50b   : > { %7204 = vmatmul.mubr.msk.bf16.gmra.mrb[212].mxu1 %vm496_vm4, %v4483_v32 }
 0x50c   : > { %7207 = vmatprep.mubr.msk.bf16.mxu1 %vm8060_vm1, %v8059_v2 }
 0x513   : > { %7208 = vmatmul.mubr.msk.bf16.gmra.mrb[216].mxu1 %vm496_vm4, %v4484_v26 }
 0x5c6   : > { %v4539_v16 = vpop.f32.mrb[200].mxu1 }
 0x5c7   : > { %v4595_v6 = vmul.f32 %v9481_v19, %v4539_v16  ;;  %v7193_v59 = vpop.f32.mrb[201].mxu1 }
 0x5c8   : > { %v4542_v63 = vpop.f32.mrb[202].mxu1 }
 0x5c9   : > { %v4612_v39 = vadd.f32 %v9486_v29, %v4595_v6  ;;  %v4596_v56 = vmul.f32 %v9481_v19, %v4542_v63  ;;  %v7194_v15 = vpop.f32.mrb[203].mxu1 }
 0x5cb   : > { %v4622_v35 = vmax.f32 %v4612_v39, 0.0  ;;  %v4613_v53 = vadd.f32 %v9486_v29, %v4596_v56 }
 0x5cd   : > { %4632 = vst.msk [vmem:[#allocation2 + $0xb] sm:$0xff] %vm496_vm4, %v4622_v35  ;;  %v4623_v37 = vmax.f32 %v4613_v53, 0.0 }
 0x5ce   : > { %v4547_v40 = vpop.f32.mrb[204].mxu1 }
 0x5cf   : > { %4633 = vst.msk [vmem:[#allocation2 + $0x13] sm:$0xfc] %vm2359_vm8, %v4623_v37  ;;  %v4597_v49 = vmul.f32 %v9481_v19, %v4547_v40  ;;  %v7197_v5 = vpop.f32.mrb[205].mxu1  ;;  %v6089_v40 = vld [vmem:[%s9777_s12 + $0x8] sm:$0xf] }
 0x5d0   : > { %v4550_v4 = vpop.f32.mrb[206].mxu1  ;;  %v4894_v5 = vsel %vm2430_vm3, %v6089_v40, 0 }
 0x5d1   : > { %v4614_v18 = vadd.f32 %v9486_v29, %v4597_v49  ;;  %v4598_v48 = vmul.f32 %v9481_v19, %v4550_v4  ;;  %v7198_v45 = vpop.f32.mrb[207].mxu1 }
 0x5d3   : > { %v4624_v14 = vmax.f32 %v4614_v18, 0.0  ;;  %v4615_v27 = vadd.f32 %v9486_v29, %v4598_v48 }
 0x5d4   : > { %v4663_v33 = vld [vmem:[#allocation2 + $0x9] sm:$0xff] }
 0x5d5   : > { %4634 = vst.msk [vmem:[#allocation2 + $0x1b] sm:$0x3] %vm2361_vm9, %v4624_v14  ;;  %v4625_v36 = vmax.f32 %v4615_v27, 0.0  ;;  %v4672_v41 = vpack.c.bf16 %v4663_v33, %v4662_v55  ;;  %v4647_v37 = vld [vmem:[#allocation2 + $0x8] sm:$0xff] }
 0x5d6   : > { %4635 = vst.msk [vmem:[#allocation2 + $0x1b] sm:$0xf0] %vm2367_vm12, %v4624_v14  ;;  %v4555_v31 = vpop.f32.mrb[208].mxu1  ;;  %v4664_v42 = vld [vmem:[#allocation2 + $0x11] sm:$0xff] }
 0x5d7   : > { %4636 = vst.msk [vmem:[#allocation2 + $0x23] sm:$0xf] %vm2369_vm13, %v4625_v36  ;;  %v4599_v62 = vmul.f32 %v9481_v19, %v4555_v31  ;;  %v7201_v1 = vpop.f32.mrb[209].mxu1  ;;  %7214 = vmatmul.mubr.msk.bf16.vlgmr.msra.gmra.mrb[40].mxu0 %vm496_vm4, %v4672_v41  ;;  %v4648_v18 = vld [vmem:[#allocation2 + $0x10] sm:$0xff]  ;;  %v4861_v31 = vld [vmem:[#allocation2 + $0x2] sm:$0xff] }
 0x5d8   : > { %4637 = vst.msk [vmem:[#allocation2 + $0x23] sm:$0xc0] %vm2375_vm6, %v4625_v36  ;;  %7234 = vmatpush3.bf16.msra.mxu0 %v4786_v54  ;;  %v4558_v52 = vpop.f32.mrb[210].mxu1  ;;  %7217 = vmatprep.mubr.msk.bf16.mxu0 %vm8060_vm1, %v8059_v2  ;;  %v6095_v1 = vld [vmem:[%s9777_s12 + $0xc] sm:$0xf] }
 0x5d9   : > { %v4616_v0 = vadd.f32 %v9486_v29, %v4599_v62  ;;  %v4600_v8 = vmul.f32 %v9481_v19, %v4558_v52  ;;  %v7202_v23 = vpop.f32.mrb[211].mxu1  ;;  %7255 = vmatprep.subr.bf16.mxu0 %v8059_v2  ;;  %v4862_v62 = vld [vmem:[#allocation2 + $0xa] sm:$0xff] }
 0x5da   : > { %v4871_v52 = vpack.c.bf16 %v4862_v62, %v4861_v31  ;;  %v4863_v23 = vld [vmem:[#allocation2 + $0x12] sm:$0xff]  ;;  %v6119_v31 = vld [vmem:[%s9777_s12 + $0x1c] sm:$0xf] }
 0x5db   : > { %v4626_v44 = vmax.f32 %v4616_v0, 0.0  ;;  %v4617_v30 = vadd.f32 %v9486_v29, %v4600_v8  ;;  %v5012_v0 = vsel %vm2430_vm3, %v6095_v1, 0  ;;  %v5215_v40 = vld [vmem:[#allocation2 + $0xc] sm:$0xff]  ;;  %v5484_v1 = vsel %vm2430_vm3, %v6119_v31, 0 }
 0x5dd   : > { %v4665_v58 = vld [vmem:[#allocation2 + $0x19] sm:$0xff]  ;;  %4638 = vst.msk [vmem:[#allocation2 + $0x2b] sm:$0x3f] %vm509_vm5, %v4626_v44  ;;  %v4627_v28 = vmax.f32 %v4617_v30, 0.0 }
 0x5de   : > { %v4673_v50 = vpack.c.bf16 %v4665_v58, %v4664_v42  ;;  %v4563_v60 = vpop.f32.mrb[212].mxu1  ;;  %v4666_v25 = vld [vmem:[#allocation2 + $0x21] sm:$0xff]  ;;  %v4649_v4 = vld [vmem:[#allocation2 + $0x18] sm:$0xff] }
 0x5df   : > { %4639 = vst.msk [vmem:[#allocation2 + $0x33] sm:$0xff] %vm496_vm4, %v4627_v28  ;;  %v4601_v11 = vmul.f32 %v9481_v19, %v4563_v60  ;;  %v7205_v17 = vpop.f32.mrb[213].mxu1  ;;  %v4657_v48 = vpack.c.bf16 %v4649_v4, %v4648_v18  ;;  %v4650_v55 = vld [vmem:[#allocation2 + $0x20] sm:$0xff] }
 0x5e0   : > { %7218 = vmatmul.mubr.msk.bf16.gmra.mrb[44].mxu0 %vm496_vm4, %v4673_v50  ;;  %v4566_v12 = vpop.f32.mrb[214].mxu1  ;;  %v4864_v8 = vld [vmem:[#allocation2 + $0x1a] sm:$0xff]  ;;  %v4865_v42 = vld [vmem:[#allocation2 + $0x22] sm:$0xff] }
 0x5e1   : > { %7221 = vmatprep.mubr.msk.bf16.mxu0 %vm8060_vm1, %v8059_v2  ;;  %v4618_v20 = vadd.f32 %v9486_v29, %v4601_v11  ;;  %v4602_v21 = vmul.f32 %v9481_v19, %v4566_v12  ;;  %v7206_v7 = vpop.f32.mrb[215].mxu1  ;;  %v4872_v44 = vpack.c.bf16 %v4864_v8, %v4863_v23  ;;  %v5217_v18 = vld [vmem:[#allocation2 + $0x1c] sm:$0xff] }
 0x5e3   : > { %v4628_v46 = vmax.f32 %v4618_v20, 0.0  ;;  %v4619_v43 = vadd.f32 %v9486_v29, %v4602_v21  ;;  %v6101_v20 = vld [vmem:[%s9777_s12 + $0x10] sm:$0xf]  ;;  %v4989_v21 = vpack.c.bf16 %v4863_v23, %v4862_v62  ;;  %v5342_v23 = vld [vmem:[#allocation2 + $0x5c] sm:$0xff] }
 0x5e4   : > { %v4667_v47 = vld [vmem:[#allocation2 + $0x29] sm:$0xff]  ;;  %v5130_v7 = vsel %vm2430_vm3, %v6101_v20, 0 }
 0x5e5   : > { %4640 = vst.msk [vmem:[#allocation2 + $0x3b] sm:$0xfc] %vm2359_vm8, %v4628_v46  ;;  %v4629_v10 = vmax.f32 %v4619_v43, 0.0  ;;  %v4674_v38 = vpack.c.bf16 %v4667_v47, %v4666_v25  ;;  %v4651_v45 = vld [vmem:[#allocation2 + $0x28] sm:$0xff]  ;;  %v4990_v46 = vpack.c.bf16 %v4865_v42, %v4864_v8 }
 0x5e6   : > { %v4571_v24 = vpop.f32.mrb[216].mxu1  ;;  %v4668_v63 = vld [vmem:[#allocation2 + $0x31] sm:$0xff]  ;;  %v4658_v3 = vpack.c.bf16 %v4651_v45, %v4650_v55  ;;  %v5218_v4 = vld [vmem:[#allocation2 + $0x24] sm:$0xff] }
 0x5e7   : > { %4641 = vst.msk [vmem:[#allocation2 + $0x43] sm:$0x3] %vm2361_vm9, %v4629_v10  ;;  %v4603_v13 = vmul.f32 %v9481_v19, %v4571_v24  ;;  %v7209_v32 = vpop.f32.mrb[217].mxu1  ;;  %v4652_v27 = vld [vmem:[#allocation2 + $0x30] sm:$0xff] }
 0x5e8   : > { %4642 = vst.msk [vmem:[#allocation2 + $0x43] sm:$0xf0] %vm2367_vm12, %v4629_v10  ;;  %7222 = vmatmul.mubr.msk.bf16.gmra.mrb[48].mxu0 %vm496_vm4, %v4674_v38  ;;  %v4574_v51 = vpop.f32.mrb[218].mxu1  ;;  %v4866_v30 = vld [vmem:[#allocation2 + $0x2a] sm:$0xff]  ;;  %v4867_v50 = vld [vmem:[#allocation2 + $0x32] sm:$0xff] }
 0x5e9   : > { %7225 = vmatprep.mubr.msk.bf16.mxu0 %vm8060_vm1, %v8059_v2  ;;  %v4620_v61 = vadd.f32 %v9486_v29, %v4603_v13  ;;  %v4604_v26 = vmul.f32 %v9481_v19, %v4574_v51  ;;  %v7210_v16 = vpop.f32.mrb[219].mxu1  ;;  %v4873_v58 = vpack.c.bf16 %v4866_v30, %v4865_v42  ;;  %v4991_v43 = vpack.c.bf16 %v4867_v50, %v4866_v30  ;;  %v5098_v38 = vld [vmem:[#allocation2 + $0x13] sm:$0xff]  ;;  %v5097_v13 = vld [vmem:[#allocation2 + $0xb] sm:$0xff]  ;;  %v5452_v30 = vld [vmem:[#allocation2 + $0x1d] sm:$0xff] }
 0x5ea   : > { %v6107_v24 = vld [vmem:[%s9777_s12 + $0x14] sm:$0xf]  ;;  %v5107_v32 = vpack.c.bf16 %v5098_v38, %v5097_v13  ;;  %v5219_v45 = vld [vmem:[#allocation2 + $0x2c] sm:$0xff]  ;;  %v6125_v42 = vld [vmem:[%s9777_s12 + $0x20] sm:$0xf] }
 0x5eb   : > { %v4630_v6 = vmax.f32 %v4620_v61, 0.0  ;;  %v4621_v59 = vadd.f32 %v9486_v29, %v4604_v26  ;;  %v4646_v29 = vld [vmem:[#allocation2] sm:$0xff]  ;;  %v5248_v51 = vsel %vm2430_vm3, %v6107_v24, 0  ;;  %v5220_v55 = vld [vmem:[#allocation2 + $0x34] sm:$0xff] }
 0x5ec   : > { %v4669_v39 = vld [vmem:[#allocation2 + $0x39] sm:$0xff]  ;;  %v4656_v49 = vpack.c.bf16 %v4647_v37, %v4646_v29  ;;  %v5100_v61 = vld [vmem:[#allocation2 + $0x23] sm:$0xff] }
 0x5ed   : > { %4643 = vst.msk [vmem:[#allocation2 + $0x4b] sm:$0xf] %vm2369_vm13, %v4630_v6  ;;  %v4631_v56 = vmax.f32 %v4621_v59, 0.0  ;;  %v4675_v15 = vpack.c.bf16 %v4669_v39, %v4668_v63  ;;  %v4653_v14 = vld [vmem:[#allocation2 + $0x38] sm:$0xff]  ;;  %v5101_v59 = vld [vmem:[#allocation2 + $0x2b] sm:$0xff] }
 0x5ee   : > { %4644 = vst.msk [vmem:[#allocation2 + $0x4b] sm:$0xc0] %vm2375_vm6, %v4630_v6  ;;  %v4659_v33 = vpack.c.bf16 %v4653_v14, %v4652_v27  ;;  %v4868_v28 = vld [vmem:[#allocation2 + $0x3a] sm:$0xff] }
 0x5ef   : > { %4645 = vst.msk [vmem:[#allocation2 + $0x53] sm:$0x3f] %vm509_vm5, %v4631_v56  ;;  %v4670_v19 = vld [vmem:[#allocation2 + $0x41] sm:$0xff]  ;;  %v4874_v60 = vpack.c.bf16 %v4868_v28, %v4867_v50  ;;  %v5102_v6 = vld [vmem:[#allocation2 + $0x33] sm:$0xff]  ;;  %v5602_v50 = vsel %vm2430_vm3, %v6125_v42, 0 }
 0x5f0   : > { %7226 = vmatmul.mubr.msk.bf16.gmra.mrb[52].mxu0 %vm496_vm4, %v4675_v15  ;;  %v4654_v41 = vld [vmem:[#allocation2 + $0x40] sm:$0xff]  ;;  %v5109_v63 = vpack.c.bf16 %v5102_v6, %v5101_v59  ;;  %v5216_v29 = vld [vmem:[#allocation2 + $0x14] sm:$0xff] }
 0x5f1   : > { %7229 = vmatprep.mubr.msk.bf16.mxu0 %vm8060_vm1, %v8059_v2  ;;  %v4869_v17 = vld [vmem:[#allocation2 + $0x42] sm:$0xff]  ;;  %v6113_v37 = vld [vmem:[%s9777_s12 + $0x18] sm:$0xf]  ;;  %v5343_v62 = vpack.c.bf16 %v5217_v18, %v5216_v29 }
 0x5f2   : > { %v4992_v25 = vpack.c.bf16 %v4869_v17, %v4868_v28  ;;  %v5099_v26 = vld [vmem:[#allocation2 + $0x1b] sm:$0xff]  ;;  %v5104_v39 = vld [vmem:[#allocation2 + $0x43] sm:$0xff] }
 0x5f3   : > { %v5108_v16 = vpack.c.bf16 %v5100_v61, %v5099_v26  ;;  %v5103_v56 = vld [vmem:[#allocation2 + $0x3b] sm:$0xff] }
 0x5f4   : > { %v4671_v35 = vld [vmem:[#allocation2 + $0x49] sm:$0xff]  ;;  %v5110_v15 = vpack.c.bf16 %v5104_v39, %v5103_v56  ;;  %v5221_v27 = vld [vmem:[#allocation2 + $0x3c] sm:$0xff] }
 0x5f5   : > { %v4676_v53 = vpack.c.bf16 %v4671_v35, %v4670_v19  ;;  %v4655_v36 = vld [vmem:[#allocation2 + $0x48] sm:$0xff]  ;;  %v5455_v20 = vld [vmem:[#allocation2 + $0x35] sm:$0xff]  ;;  %v5570_v38 = vld [vmem:[#allocation2 + $0x1e] sm:$0xff] }
 0x5f6   : > { %v4660_v54 = vpack.c.bf16 %v4655_v36, %v4654_v41  ;;  %v4870_v11 = vld [vmem:[#allocation2 + $0x4a] sm:$0xff]  ;;  %v4988_v47 = vld [vmem:[#allocation2 + $0x52] sm:$0xff]  ;;  %v5574_v26 = vld [vmem:[#allocation2 + $0x3e] sm:$0xff] }
 0x5f7   : > { %v4875_v12 = vpack.c.bf16 %v4870_v11, %v4869_v17  ;;  %v4993_v10 = vpack.c.bf16 %v4988_v47, %v4870_v11  ;;  %v5106_v19 = vld [vmem:[#allocation2 + $0x53] sm:$0xff]  ;;  %v5105_v35 = vld [vmem:[#allocation2 + $0x4b] sm:$0xff]  ;;  %v5460_v47 = vld [vmem:[#allocation2 + $0x5d] sm:$0xff] }
 0x5f8   : > { %7230 = vmatmul.mubr.msk.bf16.gmra.mrb[56].mxu0 %vm496_vm4, %v4676_v53  ;;  %v5111_v53 = vpack.c.bf16 %v5106_v19, %v5105_v35  ;;  %v5222_v14 = vld [vmem:[#allocation2 + $0x44] sm:$0xff]  ;;  %v5223_v36 = vld [vmem:[#allocation2 + $0x4c] sm:$0xff]  ;;  %v5224_v41 = vld [vmem:[#allocation2 + $0x54] sm:$0xff] }
 0x5f9   : > { %7235 = vmatprep.mubr.msk.bf16.mxu0 %vm8060_vm1, %v8059_v2  ;;  %v5346_v8 = vpack.c.bf16 %v5223_v36, %v5222_v14  ;;  %v5453_v11 = vld [vmem:[#allocation2 + $0x25] sm:$0xff]  ;;  %v5569_v24 = vld [vmem:[#allocation2 + $0x16] sm:$0xff]  ;;  %v5576_v59 = vld [vmem:[#allocation2 + $0x4e] sm:$0xff] }
 0x5fa   : > { %v5579_v13 = vpack.c.bf16 %v5570_v38, %v5569_v24  ;;  %v5577_v56 = vld [vmem:[#allocation2 + $0x56] sm:$0xff]  ;;  %v9697_v35 = vld [vmem:[%s9778_s13] ss:$0 sm:$0xff] }
 0x600   : > { %7236 = vmatmul.mubr.msk.bf16.vlgmr.msra.gmra.mrb[40].mxu0 %vm496_vm4, %v4656_v49  ;;  %v5225_v49 = vpack.c.bf16 %v5216_v29, %v5215_v40  ;;  %v9702_v29 = vld [vmem:[%s9779_s14] ss:$0 sm:$0xff] }
 0x601   : > { %7256 = vmatpush3.bf16.msra.mxu0 %v4894_v5  ;;  %7239 = vmatprep.mubr.msk.bf16.mxu0 %vm8060_vm1, %v8059_v2  ;;  %v5366_v5 = vsel %vm2430_vm3, %v6113_v37, 0 }
 0x602   : > { %7277 = vmatprep.subr.bf16.mxu0 %v8059_v2 }
 0x608   : > { %7240 = vmatmul.mubr.msk.bf16.gmra.mrb[44].mxu0 %vm496_vm4, %v4657_v48  ;;  %v5226_v48 = vpack.c.bf16 %v5218_v4, %v5217_v18 }
 0x609   : > { %7243 = vmatprep.mubr.msk.bf16.mxu0 %vm8060_vm1, %v8059_v2 }
 0x610   : > { %7244 = vmatmul.mubr.msk.bf16.gmra.mrb[48].mxu0 %vm496_vm4, %v4658_v3  ;;  %v5227_v3 = vpack.c.bf16 %v5220_v55, %v5219_v45 }
 0x611   : > { %7247 = vmatprep.mubr.msk.bf16.mxu0 %vm8060_vm1, %v8059_v2 }
 0x618   : > { %7248 = vmatmul.mubr.msk.bf16.gmra.mrb[52].mxu0 %vm496_vm4, %v4659_v33  ;;  %v5228_v33 = vpack.c.bf16 %v5222_v14, %v5221_v27 }
 0x619   : > { %7251 = vmatprep.mubr.msk.bf16.mxu0 %vm8060_vm1, %v8059_v2 }
 0x620   : > { %7252 = vmatmul.mubr.msk.bf16.gmra.mrb[56].mxu0 %vm496_vm4, %v4660_v54  ;;  %v5229_v54 = vpack.c.bf16 %v5224_v41, %v5223_v36 }
 0x621   : > { %7257 = vmatprep.mubr.msk.bf16.mxu0 %vm8060_vm1, %v8059_v2 }
 0x628   : > { %7258 = vmatmul.mubr.msk.bf16.vlgmr.msra.gmra.mrb[40].mxu0 %vm496_vm4, %v4871_v52  ;;  %v5344_v52 = vpack.c.bf16 %v5219_v45, %v5218_v4  ;;  %v5727_v45 = vrot.slane %v9443_v57, 6  ;;  %v5747_v57 = vld [vmem:[#allocation3 + $0x29] sm:$0xff] }
 0x629   : > { %7278 = vmatpush3.bf16.msra.mxu0 %v5012_v0  ;;  %7261 = vmatprep.mubr.msk.bf16.mxu0 %vm8060_vm1, %v8059_v2  ;;  %v5345_v0 = vpack.c.bf16 %v5221_v27, %v5220_v55  ;;  %v5736_v27 = vld [vmem:[#allocation3 + $0x1f] sm:$0xff] }
 0x62a   : > { %7299 = vmatprep.subr.bf16.mxu0 %v8059_v2  ;;  %v5738_v31 = vrot.slane %v5736_v27, 4 }
 0x630   : > { %7262 = vmatmul.mubr.msk.bf16.gmra.mrb[44].mxu0 %vm496_vm4, %v4872_v44  ;;  %v5347_v44 = vpack.c.bf16 %v5342_v23, %v5224_v41  ;;  %v5749_v23 = vrot.slane %v5747_v57, 2 }
 0x631   : > { %7265 = vmatprep.mubr.msk.bf16.mxu0 %vm8060_vm1, %v8059_v2 }
 0x638   : > { %7266 = vmatmul.mubr.msk.bf16.gmra.mrb[48].mxu0 %vm496_vm4, %v4873_v58  ;;  %v5451_v58 = vld [vmem:[#allocation2 + $0x15] sm:$0xff] }
 0x639   : > { %7269 = vmatprep.mubr.msk.bf16.mxu0 %vm8060_vm1, %v8059_v2  ;;  %v5461_v28 = vpack.c.bf16 %v5452_v30, %v5451_v58 }
 0x640   : > { %7270 = vmatmul.mubr.msk.bf16.gmra.mrb[52].mxu0 %vm496_vm4, %v4874_v60  ;;  %v5454_v60 = vld [vmem:[#allocation2 + $0x2d] sm:$0xff] }
 0x641   : > { %7273 = vmatprep.mubr.msk.bf16.mxu0 %vm8060_vm1, %v8059_v2  ;;  %v5462_v17 = vpack.c.bf16 %v5454_v60, %v5453_v11 }
 0x648   : > { %7274 = vmatmul.mubr.msk.bf16.gmra.mrb[56].mxu0 %vm496_vm4, %v4875_v12  ;;  %v5456_v12 = vld [vmem:[#allocation2 + $0x3d] sm:$0xff] }
 0x649   : > { %7279 = vmatprep.mubr.msk.bf16.mxu0 %vm8060_vm1, %v8059_v2 }
 0x650   : > { %7280 = vmatmul.mubr.msk.bf16.vlgmr.msra.gmra.mrb[40].mxu0 %vm496_vm4, %v4989_v21  ;;  %v5463_v21 = vpack.c.bf16 %v5456_v12, %v5455_v20 }
 0x651   : > { %7300 = vmatpush3.bf16.msra.mxu0 %v5130_v7  ;;  %7283 = vmatprep.mubr.msk.bf16.mxu0 %vm8060_vm1, %v8059_v2  ;;  %v5458_v7 = vld [vmem:[#allocation2 + $0x4d] sm:$0xff] }
 0x652   : > { %7321 = vmatprep.subr.bf16.mxu0 %v8059_v2 }
 0x658   : > { %7284 = vmatmul.mubr.msk.bf16.gmra.mrb[44].mxu0 %vm496_vm4, %v4990_v46  ;;  %v5457_v46 = vld [vmem:[#allocation2 + $0x45] sm:$0xff] }
 0x659   : > { %7287 = vmatprep.mubr.msk.bf16.mxu0 %vm8060_vm1, %v8059_v2 }
 0x660   : > { %7288 = vmatmul.mubr.msk.bf16.gmra.mrb[48].mxu0 %vm496_vm4, %v4991_v43  ;;  %v5464_v43 = vpack.c.bf16 %v5458_v7, %v5457_v46 }
 0x661   : > { %7291 = vmatprep.mubr.msk.bf16.mxu0 %vm8060_vm1, %v8059_v2 }
 0x668   : > { %7292 = vmatmul.mubr.msk.bf16.gmra.mrb[52].mxu0 %vm496_vm4, %v4992_v25  ;;  %v5459_v25 = vld [vmem:[#allocation2 + $0x55] sm:$0xff] }
 0x669   : > { %7295 = vmatprep.mubr.msk.bf16.mxu0 %vm8060_vm1, %v8059_v2 }
 0x670   : > { %7296 = vmatmul.mubr.msk.bf16.gmra.mrb[56].mxu0 %vm496_vm4, %v4993_v10  ;;  %v5465_v10 = vpack.c.bf16 %v5460_v47, %v5459_v25 }
 0x671   : > { %7301 = vmatprep.mubr.msk.bf16.mxu0 %vm8060_vm1, %v8059_v2 }
 0x678   : > { %7302 = vmatmul.mubr.msk.bf16.vlgmr.msra.gmra.mrb[40].mxu0 %vm496_vm4, %v5107_v32  ;;  %v5572_v32 = vld [vmem:[#allocation2 + $0x2e] sm:$0xff] }
 0x679   : > { %7322 = vmatpush3.bf16.msra.mxu0 %v5248_v51  ;;  %7305 = vmatprep.mubr.msk.bf16.mxu0 %vm8060_vm1, %v8059_v2  ;;  %v5571_v51 = vld [vmem:[#allocation2 + $0x26] sm:$0xff] }
 0x67a   : > { %7343 = vmatprep.subr.bf16.mxu0 %v8059_v2  ;;  %v5580_v61 = vpack.c.bf16 %v5572_v32, %v5571_v51  ;;  %v5774_v51 = vld [vmem:[#allocation3 + $0x47] sm:$0xff] }
 0x680   : > { %7306 = vmatmul.mubr.msk.bf16.gmra.mrb[44].mxu0 %vm496_vm4, %v5108_v16  ;;  %v5573_v16 = vld [vmem:[#allocation2 + $0x36] sm:$0xff] }
 0x681   : > { %7309 = vmatprep.mubr.msk.bf16.mxu0 %vm8060_vm1, %v8059_v2  ;;  %v5581_v6 = vpack.c.bf16 %v5574_v26, %v5573_v16  ;;  %v5765_v26 = vrot.slane %v9453_v34, 6 }
 0x688   : > { %7310 = vmatmul.mubr.msk.bf16.gmra.mrb[48].mxu0 %vm496_vm4, %v5109_v63  ;;  %v5575_v63 = vld [vmem:[#allocation2 + $0x46] sm:$0xff] }
 0x689   : > { %7313 = vmatprep.mubr.msk.bf16.mxu0 %vm8060_vm1, %v8059_v2  ;;  %v5582_v39 = vpack.c.bf16 %v5576_v59, %v5575_v63  ;;  %v5776_v63 = vrot.slane %v5774_v51, 4 }
 0x690   : > { %7314 = vmatmul.mubr.msk.bf16.gmra.mrb[52].mxu0 %vm496_vm4, %v5110_v15  ;;  %v5578_v15 = vld [vmem:[#allocation2 + $0x5e] sm:$0xff] }
 0x691   : > { %7317 = vmatprep.mubr.msk.bf16.mxu0 %vm8060_vm1, %v8059_v2  ;;  %v5583_v19 = vpack.c.bf16 %v5578_v15, %v5577_v56 }
 0x698   : > { %7318 = vmatmul.mubr.msk.bf16.gmra.mrb[56].mxu0 %vm496_vm4, %v5111_v53 }
 0x699   : > { %7323 = vmatprep.mubr.msk.bf16.mxu0 %vm8060_vm1, %v8059_v2 }
 0x6a0   : > { %7324 = vmatmul.mubr.msk.bf16.vlgmr.msra.gmra.mrb[40].mxu0 %vm496_vm4, %v5225_v49 }
 0x6a1   : > { %7344 = vmatpush3.bf16.msra.mxu0 %v5366_v5  ;;  %7327 = vmatprep.mubr.msk.bf16.mxu0 %vm8060_vm1, %v8059_v2 }
 0x6a2   : > { %7365 = vmatprep.subr.bf16.mxu0 %v8059_v2 }
 0x6a8   : > { %7328 = vmatmul.mubr.msk.bf16.gmra.mrb[44].mxu0 %vm496_vm4, %v5226_v48 }
 0x6a9   : > { %7331 = vmatprep.mubr.msk.bf16.mxu0 %vm8060_vm1, %v8059_v2 }
 0x6b0   : > { %7332 = vmatmul.mubr.msk.bf16.gmra.mrb[48].mxu0 %vm496_vm4, %v5227_v3 }
 0x6b1   : > { %7335 = vmatprep.mubr.msk.bf16.mxu0 %vm8060_vm1, %v8059_v2 }
 0x6b8   : > { %7336 = vmatmul.mubr.msk.bf16.gmra.mrb[52].mxu0 %vm496_vm4, %v5228_v33 }
 0x6b9   : > { %7339 = vmatprep.mubr.msk.bf16.mxu0 %vm8060_vm1, %v8059_v2 }
 0x6c0   : > { %7340 = vmatmul.mubr.msk.bf16.gmra.mrb[56].mxu0 %vm496_vm4, %v5229_v54 }
 0x6c1   : > { %7345 = vmatprep.mubr.msk.bf16.mxu0 %vm8060_vm1, %v8059_v2 }
 0x6c8   : > { %7346 = vmatmul.mubr.msk.bf16.vlgmr.msra.gmra.mrb[40].mxu0 %vm496_vm4, %v5343_v62 }
 0x6c9   : > { %7366 = vmatpush3.bf16.msra.mxu0 %v5484_v1  ;;  %7349 = vmatprep.mubr.msk.bf16.mxu0 %vm8060_vm1, %v8059_v2 }
 0x6ca   : > { %7387 = vmatprep.subr.bf16.mxu0 %v8059_v2 }
 0x6d0   : > { %7350 = vmatmul.mubr.msk.bf16.gmra.mrb[44].mxu0 %vm496_vm4, %v5344_v52 }
 0x6d1   : > { %7353 = vmatprep.mubr.msk.bf16.mxu0 %vm8060_vm1, %v8059_v2 }
 0x6d8   : > { %7354 = vmatmul.mubr.msk.bf16.gmra.mrb[48].mxu0 %vm496_vm4, %v5345_v0 }
 0x6d9   : > { %7357 = vmatprep.mubr.msk.bf16.mxu0 %vm8060_vm1, %v8059_v2 }
 0x6e0   : > { %7358 = vmatmul.mubr.msk.bf16.gmra.mrb[52].mxu0 %vm496_vm4, %v5346_v8 }
 0x6e1   : > { %7361 = vmatprep.mubr.msk.bf16.mxu0 %vm8060_vm1, %v8059_v2 }
 0x6e8   : > { %7362 = vmatmul.mubr.msk.bf16.gmra.mrb[56].mxu0 %vm496_vm4, %v5347_v44 }
 0x6e9   : > { %7367 = vmatprep.mubr.msk.bf16.mxu0 %vm8060_vm1, %v8059_v2 }
 0x6f0   : > { %7368 = vmatmul.mubr.msk.bf16.vlgmr.msra.gmra.mrb[40].mxu0 %vm496_vm4, %v5461_v28 }
 0x6f1   : > { %7388 = vmatpush3.bf16.msra.mxu0 %v5602_v50  ;;  %7371 = vmatprep.mubr.msk.bf16.mxu0 %vm8060_vm1, %v8059_v2 }
 0x6f8   : > { %7372 = vmatmul.mubr.msk.bf16.gmra.mrb[44].mxu0 %vm496_vm4, %v5462_v17 }
 0x6f9   : > { %7375 = vmatprep.mubr.msk.bf16.mxu0 %vm8060_vm1, %v8059_v2 }
 0x700   : > { %7376 = vmatmul.mubr.msk.bf16.gmra.mrb[48].mxu0 %vm496_vm4, %v5463_v21 }
 0x701   : > { %7379 = vmatprep.mubr.msk.bf16.mxu0 %vm8060_vm1, %v8059_v2 }
 0x708   : > { %7380 = vmatmul.mubr.msk.bf16.gmra.mrb[52].mxu0 %vm496_vm4, %v5464_v43 }
 0x709   : > { %7383 = vmatprep.mubr.msk.bf16.mxu0 %vm8060_vm1, %v8059_v2 }
 0x710   : > { %7384 = vmatmul.mubr.msk.bf16.gmra.mrb[56].mxu0 %vm496_vm4, %v5465_v10 }
 0x711   : > { %7389 = vmatprep.mubr.msk.bf16.mxu0 %vm8060_vm1, %v8059_v2 }
 0x718   : > { %7390 = vmatmul.mubr.msk.bf16.vlgmr.msra.gmra.mrb[40].mxu0 %vm496_vm4, %v5579_v13 }
 0x719   : > { %7393 = vmatprep.mubr.msk.bf16.mxu0 %vm8060_vm1, %v8059_v2 }
 0x720   : > { %7394 = vmatmul.mubr.msk.bf16.gmra.mrb[44].mxu0 %vm496_vm4, %v5580_v61 }
 0x721   : > { %7397 = vmatprep.mubr.msk.bf16.mxu0 %vm8060_vm1, %v8059_v2 }
 0x728   : > { %7398 = vmatmul.mubr.msk.bf16.gmra.mrb[48].mxu0 %vm496_vm4, %v5581_v6 }
 0x729   : > { %7401 = vmatprep.mubr.msk.bf16.mxu0 %vm8060_vm1, %v8059_v2 }
 0x730   : > { %7402 = vmatmul.mubr.msk.bf16.gmra.mrb[52].mxu0 %vm496_vm4, %v5582_v39 }
 0x731   : > { %7405 = vmatprep.mubr.msk.bf16.mxu0 %vm8060_vm1, %v8059_v2 }
 0x738   : > { %7406 = vmatmul.mubr.msk.bf16.gmra.mrb[56].mxu0 %vm496_vm4, %v5583_v19 }
 0x7eb   : > { %v5638_v53 = vpop.f32.mrb[40].mxu0 }
 0x7ec   : > { %v5694_v37 = vmul.f32 %v9697_v35, %v5638_v53  ;;  %v7391_v40 = vpop.f32.mrb[41].mxu0  ;;  %v5785_v53 = vld [vmem:[#allocation3 + $0x51] sm:$0xff] }
 0x7ed   : > { %v5641_v2 = vpop.f32.mrb[42].mxu0 }
 0x7ee   : > { %v5711_v49 = vadd.f32 %v9702_v29, %v5694_v37  ;;  %v5695_v5 = vmul.f32 %v9697_v35, %v5641_v2  ;;  %v7392_v4 = vpop.f32.mrb[43].mxu0 }
 0x7ef   : > { %v5787_v4 = vrot.slane %v5785_v53, 2 }
 0x7f0   : > { %v5722_v18 = vadd.f32 %v5711_v49, %v9372_v22  ;;  %v5712_v48 = vadd.f32 %v9702_v29, %v5695_v5 }
 0x7f2   : > { %v5723_v55 = vmax.f32 %v5722_v18, 0.0  ;;  %v5729_v3 = vadd.f32 %v5727_v45, %v5712_v48 }
 0x7f3   : > { %v5646_v14 = vpop.f32.mrb[44].mxu0 }
 0x7f4   : > { %5724 = vst.msk [vmem:[%s9714_s17] sm:$0xff] %vm496_vm4, %v5723_v55  ;;  %v5731_v33 = vmax.f32 %v5729_v3, 0.0  ;;  %v5696_v22 = vmul.f32 %v9697_v35, %v5646_v14  ;;  %v7395_v36 = vpop.f32.mrb[45].mxu0 }
 0x7f5   : > { %v5649_v41 = vpop.f32.mrb[46].mxu0 }
 0x7f6   : > { %6133 = vst.msk [vmem:[%s9714_s17 + $0x6] sm:$0xfc] %vm2359_vm8, %v5731_v33  ;;  %v5713_v54 = vadd.f32 %v9702_v29, %v5696_v22  ;;  %v5697_v62 = vmul.f32 %v9697_v35, %v5649_v41  ;;  %v7396_v1 = vpop.f32.mrb[47].mxu0 }
 0x7f8   : > { %v5730_v52 = vadd.f32 %v5727_v45, %v5713_v54  ;;  %v5740_v0 = vadd.f32 %v5738_v31, %v5713_v54  ;;  %v5714_v8 = vadd.f32 %v9702_v29, %v5697_v62 }
 0x7fa   : > { %v5732_v44 = vmax.f32 %v5730_v52, 0.0  ;;  %v5742_v30 = vmax.f32 %v5740_v0, 0.0  ;;  %v5741_v42 = vadd.f32 %v5738_v31, %v5714_v8  ;;  %v5751_v58 = vadd.f32 %v5749_v23, %v5714_v8 }
 0x7fb   : > { %v5654_v28 = vpop.f32.mrb[48].mxu0 }
 0x7fc   : > { %6134 = vst.msk [vmem:[%s9714_s17 + $0xe] sm:$0x3] %vm2361_vm9, %v5732_v44  ;;  %v5743_v50 = vmax.f32 %v5741_v42, 0.0  ;;  %v5753_v60 = vmax.f32 %v5751_v58, 0.0  ;;  %v5698_v11 = vmul.f32 %v9697_v35, %v5654_v28  ;;  %v7399_v17 = vpop.f32.mrb[49].mxu0 }
 0x7fd   : > { %6135 = vst.msk [vmem:[%s9714_s17 + $0xc] sm:$0xf0] %vm2367_vm12, %v5742_v30  ;;  %v5657_v12 = vpop.f32.mrb[50].mxu0 }
 0x7fe   : > { %6136 = vst.msk [vmem:[%s9714_s17 + $0x14] sm:$0xf] %vm2369_vm13, %v5743_v50  ;;  %v5715_v20 = vadd.f32 %v9702_v29, %v5698_v11  ;;  %v5699_v21 = vmul.f32 %v9697_v35, %v5657_v12  ;;  %v7400_v7 = vpop.f32.mrb[51].mxu0 }
 0x7ff   : > { %6137 = vst.msk [vmem:[%s9714_s17 + $0x12] sm:$0xc0] %vm2375_vm6, %v5753_v60 }
 0x800   : > { %v5752_v46 = vadd.f32 %v5749_v23, %v5715_v20  ;;  %v5716_v43 = vadd.f32 %v9702_v29, %v5699_v21 }
 0x802   : > { %v5754_v25 = vmax.f32 %v5752_v46, 0.0  ;;  %v5759_v47 = vadd.f32 %v5716_v43, %v9383_v9 }
 0x803   : > { %v5662_v10 = vpop.f32.mrb[52].mxu0 }
 0x804   : > { %6138 = vst.msk [vmem:[%s9714_s17 + $0x1a] sm:$0x3f] %vm509_vm5, %v5754_v25  ;;  %v5760_v38 = vmax.f32 %v5759_v47, 0.0  ;;  %v5700_v24 = vmul.f32 %v9697_v35, %v5662_v10  ;;  %v7403_v13 = vpop.f32.mrb[53].mxu0 }
 0x805   : > { %v5665_v32 = vpop.f32.mrb[54].mxu0 }
 0x806   : > { %6139 = vst.msk [vmem:[%s9714_s17 + $0x20] sm:$0xff] %vm496_vm4, %v5760_v38  ;;  %v5717_v61 = vadd.f32 %v9702_v29, %v5700_v24  ;;  %v5701_v16 = vmul.f32 %v9697_v35, %v5665_v32  ;;  %v7404_v9 = vpop.f32.mrb[55].mxu0 }
 0x808   : > { %v5767_v6 = vadd.f32 %v5765_v26, %v5717_v61  ;;  %v5718_v59 = vadd.f32 %v9702_v29, %v5701_v16 }
 0x80a   : > { %v5769_v39 = vmax.f32 %v5767_v6, 0.0  ;;  %v5768_v56 = vadd.f32 %v5765_v26, %v5718_v59  ;;  %v5778_v15 = vadd.f32 %v5776_v63, %v5718_v59 }
 0x80b   : > { %v5670_v19 = vpop.f32.mrb[56].mxu0 }
 0x80c   : > { %6140 = vst.msk [vmem:[%s9714_s17 + $0x26] sm:$0xfc] %vm2359_vm8, %v5769_v39  ;;  %v5770_v37 = vmax.f32 %v5768_v56, 0.0  ;;  %v5780_v40 = vmax.f32 %v5778_v15, 0.0  ;;  %v5702_v34 = vmul.f32 %v9697_v35, %v5670_v19  ;;  %v7407_v2 = vpop.f32.mrb[57].mxu0 }
 0x80d   : > { %v5673_v49 = vpop.f32.mrb[58].mxu0 }
 0x80e   : > { %6141 = vst.msk [vmem:[%s9714_s17 + $0x2e] sm:$0x3] %vm2361_vm9, %v5770_v37  ;;  %v5719_v5 = vadd.f32 %v9702_v29, %v5702_v34  ;;  %v5703_v18 = vmul.f32 %v9697_v35, %v5673_v49  ;;  %v7408_v48 = vpop.f32.mrb[59].mxu0 }
 0x80f   : > { %6142 = vst.msk [vmem:[%s9714_s17 + $0x2c] sm:$0xf0] %vm2367_vm12, %v5780_v40 }
 0x810   : > { %v5779_v45 = vadd.f32 %v5776_v63, %v5719_v5  ;;  %v5789_v55 = vadd.f32 %v5787_v4, %v5719_v5  ;;  %v5720_v3 = vadd.f32 %v9702_v29, %v5703_v18 }
 0x812   : > { %v5781_v14 = vmax.f32 %v5779_v45, 0.0  ;;  %v5791_v27 = vmax.f32 %v5789_v55, 0.0  ;;  %v5790_v33 = vadd.f32 %v5787_v4, %v5720_v3 }
 0x814   : > { %6143 = vst.msk [vmem:[%s9714_s17 + $0x34] sm:$0xf] %vm2369_vm13, %v5781_v14  ;;  %v5792_v22 = vmax.f32 %v5790_v33, 0.0 }
 0x815   : > { %6144 = vst.msk [vmem:[%s9714_s17 + $0x32] sm:$0xc0] %vm2375_vm6, %v5791_v27 }
 0x816   : > { %6145 = vst.msk [vmem:[%s9714_s17 + $0x3a] sm:$0x3f] %vm509_vm5, %v5792_v22 }
 0x817 PF: > { %s25_s18 = sadd.s32 1, %s8057_s18  }
 0x818   : > { %p22_p4 = scmp.ge.s32.totalorder %s25_s18, 4  }
 0x81a   :  { %24 = sbr.rel (!%p22_p4) target bundleno = 1 (0x1), region = 157 }

</bundles_post_ra>
